<compile_context>
chip_gen: v7x
topology: tpu7x:2x2x1
jax: 0.10.0
libtpu: 0.0.40
codegen_flags: <defaults>
</compile_context>

<pallas_src>
import jax
import jax.numpy as jnp
import numpy as np
from jax.experimental import pallas as pl
from jax.experimental.pallas import tpu as pltpu

BLK = 8                      # batch rows per block = f32 sublane width
LANE = 128
UNROLL = 8                   # bound the fori_loop unroll (full unroll at T<=8)
MXU_DTYPE = jnp.float32      # set to jnp.bfloat16 on v6e/v7x at real shapes


def decoder_kernel(emb_ref,    # (T, BLK, H)
                   keyT_ref,   # (1, K, BLK*S_pad)
                   val_ref,    # (1, BLK*S_pad, V)
                   bias_ref,   # (1, BLK, BLK*S_pad) additive mask bias
                   ctx0_ref,   # (BLK, V)
                   w1_ref,     # (H+V+H, 4H)   fused [w_ih.T ; w_hh.T], gates i,f,g,o
                   b1_ref,     # (BLK, 4H)     pre-broadcast b_ih + b_hh
                   w2_ref,     # (H+K, 4K)
                   b2_ref,     # (BLK, 4K)
                   wout_ref,   # (K+V, vocab_pad)
                   bout_ref,   # (BLK, vocab_pad)
                   pred_ref,   # (T, BLK, vocab_pad)
                   att_ref):   # (T, BLK, BLK*S_pad)
    T, blk, H = emb_ref.shape
    K = w2_ref.shape[1] // 4
    V = val_ref.shape[2]

    # ---- Hoist every loop-invariant load / broadcast out of the recurrence ----
    keyT = keyT_ref[0]          # (K, BLK*S_pad)
    val = val_ref[0]            # (BLK*S_pad, V)
    bias = bias_ref[0]          # (BLK, BLK*S_pad)
    w1 = w1_ref[...]
    b1 = b1_ref[...]
    w2 = w2_ref[...]
    b2 = b2_ref[...]
    wout = wout_ref[...]
    bout = bout_ref[...]

    def lstm(x_cat, w, b, c_prev, hsz):
        # Single fused gate matmul: (blk, in) @ (in, 4*hsz) -> gates i|f|g|o.
        gates = jnp.dot(x_cat.astype(w.dtype), w,
                        preferred_element_type=jnp.float32) + b
        i_g = jax.nn.sigmoid(gates[:, 0 * hsz:1 * hsz])
        f_g = jax.nn.sigmoid(gates[:, 1 * hsz:2 * hsz])
        g_g = jnp.tanh(gates[:, 2 * hsz:3 * hsz])
        o_g = jax.nn.sigmoid(gates[:, 3 * hsz:4 * hsz])
        c_new = f_g * c_prev + i_g * g_g
        h_new = o_g * jnp.tanh(c_new)
        return h_new, c_new

    def step(t, carry):
        h1, c1, h2, c2, ctx = carry
        char = emb_ref[t]                                        # (blk, H)

        # ---- LSTMCell 1: fused [char, ctx, h1] @ w1 ----
        x1 = jnp.concatenate([char, ctx, h1], axis=1)            # (blk, H+V+H)
        h1, c1 = lstm(x1, w1, b1, c1, H)

        # ---- LSTMCell 2: fused [h1, h2] @ w2 ----
        x2 = jnp.concatenate([h1, h2], axis=1)                   # (blk, H+K)
        h2, c2 = lstm(x2, w2, b2, c2, K)

        # ---- Attention: block-diagonal flat matmuls ----
        energy = jnp.dot(h2.astype(keyT.dtype), keyT,
                         preferred_element_type=jnp.float32) + bias   # (blk, blk*S_pad)
        m = jnp.max(energy, axis=1, keepdims=True)
        e = jnp.exp(energy - m)                                  # off-block -> exactly 0
        denom = jnp.sum(e, axis=1, keepdims=True)
        att = e * pl.reciprocal(denom, approx=True)
        ctx = jnp.dot(att.astype(val.dtype), val,
                      preferred_element_type=jnp.float32)        # (blk, V)

        # ---- Output projection: fused [h2, ctx] @ wout ----
        logits = jnp.dot(jnp.concatenate([h2, ctx], axis=1).astype(wout.dtype),
                         wout, preferred_element_type=jnp.float32) + bout

        pred_ref[t] = logits                                     # (blk, vocab_pad)
        att_ref[t] = att                                         # (blk, blk*S_pad)
        return (h1, c1, h2, c2, ctx)

    init = (jnp.zeros((blk, H), jnp.float32),
            jnp.zeros((blk, H), jnp.float32),
            jnp.zeros((blk, K), jnp.float32),
            jnp.zeros((blk, K), jnp.float32),
            ctx0_ref[...])
    jax.lax.fori_loop(0, T, step, init, unroll=min(T, UNROLL))


def decoder_forward(params, key_arr, values_arr, lens, text):
    """key_arr: (S, B, K), values_arr: (S, B, V), lens: (B,), text: (B, T) int32."""
    S, B, K = key_arr.shape
    V = values_arr.shape[2]
    T = text.shape[1]
    vocab, H = params['embedding'].shape

    S_pad = ((S + LANE - 1) // LANE) * LANE
    vocab_pad = ((vocab + LANE - 1) // LANE) * LANE
    Bp = ((B + BLK - 1) // BLK) * BLK
    NB = Bp // BLK
    FLAT = BLK * S_pad

    # ---- embedding lookup (glue), time-major, batch padded to sublane width ----
    emb = jnp.take(params['embedding'], text, axis=0)                   # (B, T, H)
    emb_t = jnp.transpose(emb, (1, 0, 2)).astype(jnp.float32)           # (T, B, H)
    emb_t = jnp.pad(emb_t, ((0, 0), (0, Bp - B), (0, 0)))               # (T, Bp, H)

    # ---- key/values: batch-first, zero-padded, flattened per block ----
    key_bt = jnp.transpose(key_arr, (1, 0, 2)).astype(jnp.float32)      # (B, S, K)
    val_bt = jnp.transpose(values_arr, (1, 0, 2)).astype(jnp.float32)   # (B, S, V)
    key_p = jnp.pad(key_bt, ((0, Bp - B), (0, S_pad - S), (0, 0)))      # (Bp, S_pad, K)
    val_p = jnp.pad(val_bt, ((0, Bp - B), (0, S_pad - S), (0, 0)))      # (Bp, S_pad, V)
    keyT = jnp.transpose(key_p.reshape(NB, FLAT, K), (0, 2, 1))         # (NB, K, FLAT)
    val_flat = val_p.reshape(NB, FLAT, V)                               # (NB, FLAT, V)
    keyT = keyT.astype(MXU_DTYPE)
    val_flat = val_flat.astype(MXU_DTYPE)

    # ---- additive mask bias: 0 on own-block unmasked positions, -1e9 elsewhere ----
    lens_p = jnp.pad(lens.astype(jnp.int32), (0, Bp - B), constant_values=1)
    own_keep = (jnp.arange(S_pad)[None, :] < lens_p[:, None]).astype(jnp.float32)
    own_keep = own_keep.reshape(NB, BLK, S_pad)
    eye = jnp.eye(BLK, dtype=jnp.float32)
    keep = jnp.einsum('rq,nrs->nrqs', eye, own_keep).reshape(NB, BLK, FLAT)
    bias = jnp.where(keep > 0.5, 0.0, -1e9).astype(jnp.float32)         # (NB, BLK, FLAT)

    # ---- initial context = values[0] ----
    ctx0 = jnp.pad(values_arr[0].astype(jnp.float32), ((0, Bp - B), (0, 0)))  # (Bp, V)

    # ---- fused weights (PyTorch gate order i,f,g,o preserved along lanes) ----
    w1 = jnp.concatenate([params['lstm1_w_ih'].T, params['lstm1_w_hh'].T],
                         axis=0).astype(MXU_DTYPE)                      # (H+V+H, 4H)
    b1 = jnp.broadcast_to((params['lstm1_b_ih'] + params['lstm1_b_hh'])[None, :],
                          (BLK, 4 * H)).astype(jnp.float32)
    w2 = jnp.concatenate([params['lstm2_w_ih'].T, params['lstm2_w_hh'].T],
                         axis=0).astype(MXU_DTYPE)                      # (H+K, 4K)
    b2 = jnp.broadcast_to((params['lstm2_b_ih'] + params['lstm2_b_hh'])[None, :],
                          (BLK, 4 * K)).astype(jnp.float32)
    wout = jnp.pad(params['out_w'].T,
                   ((0, 0), (0, vocab_pad - vocab))).astype(MXU_DTYPE)  # (K+V, vocab_pad)
    bout = jnp.broadcast_to(jnp.pad(params['out_b'], (0, vocab_pad - vocab))[None, :],
                            (BLK, vocab_pad)).astype(jnp.float32)

    in_specs = [
        pl.BlockSpec((T, BLK, H), lambda b: (0, b, 0)),          # emb
        pl.BlockSpec((1, K, FLAT), lambda b: (b, 0, 0)),         # keyT
        pl.BlockSpec((1, FLAT, V), lambda b: (b, 0, 0)),         # val
        pl.BlockSpec((1, BLK, FLAT), lambda b: (b, 0, 0)),       # bias
        pl.BlockSpec((BLK, V), lambda b: (b, 0)),                # ctx0
        pl.BlockSpec((2 * H + V, 4 * H), lambda b: (0, 0)),      # w1
        pl.BlockSpec((BLK, 4 * H), lambda b: (0, 0)),            # b1
        pl.BlockSpec((H + K, 4 * K), lambda b: (0, 0)),          # w2
        pl.BlockSpec((BLK, 4 * K), lambda b: (0, 0)),            # b2
        pl.BlockSpec((K + V, vocab_pad), lambda b: (0, 0)),      # wout
        pl.BlockSpec((BLK, vocab_pad), lambda b: (0, 0)),        # bout
    ]
    out_specs = (
        pl.BlockSpec((T, BLK, vocab_pad), lambda b: (0, b, 0)),
        pl.BlockSpec((T, BLK, FLAT), lambda b: (0, b, 0)),
    )

    preds_p, atts_p = pl.pallas_call(
        decoder_kernel,
        grid=(NB,),
        in_specs=in_specs,
        out_specs=out_specs,
        out_shape=(jax.ShapeDtypeStruct((T, Bp, vocab_pad), jnp.float32),
                   jax.ShapeDtypeStruct((T, Bp, FLAT), jnp.float32)),
        compiler_params=pltpu.CompilerParams(
            dimension_semantics=("parallel",),
            vmem_limit_bytes=32 * 1024 * 1024),
    )(emb_t, keyT, val_flat, bias, ctx0, w1, b1, w2, b2, wout, bout)

    # ---- slice away padding, extract own-block attention, back to (B, T, ...) ----
    preds = jnp.transpose(preds_p[:, :B, :vocab], (1, 0, 2))            # (B, T, vocab)

    att_blocks = atts_p.reshape(T, NB, BLK, BLK, S_pad)
    ridx = jnp.arange(BLK)
    att_own = att_blocks[:, :, ridx, ridx, :].reshape(T, Bp, S_pad)     # own-block diag
    atts = jnp.transpose(att_own[:, :B, :S], (1, 0, 2))                 # (B, T, S)
    return preds, atts


def reference_forward(params, key_arr, values_arr, lens, text):
    """Pure-JAX reference mirroring the PyTorch forward (teacher forcing, attended)."""
    S, B, K = key_arr.shape
    V = values_arr.shape[2]
    T = text.shape[1]
    vocab, H = params['embedding'].shape

    emb = jnp.take(params['embedding'], text, axis=0)                   # (B, T, H)
    key_bt = jnp.transpose(key_arr, (1, 0, 2))
    val_bt = jnp.transpose(values_arr, (1, 0, 2))

    def lstm_cell(x, h, c, w_ih, w_hh, b_ih, b_hh):
        gates = x @ w_ih.T + h @ w_hh.T + b_ih + b_hh
        hd = h.shape[1]
        ig = jax.nn.sigmoid(gates[:, :hd])
        fg = jax.nn.sigmoid(gates[:, hd:2 * hd])
        gg = jnp.tanh(gates[:, 2 * hd:3 * hd])
        og = jax.nn.sigmoid(gates[:, 3 * hd:])
        c_new = fg * c + ig * gg
        return og * jnp.tanh(c_new), c_new

    h1 = jnp.zeros((B, H), jnp.float32)
    c1 = jnp.zeros((B, H), jnp.float32)
    h2 = jnp.zeros((B, K), jnp.float32)
    c2 = jnp.zeros((B, K), jnp.float32)
    ctx = values_arr[0]                                                 # (B, V)

    preds, atts = [], []
    for t in range(T):
        char = emb[:, t, :]
        inp = jnp.concatenate([char, ctx], axis=1)
        h1, c1 = lstm_cell(inp, h1, c1, params['lstm1_w_ih'], params['lstm1_w_hh'],
                           params['lstm1_b_ih'], params['lstm1_b_hh'])
        h2, c2 = lstm_cell(h1, h2, c2, params['lstm2_w_ih'], params['lstm2_w_hh'],
                           params['lstm2_b_ih'], params['lstm2_b_hh'])
        energy = jnp.sum(key_bt * h2[:, None, :], axis=-1)
        mask = jnp.arange(S)[None, :] >= lens[:, None]
        energy = jnp.where(mask, -1e9, energy)
        att = jax.nn.softmax(energy, axis=1)
        ctx = jnp.sum(att[:, :, None] * val_bt, axis=1)
        logits = jnp.concatenate([h2, ctx], axis=1) @ params['out_w'].T + params['out_b']
        preds.append(logits)
        atts.append(att)
    return jnp.stack(preds, axis=1), jnp.stack(atts, axis=1)


if __name__ == "__main__":
    vocab, H, V, K = 40, 32, 32, 32     # vocab_size, hidden_dim, value_size, key_size
    B, S, T = 4, 8, 8                   # batch, encoder seq len, decoder max_len

    root = jax.random.PRNGKey(0)
    ks = jax.random.split(root, 16)

    def u(k, shape, scale):
        return jax.random.uniform(k, shape, jnp.float32, -scale, scale)

    s1 = 1.0 / np.sqrt(H)
    s2 = 1.0 / np.sqrt(K)
    s3 = 1.0 / np.sqrt(K + V)
    params = {
        'embedding': jax.random.normal(ks[0], (vocab, H), jnp.float32).at[0].set(0.0),  # padding_idx=0
        'lstm1_w_ih': u(ks[1], (4 * H, H + V), s1),
        'lstm1_w_hh': u(ks[2], (4 * H, H), s1),
        'lstm1_b_ih': u(ks[3], (4 * H,), s1),
        'lstm1_b_hh': u(ks[4], (4 * H,), s1),
        'lstm2_w_ih': u(ks[5], (4 * K, H), s2),
        'lstm2_w_hh': u(ks[6], (4 * K, K), s2),
        'lstm2_b_ih': u(ks[7], (4 * K,), s2),
        'lstm2_b_hh': u(ks[8], (4 * K,), s2),
        'out_w': u(ks[9], (vocab, K + V), s3),
        'out_b': u(ks[10], (vocab,), s3),
    }

    key_arr = jax.random.normal(ks[11], (S, B, K), jnp.float32)
    values_arr = jax.random.normal(ks[12], (S, B, V), jnp.float32)
    lens = jax.random.randint(ks[13], (B,), 3, S + 1)
    text = jax.random.randint(ks[14], (B, T), 0, vocab)

    preds, atts = decoder_forward(params, key_arr, values_arr, lens, text)
    jax.block_until_ready((preds, atts))

    ref_p, ref_a = reference_forward(params, key_arr, values_arr, lens, text)

    assert preds.shape == (B, T, vocab), preds.shape
    assert atts.shape == (B, T, S), atts.shape
    np.testing.assert_allclose(np.asarray(preds), np.asarray(ref_p), rtol=2e-2, atol=2e-2)
    np.testing.assert_allclose(np.asarray(atts), np.asarray(ref_a), rtol=2e-2, atol=2e-2)

    print("KERNEL_OK")
</pallas_src>

<mosaic_0001>
module attributes {stable_mosaic.version = 11 : i64} {
  func.func @decoder_kernel(%arg0: i32, %arg1: memref<8x8x32xf32, #tpu.memory_space<vmem>>, %arg2: memref<1x32x1024xf32, #tpu.memory_space<vmem>>, %arg3: memref<1x1024x32xf32, #tpu.memory_space<vmem>>, %arg4: memref<1x8x1024xf32, #tpu.memory_space<vmem>>, %arg5: memref<8x32xf32, #tpu.memory_space<vmem>>, %arg6: memref<96x128xf32, #tpu.memory_space<vmem>>, %arg7: memref<8x128xf32, #tpu.memory_space<vmem>>, %arg8: memref<64x128xf32, #tpu.memory_space<vmem>>, %arg9: memref<8x128xf32, #tpu.memory_space<vmem>>, %arg10: memref<64x128xf32, #tpu.memory_space<vmem>>, %arg11: memref<8x128xf32, #tpu.memory_space<vmem>>, %arg12: memref<8x8x128xf32, #tpu.memory_space<vmem>>, %arg13: memref<8x8x1024xf32, #tpu.memory_space<vmem>>) attributes {dimension_semantics = [#tpu.dimension_semantics<parallel>], iteration_bounds = array<i64: 1>, scalar_prefetch = 0 : i64, scratch_operands = 0 : i64, tpu.core_type = #tpu.core_type<tc>, window_params = [{transform_indices = @transform_0, window_bounds = array<i64: 8, 8, 32>}, {transform_indices = @transform_1, window_bounds = array<i64: 1, 32, 1024>}, {transform_indices = @transform_2, window_bounds = array<i64: 1, 1024, 32>}, {transform_indices = @transform_3, window_bounds = array<i64: 1, 8, 1024>}, {transform_indices = @transform_4, window_bounds = array<i64: 8, 32>}, {pipeline_mode = #tpu.pipeline_mode<synchronous>, transform_indices = @transform_5, window_bounds = array<i64: 96, 128>}, {pipeline_mode = #tpu.pipeline_mode<synchronous>, transform_indices = @transform_6, window_bounds = array<i64: 8, 128>}, {pipeline_mode = #tpu.pipeline_mode<synchronous>, transform_indices = @transform_7, window_bounds = array<i64: 64, 128>}, {pipeline_mode = #tpu.pipeline_mode<synchronous>, transform_indices = @transform_8, window_bounds = array<i64: 8, 128>}, {pipeline_mode = #tpu.pipeline_mode<synchronous>, transform_indices = @transform_9, window_bounds = array<i64: 64, 128>}, {pipeline_mode = #tpu.pipeline_mode<synchronous>, transform_indices = @transform_10, window_bounds = array<i64: 8, 128>}, {transform_indices = @transform_11, window_bounds = array<i64: 8, 8, 128>}, {transform_indices = @transform_12, window_bounds = array<i64: 8, 8, 1024>}]} {
    %c0 = arith.constant 0 : index
    %c0_0 = arith.constant 0 : index
    %c0_1 = arith.constant 0 : index
    %0 = vector.load %arg2[%c0, %c0_0, %c0_1] : memref<1x32x1024xf32, #tpu.memory_space<vmem>>, vector<1x32x1024xf32>
    %1 = vector.shape_cast %0 : vector<1x32x1024xf32> to vector<32x1024xf32>
    %c0_2 = arith.constant 0 : index
    %c0_3 = arith.constant 0 : index
    %c0_4 = arith.constant 0 : index
    %2 = vector.load %arg3[%c0_2, %c0_3, %c0_4] : memref<1x1024x32xf32, #tpu.memory_space<vmem>>, vector<1x1024x32xf32>
    %3 = vector.shape_cast %2 : vector<1x1024x32xf32> to vector<1024x32xf32>
    %c0_5 = arith.constant 0 : index
    %c0_6 = arith.constant 0 : index
    %c0_7 = arith.constant 0 : index
    %4 = vector.load %arg4[%c0_5, %c0_6, %c0_7] : memref<1x8x1024xf32, #tpu.memory_space<vmem>>, vector<1x8x1024xf32>
    %5 = vector.shape_cast %4 : vector<1x8x1024xf32> to vector<8x1024xf32>
    %c0_8 = arith.constant 0 : index
    %c0_9 = arith.constant 0 : index
    %6 = vector.load %arg6[%c0_8, %c0_9] : memref<96x128xf32, #tpu.memory_space<vmem>>, vector<96x128xf32>
    %c0_10 = arith.constant 0 : index
    %c0_11 = arith.constant 0 : index
    %7 = vector.load %arg7[%c0_10, %c0_11] : memref<8x128xf32, #tpu.memory_space<vmem>>, vector<8x128xf32>
    %c0_12 = arith.constant 0 : index
    %c0_13 = arith.constant 0 : index
    %8 = vector.load %arg8[%c0_12, %c0_13] : memref<64x128xf32, #tpu.memory_space<vmem>>, vector<64x128xf32>
    %c0_14 = arith.constant 0 : index
    %c0_15 = arith.constant 0 : index
    %9 = vector.load %arg9[%c0_14, %c0_15] : memref<8x128xf32, #tpu.memory_space<vmem>>, vector<8x128xf32>
    %c0_16 = arith.constant 0 : index
    %c0_17 = arith.constant 0 : index
    %10 = vector.load %arg10[%c0_16, %c0_17] : memref<64x128xf32, #tpu.memory_space<vmem>>, vector<64x128xf32>
    %c0_18 = arith.constant 0 : index
    %c0_19 = arith.constant 0 : index
    %11 = vector.load %arg11[%c0_18, %c0_19] : memref<8x128xf32, #tpu.memory_space<vmem>>, vector<8x128xf32>
    %cst = arith.constant 0.000000e+00 : f32
    %12 = vector.broadcast %cst : f32 to vector<8x32xf32>
    %cst_20 = arith.constant 0.000000e+00 : f32
    %13 = vector.broadcast %cst_20 : f32 to vector<8x32xf32>
    %cst_21 = arith.constant 0.000000e+00 : f32
    %14 = vector.broadcast %cst_21 : f32 to vector<8x32xf32>
    %cst_22 = arith.constant 0.000000e+00 : f32
    %15 = vector.broadcast %cst_22 : f32 to vector<8x32xf32>
    %c0_23 = arith.constant 0 : index
    %c0_24 = arith.constant 0 : index
    %16 = vector.load %arg5[%c0_23, %c0_24] : memref<8x32xf32, #tpu.memory_space<vmem>>, vector<8x32xf32>
    %c0_i32 = arith.constant 0 : i32
    %17 = arith.index_cast %c0_i32 : i32 to index
    %c0_25 = arith.constant 0 : index
    %c0_26 = arith.constant 0 : index
    %18 = vector.load %arg1[%17, %c0_25, %c0_26] : memref<8x8x32xf32, #tpu.memory_space<vmem>>, vector<1x8x32xf32>
    %19 = vector.shape_cast %18 : vector<1x8x32xf32> to vector<8x32xf32>
    %20 = tpu.concatenate %19, %16, %12 in 1 : vector<8x32xf32>, vector<8x32xf32>, vector<8x32xf32> -> vector<8x96xf32>
    %cst_27 = arith.constant dense<0.000000e+00> : vector<8x128xf32>
    %21 = tpu.matmul %20, %6, %cst_27 {dimension_numbers = #tpu.dot_dimension_numbers<[1], [0], [0], [1], [0, 0, 1, 1], [], []>} : vector<8x96xf32>, vector<96x128xf32>, vector<8x128xf32> -> vector<8x128xf32>
    %22 = arith.addf %21, %7 : vector<8x128xf32>
    %23 = vector.extract_strided_slice %22 {offsets = [0, 0], sizes = [8, 32], strides = [1, 1]} : vector<8x128xf32> to vector<8x32xf32>
    %24 = arith.negf %23 : vector<8x32xf32>
    %25 = math.exp %24 : vector<8x32xf32>
    %cst_28 = arith.constant 1.000000e+00 : f32
    %26 = vector.broadcast %cst_28 : f32 to vector<8x32xf32>
    %27 = arith.addf %26, %25 : vector<8x32xf32>
    %28 = arith.divf %26, %27 : vector<8x32xf32>
    %29 = vector.extract_strided_slice %22 {offsets = [0, 32], sizes = [8, 32], strides = [1, 1]} : vector<8x128xf32> to vector<8x32xf32>
    %30 = arith.negf %29 : vector<8x32xf32>
    %31 = math.exp %30 : vector<8x32xf32>
    %cst_29 = arith.constant 1.000000e+00 : f32
    %32 = vector.broadcast %cst_29 : f32 to vector<8x32xf32>
    %33 = arith.addf %32, %31 : vector<8x32xf32>
    %34 = arith.divf %32, %33 : vector<8x32xf32>
    %35 = vector.extract_strided_slice %22 {offsets = [0, 64], sizes = [8, 32], strides = [1, 1]} : vector<8x128xf32> to vector<8x32xf32>
    %36 = math.tanh %35 : vector<8x32xf32>
    %37 = vector.extract_strided_slice %22 {offsets = [0, 96], sizes = [8, 32], strides = [1, 1]} : vector<8x128xf32> to vector<8x32xf32>
    %38 = arith.negf %37 : vector<8x32xf32>
    %39 = math.exp %38 : vector<8x32xf32>
    %cst_30 = arith.constant 1.000000e+00 : f32
    %40 = vector.broadcast %cst_30 : f32 to vector<8x32xf32>
    %41 = arith.addf %40, %39 : vector<8x32xf32>
    %42 = arith.divf %40, %41 : vector<8x32xf32>
    %43 = arith.mulf %34, %13 : vector<8x32xf32>
    %44 = arith.mulf %28, %36 : vector<8x32xf32>
    %45 = arith.addf %43, %44 : vector<8x32xf32>
    %46 = math.tanh %45 : vector<8x32xf32>
    %47 = arith.mulf %42, %46 : vector<8x32xf32>
    %48 = tpu.concatenate %47, %14 in 1 : vector<8x32xf32>, vector<8x32xf32> -> vector<8x64xf32>
    %cst_31 = arith.constant dense<0.000000e+00> : vector<8x128xf32>
    %49 = tpu.matmul %48, %8, %cst_31 {dimension_numbers = #tpu.dot_dimension_numbers<[1], [0], [0], [1], [0, 0, 1, 1], [], []>} : vector<8x64xf32>, vector<64x128xf32>, vector<8x128xf32> -> vector<8x128xf32>
    %50 = arith.addf %49, %9 : vector<8x128xf32>
    %51 = vector.extract_strided_slice %50 {offsets = [0, 0], sizes = [8, 32], strides = [1, 1]} : vector<8x128xf32> to vector<8x32xf32>
    %52 = arith.negf %51 : vector<8x32xf32>
    %53 = math.exp %52 : vector<8x32xf32>
    %cst_32 = arith.constant 1.000000e+00 : f32
    %54 = vector.broadcast %cst_32 : f32 to vector<8x32xf32>
    %55 = arith.addf %54, %53 : vector<8x32xf32>
    %56 = arith.divf %54, %55 : vector<8x32xf32>
    %57 = vector.extract_strided_slice %50 {offsets = [0, 32], sizes = [8, 32], strides = [1, 1]} : vector<8x128xf32> to vector<8x32xf32>
    %58 = arith.negf %57 : vector<8x32xf32>
    %59 = math.exp %58 : vector<8x32xf32>
    %cst_33 = arith.constant 1.000000e+00 : f32
    %60 = vector.broadcast %cst_33 : f32 to vector<8x32xf32>
    %61 = arith.addf %60, %59 : vector<8x32xf32>
    %62 = arith.divf %60, %61 : vector<8x32xf32>
    %63 = vector.extract_strided_slice %50 {offsets = [0, 64], sizes = [8, 32], strides = [1, 1]} : vector<8x128xf32> to vector<8x32xf32>
    %64 = math.tanh %63 : vector<8x32xf32>
    %65 = vector.extract_strided_slice %50 {offsets = [0, 96], sizes = [8, 32], strides = [1, 1]} : vector<8x128xf32> to vector<8x32xf32>
    %66 = arith.negf %65 : vector<8x32xf32>
    %67 = math.exp %66 : vector<8x32xf32>
    %cst_34 = arith.constant 1.000000e+00 : f32
    %68 = vector.broadcast %cst_34 : f32 to vector<8x32xf32>
    %69 = arith.addf %68, %67 : vector<8x32xf32>
    %70 = arith.divf %68, %69 : vector<8x32xf32>
    %71 = arith.mulf %62, %15 : vector<8x32xf32>
    %72 = arith.mulf %56, %64 : vector<8x32xf32>
    %73 = arith.addf %71, %72 : vector<8x32xf32>
    %74 = math.tanh %73 : vector<8x32xf32>
    %75 = arith.mulf %70, %74 : vector<8x32xf32>
    %cst_35 = arith.constant dense<0.000000e+00> : vector<8x1024xf32>
    %76 = tpu.matmul %75, %1, %cst_35 {dimension_numbers = #tpu.dot_dimension_numbers<[1], [0], [0], [1], [0, 0, 1, 1], [], []>} : vector<8x32xf32>, vector<32x1024xf32>, vector<8x1024xf32> -> vector<8x1024xf32>
    %77 = arith.addf %76, %5 : vector<8x1024xf32>
    %cst_36 = arith.constant dense<0xFF800000> : vector<8xf32>
    %78 = vector.multi_reduction <maximumf>, %77, %cst_36 [1] : vector<8x1024xf32> to vector<8xf32>
    %79 = vector.shape_cast %78 : vector<8xf32> to vector<8x1xf32>
    %80 = vector.broadcast %79 : vector<8x1xf32> to vector<8x1024xf32>
    %81 = arith.subf %77, %80 : vector<8x1024xf32>
    %82 = math.exp %81 : vector<8x1024xf32>
    %cst_37 = arith.constant dense<0.000000e+00> : vector<8xf32>
    %83 = vector.multi_reduction <add>, %82, %cst_37 [1] : vector<8x1024xf32> to vector<8xf32>
    %84 = vector.shape_cast %83 : vector<8xf32> to vector<8x1xf32>
    %85 = tpu.reciprocal %84 {approx = true} : vector<8x1xf32> -> vector<8x1xf32>
    %86 = vector.broadcast %85 : vector<8x1xf32> to vector<8x1024xf32>
    %87 = arith.mulf %82, %86 : vector<8x1024xf32>
    %cst_38 = arith.constant dense<0.000000e+00> : vector<8x32xf32>
    %88 = tpu.matmul %87, %3, %cst_38 {dimension_numbers = #tpu.dot_dimension_numbers<[1], [0], [0], [1], [0, 0, 1, 1], [], []>} : vector<8x1024xf32>, vector<1024x32xf32>, vector<8x32xf32> -> vector<8x32xf32>
    %89 = tpu.concatenate %75, %88 in 1 : vector<8x32xf32>, vector<8x32xf32> -> vector<8x64xf32>
    %cst_39 = arith.constant dense<0.000000e+00> : vector<8x128xf32>
    %90 = tpu.matmul %89, %10, %cst_39 {dimension_numbers = #tpu.dot_dimension_numbers<[1], [0], [0], [1], [0, 0, 1, 1], [], []>} : vector<8x64xf32>, vector<64x128xf32>, vector<8x128xf32> -> vector<8x128xf32>
    %91 = arith.addf %90, %11 : vector<8x128xf32>
    %92 = arith.index_cast %c0_i32 : i32 to index
    %c0_40 = arith.constant 0 : index
    %c0_41 = arith.constant 0 : index
    %93 = vector.load %arg12[%92, %c0_40, %c0_41] : memref<8x8x128xf32, #tpu.memory_space<vmem>>, vector<1x8x128xf32>
    %94 = vector.shape_cast %93 : vector<1x8x128xf32> to vector<8x128xf32>
    %95 = vector.shape_cast %91 : vector<8x128xf32> to vector<1x8x128xf32>
    tpu.vector_store %arg12[%92, %c0_40, %c0_41], %95 {strides = array<i32>} : memref<8x8x128xf32, #tpu.memory_space<vmem>>, vector<1x8x128xf32>,
    %96 = arith.index_cast %c0_i32 : i32 to index
    %c0_42 = arith.constant 0 : index
    %c0_43 = arith.constant 0 : index
    %97 = vector.load %arg13[%96, %c0_42, %c0_43] : memref<8x8x1024xf32, #tpu.memory_space<vmem>>, vector<1x8x1024xf32>
    %98 = vector.shape_cast %97 : vector<1x8x1024xf32> to vector<8x1024xf32>
    %99 = vector.shape_cast %87 : vector<8x1024xf32> to vector<1x8x1024xf32>
    tpu.vector_store %arg13[%96, %c0_42, %c0_43], %99 {strides = array<i32>} : memref<8x8x1024xf32, #tpu.memory_space<vmem>>, vector<1x8x1024xf32>,
    %c1_i32 = arith.constant 1 : i32
    %100 = arith.index_cast %c1_i32 : i32 to index
    %c0_44 = arith.constant 0 : index
    %c0_45 = arith.constant 0 : index
    %101 = vector.load %arg1[%100, %c0_44, %c0_45] : memref<8x8x32xf32, #tpu.memory_space<vmem>>, vector<1x8x32xf32>
    %102 = vector.shape_cast %101 : vector<1x8x32xf32> to vector<8x32xf32>
    %103 = tpu.concatenate %102, %88, %47 in 1 : vector<8x32xf32>, vector<8x32xf32>, vector<8x32xf32> -> vector<8x96xf32>
    %cst_46 = arith.constant dense<0.000000e+00> : vector<8x128xf32>
    %104 = tpu.matmul %103, %6, %cst_46 {dimension_numbers = #tpu.dot_dimension_numbers<[1], [0], [0], [1], [0, 0, 1, 1], [], []>} : vector<8x96xf32>, vector<96x128xf32>, vector<8x128xf32> -> vector<8x128xf32>
    %105 = arith.addf %104, %7 : vector<8x128xf32>
    %106 = vector.extract_strided_slice %105 {offsets = [0, 0], sizes = [8, 32], strides = [1, 1]} : vector<8x128xf32> to vector<8x32xf32>
    %107 = arith.negf %106 : vector<8x32xf32>
    %108 = math.exp %107 : vector<8x32xf32>
    %cst_47 = arith.constant 1.000000e+00 : f32
    %109 = vector.broadcast %cst_47 : f32 to vector<8x32xf32>
    %110 = arith.addf %109, %108 : vector<8x32xf32>
    %111 = arith.divf %109, %110 : vector<8x32xf32>
    %112 = vector.extract_strided_slice %105 {offsets = [0, 32], sizes = [8, 32], strides = [1, 1]} : vector<8x128xf32> to vector<8x32xf32>
    %113 = arith.negf %112 : vector<8x32xf32>
    %114 = math.exp %113 : vector<8x32xf32>
    %cst_48 = arith.constant 1.000000e+00 : f32
    %115 = vector.broadcast %cst_48 : f32 to vector<8x32xf32>
    %116 = arith.addf %115, %114 : vector<8x32xf32>
    %117 = arith.divf %115, %116 : vector<8x32xf32>
    %118 = vector.extract_strided_slice %105 {offsets = [0, 64], sizes = [8, 32], strides = [1, 1]} : vector<8x128xf32> to vector<8x32xf32>
    %119 = math.tanh %118 : vector<8x32xf32>
    %120 = vector.extract_strided_slice %105 {offsets = [0, 96], sizes = [8, 32], strides = [1, 1]} : vector<8x128xf32> to vector<8x32xf32>
    %121 = arith.negf %120 : vector<8x32xf32>
    %122 = math.exp %121 : vector<8x32xf32>
    %cst_49 = arith.constant 1.000000e+00 : f32
    %123 = vector.broadcast %cst_49 : f32 to vector<8x32xf32>
    %124 = arith.addf %123, %122 : vector<8x32xf32>
    %125 = arith.divf %123, %124 : vector<8x32xf32>
    %126 = arith.mulf %117, %45 : vector<8x32xf32>
    %127 = arith.mulf %111, %119 : vector<8x32xf32>
    %128 = arith.addf %126, %127 : vector<8x32xf32>
    %129 = math.tanh %128 : vector<8x32xf32>
    %130 = arith.mulf %125, %129 : vector<8x32xf32>
    %131 = tpu.concatenate %130, %75 in 1 : vector<8x32xf32>, vector<8x32xf32> -> vector<8x64xf32>
    %cst_50 = arith.constant dense<0.000000e+00> : vector<8x128xf32>
    %132 = tpu.matmul %131, %8, %cst_50 {dimension_numbers = #tpu.dot_dimension_numbers<[1], [0], [0], [1], [0, 0, 1, 1], [], []>} : vector<8x64xf32>, vector<64x128xf32>, vector<8x128xf32> -> vector<8x128xf32>
    %133 = arith.addf %132, %9 : vector<8x128xf32>
    %134 = vector.extract_strided_slice %133 {offsets = [0, 0], sizes = [8, 32], strides = [1, 1]} : vector<8x128xf32> to vector<8x32xf32>
    %135 = arith.negf %134 : vector<8x32xf32>
    %136 = math.exp %135 : vector<8x32xf32>
    %cst_51 = arith.constant 1.000000e+00 : f32
    %137 = vector.broadcast %cst_51 : f32 to vector<8x32xf32>
    %138 = arith.addf %137, %136 : vector<8x32xf32>
    %139 = arith.divf %137, %138 : vector<8x32xf32>
    %140 = vector.extract_strided_slice %133 {offsets = [0, 32], sizes = [8, 32], strides = [1, 1]} : vector<8x128xf32> to vector<8x32xf32>
    %141 = arith.negf %140 : vector<8x32xf32>
    %142 = math.exp %141 : vector<8x32xf32>
    %cst_52 = arith.constant 1.000000e+00 : f32
    %143 = vector.broadcast %cst_52 : f32 to vector<8x32xf32>
    %144 = arith.addf %143, %142 : vector<8x32xf32>
    %145 = arith.divf %143, %144 : vector<8x32xf32>
    %146 = vector.extract_strided_slice %133 {offsets = [0, 64], sizes = [8, 32], strides = [1, 1]} : vector<8x128xf32> to vector<8x32xf32>
    %147 = math.tanh %146 : vector<8x32xf32>
    %148 = vector.extract_strided_slice %133 {offsets = [0, 96], sizes = [8, 32], strides = [1, 1]} : vector<8x128xf32> to vector<8x32xf32>
    %149 = arith.negf %148 : vector<8x32xf32>
    %150 = math.exp %149 : vector<8x32xf32>
    %cst_53 = arith.constant 1.000000e+00 : f32
    %151 = vector.broadcast %cst_53 : f32 to vector<8x32xf32>
    %152 = arith.addf %151, %150 : vector<8x32xf32>
    %153 = arith.divf %151, %152 : vector<8x32xf32>
    %154 = arith.mulf %145, %73 : vector<8x32xf32>
    %155 = arith.mulf %139, %147 : vector<8x32xf32>
    %156 = arith.addf %154, %155 : vector<8x32xf32>
    %157 = math.tanh %156 : vector<8x32xf32>
    %158 = arith.mulf %153, %157 : vector<8x32xf32>
    %cst_54 = arith.constant dense<0.000000e+00> : vector<8x1024xf32>
    %159 = tpu.matmul %158, %1, %cst_54 {dimension_numbers = #tpu.dot_dimension_numbers<[1], [0], [0], [1], [0, 0, 1, 1], [], []>} : vector<8x32xf32>, vector<32x1024xf32>, vector<8x1024xf32> -> vector<8x1024xf32>
    %160 = arith.addf %159, %5 : vector<8x1024xf32>
    %cst_55 = arith.constant dense<0xFF800000> : vector<8xf32>
    %161 = vector.multi_reduction <maximumf>, %160, %cst_55 [1] : vector<8x1024xf32> to vector<8xf32>
    %162 = vector.shape_cast %161 : vector<8xf32> to vector<8x1xf32>
    %163 = vector.broadcast %162 : vector<8x1xf32> to vector<8x1024xf32>
    %164 = arith.subf %160, %163 : vector<8x1024xf32>
    %165 = math.exp %164 : vector<8x1024xf32>
    %cst_56 = arith.constant dense<0.000000e+00> : vector<8xf32>
    %166 = vector.multi_reduction <add>, %165, %cst_56 [1] : vector<8x1024xf32> to vector<8xf32>
    %167 = vector.shape_cast %166 : vector<8xf32> to vector<8x1xf32>
    %168 = tpu.reciprocal %167 {approx = true} : vector<8x1xf32> -> vector<8x1xf32>
    %169 = vector.broadcast %168 : vector<8x1xf32> to vector<8x1024xf32>
    %170 = arith.mulf %165, %169 : vector<8x1024xf32>
    %cst_57 = arith.constant dense<0.000000e+00> : vector<8x32xf32>
    %171 = tpu.matmul %170, %3, %cst_57 {dimension_numbers = #tpu.dot_dimension_numbers<[1], [0], [0], [1], [0, 0, 1, 1], [], []>} : vector<8x1024xf32>, vector<1024x32xf32>, vector<8x32xf32> -> vector<8x32xf32>
    %172 = tpu.concatenate %158, %171 in 1 : vector<8x32xf32>, vector<8x32xf32> -> vector<8x64xf32>
    %cst_58 = arith.constant dense<0.000000e+00> : vector<8x128xf32>
    %173 = tpu.matmul %172, %10, %cst_58 {dimension_numbers = #tpu.dot_dimension_numbers<[1], [0], [0], [1], [0, 0, 1, 1], [], []>} : vector<8x64xf32>, vector<64x128xf32>, vector<8x128xf32> -> vector<8x128xf32>
    %174 = arith.addf %173, %11 : vector<8x128xf32>
    %175 = arith.index_cast %c1_i32 : i32 to index
    %c0_59 = arith.constant 0 : index
    %c0_60 = arith.constant 0 : index
    %176 = vector.load %arg12[%175, %c0_59, %c0_60] : memref<8x8x128xf32, #tpu.memory_space<vmem>>, vector<1x8x128xf32>
    %177 = vector.shape_cast %176 : vector<1x8x128xf32> to vector<8x128xf32>
    %178 = vector.shape_cast %174 : vector<8x128xf32> to vector<1x8x128xf32>
    tpu.vector_store %arg12[%175, %c0_59, %c0_60], %178 {strides = array<i32>} : memref<8x8x128xf32, #tpu.memory_space<vmem>>, vector<1x8x128xf32>,
    %179 = arith.index_cast %c1_i32 : i32 to index
    %c0_61 = arith.constant 0 : index
    %c0_62 = arith.constant 0 : index
    %180 = vector.load %arg13[%179, %c0_61, %c0_62] : memref<8x8x1024xf32, #tpu.memory_space<vmem>>, vector<1x8x1024xf32>
    %181 = vector.shape_cast %180 : vector<1x8x1024xf32> to vector<8x1024xf32>
    %182 = vector.shape_cast %170 : vector<8x1024xf32> to vector<1x8x1024xf32>
    tpu.vector_store %arg13[%179, %c0_61, %c0_62], %182 {strides = array<i32>} : memref<8x8x1024xf32, #tpu.memory_space<vmem>>, vector<1x8x1024xf32>,
    %c2_i32 = arith.constant 2 : i32
    %183 = arith.index_cast %c2_i32 : i32 to index
    %c0_63 = arith.constant 0 : index
    %c0_64 = arith.constant 0 : index
    %184 = vector.load %arg1[%183, %c0_63, %c0_64] : memref<8x8x32xf32, #tpu.memory_space<vmem>>, vector<1x8x32xf32>
    %185 = vector.shape_cast %184 : vector<1x8x32xf32> to vector<8x32xf32>
    %186 = tpu.concatenate %185, %171, %130 in 1 : vector<8x32xf32>, vector<8x32xf32>, vector<8x32xf32> -> vector<8x96xf32>
    %cst_65 = arith.constant dense<0.000000e+00> : vector<8x128xf32>
    %187 = tpu.matmul %186, %6, %cst_65 {dimension_numbers = #tpu.dot_dimension_numbers<[1], [0], [0], [1], [0, 0, 1, 1], [], []>} : vector<8x96xf32>, vector<96x128xf32>, vector<8x128xf32> -> vector<8x128xf32>
    %188 = arith.addf %187, %7 : vector<8x128xf32>
    %189 = vector.extract_strided_slice %188 {offsets = [0, 0], sizes = [8, 32], strides = [1, 1]} : vector<8x128xf32> to vector<8x32xf32>
    %190 = arith.negf %189 : vector<8x32xf32>
    %191 = math.exp %190 : vector<8x32xf32>
    %cst_66 = arith.constant 1.000000e+00 : f32
    %192 = vector.broadcast %cst_66 : f32 to vector<8x32xf32>
    %193 = arith.addf %192, %191 : vector<8x32xf32>
    %194 = arith.divf %192, %193 : vector<8x32xf32>
    %195 = vector.extract_strided_slice %188 {offsets = [0, 32], sizes = [8, 32], strides = [1, 1]} : vector<8x128xf32> to vector<8x32xf32>
    %196 = arith.negf %195 : vector<8x32xf32>
    %197 = math.exp %196 : vector<8x32xf32>
    %cst_67 = arith.constant 1.000000e+00 : f32
    %198 = vector.broadcast %cst_67 : f32 to vector<8x32xf32>
    %199 = arith.addf %198, %197 : vector<8x32xf32>
    %200 = arith.divf %198, %199 : vector<8x32xf32>
    %201 = vector.extract_strided_slice %188 {offsets = [0, 64], sizes = [8, 32], strides = [1, 1]} : vector<8x128xf32> to vector<8x32xf32>
    %202 = math.tanh %201 : vector<8x32xf32>
    %203 = vector.extract_strided_slice %188 {offsets = [0, 96], sizes = [8, 32], strides = [1, 1]} : vector<8x128xf32> to vector<8x32xf32>
    %204 = arith.negf %203 : vector<8x32xf32>
    %205 = math.exp %204 : vector<8x32xf32>
    %cst_68 = arith.constant 1.000000e+00 : f32
    %206 = vector.broadcast %cst_68 : f32 to vector<8x32xf32>
    %207 = arith.addf %206, %205 : vector<8x32xf32>
    %208 = arith.divf %206, %207 : vector<8x32xf32>
    %209 = arith.mulf %200, %128 : vector<8x32xf32>
    %210 = arith.mulf %194, %202 : vector<8x32xf32>
    %211 = arith.addf %209, %210 : vector<8x32xf32>
    %212 = math.tanh %211 : vector<8x32xf32>
    %213 = arith.mulf %208, %212 : vector<8x32xf32>
    %214 = tpu.concatenate %213, %158 in 1 : vector<8x32xf32>, vector<8x32xf32> -> vector<8x64xf32>
    %cst_69 = arith.constant dense<0.000000e+00> : vector<8x128xf32>
    %215 = tpu.matmul %214, %8, %cst_69 {dimension_numbers = #tpu.dot_dimension_numbers<[1], [0], [0], [1], [0, 0, 1, 1], [], []>} : vector<8x64xf32>, vector<64x128xf32>, vector<8x128xf32> -> vector<8x128xf32>
    %216 = arith.addf %215, %9 : vector<8x128xf32>
    %217 = vector.extract_strided_slice %216 {offsets = [0, 0], sizes = [8, 32], strides = [1, 1]} : vector<8x128xf32> to vector<8x32xf32>
    %218 = arith.negf %217 : vector<8x32xf32>
    %219 = math.exp %218 : vector<8x32xf32>
    %cst_70 = arith.constant 1.000000e+00 : f32
    %220 = vector.broadcast %cst_70 : f32 to vector<8x32xf32>
    %221 = arith.addf %220, %219 : vector<8x32xf32>
    %222 = arith.divf %220, %221 : vector<8x32xf32>
    %223 = vector.extract_strided_slice %216 {offsets = [0, 32], sizes = [8, 32], strides = [1, 1]} : vector<8x128xf32> to vector<8x32xf32>
    %224 = arith.negf %223 : vector<8x32xf32>
    %225 = math.exp %224 : vector<8x32xf32>
    %cst_71 = arith.constant 1.000000e+00 : f32
    %226 = vector.broadcast %cst_71 : f32 to vector<8x32xf32>
    %227 = arith.addf %226, %225 : vector<8x32xf32>
    %228 = arith.divf %226, %227 : vector<8x32xf32>
    %229 = vector.extract_strided_slice %216 {offsets = [0, 64], sizes = [8, 32], strides = [1, 1]} : vector<8x128xf32> to vector<8x32xf32>
    %230 = math.tanh %229 : vector<8x32xf32>
    %231 = vector.extract_strided_slice %216 {offsets = [0, 96], sizes = [8, 32], strides = [1, 1]} : vector<8x128xf32> to vector<8x32xf32>
    %232 = arith.negf %231 : vector<8x32xf32>
    %233 = math.exp %232 : vector<8x32xf32>
    %cst_72 = arith.constant 1.000000e+00 : f32
    %234 = vector.broadcast %cst_72 : f32 to vector<8x32xf32>
    %235 = arith.addf %234, %233 : vector<8x32xf32>
    %236 = arith.divf %234, %235 : vector<8x32xf32>
    %237 = arith.mulf %228, %156 : vector<8x32xf32>
    %238 = arith.mulf %222, %230 : vector<8x32xf32>
    %239 = arith.addf %237, %238 : vector<8x32xf32>
    %240 = math.tanh %239 : vector<8x32xf32>
    %241 = arith.mulf %236, %240 : vector<8x32xf32>
    %cst_73 = arith.constant dense<0.000000e+00> : vector<8x1024xf32>
    %242 = tpu.matmul %241, %1, %cst_73 {dimension_numbers = #tpu.dot_dimension_numbers<[1], [0], [0], [1], [0, 0, 1, 1], [], []>} : vector<8x32xf32>, vector<32x1024xf32>, vector<8x1024xf32> -> vector<8x1024xf32>
    %243 = arith.addf %242, %5 : vector<8x1024xf32>
    %cst_74 = arith.constant dense<0xFF800000> : vector<8xf32>
    %244 = vector.multi_reduction <maximumf>, %243, %cst_74 [1] : vector<8x1024xf32> to vector<8xf32>
    %245 = vector.shape_cast %244 : vector<8xf32> to vector<8x1xf32>
    %246 = vector.broadcast %245 : vector<8x1xf32> to vector<8x1024xf32>
    %247 = arith.subf %243, %246 : vector<8x1024xf32>
    %248 = math.exp %247 : vector<8x1024xf32>
    %cst_75 = arith.constant dense<0.000000e+00> : vector<8xf32>
    %249 = vector.multi_reduction <add>, %248, %cst_75 [1] : vector<8x1024xf32> to vector<8xf32>
    %250 = vector.shape_cast %249 : vector<8xf32> to vector<8x1xf32>
    %251 = tpu.reciprocal %250 {approx = true} : vector<8x1xf32> -> vector<8x1xf32>
    %252 = vector.broadcast %251 : vector<8x1xf32> to vector<8x1024xf32>
    %253 = arith.mulf %248, %252 : vector<8x1024xf32>
    %cst_76 = arith.constant dense<0.000000e+00> : vector<8x32xf32>
    %254 = tpu.matmul %253, %3, %cst_76 {dimension_numbers = #tpu.dot_dimension_numbers<[1], [0], [0], [1], [0, 0, 1, 1], [], []>} : vector<8x1024xf32>, vector<1024x32xf32>, vector<8x32xf32> -> vector<8x32xf32>
    %255 = tpu.concatenate %241, %254 in 1 : vector<8x32xf32>, vector<8x32xf32> -> vector<8x64xf32>
    %cst_77 = arith.constant dense<0.000000e+00> : vector<8x128xf32>
    %256 = tpu.matmul %255, %10, %cst_77 {dimension_numbers = #tpu.dot_dimension_numbers<[1], [0], [0], [1], [0, 0, 1, 1], [], []>} : vector<8x64xf32>, vector<64x128xf32>, vector<8x128xf32> -> vector<8x128xf32>
    %257 = arith.addf %256, %11 : vector<8x128xf32>
    %258 = arith.index_cast %c2_i32 : i32 to index
    %c0_78 = arith.constant 0 : index
    %c0_79 = arith.constant 0 : index
    %259 = vector.load %arg12[%258, %c0_78, %c0_79] : memref<8x8x128xf32, #tpu.memory_space<vmem>>, vector<1x8x128xf32>
    %260 = vector.shape_cast %259 : vector<1x8x128xf32> to vector<8x128xf32>
    %261 = vector.shape_cast %257 : vector<8x128xf32> to vector<1x8x128xf32>
    tpu.vector_store %arg12[%258, %c0_78, %c0_79], %261 {strides = array<i32>} : memref<8x8x128xf32, #tpu.memory_space<vmem>>, vector<1x8x128xf32>,
    %262 = arith.index_cast %c2_i32 : i32 to index
    %c0_80 = arith.constant 0 : index
    %c0_81 = arith.constant 0 : index
    %263 = vector.load %arg13[%262, %c0_80, %c0_81] : memref<8x8x1024xf32, #tpu.memory_space<vmem>>, vector<1x8x1024xf32>
    %264 = vector.shape_cast %263 : vector<1x8x1024xf32> to vector<8x1024xf32>
    %265 = vector.shape_cast %253 : vector<8x1024xf32> to vector<1x8x1024xf32>
    tpu.vector_store %arg13[%262, %c0_80, %c0_81], %265 {strides = array<i32>} : memref<8x8x1024xf32, #tpu.memory_space<vmem>>, vector<1x8x1024xf32>,
    %c3_i32 = arith.constant 3 : i32
    %266 = arith.index_cast %c3_i32 : i32 to index
    %c0_82 = arith.constant 0 : index
    %c0_83 = arith.constant 0 : index
    %267 = vector.load %arg1[%266, %c0_82, %c0_83] : memref<8x8x32xf32, #tpu.memory_space<vmem>>, vector<1x8x32xf32>
    %268 = vector.shape_cast %267 : vector<1x8x32xf32> to vector<8x32xf32>
    %269 = tpu.concatenate %268, %254, %213 in 1 : vector<8x32xf32>, vector<8x32xf32>, vector<8x32xf32> -> vector<8x96xf32>
    %cst_84 = arith.constant dense<0.000000e+00> : vector<8x128xf32>
    %270 = tpu.matmul %269, %6, %cst_84 {dimension_numbers = #tpu.dot_dimension_numbers<[1], [0], [0], [1], [0, 0, 1, 1], [], []>} : vector<8x96xf32>, vector<96x128xf32>, vector<8x128xf32> -> vector<8x128xf32>
    %271 = arith.addf %270, %7 : vector<8x128xf32>
    %272 = vector.extract_strided_slice %271 {offsets = [0, 0], sizes = [8, 32], strides = [1, 1]} : vector<8x128xf32> to vector<8x32xf32>
    %273 = arith.negf %272 : vector<8x32xf32>
    %274 = math.exp %273 : vector<8x32xf32>
    %cst_85 = arith.constant 1.000000e+00 : f32
    %275 = vector.broadcast %cst_85 : f32 to vector<8x32xf32>
    %276 = arith.addf %275, %274 : vector<8x32xf32>
    %277 = arith.divf %275, %276 : vector<8x32xf32>
    %278 = vector.extract_strided_slice %271 {offsets = [0, 32], sizes = [8, 32], strides = [1, 1]} : vector<8x128xf32> to vector<8x32xf32>
    %279 = arith.negf %278 : vector<8x32xf32>
    %280 = math.exp %279 : vector<8x32xf32>
    %cst_86 = arith.constant 1.000000e+00 : f32
    %281 = vector.broadcast %cst_86 : f32 to vector<8x32xf32>
    %282 = arith.addf %281, %280 : vector<8x32xf32>
    %283 = arith.divf %281, %282 : vector<8x32xf32>
    %284 = vector.extract_strided_slice %271 {offsets = [0, 64], sizes = [8, 32], strides = [1, 1]} : vector<8x128xf32> to vector<8x32xf32>
    %285 = math.tanh %284 : vector<8x32xf32>
    %286 = vector.extract_strided_slice %271 {offsets = [0, 96], sizes = [8, 32], strides = [1, 1]} : vector<8x128xf32> to vector<8x32xf32>
    %287 = arith.negf %286 : vector<8x32xf32>
    %288 = math.exp %287 : vector<8x32xf32>
    %cst_87 = arith.constant 1.000000e+00 : f32
    %289 = vector.broadcast %cst_87 : f32 to vector<8x32xf32>
    %290 = arith.addf %289, %288 : vector<8x32xf32>
    %291 = arith.divf %289, %290 : vector<8x32xf32>
    %292 = arith.mulf %283, %211 : vector<8x32xf32>
    %293 = arith.mulf %277, %285 : vector<8x32xf32>
    %294 = arith.addf %292, %293 : vector<8x32xf32>
    %295 = math.tanh %294 : vector<8x32xf32>
    %296 = arith.mulf %291, %295 : vector<8x32xf32>
    %297 = tpu.concatenate %296, %241 in 1 : vector<8x32xf32>, vector<8x32xf32> -> vector<8x64xf32>
    %cst_88 = arith.constant dense<0.000000e+00> : vector<8x128xf32>
    %298 = tpu.matmul %297, %8, %cst_88 {dimension_numbers = #tpu.dot_dimension_numbers<[1], [0], [0], [1], [0, 0, 1, 1], [], []>} : vector<8x64xf32>, vector<64x128xf32>, vector<8x128xf32> -> vector<8x128xf32>
    %299 = arith.addf %298, %9 : vector<8x128xf32>
    %300 = vector.extract_strided_slice %299 {offsets = [0, 0], sizes = [8, 32], strides = [1, 1]} : vector<8x128xf32> to vector<8x32xf32>
    %301 = arith.negf %300 : vector<8x32xf32>
    %302 = math.exp %301 : vector<8x32xf32>
    %cst_89 = arith.constant 1.000000e+00 : f32
    %303 = vector.broadcast %cst_89 : f32 to vector<8x32xf32>
    %304 = arith.addf %303, %302 : vector<8x32xf32>
    %305 = arith.divf %303, %304 : vector<8x32xf32>
    %306 = vector.extract_strided_slice %299 {offsets = [0, 32], sizes = [8, 32], strides = [1, 1]} : vector<8x128xf32> to vector<8x32xf32>
    %307 = arith.negf %306 : vector<8x32xf32>
    %308 = math.exp %307 : vector<8x32xf32>
    %cst_90 = arith.constant 1.000000e+00 : f32
    %309 = vector.broadcast %cst_90 : f32 to vector<8x32xf32>
    %310 = arith.addf %309, %308 : vector<8x32xf32>
    %311 = arith.divf %309, %310 : vector<8x32xf32>
    %312 = vector.extract_strided_slice %299 {offsets = [0, 64], sizes = [8, 32], strides = [1, 1]} : vector<8x128xf32> to vector<8x32xf32>
    %313 = math.tanh %312 : vector<8x32xf32>
    %314 = vector.extract_strided_slice %299 {offsets = [0, 96], sizes = [8, 32], strides = [1, 1]} : vector<8x128xf32> to vector<8x32xf32>
    %315 = arith.negf %314 : vector<8x32xf32>
    %316 = math.exp %315 : vector<8x32xf32>
    %cst_91 = arith.constant 1.000000e+00 : f32
    %317 = vector.broadcast %cst_91 : f32 to vector<8x32xf32>
    %318 = arith.addf %317, %316 : vector<8x32xf32>
    %319 = arith.divf %317, %318 : vector<8x32xf32>
    %320 = arith.mulf %311, %239 : vector<8x32xf32>
    %321 = arith.mulf %305, %313 : vector<8x32xf32>
    %322 = arith.addf %320, %321 : vector<8x32xf32>
    %323 = math.tanh %322 : vector<8x32xf32>
    %324 = arith.mulf %319, %323 : vector<8x32xf32>
    %cst_92 = arith.constant dense<0.000000e+00> : vector<8x1024xf32>
    %325 = tpu.matmul %324, %1, %cst_92 {dimension_numbers = #tpu.dot_dimension_numbers<[1], [0], [0], [1], [0, 0, 1, 1], [], []>} : vector<8x32xf32>, vector<32x1024xf32>, vector<8x1024xf32> -> vector<8x1024xf32>
    %326 = arith.addf %325, %5 : vector<8x1024xf32>
    %cst_93 = arith.constant dense<0xFF800000> : vector<8xf32>
    %327 = vector.multi_reduction <maximumf>, %326, %cst_93 [1] : vector<8x1024xf32> to vector<8xf32>
    %328 = vector.shape_cast %327 : vector<8xf32> to vector<8x1xf32>
    %329 = vector.broadcast %328 : vector<8x1xf32> to vector<8x1024xf32>
    %330 = arith.subf %326, %329 : vector<8x1024xf32>
    %331 = math.exp %330 : vector<8x1024xf32>
    %cst_94 = arith.constant dense<0.000000e+00> : vector<8xf32>
    %332 = vector.multi_reduction <add>, %331, %cst_94 [1] : vector<8x1024xf32> to vector<8xf32>
    %333 = vector.shape_cast %332 : vector<8xf32> to vector<8x1xf32>
    %334 = tpu.reciprocal %333 {approx = true} : vector<8x1xf32> -> vector<8x1xf32>
    %335 = vector.broadcast %334 : vector<8x1xf32> to vector<8x1024xf32>
    %336 = arith.mulf %331, %335 : vector<8x1024xf32>
    %cst_95 = arith.constant dense<0.000000e+00> : vector<8x32xf32>
    %337 = tpu.matmul %336, %3, %cst_95 {dimension_numbers = #tpu.dot_dimension_numbers<[1], [0], [0], [1], [0, 0, 1, 1], [], []>} : vector<8x1024xf32>, vector<1024x32xf32>, vector<8x32xf32> -> vector<8x32xf32>
    %338 = tpu.concatenate %324, %337 in 1 : vector<8x32xf32>, vector<8x32xf32> -> vector<8x64xf32>
    %cst_96 = arith.constant dense<0.000000e+00> : vector<8x128xf32>
    %339 = tpu.matmul %338, %10, %cst_96 {dimension_numbers = #tpu.dot_dimension_numbers<[1], [0], [0], [1], [0, 0, 1, 1], [], []>} : vector<8x64xf32>, vector<64x128xf32>, vector<8x128xf32> -> vector<8x128xf32>
    %340 = arith.addf %339, %11 : vector<8x128xf32>
    %341 = arith.index_cast %c3_i32 : i32 to index
    %c0_97 = arith.constant 0 : index
    %c0_98 = arith.constant 0 : index
    %342 = vector.load %arg12[%341, %c0_97, %c0_98] : memref<8x8x128xf32, #tpu.memory_space<vmem>>, vector<1x8x128xf32>
    %343 = vector.shape_cast %342 : vector<1x8x128xf32> to vector<8x128xf32>
    %344 = vector.shape_cast %340 : vector<8x128xf32> to vector<1x8x128xf32>
    tpu.vector_store %arg12[%341, %c0_97, %c0_98], %344 {strides = array<i32>} : memref<8x8x128xf32, #tpu.memory_space<vmem>>, vector<1x8x128xf32>,
    %345 = arith.index_cast %c3_i32 : i32 to index
    %c0_99 = arith.constant 0 : index
    %c0_100 = arith.constant 0 : index
    %346 = vector.load %arg13[%345, %c0_99, %c0_100] : memref<8x8x1024xf32, #tpu.memory_space<vmem>>, vector<1x8x1024xf32>
    %347 = vector.shape_cast %346 : vector<1x8x1024xf32> to vector<8x1024xf32>
    %348 = vector.shape_cast %336 : vector<8x1024xf32> to vector<1x8x1024xf32>
    tpu.vector_store %arg13[%345, %c0_99, %c0_100], %348 {strides = array<i32>} : memref<8x8x1024xf32, #tpu.memory_space<vmem>>, vector<1x8x1024xf32>,
    %c4_i32 = arith.constant 4 : i32
    %349 = arith.index_cast %c4_i32 : i32 to index
    %c0_101 = arith.constant 0 : index
    %c0_102 = arith.constant 0 : index
    %350 = vector.load %arg1[%349, %c0_101, %c0_102] : memref<8x8x32xf32, #tpu.memory_space<vmem>>, vector<1x8x32xf32>
    %351 = vector.shape_cast %350 : vector<1x8x32xf32> to vector<8x32xf32>
    %352 = tpu.concatenate %351, %337, %296 in 1 : vector<8x32xf32>, vector<8x32xf32>, vector<8x32xf32> -> vector<8x96xf32>
    %cst_103 = arith.constant dense<0.000000e+00> : vector<8x128xf32>
    %353 = tpu.matmul %352, %6, %cst_103 {dimension_numbers = #tpu.dot_dimension_numbers<[1], [0], [0], [1], [0, 0, 1, 1], [], []>} : vector<8x96xf32>, vector<96x128xf32>, vector<8x128xf32> -> vector<8x128xf32>
    %354 = arith.addf %353, %7 : vector<8x128xf32>
    %355 = vector.extract_strided_slice %354 {offsets = [0, 0], sizes = [8, 32], strides = [1, 1]} : vector<8x128xf32> to vector<8x32xf32>
    %356 = arith.negf %355 : vector<8x32xf32>
    %357 = math.exp %356 : vector<8x32xf32>
    %cst_104 = arith.constant 1.000000e+00 : f32
    %358 = vector.broadcast %cst_104 : f32 to vector<8x32xf32>
    %359 = arith.addf %358, %357 : vector<8x32xf32>
    %360 = arith.divf %358, %359 : vector<8x32xf32>
    %361 = vector.extract_strided_slice %354 {offsets = [0, 32], sizes = [8, 32], strides = [1, 1]} : vector<8x128xf32> to vector<8x32xf32>
    %362 = arith.negf %361 : vector<8x32xf32>
    %363 = math.exp %362 : vector<8x32xf32>
    %cst_105 = arith.constant 1.000000e+00 : f32
    %364 = vector.broadcast %cst_105 : f32 to vector<8x32xf32>
    %365 = arith.addf %364, %363 : vector<8x32xf32>
    %366 = arith.divf %364, %365 : vector<8x32xf32>
    %367 = vector.extract_strided_slice %354 {offsets = [0, 64], sizes = [8, 32], strides = [1, 1]} : vector<8x128xf32> to vector<8x32xf32>
    %368 = math.tanh %367 : vector<8x32xf32>
    %369 = vector.extract_strided_slice %354 {offsets = [0, 96], sizes = [8, 32], strides = [1, 1]} : vector<8x128xf32> to vector<8x32xf32>
    %370 = arith.negf %369 : vector<8x32xf32>
    %371 = math.exp %370 : vector<8x32xf32>
    %cst_106 = arith.constant 1.000000e+00 : f32
    %372 = vector.broadcast %cst_106 : f32 to vector<8x32xf32>
    %373 = arith.addf %372, %371 : vector<8x32xf32>
    %374 = arith.divf %372, %373 : vector<8x32xf32>
    %375 = arith.mulf %366, %294 : vector<8x32xf32>
    %376 = arith.mulf %360, %368 : vector<8x32xf32>
    %377 = arith.addf %375, %376 : vector<8x32xf32>
    %378 = math.tanh %377 : vector<8x32xf32>
    %379 = arith.mulf %374, %378 : vector<8x32xf32>
    %380 = tpu.concatenate %379, %324 in 1 : vector<8x32xf32>, vector<8x32xf32> -> vector<8x64xf32>
    %cst_107 = arith.constant dense<0.000000e+00> : vector<8x128xf32>
    %381 = tpu.matmul %380, %8, %cst_107 {dimension_numbers = #tpu.dot_dimension_numbers<[1], [0], [0], [1], [0, 0, 1, 1], [], []>} : vector<8x64xf32>, vector<64x128xf32>, vector<8x128xf32> -> vector<8x128xf32>
    %382 = arith.addf %381, %9 : vector<8x128xf32>
    %383 = vector.extract_strided_slice %382 {offsets = [0, 0], sizes = [8, 32], strides = [1, 1]} : vector<8x128xf32> to vector<8x32xf32>
    %384 = arith.negf %383 : vector<8x32xf32>
    %385 = math.exp %384 : vector<8x32xf32>
    %cst_108 = arith.constant 1.000000e+00 : f32
    %386 = vector.broadcast %cst_108 : f32 to vector<8x32xf32>
    %387 = arith.addf %386, %385 : vector<8x32xf32>
    %388 = arith.divf %386, %387 : vector<8x32xf32>
    %389 = vector.extract_strided_slice %382 {offsets = [0, 32], sizes = [8, 32], strides = [1, 1]} : vector<8x128xf32> to vector<8x32xf32>
    %390 = arith.negf %389 : vector<8x32xf32>
    %391 = math.exp %390 : vector<8x32xf32>
    %cst_109 = arith.constant 1.000000e+00 : f32
    %392 = vector.broadcast %cst_109 : f32 to vector<8x32xf32>
    %393 = arith.addf %392, %391 : vector<8x32xf32>
    %394 = arith.divf %392, %393 : vector<8x32xf32>
    %395 = vector.extract_strided_slice %382 {offsets = [0, 64], sizes = [8, 32], strides = [1, 1]} : vector<8x128xf32> to vector<8x32xf32>
    %396 = math.tanh %395 : vector<8x32xf32>
    %397 = vector.extract_strided_slice %382 {offsets = [0, 96], sizes = [8, 32], strides = [1, 1]} : vector<8x128xf32> to vector<8x32xf32>
    %398 = arith.negf %397 : vector<8x32xf32>
    %399 = math.exp %398 : vector<8x32xf32>
    %cst_110 = arith.constant 1.000000e+00 : f32
    %400 = vector.broadcast %cst_110 : f32 to vector<8x32xf32>
    %401 = arith.addf %400, %399 : vector<8x32xf32>
    %402 = arith.divf %400, %401 : vector<8x32xf32>
    %403 = arith.mulf %394, %322 : vector<8x32xf32>
    %404 = arith.mulf %388, %396 : vector<8x32xf32>
    %405 = arith.addf %403, %404 : vector<8x32xf32>
    %406 = math.tanh %405 : vector<8x32xf32>
    %407 = arith.mulf %402, %406 : vector<8x32xf32>
    %cst_111 = arith.constant dense<0.000000e+00> : vector<8x1024xf32>
    %408 = tpu.matmul %407, %1, %cst_111 {dimension_numbers = #tpu.dot_dimension_numbers<[1], [0], [0], [1], [0, 0, 1, 1], [], []>} : vector<8x32xf32>, vector<32x1024xf32>, vector<8x1024xf32> -> vector<8x1024xf32>
    %409 = arith.addf %408, %5 : vector<8x1024xf32>
    %cst_112 = arith.constant dense<0xFF800000> : vector<8xf32>
    %410 = vector.multi_reduction <maximumf>, %409, %cst_112 [1] : vector<8x1024xf32> to vector<8xf32>
    %411 = vector.shape_cast %410 : vector<8xf32> to vector<8x1xf32>
    %412 = vector.broadcast %411 : vector<8x1xf32> to vector<8x1024xf32>
    %413 = arith.subf %409, %412 : vector<8x1024xf32>
    %414 = math.exp %413 : vector<8x1024xf32>
    %cst_113 = arith.constant dense<0.000000e+00> : vector<8xf32>
    %415 = vector.multi_reduction <add>, %414, %cst_113 [1] : vector<8x1024xf32> to vector<8xf32>
    %416 = vector.shape_cast %415 : vector<8xf32> to vector<8x1xf32>
    %417 = tpu.reciprocal %416 {approx = true} : vector<8x1xf32> -> vector<8x1xf32>
    %418 = vector.broadcast %417 : vector<8x1xf32> to vector<8x1024xf32>
    %419 = arith.mulf %414, %418 : vector<8x1024xf32>
    %cst_114 = arith.constant dense<0.000000e+00> : vector<8x32xf32>
    %420 = tpu.matmul %419, %3, %cst_114 {dimension_numbers = #tpu.dot_dimension_numbers<[1], [0], [0], [1], [0, 0, 1, 1], [], []>} : vector<8x1024xf32>, vector<1024x32xf32>, vector<8x32xf32> -> vector<8x32xf32>
    %421 = tpu.concatenate %407, %420 in 1 : vector<8x32xf32>, vector<8x32xf32> -> vector<8x64xf32>
    %cst_115 = arith.constant dense<0.000000e+00> : vector<8x128xf32>
    %422 = tpu.matmul %421, %10, %cst_115 {dimension_numbers = #tpu.dot_dimension_numbers<[1], [0], [0], [1], [0, 0, 1, 1], [], []>} : vector<8x64xf32>, vector<64x128xf32>, vector<8x128xf32> -> vector<8x128xf32>
    %423 = arith.addf %422, %11 : vector<8x128xf32>
    %424 = arith.index_cast %c4_i32 : i32 to index
    %c0_116 = arith.constant 0 : index
    %c0_117 = arith.constant 0 : index
    %425 = vector.load %arg12[%424, %c0_116, %c0_117] : memref<8x8x128xf32, #tpu.memory_space<vmem>>, vector<1x8x128xf32>
    %426 = vector.shape_cast %425 : vector<1x8x128xf32> to vector<8x128xf32>
    %427 = vector.shape_cast %423 : vector<8x128xf32> to vector<1x8x128xf32>
    tpu.vector_store %arg12[%424, %c0_116, %c0_117], %427 {strides = array<i32>} : memref<8x8x128xf32, #tpu.memory_space<vmem>>, vector<1x8x128xf32>,
    %428 = arith.index_cast %c4_i32 : i32 to index
    %c0_118 = arith.constant 0 : index
    %c0_119 = arith.constant 0 : index
    %429 = vector.load %arg13[%428, %c0_118, %c0_119] : memref<8x8x1024xf32, #tpu.memory_space<vmem>>, vector<1x8x1024xf32>
    %430 = vector.shape_cast %429 : vector<1x8x1024xf32> to vector<8x1024xf32>
    %431 = vector.shape_cast %419 : vector<8x1024xf32> to vector<1x8x1024xf32>
    tpu.vector_store %arg13[%428, %c0_118, %c0_119], %431 {strides = array<i32>} : memref<8x8x1024xf32, #tpu.memory_space<vmem>>, vector<1x8x1024xf32>,
    %c5_i32 = arith.constant 5 : i32
    %432 = arith.index_cast %c5_i32 : i32 to index
    %c0_120 = arith.constant 0 : index
    %c0_121 = arith.constant 0 : index
    %433 = vector.load %arg1[%432, %c0_120, %c0_121] : memref<8x8x32xf32, #tpu.memory_space<vmem>>, vector<1x8x32xf32>
    %434 = vector.shape_cast %433 : vector<1x8x32xf32> to vector<8x32xf32>
    %435 = tpu.concatenate %434, %420, %379 in 1 : vector<8x32xf32>, vector<8x32xf32>, vector<8x32xf32> -> vector<8x96xf32>
    %cst_122 = arith.constant dense<0.000000e+00> : vector<8x128xf32>
    %436 = tpu.matmul %435, %6, %cst_122 {dimension_numbers = #tpu.dot_dimension_numbers<[1], [0], [0], [1], [0, 0, 1, 1], [], []>} : vector<8x96xf32>, vector<96x128xf32>, vector<8x128xf32> -> vector<8x128xf32>
    %437 = arith.addf %436, %7 : vector<8x128xf32>
    %438 = vector.extract_strided_slice %437 {offsets = [0, 0], sizes = [8, 32], strides = [1, 1]} : vector<8x128xf32> to vector<8x32xf32>
    %439 = arith.negf %438 : vector<8x32xf32>
    %440 = math.exp %439 : vector<8x32xf32>
    %cst_123 = arith.constant 1.000000e+00 : f32
    %441 = vector.broadcast %cst_123 : f32 to vector<8x32xf32>
    %442 = arith.addf %441, %440 : vector<8x32xf32>
    %443 = arith.divf %441, %442 : vector<8x32xf32>
    %444 = vector.extract_strided_slice %437 {offsets = [0, 32], sizes = [8, 32], strides = [1, 1]} : vector<8x128xf32> to vector<8x32xf32>
    %445 = arith.negf %444 : vector<8x32xf32>
    %446 = math.exp %445 : vector<8x32xf32>
    %cst_124 = arith.constant 1.000000e+00 : f32
    %447 = vector.broadcast %cst_124 : f32 to vector<8x32xf32>
    %448 = arith.addf %447, %446 : vector<8x32xf32>
    %449 = arith.divf %447, %448 : vector<8x32xf32>
    %450 = vector.extract_strided_slice %437 {offsets = [0, 64], sizes = [8, 32], strides = [1, 1]} : vector<8x128xf32> to vector<8x32xf32>
    %451 = math.tanh %450 : vector<8x32xf32>
    %452 = vector.extract_strided_slice %437 {offsets = [0, 96], sizes = [8, 32], strides = [1, 1]} : vector<8x128xf32> to vector<8x32xf32>
    %453 = arith.negf %452 : vector<8x32xf32>
    %454 = math.exp %453 : vector<8x32xf32>
    %cst_125 = arith.constant 1.000000e+00 : f32
    %455 = vector.broadcast %cst_125 : f32 to vector<8x32xf32>
    %456 = arith.addf %455, %454 : vector<8x32xf32>
    %457 = arith.divf %455, %456 : vector<8x32xf32>
    %458 = arith.mulf %449, %377 : vector<8x32xf32>
    %459 = arith.mulf %443, %451 : vector<8x32xf32>
    %460 = arith.addf %458, %459 : vector<8x32xf32>
    %461 = math.tanh %460 : vector<8x32xf32>
    %462 = arith.mulf %457, %461 : vector<8x32xf32>
    %463 = tpu.concatenate %462, %407 in 1 : vector<8x32xf32>, vector<8x32xf32> -> vector<8x64xf32>
    %cst_126 = arith.constant dense<0.000000e+00> : vector<8x128xf32>
    %464 = tpu.matmul %463, %8, %cst_126 {dimension_numbers = #tpu.dot_dimension_numbers<[1], [0], [0], [1], [0, 0, 1, 1], [], []>} : vector<8x64xf32>, vector<64x128xf32>, vector<8x128xf32> -> vector<8x128xf32>
    %465 = arith.addf %464, %9 : vector<8x128xf32>
    %466 = vector.extract_strided_slice %465 {offsets = [0, 0], sizes = [8, 32], strides = [1, 1]} : vector<8x128xf32> to vector<8x32xf32>
    %467 = arith.negf %466 : vector<8x32xf32>
    %468 = math.exp %467 : vector<8x32xf32>
    %cst_127 = arith.constant 1.000000e+00 : f32
    %469 = vector.broadcast %cst_127 : f32 to vector<8x32xf32>
    %470 = arith.addf %469, %468 : vector<8x32xf32>
    %471 = arith.divf %469, %470 : vector<8x32xf32>
    %472 = vector.extract_strided_slice %465 {offsets = [0, 32], sizes = [8, 32], strides = [1, 1]} : vector<8x128xf32> to vector<8x32xf32>
    %473 = arith.negf %472 : vector<8x32xf32>
    %474 = math.exp %473 : vector<8x32xf32>
    %cst_128 = arith.constant 1.000000e+00 : f32
    %475 = vector.broadcast %cst_128 : f32 to vector<8x32xf32>
    %476 = arith.addf %475, %474 : vector<8x32xf32>
    %477 = arith.divf %475, %476 : vector<8x32xf32>
    %478 = vector.extract_strided_slice %465 {offsets = [0, 64], sizes = [8, 32], strides = [1, 1]} : vector<8x128xf32> to vector<8x32xf32>
    %479 = math.tanh %478 : vector<8x32xf32>
    %480 = vector.extract_strided_slice %465 {offsets = [0, 96], sizes = [8, 32], strides = [1, 1]} : vector<8x128xf32> to vector<8x32xf32>
    %481 = arith.negf %480 : vector<8x32xf32>
    %482 = math.exp %481 : vector<8x32xf32>
    %cst_129 = arith.constant 1.000000e+00 : f32
    %483 = vector.broadcast %cst_129 : f32 to vector<8x32xf32>
    %484 = arith.addf %483, %482 : vector<8x32xf32>
    %485 = arith.divf %483, %484 : vector<8x32xf32>
    %486 = arith.mulf %477, %405 : vector<8x32xf32>
    %487 = arith.mulf %471, %479 : vector<8x32xf32>
    %488 = arith.addf %486, %487 : vector<8x32xf32>
    %489 = math.tanh %488 : vector<8x32xf32>
    %490 = arith.mulf %485, %489 : vector<8x32xf32>
    %cst_130 = arith.constant dense<0.000000e+00> : vector<8x1024xf32>
    %491 = tpu.matmul %490, %1, %cst_130 {dimension_numbers = #tpu.dot_dimension_numbers<[1], [0], [0], [1], [0, 0, 1, 1], [], []>} : vector<8x32xf32>, vector<32x1024xf32>, vector<8x1024xf32> -> vector<8x1024xf32>
    %492 = arith.addf %491, %5 : vector<8x1024xf32>
    %cst_131 = arith.constant dense<0xFF800000> : vector<8xf32>
    %493 = vector.multi_reduction <maximumf>, %492, %cst_131 [1] : vector<8x1024xf32> to vector<8xf32>
    %494 = vector.shape_cast %493 : vector<8xf32> to vector<8x1xf32>
    %495 = vector.broadcast %494 : vector<8x1xf32> to vector<8x1024xf32>
    %496 = arith.subf %492, %495 : vector<8x1024xf32>
    %497 = math.exp %496 : vector<8x1024xf32>
    %cst_132 = arith.constant dense<0.000000e+00> : vector<8xf32>
    %498 = vector.multi_reduction <add>, %497, %cst_132 [1] : vector<8x1024xf32> to vector<8xf32>
    %499 = vector.shape_cast %498 : vector<8xf32> to vector<8x1xf32>
    %500 = tpu.reciprocal %499 {approx = true} : vector<8x1xf32> -> vector<8x1xf32>
    %501 = vector.broadcast %500 : vector<8x1xf32> to vector<8x1024xf32>
    %502 = arith.mulf %497, %501 : vector<8x1024xf32>
    %cst_133 = arith.constant dense<0.000000e+00> : vector<8x32xf32>
    %503 = tpu.matmul %502, %3, %cst_133 {dimension_numbers = #tpu.dot_dimension_numbers<[1], [0], [0], [1], [0, 0, 1, 1], [], []>} : vector<8x1024xf32>, vector<1024x32xf32>, vector<8x32xf32> -> vector<8x32xf32>
    %504 = tpu.concatenate %490, %503 in 1 : vector<8x32xf32>, vector<8x32xf32> -> vector<8x64xf32>
    %cst_134 = arith.constant dense<0.000000e+00> : vector<8x128xf32>
    %505 = tpu.matmul %504, %10, %cst_134 {dimension_numbers = #tpu.dot_dimension_numbers<[1], [0], [0], [1], [0, 0, 1, 1], [], []>} : vector<8x64xf32>, vector<64x128xf32>, vector<8x128xf32> -> vector<8x128xf32>
    %506 = arith.addf %505, %11 : vector<8x128xf32>
    %507 = arith.index_cast %c5_i32 : i32 to index
    %c0_135 = arith.constant 0 : index
    %c0_136 = arith.constant 0 : index
    %508 = vector.load %arg12[%507, %c0_135, %c0_136] : memref<8x8x128xf32, #tpu.memory_space<vmem>>, vector<1x8x128xf32>
    %509 = vector.shape_cast %508 : vector<1x8x128xf32> to vector<8x128xf32>
    %510 = vector.shape_cast %506 : vector<8x128xf32> to vector<1x8x128xf32>
    tpu.vector_store %arg12[%507, %c0_135, %c0_136], %510 {strides = array<i32>} : memref<8x8x128xf32, #tpu.memory_space<vmem>>, vector<1x8x128xf32>,
    %511 = arith.index_cast %c5_i32 : i32 to index
    %c0_137 = arith.constant 0 : index
    %c0_138 = arith.constant 0 : index
    %512 = vector.load %arg13[%511, %c0_137, %c0_138] : memref<8x8x1024xf32, #tpu.memory_space<vmem>>, vector<1x8x1024xf32>
    %513 = vector.shape_cast %512 : vector<1x8x1024xf32> to vector<8x1024xf32>
    %514 = vector.shape_cast %502 : vector<8x1024xf32> to vector<1x8x1024xf32>
    tpu.vector_store %arg13[%511, %c0_137, %c0_138], %514 {strides = array<i32>} : memref<8x8x1024xf32, #tpu.memory_space<vmem>>, vector<1x8x1024xf32>,
    %c6_i32 = arith.constant 6 : i32
    %515 = arith.index_cast %c6_i32 : i32 to index
    %c0_139 = arith.constant 0 : index
    %c0_140 = arith.constant 0 : index
    %516 = vector.load %arg1[%515, %c0_139, %c0_140] : memref<8x8x32xf32, #tpu.memory_space<vmem>>, vector<1x8x32xf32>
    %517 = vector.shape_cast %516 : vector<1x8x32xf32> to vector<8x32xf32>
    %518 = tpu.concatenate %517, %503, %462 in 1 : vector<8x32xf32>, vector<8x32xf32>, vector<8x32xf32> -> vector<8x96xf32>
    %cst_141 = arith.constant dense<0.000000e+00> : vector<8x128xf32>
    %519 = tpu.matmul %518, %6, %cst_141 {dimension_numbers = #tpu.dot_dimension_numbers<[1], [0], [0], [1], [0, 0, 1, 1], [], []>} : vector<8x96xf32>, vector<96x128xf32>, vector<8x128xf32> -> vector<8x128xf32>
    %520 = arith.addf %519, %7 : vector<8x128xf32>
    %521 = vector.extract_strided_slice %520 {offsets = [0, 0], sizes = [8, 32], strides = [1, 1]} : vector<8x128xf32> to vector<8x32xf32>
    %522 = arith.negf %521 : vector<8x32xf32>
    %523 = math.exp %522 : vector<8x32xf32>
    %cst_142 = arith.constant 1.000000e+00 : f32
    %524 = vector.broadcast %cst_142 : f32 to vector<8x32xf32>
    %525 = arith.addf %524, %523 : vector<8x32xf32>
    %526 = arith.divf %524, %525 : vector<8x32xf32>
    %527 = vector.extract_strided_slice %520 {offsets = [0, 32], sizes = [8, 32], strides = [1, 1]} : vector<8x128xf32> to vector<8x32xf32>
    %528 = arith.negf %527 : vector<8x32xf32>
    %529 = math.exp %528 : vector<8x32xf32>
    %cst_143 = arith.constant 1.000000e+00 : f32
    %530 = vector.broadcast %cst_143 : f32 to vector<8x32xf32>
    %531 = arith.addf %530, %529 : vector<8x32xf32>
    %532 = arith.divf %530, %531 : vector<8x32xf32>
    %533 = vector.extract_strided_slice %520 {offsets = [0, 64], sizes = [8, 32], strides = [1, 1]} : vector<8x128xf32> to vector<8x32xf32>
    %534 = math.tanh %533 : vector<8x32xf32>
    %535 = vector.extract_strided_slice %520 {offsets = [0, 96], sizes = [8, 32], strides = [1, 1]} : vector<8x128xf32> to vector<8x32xf32>
    %536 = arith.negf %535 : vector<8x32xf32>
    %537 = math.exp %536 : vector<8x32xf32>
    %cst_144 = arith.constant 1.000000e+00 : f32
    %538 = vector.broadcast %cst_144 : f32 to vector<8x32xf32>
    %539 = arith.addf %538, %537 : vector<8x32xf32>
    %540 = arith.divf %538, %539 : vector<8x32xf32>
    %541 = arith.mulf %532, %460 : vector<8x32xf32>
    %542 = arith.mulf %526, %534 : vector<8x32xf32>
    %543 = arith.addf %541, %542 : vector<8x32xf32>
    %544 = math.tanh %543 : vector<8x32xf32>
    %545 = arith.mulf %540, %544 : vector<8x32xf32>
    %546 = tpu.concatenate %545, %490 in 1 : vector<8x32xf32>, vector<8x32xf32> -> vector<8x64xf32>
    %cst_145 = arith.constant dense<0.000000e+00> : vector<8x128xf32>
    %547 = tpu.matmul %546, %8, %cst_145 {dimension_numbers = #tpu.dot_dimension_numbers<[1], [0], [0], [1], [0, 0, 1, 1], [], []>} : vector<8x64xf32>, vector<64x128xf32>, vector<8x128xf32> -> vector<8x128xf32>
    %548 = arith.addf %547, %9 : vector<8x128xf32>
    %549 = vector.extract_strided_slice %548 {offsets = [0, 0], sizes = [8, 32], strides = [1, 1]} : vector<8x128xf32> to vector<8x32xf32>
    %550 = arith.negf %549 : vector<8x32xf32>
    %551 = math.exp %550 : vector<8x32xf32>
    %cst_146 = arith.constant 1.000000e+00 : f32
    %552 = vector.broadcast %cst_146 : f32 to vector<8x32xf32>
    %553 = arith.addf %552, %551 : vector<8x32xf32>
    %554 = arith.divf %552, %553 : vector<8x32xf32>
    %555 = vector.extract_strided_slice %548 {offsets = [0, 32], sizes = [8, 32], strides = [1, 1]} : vector<8x128xf32> to vector<8x32xf32>
    %556 = arith.negf %555 : vector<8x32xf32>
    %557 = math.exp %556 : vector<8x32xf32>
    %cst_147 = arith.constant 1.000000e+00 : f32
    %558 = vector.broadcast %cst_147 : f32 to vector<8x32xf32>
    %559 = arith.addf %558, %557 : vector<8x32xf32>
    %560 = arith.divf %558, %559 : vector<8x32xf32>
    %561 = vector.extract_strided_slice %548 {offsets = [0, 64], sizes = [8, 32], strides = [1, 1]} : vector<8x128xf32> to vector<8x32xf32>
    %562 = math.tanh %561 : vector<8x32xf32>
    %563 = vector.extract_strided_slice %548 {offsets = [0, 96], sizes = [8, 32], strides = [1, 1]} : vector<8x128xf32> to vector<8x32xf32>
    %564 = arith.negf %563 : vector<8x32xf32>
    %565 = math.exp %564 : vector<8x32xf32>
    %cst_148 = arith.constant 1.000000e+00 : f32
    %566 = vector.broadcast %cst_148 : f32 to vector<8x32xf32>
    %567 = arith.addf %566, %565 : vector<8x32xf32>
    %568 = arith.divf %566, %567 : vector<8x32xf32>
    %569 = arith.mulf %560, %488 : vector<8x32xf32>
    %570 = arith.mulf %554, %562 : vector<8x32xf32>
    %571 = arith.addf %569, %570 : vector<8x32xf32>
    %572 = math.tanh %571 : vector<8x32xf32>
    %573 = arith.mulf %568, %572 : vector<8x32xf32>
    %cst_149 = arith.constant dense<0.000000e+00> : vector<8x1024xf32>
    %574 = tpu.matmul %573, %1, %cst_149 {dimension_numbers = #tpu.dot_dimension_numbers<[1], [0], [0], [1], [0, 0, 1, 1], [], []>} : vector<8x32xf32>, vector<32x1024xf32>, vector<8x1024xf32> -> vector<8x1024xf32>
    %575 = arith.addf %574, %5 : vector<8x1024xf32>
    %cst_150 = arith.constant dense<0xFF800000> : vector<8xf32>
    %576 = vector.multi_reduction <maximumf>, %575, %cst_150 [1] : vector<8x1024xf32> to vector<8xf32>
    %577 = vector.shape_cast %576 : vector<8xf32> to vector<8x1xf32>
    %578 = vector.broadcast %577 : vector<8x1xf32> to vector<8x1024xf32>
    %579 = arith.subf %575, %578 : vector<8x1024xf32>
    %580 = math.exp %579 : vector<8x1024xf32>
    %cst_151 = arith.constant dense<0.000000e+00> : vector<8xf32>
    %581 = vector.multi_reduction <add>, %580, %cst_151 [1] : vector<8x1024xf32> to vector<8xf32>
    %582 = vector.shape_cast %581 : vector<8xf32> to vector<8x1xf32>
    %583 = tpu.reciprocal %582 {approx = true} : vector<8x1xf32> -> vector<8x1xf32>
    %584 = vector.broadcast %583 : vector<8x1xf32> to vector<8x1024xf32>
    %585 = arith.mulf %580, %584 : vector<8x1024xf32>
    %cst_152 = arith.constant dense<0.000000e+00> : vector<8x32xf32>
    %586 = tpu.matmul %585, %3, %cst_152 {dimension_numbers = #tpu.dot_dimension_numbers<[1], [0], [0], [1], [0, 0, 1, 1], [], []>} : vector<8x1024xf32>, vector<1024x32xf32>, vector<8x32xf32> -> vector<8x32xf32>
    %587 = tpu.concatenate %573, %586 in 1 : vector<8x32xf32>, vector<8x32xf32> -> vector<8x64xf32>
    %cst_153 = arith.constant dense<0.000000e+00> : vector<8x128xf32>
    %588 = tpu.matmul %587, %10, %cst_153 {dimension_numbers = #tpu.dot_dimension_numbers<[1], [0], [0], [1], [0, 0, 1, 1], [], []>} : vector<8x64xf32>, vector<64x128xf32>, vector<8x128xf32> -> vector<8x128xf32>
    %589 = arith.addf %588, %11 : vector<8x128xf32>
    %590 = arith.index_cast %c6_i32 : i32 to index
    %c0_154 = arith.constant 0 : index
    %c0_155 = arith.constant 0 : index
    %591 = vector.load %arg12[%590, %c0_154, %c0_155] : memref<8x8x128xf32, #tpu.memory_space<vmem>>, vector<1x8x128xf32>
    %592 = vector.shape_cast %591 : vector<1x8x128xf32> to vector<8x128xf32>
    %593 = vector.shape_cast %589 : vector<8x128xf32> to vector<1x8x128xf32>
    tpu.vector_store %arg12[%590, %c0_154, %c0_155], %593 {strides = array<i32>} : memref<8x8x128xf32, #tpu.memory_space<vmem>>, vector<1x8x128xf32>,
    %594 = arith.index_cast %c6_i32 : i32 to index
    %c0_156 = arith.constant 0 : index
    %c0_157 = arith.constant 0 : index
    %595 = vector.load %arg13[%594, %c0_156, %c0_157] : memref<8x8x1024xf32, #tpu.memory_space<vmem>>, vector<1x8x1024xf32>
    %596 = vector.shape_cast %595 : vector<1x8x1024xf32> to vector<8x1024xf32>
    %597 = vector.shape_cast %585 : vector<8x1024xf32> to vector<1x8x1024xf32>
    tpu.vector_store %arg13[%594, %c0_156, %c0_157], %597 {strides = array<i32>} : memref<8x8x1024xf32, #tpu.memory_space<vmem>>, vector<1x8x1024xf32>,
    %c7_i32 = arith.constant 7 : i32
    %598 = arith.index_cast %c7_i32 : i32 to index
    %c0_158 = arith.constant 0 : index
    %c0_159 = arith.constant 0 : index
    %599 = vector.load %arg1[%598, %c0_158, %c0_159] : memref<8x8x32xf32, #tpu.memory_space<vmem>>, vector<1x8x32xf32>
    %600 = vector.shape_cast %599 : vector<1x8x32xf32> to vector<8x32xf32>
    %601 = tpu.concatenate %600, %586, %545 in 1 : vector<8x32xf32>, vector<8x32xf32>, vector<8x32xf32> -> vector<8x96xf32>
    %cst_160 = arith.constant dense<0.000000e+00> : vector<8x128xf32>
    %602 = tpu.matmul %601, %6, %cst_160 {dimension_numbers = #tpu.dot_dimension_numbers<[1], [0], [0], [1], [0, 0, 1, 1], [], []>} : vector<8x96xf32>, vector<96x128xf32>, vector<8x128xf32> -> vector<8x128xf32>
    %603 = arith.addf %602, %7 : vector<8x128xf32>
    %604 = vector.extract_strided_slice %603 {offsets = [0, 0], sizes = [8, 32], strides = [1, 1]} : vector<8x128xf32> to vector<8x32xf32>
    %605 = arith.negf %604 : vector<8x32xf32>
    %606 = math.exp %605 : vector<8x32xf32>
    %cst_161 = arith.constant 1.000000e+00 : f32
    %607 = vector.broadcast %cst_161 : f32 to vector<8x32xf32>
    %608 = arith.addf %607, %606 : vector<8x32xf32>
    %609 = arith.divf %607, %608 : vector<8x32xf32>
    %610 = vector.extract_strided_slice %603 {offsets = [0, 32], sizes = [8, 32], strides = [1, 1]} : vector<8x128xf32> to vector<8x32xf32>
    %611 = arith.negf %610 : vector<8x32xf32>
    %612 = math.exp %611 : vector<8x32xf32>
    %cst_162 = arith.constant 1.000000e+00 : f32
    %613 = vector.broadcast %cst_162 : f32 to vector<8x32xf32>
    %614 = arith.addf %613, %612 : vector<8x32xf32>
    %615 = arith.divf %613, %614 : vector<8x32xf32>
    %616 = vector.extract_strided_slice %603 {offsets = [0, 64], sizes = [8, 32], strides = [1, 1]} : vector<8x128xf32> to vector<8x32xf32>
    %617 = math.tanh %616 : vector<8x32xf32>
    %618 = vector.extract_strided_slice %603 {offsets = [0, 96], sizes = [8, 32], strides = [1, 1]} : vector<8x128xf32> to vector<8x32xf32>
    %619 = arith.negf %618 : vector<8x32xf32>
    %620 = math.exp %619 : vector<8x32xf32>
    %cst_163 = arith.constant 1.000000e+00 : f32
    %621 = vector.broadcast %cst_163 : f32 to vector<8x32xf32>
    %622 = arith.addf %621, %620 : vector<8x32xf32>
    %623 = arith.divf %621, %622 : vector<8x32xf32>
    %624 = arith.mulf %615, %543 : vector<8x32xf32>
    %625 = arith.mulf %609, %617 : vector<8x32xf32>
    %626 = arith.addf %624, %625 : vector<8x32xf32>
    %627 = math.tanh %626 : vector<8x32xf32>
    %628 = arith.mulf %623, %627 : vector<8x32xf32>
    %629 = tpu.concatenate %628, %573 in 1 : vector<8x32xf32>, vector<8x32xf32> -> vector<8x64xf32>
    %cst_164 = arith.constant dense<0.000000e+00> : vector<8x128xf32>
    %630 = tpu.matmul %629, %8, %cst_164 {dimension_numbers = #tpu.dot_dimension_numbers<[1], [0], [0], [1], [0, 0, 1, 1], [], []>} : vector<8x64xf32>, vector<64x128xf32>, vector<8x128xf32> -> vector<8x128xf32>
    %631 = arith.addf %630, %9 : vector<8x128xf32>
    %632 = vector.extract_strided_slice %631 {offsets = [0, 0], sizes = [8, 32], strides = [1, 1]} : vector<8x128xf32> to vector<8x32xf32>
    %633 = arith.negf %632 : vector<8x32xf32>
    %634 = math.exp %633 : vector<8x32xf32>
    %cst_165 = arith.constant 1.000000e+00 : f32
    %635 = vector.broadcast %cst_165 : f32 to vector<8x32xf32>
    %636 = arith.addf %635, %634 : vector<8x32xf32>
    %637 = arith.divf %635, %636 : vector<8x32xf32>
    %638 = vector.extract_strided_slice %631 {offsets = [0, 32], sizes = [8, 32], strides = [1, 1]} : vector<8x128xf32> to vector<8x32xf32>
    %639 = arith.negf %638 : vector<8x32xf32>
    %640 = math.exp %639 : vector<8x32xf32>
    %cst_166 = arith.constant 1.000000e+00 : f32
    %641 = vector.broadcast %cst_166 : f32 to vector<8x32xf32>
    %642 = arith.addf %641, %640 : vector<8x32xf32>
    %643 = arith.divf %641, %642 : vector<8x32xf32>
    %644 = vector.extract_strided_slice %631 {offsets = [0, 64], sizes = [8, 32], strides = [1, 1]} : vector<8x128xf32> to vector<8x32xf32>
    %645 = math.tanh %644 : vector<8x32xf32>
    %646 = vector.extract_strided_slice %631 {offsets = [0, 96], sizes = [8, 32], strides = [1, 1]} : vector<8x128xf32> to vector<8x32xf32>
    %647 = arith.negf %646 : vector<8x32xf32>
    %648 = math.exp %647 : vector<8x32xf32>
    %cst_167 = arith.constant 1.000000e+00 : f32
    %649 = vector.broadcast %cst_167 : f32 to vector<8x32xf32>
    %650 = arith.addf %649, %648 : vector<8x32xf32>
    %651 = arith.divf %649, %650 : vector<8x32xf32>
    %652 = arith.mulf %643, %571 : vector<8x32xf32>
    %653 = arith.mulf %637, %645 : vector<8x32xf32>
    %654 = arith.addf %652, %653 : vector<8x32xf32>
    %655 = math.tanh %654 : vector<8x32xf32>
    %656 = arith.mulf %651, %655 : vector<8x32xf32>
    %cst_168 = arith.constant dense<0.000000e+00> : vector<8x1024xf32>
    %657 = tpu.matmul %656, %1, %cst_168 {dimension_numbers = #tpu.dot_dimension_numbers<[1], [0], [0], [1], [0, 0, 1, 1], [], []>} : vector<8x32xf32>, vector<32x1024xf32>, vector<8x1024xf32> -> vector<8x1024xf32>
    %658 = arith.addf %657, %5 : vector<8x1024xf32>
    %cst_169 = arith.constant dense<0xFF800000> : vector<8xf32>
    %659 = vector.multi_reduction <maximumf>, %658, %cst_169 [1] : vector<8x1024xf32> to vector<8xf32>
    %660 = vector.shape_cast %659 : vector<8xf32> to vector<8x1xf32>
    %661 = vector.broadcast %660 : vector<8x1xf32> to vector<8x1024xf32>
    %662 = arith.subf %658, %661 : vector<8x1024xf32>
    %663 = math.exp %662 : vector<8x1024xf32>
    %cst_170 = arith.constant dense<0.000000e+00> : vector<8xf32>
    %664 = vector.multi_reduction <add>, %663, %cst_170 [1] : vector<8x1024xf32> to vector<8xf32>
    %665 = vector.shape_cast %664 : vector<8xf32> to vector<8x1xf32>
    %666 = tpu.reciprocal %665 {approx = true} : vector<8x1xf32> -> vector<8x1xf32>
    %667 = vector.broadcast %666 : vector<8x1xf32> to vector<8x1024xf32>
    %668 = arith.mulf %663, %667 : vector<8x1024xf32>
    %cst_171 = arith.constant dense<0.000000e+00> : vector<8x32xf32>
    %669 = tpu.matmul %668, %3, %cst_171 {dimension_numbers = #tpu.dot_dimension_numbers<[1], [0], [0], [1], [0, 0, 1, 1], [], []>} : vector<8x1024xf32>, vector<1024x32xf32>, vector<8x32xf32> -> vector<8x32xf32>
    %670 = tpu.concatenate %656, %669 in 1 : vector<8x32xf32>, vector<8x32xf32> -> vector<8x64xf32>
    %cst_172 = arith.constant dense<0.000000e+00> : vector<8x128xf32>
    %671 = tpu.matmul %670, %10, %cst_172 {dimension_numbers = #tpu.dot_dimension_numbers<[1], [0], [0], [1], [0, 0, 1, 1], [], []>} : vector<8x64xf32>, vector<64x128xf32>, vector<8x128xf32> -> vector<8x128xf32>
    %672 = arith.addf %671, %11 : vector<8x128xf32>
    %673 = arith.index_cast %c7_i32 : i32 to index
    %c0_173 = arith.constant 0 : index
    %c0_174 = arith.constant 0 : index
    %674 = vector.load %arg12[%673, %c0_173, %c0_174] : memref<8x8x128xf32, #tpu.memory_space<vmem>>, vector<1x8x128xf32>
    %675 = vector.shape_cast %674 : vector<1x8x128xf32> to vector<8x128xf32>
    %676 = vector.shape_cast %672 : vector<8x128xf32> to vector<1x8x128xf32>
    tpu.vector_store %arg12[%673, %c0_173, %c0_174], %676 {strides = array<i32>} : memref<8x8x128xf32, #tpu.memory_space<vmem>>, vector<1x8x128xf32>,
    %677 = arith.index_cast %c7_i32 : i32 to index
    %c0_175 = arith.constant 0 : index
    %c0_176 = arith.constant 0 : index
    %678 = vector.load %arg13[%677, %c0_175, %c0_176] : memref<8x8x1024xf32, #tpu.memory_space<vmem>>, vector<1x8x1024xf32>
    %679 = vector.shape_cast %678 : vector<1x8x1024xf32> to vector<8x1024xf32>
    %680 = vector.shape_cast %668 : vector<8x1024xf32> to vector<1x8x1024xf32>
    tpu.vector_store %arg13[%677, %c0_175, %c0_176], %680 {strides = array<i32>} : memref<8x8x1024xf32, #tpu.memory_space<vmem>>, vector<1x8x1024xf32>,
    %c8_i32 = arith.constant 8 : i32
    return
  }
  func.func @transform_0(%arg0: i32) -> (i32, i32, i32) {
    %c0_i32 = arith.constant 0 : i32
    %c0_i32_0 = arith.constant 0 : i32
    %c0_i32_1 = arith.constant 0 : i32
    return %c0_i32, %arg0, %c0_i32_0 : i32, i32, i32
  }
  func.func @transform_1(%arg0: i32) -> (i32, i32, i32) {
    %c0_i32 = arith.constant 0 : i32
    %c0_i32_0 = arith.constant 0 : i32
    %c0_i32_1 = arith.constant 0 : i32
    return %arg0, %c0_i32, %c0_i32_0 : i32, i32, i32
  }
  func.func @transform_2(%arg0: i32) -> (i32, i32, i32) {
    %c0_i32 = arith.constant 0 : i32
    %c0_i32_0 = arith.constant 0 : i32
    %c0_i32_1 = arith.constant 0 : i32
    return %arg0, %c0_i32, %c0_i32_0 : i32, i32, i32
  }
  func.func @transform_3(%arg0: i32) -> (i32, i32, i32) {
    %c0_i32 = arith.constant 0 : i32
    %c0_i32_0 = arith.constant 0 : i32
    %c0_i32_1 = arith.constant 0 : i32
    return %arg0, %c0_i32, %c0_i32_0 : i32, i32, i32
  }
  func.func @transform_4(%arg0: i32) -> (i32, i32) {
    %c0_i32 = arith.constant 0 : i32
    %c0_i32_0 = arith.constant 0 : i32
    return %arg0, %c0_i32 : i32, i32
  }
  func.func @transform_5(%arg0: i32) -> (i32, i32) {
    %c0_i32 = arith.constant 0 : i32
    %c0_i32_0 = arith.constant 0 : i32
    %c0_i32_1 = arith.constant 0 : i32
    return %c0_i32, %c0_i32_0 : i32, i32
  }
  func.func @transform_6(%arg0: i32) -> (i32, i32) {
    %c0_i32 = arith.constant 0 : i32
    %c0_i32_0 = arith.constant 0 : i32
    %c0_i32_1 = arith.constant 0 : i32
    return %c0_i32, %c0_i32_0 : i32, i32
  }
  func.func @transform_7(%arg0: i32) -> (i32, i32) {
    %c0_i32 = arith.constant 0 : i32
    %c0_i32_0 = arith.constant 0 : i32
    %c0_i32_1 = arith.constant 0 : i32
    return %c0_i32, %c0_i32_0 : i32, i32
  }
  func.func @transform_8(%arg0: i32) -> (i32, i32) {
    %c0_i32 = arith.constant 0 : i32
    %c0_i32_0 = arith.constant 0 : i32
    %c0_i32_1 = arith.constant 0 : i32
    return %c0_i32, %c0_i32_0 : i32, i32
  }
  func.func @transform_9(%arg0: i32) -> (i32, i32) {
    %c0_i32 = arith.constant 0 : i32
    %c0_i32_0 = arith.constant 0 : i32
    %c0_i32_1 = arith.constant 0 : i32
    return %c0_i32, %c0_i32_0 : i32, i32
  }
  func.func @transform_10(%arg0: i32) -> (i32, i32) {
    %c0_i32 = arith.constant 0 : i32
    %c0_i32_0 = arith.constant 0 : i32
    %c0_i32_1 = arith.constant 0 : i32
    return %c0_i32, %c0_i32_0 : i32, i32
  }
  func.func @transform_11(%arg0: i32) -> (i32, i32, i32) {
    %c0_i32 = arith.constant 0 : i32
    %c0_i32_0 = arith.constant 0 : i32
    %c0_i32_1 = arith.constant 0 : i32
    return %c0_i32, %arg0, %c0_i32_0 : i32, i32, i32
  }
  func.func @transform_12(%arg0: i32) -> (i32, i32, i32) {
    %c0_i32 = arith.constant 0 : i32
    %c0_i32_0 = arith.constant 0 : i32
    %c0_i32_1 = arith.constant 0 : i32
    return %c0_i32, %arg0, %c0_i32_0 : i32, i32, i32
  }
}

</mosaic_0001>

<bundles_post_ra>
// kernel: tpu_custom_call.1
= control target key start
LH: loop header
LB: loop body
LE: loop exit
PB: predicated region body
PF: predicated region fallthrough
CT: control target
= control target key end

     0   :  { %18 = vsyncpa [#allocation3], 0  ;;  %s11581_s27 = smov 32   ;;  %v14133_v3 = vmov 0.0|0.0   ;;  %vm11583_vm0 = vmmov 0   ;;  %v14131_v7 = vmov 0.0   ;;  %s14118_s0 = inlined_call_operand.vmem [shape: f32[8,8,32], index: 0, kind: input, shape index: {}]   ;;  %s14119_s1 = inlined_call_operand.vmem [shape: f32[1,32,1024], index: 1, kind: input, shape index: {}]   ;;  %s14120_s2 = inlined_call_operand.vmem [shape: f32[1,1024,32], index: 2, kind: input, shape index: {}]   ;;  %s14121_s3 = inlined_call_operand.vmem [shape: f32[1,8,1024], index: 3, kind: input, shape index: {}]   ;;  %s14122_s4 = inlined_call_operand.vmem [shape: f32[8,32], index: 4, kind: input, shape index: {}]   ;;  %s14123_s5 = inlined_call_operand.vmem [shape: f32[96,128], index: 5, kind: input, shape index: {}]   ;;  %s14124_s6 = inlined_call_operand.vmem [shape: f32[8,128], index: 6, kind: input, shape index: {}]   ;;  %s14125_s7 = inlined_call_operand.vmem [shape: f32[64,128], index: 7, kind: input, shape index: {}]   ;;  %s14126_s8 = inlined_call_operand.vmem [shape: f32[8,128], index: 8, kind: input, shape index: {}]   ;;  %s14127_s9 = inlined_call_operand.vmem [shape: f32[64,128], index: 9, kind: input, shape index: {}]   ;;  %s14128_s10 = inlined_call_operand.vmem [shape: f32[8,128], index: 10, kind: input, shape index: {}]   ;;  %s14129_s11 = inlined_call_operand.hbm [shape: f32[8,8,128], index: 11, kind: output, shape index: {0}]   ;;  %s14130_s12 = inlined_call_operand.hbm [shape: f32[8,8,1024], index: 12, kind: output, shape index: {1}]  }
   0x1   :  { %v241_v0 = vld [vmem:[%s14122_s4] sm:$0xff]  ;;  %v211_v2 = vld [vmem:[%s14123_s5 + $0x8] sm:$0xff]  ;;  %9591 = vmatprep.subr.bf16.mxu0 %v14133_v3  ;;  %v212_v5 = vld [vmem:[%s14123_s5 + $0x10] sm:$0xff]  ;;  %9095 = vmatprep.mubr.msk.f32.mxu0 %vm11583_vm0, %v14131_v7 }
   0x2   :  { %v210_v1 = vld [vmem:[%s14123_s5] sm:$0xff]  ;;  %244 = vrot.lane.b32.xlu0 %v241_v0, %s11581_s27  ;;  %v213_v6 = vld [vmem:[%s14123_s5 + $0x18] sm:$0xff]  ;;  %9609 = vmatprep.subr.bf16.mxu1 %v14133_v3  ;;  %v215_v10 = vld [vmem:[%s14123_s5 + $0x28] sm:$0xff] }
   0x3   :  { %v11668_v4 = vpack.c.bf16 %v211_v2, %v210_v1  ;;  %v11680_v8 = vpack.c.bf16 %v213_v6, %v212_v5  ;;  %9114 = vmatprep.mubr.msk.f32.mxu1 %vm11583_vm0, %v14131_v7  ;;  %v214_v9 = vld [vmem:[%s14123_s5 + $0x20] sm:$0xff] }
   0x5   :  { %14358 = vst [vmem:[#allocation8_spill] sm:$0xff] %v11668_v4  ;;  %9593 = vmatpush3.bf16.msra.mxu0 %v11668_v4  ;;  %14359 = vst [vmem:[#allocation9_spill] sm:$0xff] %v11680_v8 }
   0x6   :  { %9594 = vmatprep.subr.bf16.mxu0 %v14133_v3 }
   0x7   :  { %19 = vsyncpa [#allocation5], 0  ;;  %v11692_v11 = vpack.c.bf16 %v215_v10, %v214_v9  ;;  %v216_v12 = vld [vmem:[%s14123_s5 + $0x30] sm:$0xff]  ;;  %v217_v13 = vld [vmem:[%s14123_s5 + $0x38] sm:$0xff]  ;;  %vm247_vm1 = vcmask 261120   ;;  %vm249_vm2 = vcmask 523264  }
   0x8   :  { %v11702_v14 = vpack.c.bf16 %v217_v13, %v216_v12  ;;  %v218_v15 = vld [vmem:[%s14123_s5 + $0x40] sm:$0xff]  ;;  %v219_v16 = vld [vmem:[%s14123_s5 + $0x48] sm:$0xff]  ;;  %v220_v18 = vld [vmem:[%s14123_s5 + $0x50] sm:$0xff]  ;;  %vm251_vm3 = vcmask 785408   ;;  %s11585_s14 = smov 64   ;;  %s11586_s17 = smov 96  }
   0x9   :  { %9596 = vmatpush3.bf16.msra.mxu0 %v11680_v8  ;;  %14360 = vst [vmem:[#allocation10_spill] sm:$0xff] %v11692_v11  ;;  %v11712_v17 = vpack.c.bf16 %v219_v16, %v218_v15  ;;  %v221_v19 = vld [vmem:[%s14123_s5 + $0x58] sm:$0xff]  ;;  %v242_v21 = vld [vmem:[%s14118_s0] sm:$0xff]  ;;  %v224_v40 = vld [vmem:[%s14125_s7 + $0x8] sm:$0xff] }
   0xa   :  { %9597 = vmatprep.subr.bf16.mxu0 %v14133_v3  ;;  %14361 = vst [vmem:[#allocation11_spill] sm:$0xff] %v11702_v14  ;;  %v11722_v20 = vpack.c.bf16 %v221_v19, %v220_v18  ;;  %v222_v25 = vld [vmem:[%s14124_s6] sm:$0xff]  ;;  %v225_v41 = vld [vmem:[%s14125_s7 + $0x10] sm:$0xff]  ;;  %v226_v43 = vld [vmem:[%s14125_s7 + $0x18] sm:$0xff] }
   0xb   :  { %14362 = vst [vmem:[#allocation12_spill] sm:$0xff] %v11712_v17  ;;  %v223_v39 = vld [vmem:[%s14125_s7] sm:$0xff]  ;;  %v11756_v44 = vpack.c.bf16 %v226_v43, %v225_v41  ;;  %v228_v46 = vld [vmem:[%s14125_s7 + $0x28] sm:$0xff]  ;;  %v229_v48 = vld [vmem:[%s14125_s7 + $0x30] sm:$0xff] }
   0xc   :  { %14363 = vst [vmem:[#allocation13_spill] sm:$0xff] %v11722_v20  ;;  %v11750_v42 = vpack.c.bf16 %v224_v40, %v223_v39  ;;  %v227_v45 = vld [vmem:[%s14125_s7 + $0x20] sm:$0xff]  ;;  %v230_v49 = vld [vmem:[%s14125_s7 + $0x38] sm:$0xff]  ;;  %v43_v10 = vld [vmem:[%s14119_s1 + $0x8] sm:$0xff] }
   0xd   :  { %9599 = vmatpush3.bf16.msra.mxu0 %v11692_v11  ;;  %14365 = vst [vmem:[#allocation15_spill] sm:$0xff] %v11756_v44  ;;  %v11766_v47 = vpack.c.bf16 %v228_v46, %v227_v45  ;;  %v11777_v51 = vpack.c.bf16 %v230_v49, %v229_v48  ;;  %v231_v56 = vld [vmem:[%s14126_s8] sm:$0xff]  ;;  %v51_v12 = vld [vmem:[%s14119_s1 + $0x48] sm:$0xff]  ;;  %v49_v18 = vld [vmem:[%s14119_s1 + $0x38] sm:$0xff] }
   0xe   :  { %9600 = vmatprep.subr.bf16.mxu0 %v14133_v3  ;;  %14364 = vst [vmem:[#allocation14_spill] sm:$0xff] %v11750_v42  ;;  %9611 = vmatpush3.bf16.msra.mxu1 %v11750_v42  ;;  %v42_v13 = vld [vmem:[%s14119_s1] sm:$0xff]  ;;  %v11805_v15 = vpack.c.bf16 %v51_v12, %v43_v10  ;;  %v57_v19 = vld [vmem:[%s14119_s1 + $0x78] sm:$0xff]  ;;  %v44_v48 = vld [vmem:[%s14119_s1 + $0x10] sm:$0xff] }
   0xf   :  { %9612 = vmatprep.subr.bf16.mxu1 %v14133_v3  ;;  %14366 = vst [vmem:[#allocation16_spill] sm:$0xff] %v11766_v47  ;;  %14367 = vst [vmem:[#allocation17_spill] sm:$0xff] %v11777_v51  ;;  %v50_v16 = vld [vmem:[%s14119_s1 + $0x40] sm:$0xff]  ;;  %v45_v40 = vld [vmem:[%s14119_s1 + $0x18] sm:$0xff] }
  0x10   :  { %14368 = vst [vmem:[#allocation18_spill] sm:$0xff] %v11805_v15  ;;  %v53_v41 = vld [vmem:[%s14119_s1 + $0x58] sm:$0xff]  ;;  %v52_v49 = vld [vmem:[%s14119_s1 + $0x50] sm:$0xff]  ;;  %v62_v10 = vld [vmem:[%s14119_s1 + $0xa0] sm:$0xff] }
  0x11   :  { %9602 = vmatpush3.bf16.msra.mxu0 %v11702_v14  ;;  %v11875_v43 = vpack.c.bf16 %v53_v41, %v45_v40  ;;  %v70_v12 = vld [vmem:[%s14119_s1 + $0xe0] sm:$0xff]  ;;  %v203_v40 = vld [vmem:[%s14121_s3 + $0x8] sm:$0xff] }
  0x12   :  { %9603 = vmatprep.subr.bf16.mxu0 %v14133_v3  ;;  %9614 = vmatpush3.bf16.msra.mxu1 %v11756_v44  ;;  %v207_v41 = vld [vmem:[%s14121_s3 + $0x28] sm:$0xff] }
  0x13   :  { %9615 = vmatprep.subr.bf16.mxu1 %v14133_v3  ;;  %14376 = vst [vmem:[#allocation26_spill] sm:$0xff] %v11875_v43 }
  0x15   :  { %9605 = vmatpush3.bf16.msra.mxu0 %v11712_v17 }
  0x16   :  { %9606 = vmatprep.subr.bf16.mxu0 %v14133_v3  ;;  %9617 = vmatpush3.bf16.msra.mxu1 %v11766_v47 }
  0x17   :  { %9618 = vmatprep.subr.bf16.mxu1 %v14133_v3  ;;  %v82_v3 = vld [vmem:[%s14120_s2 + $0x40] sm:$0xff] }
  0x19   :  { %9608 = vmatpush3.bf16.msra.mxu0 %v11722_v20 }
  0x1a   :  { %9620 = vmatpush3.bf16.msra.mxu1 %v11777_v51 }
  0x1b   :  { %9622 = vmatprep.subr.bf16.mxu1 %v11805_v15 }
  0x74   :  { %v245_v22 = vpop.permute.xlu0 %244 }
  0x75   :  { %v248_v23 = vsel %vm247_vm1, %v242_v21, %v245_v22  ;;  %v11816_v21 = vpack.c.bf16 %v50_v16, %v42_v13  ;;  %v11818_v22 = vpack.c.bf16 %v57_v19, %v49_v18  ;;  %v11950_v13 = vpack.c.bf16 %v70_v12, %v62_v10 }
  0x76   :  { %v250_v24 = vsel %vm249_vm2, %v248_v23, 0.0  ;;  %v48_v23 = vld [vmem:[%s14119_s1 + $0x30] sm:$0xff] }
  0x77   :  { %9096 = vmatmul.mubr.msk.f32.vlgmr.msra.gmra.mrb[0].mxu0 %vm251_vm3, %v250_v24  ;;  %14369 = vst [vmem:[#allocation19_spill] sm:$0xff] %v11816_v21  ;;  %14370 = vst [vmem:[#allocation20_spill] sm:$0xff] %v11818_v22  ;;  %v56_v24 = vld [vmem:[%s14119_s1 + $0x70] sm:$0xff]  ;;  %9646 = vmatprep.subr.bf16.mxu0 %v11818_v22 }
  0x78   :  { %733 = vmatprep.mubr.f32.mxu0 %v14131_v7  ;;  %14383 = vst [vmem:[#allocation33_spill] sm:$0xff] %v11950_v13 }
 0x14a   :  { %v321_v26 = vpop.f32.mrb[0].mxu0 }
 0x14b   :  { %v322_v27 = vadd.f32 %v321_v26, %v222_v25  ;;  %v9097_v28 = vpop.f32.mrb[1].mxu0  ;;  %v59_v25 = vld [vmem:[%s14119_s1 + $0x88] sm:$0xff]  ;;  %v11830_v26 = vpack.c.bf16 %v56_v24, %v48_v23 }
 0x14c   :  { %v58_v28 = vld [vmem:[%s14119_s1 + $0x80] sm:$0xff] }
 0x14d   :  { %11218 = vtanh.f32 %v322_v27  ;;  %v7625_v30 = vmul.f32 -1.442695, %v322_v27  ;;  %14371 = vst [vmem:[#allocation21_spill] sm:$0xff] %v11830_v26  ;;  %v67_v27 = vld [vmem:[%s14119_s1 + $0xc8] sm:$0xff]  ;;  %9648 = vmatpush1.bf16.msra.mxu0 %v11830_v26 }
 0x14f   :  { %11220 = vpow2.f32 %v7625_v30  ;;  %v11843_v30 = vpack.c.bf16 %v67_v27, %v59_v25  ;;  %v204_v27 = vld [vmem:[%s14121_s3 + $0x10] sm:$0xff] }
 0x151   :  { %14372 = vst [vmem:[#allocation22_spill] sm:$0xff] %v11843_v30 }
 0x157   :  { %v11219_v29 = vpop.eup %11218 }
 0x158   :  { %334 = vrot.lane.b32.xlu0 %v11219_v29, %s11585_s14  ;;  %v66_v29 = vld [vmem:[%s14119_s1 + $0xc0] sm:$0xff] }
 0x159   :  { %v11221_v31 = vpop.eup %11220 }
 0x15a   :  { %v328_v32 = vadd.f32 1.0, %v11221_v31  ;;  %v11845_v31 = vpack.c.bf16 %v66_v29, %v58_v28  ;;  %v205_v28 = vld [vmem:[%s14121_s3 + $0x18] sm:$0xff]  ;;  %v208_v29 = vld [vmem:[%s14121_s3 + $0x30] sm:$0xff] }
 0x15c   :  { %11222 = vrcp.f32 %v328_v32  ;;  %14373 = vst [vmem:[#allocation23_spill] sm:$0xff] %v11845_v31  ;;  %v65_v32 = vld [vmem:[%s14119_s1 + $0xb8] sm:$0xff] }
 0x166   :  { %v11223_v33 = vpop.eup %11222 }
 0x167   :  { %v332_v36 = vmul.f32 0.0, %v11223_v33 }
 0x1ca   :  { %v335_v34 = vpop.permute.xlu0 %334 }
 0x1cb   :  { %v337_v35 = vmul.f32 %v11223_v33, %v335_v34  ;;  %v64_v34 = vld [vmem:[%s14119_s1 + $0xb0] sm:$0xff] }
 0x1cd   :  { %339 = vrot.lane.b32.xlu1 %v337_v35, %s11581_s27 }
 0x23f   :  { %v340_v37 = vpop.permute.xlu1 %339 }
 0x240   :  { %v11738_v38 = vadd.f32 %v340_v37, %v332_v36  ;;  %v72_v36 = vld [vmem:[%s14119_s1 + $0xf0] sm:$0xff] }
 0x241   :  { %v11863_v37 = vpack.c.bf16 %v72_v36, %v64_v34 }
 0x242   :  { %11224 = vtanh.f32 %v11738_v38 }
 0x243   :  { %14375 = vst [vmem:[#allocation25_spill] sm:$0xff] %v11863_v37 }
 0x24c   :  { %v11225_v50 = vpop.eup %11224 }
 0x24d   :  { %345 = vrot.lane.b32.xlu1 %v11225_v50, %s11585_s14  ;;  %v61_v50 = vld [vmem:[%s14119_s1 + $0x98] sm:$0xff] }
 0x2bf   :  { %v346_v52 = vpop.permute.xlu1 %345 }
 0x2c0   :  { %v11781_v53 = vmul.f32 %v11223_v33, %v346_v52  ;;  %v73_v33 = vld [vmem:[%s14119_s1 + $0xf8] sm:$0xff] }
 0x2c1   :  { %v11857_v35 = vpack.c.bf16 %v73_v33, %v65_v32  ;;  %v69_v52 = vld [vmem:[%s14119_s1 + $0xd8] sm:$0xff]  ;;  %v202_v33 = vld [vmem:[%s14121_s3] sm:$0xff] }
 0x2c2   :  { %350 = vrot.lane.b32.xlu0 %v11781_v53, %s11581_s27  ;;  %v209_v32 = vld [vmem:[%s14121_s3 + $0x38] sm:$0xff] }
 0x2c3   :  { %14374 = vst [vmem:[#allocation24_spill] sm:$0xff] %v11857_v35  ;;  %9650 = vmatprep.subr.bf16.mxu0 %v11857_v35 }
 0x2c4   :  { %9652 = vmatpush1.bf16.msra.mxu0 %v11863_v37 }
 0x334   :  { %v351_v54 = vpop.permute.xlu0 %350 }
 0x335   :  { %v353_v55 = vsel %vm247_vm1, %v351_v54, 0.0  ;;  %v11894_v54 = vpack.c.bf16 %v52_v49, %v44_v48 }
 0x336   :  { %9115 = vmatmul.mubr.msk.f32.vlgmr.msra.gmra.mrb[0].mxu1 %vm249_vm2, %v353_v55  ;;  %v11896_v55 = vpack.c.bf16 %v69_v52, %v61_v50 }
 0x337   :  { %520 = vmatprep.mubr.f32.mxu1 %v14131_v7  ;;  %9624 = vmatpush1.bf16.msra.mxu1 %v11816_v21  ;;  %14377 = vst [vmem:[#allocation27_spill] sm:$0xff] %v11894_v54 }
 0x338   :  { %9626 = vmatprep.subr.bf16.mxu1 %v11843_v30  ;;  %14378 = vst [vmem:[#allocation28_spill] sm:$0xff] %v11896_v55 }
 0x33b   :  { %9628 = vmatpush1.bf16.msra.mxu1 %v11845_v31 }
 0x33c   :  { %9630 = vmatprep.subr.bf16.mxu1 %v11875_v43 }
 0x409   :  { %v423_v57 = vpop.f32.mrb[0].mxu1 }
 0x40a   :  { %v424_v58 = vadd.f32 %v423_v57, %v231_v56  ;;  %v9116_v59 = vpop.f32.mrb[1].mxu1  ;;  %v60_v56 = vld [vmem:[%s14119_s1 + $0x90] sm:$0xff] }
 0x40b   :  { %v68_v57 = vld [vmem:[%s14119_s1 + $0xd0] sm:$0xff]  ;;  %v47_v59 = vld [vmem:[%s14119_s1 + $0x28] sm:$0xff] }
 0x40c   :  { %11226 = vtanh.f32 %v424_v58  ;;  %v7627_v61 = vmul.f32 -1.442695, %v424_v58 }
 0x40e   :  { %11228 = vpow2.f32 %v7627_v61  ;;  %v11917_v61 = vpack.c.bf16 %v68_v57, %v60_v56 }
 0x410   :  { %14379 = vst [vmem:[#allocation29_spill] sm:$0xff] %v11917_v61 }
 0x416   :  { %v11227_v60 = vpop.eup %11226 }
 0x417   :  { %436 = vrot.lane.b32.xlu1 %v11227_v60, %s11585_s14  ;;  %v55_v60 = vld [vmem:[%s14119_s1 + $0x68] sm:$0xff] }
 0x418   :  { %v11229_v62 = vpop.eup %11228 }
 0x419   :  { %v430_v63 = vadd.f32 1.0, %v11229_v62  ;;  %v11921_v62 = vpack.c.bf16 %v55_v60, %v47_v59 }
 0x41b   :  { %11230 = vrcp.f32 %v430_v63  ;;  %14380 = vst [vmem:[#allocation30_spill] sm:$0xff] %v11921_v62  ;;  %v46_v63 = vld [vmem:[%s14119_s1 + $0x20] sm:$0xff] }
 0x425   :  { %v11231_v0 = vpop.eup %11230 }
 0x426   :  { %v434_v5 = vmul.f32 0.0, %v11231_v0 }
 0x489   :  { %v437_v1 = vpop.permute.xlu1 %436 }
 0x48a   :  { %v439_v2 = vmul.f32 %v11231_v0, %v437_v1  ;;  %v63_v1 = vld [vmem:[%s14119_s1 + $0xa8] sm:$0xff] }
 0x48c   :  { %441 = vrot.lane.b32.xlu0 %v439_v2, %s11581_s27  ;;  %v71_v2 = vld [vmem:[%s14119_s1 + $0xe8] sm:$0xff] }
 0x4fe   :  { %v442_v6 = vpop.permute.xlu0 %441 }
 0x4ff   :  { %v11793_v9 = vadd.f32 %v442_v6, %v434_v5  ;;  %v11939_v6 = vpack.c.bf16 %v71_v2, %v63_v1 }
 0x501   :  { %11232 = vtanh.f32 %v11793_v9  ;;  %14382 = vst [vmem:[#allocation32_spill] sm:$0xff] %v11939_v6 }
 0x50b   :  { %v11233_v39 = vpop.eup %11232 }
 0x50c   :  { %447 = vrot.lane.b32.xlu1 %v11233_v39, %s11585_s14  ;;  %v206_v39 = vld [vmem:[%s14121_s3 + $0x20] sm:$0xff] }
 0x57e   :  { %v448_v45 = vpop.permute.xlu1 %447 }
 0x57f   :  { %v11878_v46 = vmul.f32 %v11231_v0, %v448_v45  ;;  %v54_v0 = vld [vmem:[%s14119_s1 + $0x60] sm:$0xff] }
 0x580   :  { %v11936_v5 = vpack.c.bf16 %v54_v0, %v46_v63 }
 0x581   :  { %452 = vrot.lane.b32.xlu0 %v11878_v46, %s11581_s27 }
 0x582   :  { %14381 = vst [vmem:[#allocation31_spill] sm:$0xff] %v11936_v5 }
 0x5f3   :  { %v11904_v58 = vpop.permute.xlu0 %452 }
 0x5f4   :  { %7628 = vmatmul.mubr.msk.f32.vlgmr.msra.gmra.mrb[2].mxu1 %vm247_vm1, %v11904_v58  ;;  %7631 = vmatmul.mubr.msk.f32.vlgmr.msra.gmra.mrb[2].mxu0 %vm247_vm1, %v11904_v58 }
 0x5f5   :  { %9632 = vmatpush1.bf16.msra.mxu1 %v11894_v54  ;;  %591 = vmatprep.mubr.f32.mxu1 %v14131_v7 }
 0x5f6   :  { %9634 = vmatprep.subr.bf16.mxu1 %v11896_v55 }
 0x5f9   :  { %9636 = vmatpush1.bf16.msra.mxu1 %v11917_v61 }
 0x5fa   :  { %9638 = vmatprep.subr.bf16.mxu1 %v11921_v62 }
 0x5fc   :  { %7629 = vmatmul.mubr.msk.f32.vlgmr.msra.gmra.mrb[4].mxu1 %vm247_vm1, %v11904_v58 }
 0x5fd   :  { %9640 = vmatpush1.bf16.msra.mxu1 %v11936_v5  ;;  %662 = vmatprep.mubr.f32.mxu1 %v14131_v7 }
 0x5fe   :  { %9642 = vmatprep.subr.bf16.mxu1 %v11939_v6 }
 0x601   :  { %9644 = vmatpush1.bf16.msra.mxu1 %v11950_v13 }
 0x604   :  { %7630 = vmatmul.mubr.msk.f32.vlgmr.msra.gmra.mrb[6].mxu1 %vm247_vm1, %v11904_v58 }
 0x6c7   :  { %v522_v16 = vpop.f32.mrb[2].mxu1  ;;  %v735_v18 = vpop.f32.mrb[2].mxu0 }
 0x6c8   :  { %v524_v19 = vpop.f32.mrb[3].mxu1  ;;  %v737_v23 = vpop.f32.mrb[3].mxu0  ;;  %v11985_v45 = vadd.f32 %v735_v18, %v208_v29  ;;  %v11989_v50 = vadd.f32 %v522_v16, %v202_v33  ;;  %v90_v16 = vld [vmem:[%s14120_s2 + $0x80] sm:$0xff]  ;;  %v91_v18 = vld [vmem:[%s14120_s2 + $0x88] sm:$0xff]  ;;  %v92_v33 = vld [vmem:[%s14120_s2 + $0x90] sm:$0xff] }
 0x6c9   :  { %v11987_v48 = vadd.f32 %v737_v23, %v209_v32  ;;  %v11993_v57 = vadd.f32 %v524_v19, %v203_v40  ;;  %v122_v19 = vld [vmem:[%s14120_s2 + $0x180] sm:$0xff]  ;;  %v12016_v23 = vpack.c.bf16 %v91_v18, %v90_v16  ;;  %v107_v32 = vld [vmem:[%s14120_s2 + $0x108] sm:$0xff]  ;;  %v93_v40 = vld [vmem:[%s14120_s2 + $0x98] sm:$0xff] }
 0x6ca   :  { %v106_v29 = vld [vmem:[%s14120_s2 + $0x100] sm:$0xff]  ;;  %v95_v16 = vld [vmem:[%s14120_s2 + $0xa8] sm:$0xff] }
 0x6cb   :  { %14384 = vst [vmem:[#allocation34_spill] sm:$0xff] %v12016_v23  ;;  %9654 = vmatprep.subr.bf16.mxu1 %v12016_v23 }
 0x6cf   :  { %v593_v24 = vpop.f32.mrb[4].mxu1 }
 0x6d0   :  { %v595_v25 = vpop.f32.mrb[5].mxu1  ;;  %v11972_v34 = vadd.f32 %v593_v24, %v204_v27  ;;  %v123_v24 = vld [vmem:[%s14120_s2 + $0x188] sm:$0xff] }
 0x6d1   :  { %v11974_v36 = vadd.f32 %v595_v25, %v205_v28  ;;  %v75_v25 = vld [vmem:[%s14120_s2 + $0x8] sm:$0xff]  ;;  %v12027_v27 = vpack.c.bf16 %v123_v24, %v122_v19  ;;  %v126_v24 = vld [vmem:[%s14120_s2 + $0x1a0] sm:$0xff] }
 0x6d2   :  { %v742_v59 = vmax.f32 %v11972_v34, %v11985_v45 }
 0x6d3   :  { %v743_v60 = vmax.f32 %v11974_v36, %v11987_v48  ;;  %14385 = vst [vmem:[#allocation35_spill] sm:$0xff] %v12027_v27  ;;  %9686 = vmatprep.subr.bf16.mxu0 %v12027_v27 }
 0x6d5   :  { %v745_v10 = vmax.f32 %v742_v59, %v743_v60  ;;  %v76_v60 = vld [vmem:[%s14120_s2 + $0x10] sm:$0xff] }
 0x6d7   :  { %v664_v49 = vpop.f32.mrb[6].mxu1 }
 0x6d8   :  { %v11991_v52 = vadd.f32 %v664_v49, %v206_v39  ;;  %v666_v56 = vpop.f32.mrb[7].mxu1  ;;  %v12041_v39 = vpack.c.bf16 %v107_v32, %v106_v29  ;;  %v125_v49 = vld [vmem:[%s14120_s2 + $0x198] sm:$0xff]  ;;  %v79_v32 = vld [vmem:[%s14120_s2 + $0x28] sm:$0xff] }
 0x6d9   :  { %v11999_v63 = vadd.f32 %v666_v56, %v207_v41  ;;  %v124_v41 = vld [vmem:[%s14120_s2 + $0x190] sm:$0xff]  ;;  %v12054_v56 = vpack.c.bf16 %v93_v40, %v92_v33  ;;  %v110_v33 = vld [vmem:[%s14120_s2 + $0x120] sm:$0xff]  ;;  %v111_v40 = vld [vmem:[%s14120_s2 + $0x128] sm:$0xff] }
 0x6da   :  { %v740_v0 = vmax.f32 %v11989_v50, %v11991_v52  ;;  %14387 = vst [vmem:[#allocation37_spill] sm:$0xff] %v12041_v39  ;;  %v12056_v59 = vpack.c.bf16 %v125_v49, %v124_v41  ;;  %9688 = vmatpush3.bf16.msra.mxu0 %v12041_v39  ;;  %v96_v49 = vld [vmem:[%s14120_s2 + $0xb0] sm:$0xff] }
 0x6db   :  { %v741_v1 = vmax.f32 %v11993_v57, %v11999_v63  ;;  %14388 = vst [vmem:[#allocation38_spill] sm:$0xff] %v12054_v56 }
 0x6dc   :  { %14389 = vst [vmem:[#allocation39_spill] sm:$0xff] %v12056_v59  ;;  %9690 = vmatprep.subr.bf16.mxu0 %v12056_v59 }
 0x6dd   :  { %v744_v2 = vmax.f32 %v740_v0, %v741_v1  ;;  %v77_v0 = vld [vmem:[%s14120_s2 + $0x18] sm:$0xff]  ;;  %v108_v1 = vld [vmem:[%s14120_s2 + $0x110] sm:$0xff] }
 0x6df   :  { %v746_v12 = vmax.f32 %v744_v2, %v745_v10  ;;  %v12068_v2 = vpack.c.bf16 %v77_v0, %v76_v60  ;;  %v109_v10 = vld [vmem:[%s14120_s2 + $0x118] sm:$0xff]  ;;  %v128_v0 = vld [vmem:[%s14120_s2 + $0x1b0] sm:$0xff] }
 0x6e0   :  { %v12081_v18 = vpack.c.bf16 %v109_v10, %v108_v1  ;;  %v97_v60 = vld [vmem:[%s14120_s2 + $0xb8] sm:$0xff]  ;;  %v12119_v1 = vpack.c.bf16 %v111_v40, %v110_v33  ;;  %v98_v33 = vld [vmem:[%s14120_s2 + $0xc0] sm:$0xff]  ;;  %v99_v40 = vld [vmem:[%s14120_s2 + $0xc8] sm:$0xff] }
 0x6e1   :  { %747 = vmax.xlane.f32.xlu1 %v746_v12  ;;  %14390 = vst [vmem:[#allocation40_spill] sm:$0xff] %v12068_v2  ;;  %v94_v12 = vld [vmem:[%s14120_s2 + $0xa0] sm:$0xff]  ;;  %v12121_v10 = vpack.c.bf16 %v97_v60, %v96_v49  ;;  %v131_v60 = vld [vmem:[%s14120_s2 + $0x1c8] sm:$0xff]  ;;  %v12160_v7 = vpack.c.bf16 %v99_v40, %v98_v33 }
 0x6e2   :  { %14391 = vst [vmem:[#allocation41_spill] sm:$0xff] %v12081_v18  ;;  %v12083_v19 = vpack.c.bf16 %v95_v16, %v94_v12  ;;  %9692 = vmatpush3.bf16.msra.mxu0 %v12081_v18  ;;  %14395 = vst [vmem:[#allocation45_spill] sm:$0xff] %v12119_v1  ;;  %v129_v12 = vld [vmem:[%s14120_s2 + $0x1b8] sm:$0xff]  ;;  %v80_v16 = vld [vmem:[%s14120_s2 + $0x30] sm:$0xff] }
 0x6e3   :  { %14396 = vst [vmem:[#allocation46_spill] sm:$0xff] %v12121_v10  ;;  %v130_v49 = vld [vmem:[%s14120_s2 + $0x1c0] sm:$0xff]  ;;  %14400 = vst [vmem:[#allocation50_spill] sm:$0xff] %v12160_v7 }
 0x6e4   :  { %14392 = vst [vmem:[#allocation42_spill] sm:$0xff] %v12083_v19 }
 0x6f2   :  { %1161 = vrot.lane.b32.xlu1 %v11781_v53, %s11586_s17  ;;  %v74_v53 = vld [vmem:[%s14120_s2] sm:$0xff] }
 0x6f3   :  { %v12029_v28 = vpack.c.bf16 %v75_v25, %v74_v53  ;;  %v127_v53 = vld [vmem:[%s14120_s2 + $0x1a8] sm:$0xff]  ;;  %v78_v25 = vld [vmem:[%s14120_s2 + $0x20] sm:$0xff] }
 0x6f4   :  { %v12094_v29 = vpack.c.bf16 %v127_v53, %v126_v24  ;;  %v12106_v41 = vpack.c.bf16 %v79_v32, %v78_v25  ;;  %v81_v24 = vld [vmem:[%s14120_s2 + $0x38] sm:$0xff]  ;;  %v12133_v53 = vpack.c.bf16 %v129_v12, %v128_v0  ;;  %v112_v25 = vld [vmem:[%s14120_s2 + $0x130] sm:$0xff] }
 0x6f5   :  { %14386 = vst [vmem:[#allocation36_spill] sm:$0xff] %v12029_v28  ;;  %9656 = vmatpush3.bf16.msra.mxu1 %v12029_v28  ;;  %v113_v32 = vld [vmem:[%s14120_s2 + $0x138] sm:$0xff]  ;;  %v12154_v0 = vpack.c.bf16 %v81_v24, %v80_v16  ;;  %v12169_v16 = vpack.c.bf16 %v131_v60, %v130_v49  ;;  %v114_v24 = vld [vmem:[%s14120_s2 + $0x140] sm:$0xff] }
 0x6f6   :  { %9658 = vmatprep.subr.bf16.mxu1 %v12054_v56  ;;  %14393 = vst [vmem:[#allocation43_spill] sm:$0xff] %v12094_v29  ;;  %14394 = vst [vmem:[#allocation44_spill] sm:$0xff] %v12106_v41  ;;  %9694 = vmatprep.subr.bf16.mxu0 %v12094_v29  ;;  %v12158_v12 = vpack.c.bf16 %v113_v32, %v112_v25  ;;  %v83_v29 = vld [vmem:[%s14120_s2 + $0x48] sm:$0xff] }
 0x6f7   :  { %14397 = vst [vmem:[#allocation47_spill] sm:$0xff] %v12133_v53  ;;  %14398 = vst [vmem:[#allocation48_spill] sm:$0xff] %v12154_v0  ;;  %9696 = vmatpush3.bf16.msra.mxu0 %v12119_v1  ;;  %v115_v25 = vld [vmem:[%s14120_s2 + $0x148] sm:$0xff]  ;;  %v12178_v32 = vpack.c.bf16 %v83_v29, %v82_v3 }
 0x6f8   :  { %14399 = vst [vmem:[#allocation49_spill] sm:$0xff] %v12158_v12  ;;  %9698 = vmatprep.subr.bf16.mxu0 %v12133_v53  ;;  %14401 = vst [vmem:[#allocation51_spill] sm:$0xff] %v12169_v16  ;;  %v12182_v33 = vpack.c.bf16 %v115_v25, %v114_v24 }
 0x6f9   :  { %9660 = vmatpush3.bf16.msra.mxu1 %v12068_v2  ;;  %14402 = vst [vmem:[#allocation52_spill] sm:$0xff] %v12178_v32 }
 0x6fa   :  { %9662 = vmatprep.subr.bf16.mxu1 %v12083_v19  ;;  %14403 = vst [vmem:[#allocation53_spill] sm:$0xff] %v12182_v33 }
 0x6fb   :  { %9700 = vmatpush3.bf16.msra.mxu0 %v12158_v12 }
 0x6fc   :  { %9702 = vmatprep.subr.bf16.mxu0 %v12169_v16 }
 0x6fd   :  { %9664 = vmatpush3.bf16.msra.mxu1 %v12106_v41  ;;  %v159_v41 = vld [vmem:[%s14120_s2 + $0x2a8] sm:$0xff] }
 0x6fe   :  { %9666 = vmatprep.subr.bf16.mxu1 %v12121_v10 }
 0x6ff   :  { %9704 = vmatpush3.bf16.msra.mxu0 %v12182_v33 }
 0x701   :  { %9668 = vmatpush3.bf16.msra.mxu1 %v12154_v0 }
 0x702   :  { %9670 = vmatprep.subr.bf16.mxu1 %v12160_v7 }
 0x705   :  { %9672 = vmatpush3.bf16.msra.mxu1 %v12178_v32 }
 0x76e   :  { %v748_v40 = vpop.xlane.xlu1 %747 }
 0x76f   :  { %v749_v49 = vsub.f32 %v11989_v50, %v748_v40  ;;  %v750_v60 = vsub.f32 %v11993_v57, %v748_v40  ;;  %v751_v3 = vsub.f32 %v11972_v34, %v748_v40  ;;  %v752_v29 = vsub.f32 %v11974_v36, %v748_v40 }
 0x770   :  { %v753_v24 = vsub.f32 %v11991_v52, %v748_v40  ;;  %v754_v32 = vsub.f32 %v11999_v63, %v748_v40  ;;  %v755_v33 = vsub.f32 %v11985_v45, %v748_v40  ;;  %v756_v57 = vsub.f32 %v11987_v48, %v748_v40 }
 0x771   :  { %v757_v12 = vmul.f32 1.442695, %v749_v49  ;;  %v759_v0 = vmul.f32 1.442695, %v750_v60  ;;  %v761_v7 = vmul.f32 1.442695, %v751_v3 }
 0x772   :  { %v763_v25 = vmul.f32 1.442695, %v752_v29  ;;  %v765_v50 = vmul.f32 1.442695, %v753_v24  ;;  %v767_v34 = vmul.f32 1.442695, %v754_v32 }
 0x773   :  { %11234 = vpow2.f32 %v757_v12  ;;  %v769_v36 = vmul.f32 1.442695, %v755_v33  ;;  %v771_v49 = vmul.f32 1.442695, %v756_v57  ;;  %v101_v57 = vld [vmem:[%s14120_s2 + $0xd8] sm:$0xff] }
 0x774   :  { %11236 = vpow2.f32 %v759_v0 }
 0x775   :  { %11238 = vpow2.f32 %v761_v7 }
 0x776   :  { %11240 = vpow2.f32 %v763_v25 }
 0x777   :  { %11242 = vpow2.f32 %v765_v50  ;;  %v100_v50 = vld [vmem:[%s14120_s2 + $0xd0] sm:$0xff] }
 0x778   :  { %11244 = vpow2.f32 %v767_v34  ;;  %v132_v34 = vld [vmem:[%s14120_s2 + $0x1d0] sm:$0xff] }
 0x779   :  { %11246 = vpow2.f32 %v769_v36  ;;  %v12228_v36 = vpack.c.bf16 %v101_v57, %v100_v50  ;;  %v103_v57 = vld [vmem:[%s14120_s2 + $0xe8] sm:$0xff] }
 0x77a   :  { %11248 = vpow2.f32 %v771_v49  ;;  %v133_v49 = vld [vmem:[%s14120_s2 + $0x1d8] sm:$0xff] }
 0x77b   :  { %14404 = vst [vmem:[#allocation54_spill] sm:$0xff] %v12228_v36  ;;  %9674 = vmatprep.subr.bf16.mxu1 %v12228_v36  ;;  %v118_v36 = vld [vmem:[%s14120_s2 + $0x160] sm:$0xff] }
 0x77d   :  { %v12195_v60 = vpop.eup %11234 }
 0x77e   :  { %v12197_v52 = vpop.eup %11236 }
 0x77f   :  { %v773_v63 = vadd.f32 %v12197_v52, %v12195_v60  ;;  %v12201_v7 = vpop.eup %11238 }
 0x780   :  { %v12204_v48 = vpop.eup %11240 }
 0x781   :  { %v774_v45 = vadd.f32 %v12201_v7, %v773_v63  ;;  %v12207_v12 = vpop.eup %11242  ;;  %v84_v63 = vld [vmem:[%s14120_s2 + $0x50] sm:$0xff] }
 0x782   :  { %v12210_v33 = vpop.eup %11244 }
 0x783   :  { %v775_v0 = vadd.f32 %v12204_v48, %v774_v45  ;;  %v12213_v3 = vpop.eup %11246  ;;  %v85_v45 = vld [vmem:[%s14120_s2 + $0x58] sm:$0xff] }
 0x784   :  { %v12216_v24 = vpop.eup %11248 }
 0x785   :  { %v776_v32 = vadd.f32 %v12207_v12, %v775_v0  ;;  %v12239_v0 = vpack.c.bf16 %v133_v49, %v132_v34  ;;  %v134_v34 = vld [vmem:[%s14120_s2 + $0x1e0] sm:$0xff]  ;;  %v135_v49 = vld [vmem:[%s14120_s2 + $0x1e8] sm:$0xff] }
 0x787   :  { %v777_v40 = vadd.f32 %v12210_v33, %v776_v32  ;;  %14405 = vst [vmem:[#allocation55_spill] sm:$0xff] %v12239_v0  ;;  %v12241_v32 = vpack.c.bf16 %v85_v45, %v84_v63  ;;  %9706 = vmatprep.subr.bf16.mxu0 %v12239_v0  ;;  %v12268_v45 = vpack.c.bf16 %v135_v49, %v134_v34  ;;  %v105_v34 = vld [vmem:[%s14120_s2 + $0xf8] sm:$0xff] }
 0x789   :  { %v778_v29 = vadd.f32 %v12213_v3, %v777_v40  ;;  %14406 = vst [vmem:[#allocation56_spill] sm:$0xff] %v12241_v32  ;;  %v116_v40 = vld [vmem:[%s14120_s2 + $0x150] sm:$0xff]  ;;  %9676 = vmatpush3.bf16.msra.mxu1 %v12241_v32  ;;  %14409 = vst [vmem:[#allocation59_spill] sm:$0xff] %v12268_v45 }
 0x78a   :  { %v88_v32 = vld [vmem:[%s14120_s2 + $0x70] sm:$0xff] }
 0x78b   :  { %v779_v25 = vadd.f32 %v12216_v24, %v778_v29  ;;  %v117_v29 = vld [vmem:[%s14120_s2 + $0x158] sm:$0xff] }
 0x78c   :  { %v12253_v50 = vpack.c.bf16 %v117_v29, %v116_v40  ;;  %v86_v40 = vld [vmem:[%s14120_s2 + $0x60] sm:$0xff]  ;;  %v87_v29 = vld [vmem:[%s14120_s2 + $0x68] sm:$0xff] }
 0x78d   :  { %780 = vadd.xlane.f32.xlu0 %v779_v25  ;;  %v102_v25 = vld [vmem:[%s14120_s2 + $0xe0] sm:$0xff]  ;;  %v12280_v0 = vpack.c.bf16 %v87_v29, %v86_v40  ;;  %v136_v29 = vld [vmem:[%s14120_s2 + $0x1f0] sm:$0xff] }
 0x78e   :  { %14407 = vst [vmem:[#allocation57_spill] sm:$0xff] %v12253_v50  ;;  %v12266_v63 = vpack.c.bf16 %v103_v57, %v102_v25  ;;  %9708 = vmatpush3.bf16.msra.mxu0 %v12253_v50  ;;  %v119_v25 = vld [vmem:[%s14120_s2 + $0x168] sm:$0xff]  ;;  %v104_v57 = vld [vmem:[%s14120_s2 + $0xf0] sm:$0xff]  ;;  %v137_v50 = vld [vmem:[%s14120_s2 + $0x1f8] sm:$0xff] }
 0x78f   :  { %14410 = vst [vmem:[#allocation60_spill] sm:$0xff] %v12280_v0  ;;  %9710 = vmatprep.subr.bf16.mxu0 %v12268_v45  ;;  %v12293_v49 = vpack.c.bf16 %v119_v25, %v118_v36  ;;  %v12295_v40 = vpack.c.bf16 %v105_v34, %v104_v57  ;;  %v12306_v16 = vpack.c.bf16 %v137_v50, %v136_v29  ;;  %v89_v36 = vld [vmem:[%s14120_s2 + $0x78] sm:$0xff]  ;;  %v120_v25 = vld [vmem:[%s14120_s2 + $0x170] sm:$0xff]  ;;  %v154_v29 = vld [vmem:[%s14120_s2 + $0x280] sm:$0xff] }
 0x790   :  { %14408 = vst [vmem:[#allocation58_spill] sm:$0xff] %v12266_v63  ;;  %9678 = vmatprep.subr.bf16.mxu1 %v12266_v63  ;;  %v121_v57 = vld [vmem:[%s14120_s2 + $0x178] sm:$0xff]  ;;  %v12318_v34 = vpack.c.bf16 %v89_v36, %v88_v32  ;;  %v155_v32 = vld [vmem:[%s14120_s2 + $0x288] sm:$0xff]  ;;  %v186_v36 = vld [vmem:[%s14120_s2 + $0x380] sm:$0xff] }
 0x791   :  { %14411 = vst [vmem:[#allocation61_spill] sm:$0xff] %v12293_v49  ;;  %14412 = vst [vmem:[#allocation62_spill] sm:$0xff] %v12295_v40  ;;  %9680 = vmatpush3.bf16.msra.mxu1 %v12280_v0  ;;  %v12322_v50 = vpack.c.bf16 %v121_v57, %v120_v25  ;;  %v12336_v25 = vpack.c.bf16 %v155_v32, %v154_v29  ;;  %v187_v57 = vld [vmem:[%s14120_s2 + $0x388] sm:$0xff]  ;;  %v170_v32 = vld [vmem:[%s14120_s2 + $0x300] sm:$0xff] }
 0x792   :  { %14413 = vst [vmem:[#allocation63_spill] sm:$0xff] %v12306_v16  ;;  %14414 = vst [vmem:[#allocation64_spill] sm:$0xff] %v12318_v34  ;;  %9712 = vmatpush3.bf16.msra.mxu0 %v12293_v49  ;;  %9682 = vmatprep.subr.bf16.mxu1 %v12295_v40  ;;  %v139_v29 = vld [vmem:[%s14120_s2 + $0x208] sm:$0xff]  ;;  %v157_v40 = vld [vmem:[%s14120_s2 + $0x298] sm:$0xff] }
 0x793   :  { %14415 = vst [vmem:[#allocation65_spill] sm:$0xff] %v12322_v50  ;;  %9714 = vmatprep.subr.bf16.mxu0 %v12306_v16  ;;  %14416 = vst [vmem:[#allocation66_spill] sm:$0xff] %v12336_v25  ;;  %v138_v16 = vld [vmem:[%s14120_s2 + $0x200] sm:$0xff]  ;;  %v188_v49 = vld [vmem:[%s14120_s2 + $0x390] sm:$0xff] }
 0x794   :  { %v189_v0 = vld [vmem:[%s14120_s2 + $0x398] sm:$0xff] }
 0x795   :  { %9684 = vmatpush3.bf16.msra.mxu1 %v12318_v34  ;;  %v12341_v34 = vpack.c.bf16 %v187_v57, %v186_v36  ;;  %v171_v36 = vld [vmem:[%s14120_s2 + $0x308] sm:$0xff] }
 0x796   :  { %9716 = vmatpush3.bf16.msra.mxu0 %v12322_v50  ;;  %9718 = vmatprep.subr.bf16.mxu1 %v12336_v25  ;;  %v12362_v25 = vpack.c.bf16 %v171_v36, %v170_v32  ;;  %v140_v32 = vld [vmem:[%s14120_s2 + $0x210] sm:$0xff]  ;;  %v141_v36 = vld [vmem:[%s14120_s2 + $0x218] sm:$0xff] }
 0x797   :  { %14417 = vst [vmem:[#allocation67_spill] sm:$0xff] %v12341_v34  ;;  %9750 = vmatprep.subr.bf16.mxu0 %v12341_v34  ;;  %v12360_v34 = vpack.c.bf16 %v139_v29, %v138_v16 }
 0x81a   :  { %v781_v50 = vpop.xlane.xlu0 %780 }
 0x81b   :  { %11250 = vrcp.f32 %v781_v50  ;;  %v156_v50 = vld [vmem:[%s14120_s2 + $0x290] sm:$0xff] }
 0x825   :  { %v11251_v57 = vpop.eup %11250 }
 0x826   :  { %v784_v45 = vmul.f32 %v11251_v57, %v12197_v52  ;;  %v786_v63 = vmul.f32 %v11251_v57, %v12204_v48  ;;  %v783_v16 = vmul.f32 %v11251_v57, %v12195_v60  ;;  %v785_v29 = vmul.f32 %v11251_v57, %v12201_v7  ;;  %v172_v52 = vld [vmem:[%s14120_s2 + $0x310] sm:$0xff]  ;;  %v173_v60 = vld [vmem:[%s14120_s2 + $0x318] sm:$0xff]  ;;  %v158_v7 = vld [vmem:[%s14120_s2 + $0x2a0] sm:$0xff] }
 0x827   :  { %v788_v53 = vmul.f32 %v11251_v57, %v12210_v33  ;;  %v790_v10 = vmul.f32 %v11251_v57, %v12216_v24  ;;  %v12395_v48 = vmul.f32 %v11251_v57, %v12207_v12  ;;  %v12398_v1 = vmul.f32 %v11251_v57, %v12213_v3  ;;  %v190_v12 = vld [vmem:[%s14120_s2 + $0x3a0] sm:$0xff]  ;;  %v191_v3 = vld [vmem:[%s14120_s2 + $0x3a8] sm:$0xff] }
 0x828   :  { %855 = vmatprep.mubr.f32.mxu1 %v784_v45  ;;  %1152 = vst [vmem:[#allocation4 + $0x8] sm:$0xff] %v784_v45  ;;  %925 = vmatprep.mubr.f32.mxu0 %v786_v63  ;;  %1154 = vst [vmem:[#allocation4 + $0x18] sm:$0xff] %v786_v63  ;;  %v12400_v33 = vpack.c.bf16 %v157_v40, %v156_v50  ;;  %v12402_v24 = vpack.c.bf16 %v189_v0, %v188_v49  ;;  %v142_v45 = vld [vmem:[%s14120_s2 + $0x220] sm:$0xff]  ;;  %v143_v49 = vld [vmem:[%s14120_s2 + $0x228] sm:$0xff] }
 0x829   :  { %1151 = vst [vmem:[#allocation4] sm:$0xff] %v783_v16  ;;  %1153 = vst [vmem:[#allocation4 + $0x10] sm:$0xff] %v785_v29  ;;  %856 = vmatmul.mubr.f32.vlgmr.msra.gmra.mrb[8].mxu1 %v783_v16  ;;  %926 = vmatmul.mubr.f32.vlgmr.msra.gmra.mrb[4].mxu0 %v785_v29  ;;  %v12417_v0 = vpack.c.bf16 %v141_v36, %v140_v32  ;;  %v12419_v63 = vpack.c.bf16 %v173_v60, %v172_v52  ;;  %v174_v57 = vld [vmem:[%s14120_s2 + $0x320] sm:$0xff]  ;;  %v175_v16 = vld [vmem:[%s14120_s2 + $0x328] sm:$0xff] }
 0x82a   :  { %1156 = vst [vmem:[#allocation4 + $0x28] sm:$0xff] %v788_v53  ;;  %1158 = vst [vmem:[#allocation4 + $0x38] sm:$0xff] %v790_v10  ;;  %9720 = vmatpush3.bf16.msra.mxu1 %v12360_v34  ;;  %9752 = vmatpush3.bf16.msra.mxu0 %v12362_v25  ;;  %v12427_v40 = vpack.c.bf16 %v159_v41, %v158_v7  ;;  %v12429_v50 = vpack.c.bf16 %v191_v3, %v190_v12  ;;  %v160_v29 = vld [vmem:[%s14120_s2 + $0x2b0] sm:$0xff]  ;;  %v161_v41 = vld [vmem:[%s14120_s2 + $0x2b8] sm:$0xff] }
 0x82b   :  { %1155 = vst [vmem:[#allocation4 + $0x20] sm:$0xff] %v12395_v48  ;;  %1157 = vst [vmem:[#allocation4 + $0x30] sm:$0xff] %v12398_v1  ;;  %995 = vmatprep.mubr.f32.mxu1 %v788_v53  ;;  %1065 = vmatprep.mubr.f32.mxu0 %v790_v10  ;;  %v192_v10 = vld [vmem:[%s14120_s2 + $0x3b0] sm:$0xff]  ;;  %v193_v53 = vld [vmem:[%s14120_s2 + $0x3b8] sm:$0xff]  ;;  %v12453_v32 = vpack.c.bf16 %v143_v49, %v142_v45  ;;  %v12455_v36 = vpack.c.bf16 %v175_v16, %v174_v57 }
 0x82c   :  { %14418 = vst [vmem:[#allocation68_spill] sm:$0xff] %v12427_v40  ;;  %14419 = vst [vmem:[#allocation69_spill] sm:$0xff] %v12429_v50  ;;  %9722 = vmatprep.subr.bf16.mxu1 %v12400_v33  ;;  %9754 = vmatprep.subr.bf16.mxu0 %v12402_v24  ;;  %v144_v52 = vld [vmem:[%s14120_s2 + $0x230] sm:$0xff]  ;;  %v145_v60 = vld [vmem:[%s14120_s2 + $0x238] sm:$0xff]  ;;  %v12465_v7 = vpack.c.bf16 %v161_v41, %v160_v29  ;;  %v12467_v12 = vpack.c.bf16 %v193_v53, %v192_v10 }
 0x82d   :  { %14420 = vst [vmem:[#allocation70_spill] sm:$0xff] %v12453_v32  ;;  %14421 = vst [vmem:[#allocation71_spill] sm:$0xff] %v12455_v36  ;;  %v176_v3 = vld [vmem:[%s14120_s2 + $0x330] sm:$0xff]  ;;  %v177_v45 = vld [vmem:[%s14120_s2 + $0x338] sm:$0xff]  ;;  %v12489_v41 = vpack.c.bf16 %v145_v60, %v144_v52 }
 0x82e   :  { %9724 = vmatpush3.bf16.msra.mxu1 %v12417_v0  ;;  %9756 = vmatpush3.bf16.msra.mxu0 %v12419_v63  ;;  %14422 = vst [vmem:[#allocation72_spill] sm:$0xff] %v12465_v7  ;;  %14423 = vst [vmem:[#allocation73_spill] sm:$0xff] %v12467_v12  ;;  %v162_v49 = vld [vmem:[%s14120_s2 + $0x2c0] sm:$0xff]  ;;  %v163_v57 = vld [vmem:[%s14120_s2 + $0x2c8] sm:$0xff]  ;;  %v12491_v10 = vpack.c.bf16 %v177_v45, %v176_v3 }
 0x82f   :  { %9726 = vmatprep.subr.bf16.mxu1 %v12427_v40  ;;  %9758 = vmatprep.subr.bf16.mxu0 %v12429_v50  ;;  %v194_v16 = vld [vmem:[%s14120_s2 + $0x3c0] sm:$0xff]  ;;  %v195_v29 = vld [vmem:[%s14120_s2 + $0x3c8] sm:$0xff]  ;;  %14424 = vst [vmem:[#allocation74_spill] sm:$0xff] %v12489_v41  ;;  %v12501_v40 = vpack.c.bf16 %v163_v57, %v162_v49  ;;  %v164_v3 = vld [vmem:[%s14120_s2 + $0x2d0] sm:$0xff] }
 0x830   :  { %14425 = vst [vmem:[#allocation75_spill] sm:$0xff] %v12491_v10  ;;  %v146_v53 = vld [vmem:[%s14120_s2 + $0x240] sm:$0xff]  ;;  %v147_v50 = vld [vmem:[%s14120_s2 + $0x248] sm:$0xff]  ;;  %v165_v45 = vld [vmem:[%s14120_s2 + $0x2d8] sm:$0xff] }
 0x831   :  { %14426 = vst [vmem:[#allocation76_spill] sm:$0xff] %v12501_v40  ;;  %v178_v52 = vld [vmem:[%s14120_s2 + $0x340] sm:$0xff]  ;;  %v179_v60 = vld [vmem:[%s14120_s2 + $0x348] sm:$0xff]  ;;  %v196_v49 = vld [vmem:[%s14120_s2 + $0x3d0] sm:$0xff] }
 0x832   :  { %9728 = vmatpush3.bf16.msra.mxu1 %v12453_v32  ;;  %9760 = vmatpush3.bf16.msra.mxu0 %v12455_v36  ;;  %v12503_v32 = vpack.c.bf16 %v195_v29, %v194_v16  ;;  %v197_v57 = vld [vmem:[%s14120_s2 + $0x3d8] sm:$0xff]  ;;  %v12525_v16 = vpack.c.bf16 %v147_v50, %v146_v53  ;;  %v12527_v29 = vpack.c.bf16 %v179_v60, %v178_v52  ;;  %v180_v50 = vld [vmem:[%s14120_s2 + $0x350] sm:$0xff]  ;;  %v166_v52 = vld [vmem:[%s14120_s2 + $0x2e0] sm:$0xff] }
 0x833   :  { %9730 = vmatprep.subr.bf16.mxu1 %v12465_v7  ;;  %9762 = vmatprep.subr.bf16.mxu0 %v12467_v12  ;;  %v148_v12 = vld [vmem:[%s14120_s2 + $0x250] sm:$0xff]  ;;  %v149_v7 = vld [vmem:[%s14120_s2 + $0x258] sm:$0xff]  ;;  %v12537_v36 = vpack.c.bf16 %v165_v45, %v164_v3  ;;  %v167_v60 = vld [vmem:[%s14120_s2 + $0x2e8] sm:$0xff] }
 0x834   :  { %14427 = vst [vmem:[#allocation77_spill] sm:$0xff] %v12503_v32  ;;  %14428 = vst [vmem:[#allocation78_spill] sm:$0xff] %v12525_v16  ;;  %v181_v53 = vld [vmem:[%s14120_s2 + $0x358] sm:$0xff]  ;;  %v198_v3 = vld [vmem:[%s14120_s2 + $0x3e0] sm:$0xff] }
 0x835   :  { %14429 = vst [vmem:[#allocation79_spill] sm:$0xff] %v12527_v29  ;;  %14430 = vst [vmem:[#allocation80_spill] sm:$0xff] %v12537_v36  ;;  %v199_v45 = vld [vmem:[%s14120_s2 + $0x3e8] sm:$0xff] }
 0x836   :  { %9732 = vmatpush3.bf16.msra.mxu1 %v12489_v41  ;;  %9764 = vmatpush3.bf16.msra.mxu0 %v12491_v10  ;;  %v12539_v41 = vpack.c.bf16 %v197_v57, %v196_v49  ;;  %v12561_v49 = vpack.c.bf16 %v149_v7, %v148_v12  ;;  %v12563_v57 = vpack.c.bf16 %v181_v53, %v180_v50  ;;  %v182_v7 = vld [vmem:[%s14120_s2 + $0x360] sm:$0xff]  ;;  %v183_v12 = vld [vmem:[%s14120_s2 + $0x368] sm:$0xff]  ;;  %v168_v50 = vld [vmem:[%s14120_s2 + $0x2f0] sm:$0xff] }
 0x837   :  { %9734 = vmatprep.subr.bf16.mxu1 %v12501_v40  ;;  %9766 = vmatprep.subr.bf16.mxu0 %v12503_v32  ;;  %v150_v32 = vld [vmem:[%s14120_s2 + $0x260] sm:$0xff]  ;;  %v151_v40 = vld [vmem:[%s14120_s2 + $0x268] sm:$0xff]  ;;  %v12573_v10 = vpack.c.bf16 %v167_v60, %v166_v52  ;;  %v169_v53 = vld [vmem:[%s14120_s2 + $0x2f8] sm:$0xff] }
 0x838   :  { %14431 = vst [vmem:[#allocation81_spill] sm:$0xff] %v12539_v41  ;;  %14432 = vst [vmem:[#allocation82_spill] sm:$0xff] %v12563_v57  ;;  %v200_v52 = vld [vmem:[%s14120_s2 + $0x3f0] sm:$0xff]  ;;  %v201_v60 = vld [vmem:[%s14120_s2 + $0x3f8] sm:$0xff] }
 0x83a   :  { %9736 = vmatpush3.bf16.msra.mxu1 %v12525_v16  ;;  %9768 = vmatpush3.bf16.msra.mxu0 %v12527_v29  ;;  %v12575_v16 = vpack.c.bf16 %v199_v45, %v198_v3  ;;  %v12597_v3 = vpack.c.bf16 %v151_v40, %v150_v32  ;;  %v12599_v45 = vpack.c.bf16 %v183_v12, %v182_v7  ;;  %v184_v40 = vld [vmem:[%s14120_s2 + $0x370] sm:$0xff]  ;;  %v185_v32 = vld [vmem:[%s14120_s2 + $0x378] sm:$0xff] }
 0x83b   :  { %9738 = vmatprep.subr.bf16.mxu1 %v12537_v36  ;;  %9770 = vmatprep.subr.bf16.mxu0 %v12539_v41  ;;  %v152_v41 = vld [vmem:[%s14120_s2 + $0x270] sm:$0xff]  ;;  %v12606_v36 = vpack.c.bf16 %v169_v53, %v168_v50  ;;  %v12608_v29 = vpack.c.bf16 %v201_v60, %v200_v52  ;;  %v12623_v12 = vpack.c.bf16 %v185_v32, %v184_v40  ;;  %v14440_v50 = vmov 0.0|0.0   ;;  %v235_v52 = vld [vmem:[%s14127_s9 + $0x18] sm:$0xff]  ;;  %v236_v40 = vld [vmem:[%s14127_s9 + $0x20] sm:$0xff] }
 0x83c   :  { %14433 = vst [vmem:[#allocation83_spill] sm:$0xff] %v12575_v16  ;;  %14434 = vst [vmem:[#allocation84_spill] sm:$0xff] %v12597_v3  ;;  %v237_v32 = vld [vmem:[%s14127_s9 + $0x28] sm:$0xff] }
 0x83d   :  { %14435 = vst [vmem:[#allocation85_spill] sm:$0xff] %v12599_v45  ;;  %14436 = vst [vmem:[#allocation86_spill] sm:$0xff] %v12606_v36 }
 0x83e   :  { %9740 = vmatpush3.bf16.msra.mxu1 %v12561_v49  ;;  %9772 = vmatpush3.bf16.msra.mxu0 %v12563_v57  ;;  %14437 = vst [vmem:[#allocation87_spill] sm:$0xff] %v12608_v29  ;;  %v153_v57 = vld [vmem:[%s14120_s2 + $0x278] sm:$0xff]  ;;  %14439 = vst [vmem:[#allocation89_spill] sm:$0xff] %v12623_v12 }
 0x83f   :  { %9742 = vmatprep.subr.bf16.mxu1 %v12573_v10  ;;  %9774 = vmatprep.subr.bf16.mxu0 %v12575_v16  ;;  %v12621_v7 = vpack.c.bf16 %v153_v57, %v152_v41  ;;  %v14441_v41 = vmov 0.0   ;;  %v234_v57 = vld [vmem:[%s14127_s9 + $0x10] sm:$0xff] }
 0x840   :  { %v12664_v60 = vpack.c.bf16 %v235_v52, %v234_v57  ;;  %v239_v57 = vld [vmem:[%s14127_s9 + $0x38] sm:$0xff] }
 0x841   :  { %14438 = vst [vmem:[#allocation88_spill] sm:$0xff] %v12621_v7 }
 0x842   :  { %9744 = vmatpush3.bf16.msra.mxu1 %v12597_v3  ;;  %9776 = vmatpush3.bf16.msra.mxu0 %v12599_v45  ;;  %14443 = vst [vmem:[#allocation91_spill] sm:$0xff] %v12664_v60 }
 0x843   :  { %9746 = vmatprep.subr.bf16.mxu1 %v12606_v36  ;;  %9778 = vmatprep.subr.bf16.mxu0 %v12608_v29  ;;  %v1162_v29 = vpop.permute.xlu1 %1161 }
 0x846   :  { %9748 = vmatpush3.bf16.msra.mxu1 %v12621_v7  ;;  %9780 = vmatpush3.bf16.msra.mxu0 %v12623_v12 }
 0x847   :  { %9793 = vmatprep.subr.bf16.mxu0 %v14440_v50  ;;  %9781 = vmatprep.subr.bf16.mxu1 %v14440_v50 }
 0x849   :  { %996 = vmatmul.mubr.f32.vlgmr.msra.gmra.mrb[10].mxu1 %v12395_v48  ;;  %1066 = vmatmul.mubr.f32.vlgmr.msra.gmra.mrb[6].mxu0 %v12398_v1  ;;  %v232_v1 = vld [vmem:[%s14127_s9] sm:$0xff]  ;;  %v233_v48 = vld [vmem:[%s14127_s9 + $0x8] sm:$0xff] }
 0x84a   :  { %9795 = vmatpush3.bf16.msra.mxu0 %v11668_v4  ;;  %9133 = vmatprep.mubr.msk.f32.mxu1 %vm11583_vm0, %v14441_v41  ;;  %v12658_v53 = vpack.c.bf16 %v233_v48, %v232_v1  ;;  %v12674_v1 = vpack.c.bf16 %v237_v32, %v236_v40  ;;  %v238_v48 = vld [vmem:[%s14127_s9 + $0x30] sm:$0xff] }
 0x84b   :  { %9796 = vmatprep.subr.bf16.mxu0 %v14440_v50  ;;  %9160 = vmatprep.mubr.msk.f32.mxu0 %vm11583_vm0, %v14441_v41  ;;  %v12684_v52 = vpack.c.bf16 %v239_v57, %v238_v48 }
 0x84c   :  { %14442 = vst [vmem:[#allocation90_spill] sm:$0xff] %v12658_v53  ;;  %9783 = vmatpush3.bf16.msra.mxu1 %v12658_v53  ;;  %14444 = vst [vmem:[#allocation92_spill] sm:$0xff] %v12674_v1 }
 0x84d   :  { %9784 = vmatprep.subr.bf16.mxu1 %v14440_v50  ;;  %14445 = vst [vmem:[#allocation93_spill] sm:$0xff] %v12684_v52 }
 0x84e   :  { %9798 = vmatpush3.bf16.msra.mxu0 %v11680_v8 }
 0x84f   :  { %9799 = vmatprep.subr.bf16.mxu0 %v14440_v50 }
 0x850   :  { %9786 = vmatpush3.bf16.msra.mxu1 %v12664_v60 }
 0x851   :  { %9787 = vmatprep.subr.bf16.mxu1 %v14440_v50 }
 0x852   :  { %9801 = vmatpush3.bf16.msra.mxu0 %v11692_v11 }
 0x853   :  { %9802 = vmatprep.subr.bf16.mxu0 %v14440_v50 }
 0x854   :  { %9789 = vmatpush3.bf16.msra.mxu1 %v12674_v1 }
 0x855   :  { %9790 = vmatprep.subr.bf16.mxu1 %v14440_v50 }
 0x856   :  { %9804 = vmatpush3.bf16.msra.mxu0 %v11702_v14 }
 0x857   :  { %9805 = vmatprep.subr.bf16.mxu0 %v14440_v50 }
 0x858   :  { %9792 = vmatpush3.bf16.msra.mxu1 %v12684_v52  ;;  %v7633_v52 = vld [vmem:[%s14118_s0 + $0x8] sm:$0xff] }
 0x859   :  { %9811 = vmatprep.subr.bf16.mxu1 %v14440_v50 }
 0x85a   :  { %9807 = vmatpush3.bf16.msra.mxu0 %v11712_v17 }
 0x85b   :  { %9808 = vmatprep.subr.bf16.mxu0 %v14440_v50 }
 0x85e   :  { %9810 = vmatpush3.bf16.msra.mxu0 %v11722_v20 }
 0x85f   :  { %9824 = vmatprep.subr.bf16.mxu0 %v11805_v15 }
 0x8fc   :  { %v7757_v40 = vpop.f32.mrb[8].mxu1  ;;  %v7792_v32 = vpop.f32.mrb[4].mxu0 }
 0x8fd   :  { %v7758_v15 = vpop.f32.mrb[9].mxu1  ;;  %v7793_v20 = vpop.f32.mrb[5].mxu0 }
 0x8fe   :  { %v7759_v17 = vadd.f32 %v7758_v15, %v7757_v40  ;;  %v7794_v14 = vadd.f32 %v7793_v20, %v7792_v32 }
 0x900   :  { %v928_v11 = vadd.f32 %v7794_v14, %v7759_v17 }
 0x91c   :  { %v7827_v60 = vpop.f32.mrb[10].mxu1  ;;  %v7862_v8 = vpop.f32.mrb[6].mxu0 }
 0x91d   :  { %v7828_v53 = vpop.f32.mrb[11].mxu1  ;;  %v7863_v4 = vpop.f32.mrb[7].mxu0 }
 0x91e   :  { %v7829_v1 = vadd.f32 %v7828_v53, %v7827_v60  ;;  %v7864_v48 = vadd.f32 %v7863_v4, %v7862_v8  ;;  %v12717_v4 = vld [vmem:[%s14128_s10] sm:$0xff] }
 0x920   :  { %v998_v57 = vadd.f32 %v7829_v1, %v928_v11 }
 0x922   :  { %v1068_v12 = vadd.f32 %v7864_v48, %v998_v57 }
 0x924   :  { %1073 = vrot.lane.b32.xlu0 %v1068_v12, %s11581_s27 }
 0x996   :  { %v1074_v7 = vpop.permute.xlu0 %1073 }
 0x997   :  { %v1076_v20 = vsel %vm247_vm1, %v11904_v58, %v1074_v7  ;;  %v1164_v14 = vsel %vm247_vm1, %v7633_v52, %v1074_v7 }
 0x998   :  { %v1165_v17 = vsel %vm249_vm2, %v1164_v14, %v1162_v29  ;;  %9134 = vmatmul.mubr.msk.f32.vlgmr.msra.gmra.mrb[12].mxu1 %vm249_vm2, %v1076_v20  ;;  %v12723_v29 = vld [vmem:[%s14124_s6] sm:$0xff] }
 0x999   :  { %9161 = vmatmul.mubr.msk.f32.vlgmr.msra.gmra.mrb[8].mxu0 %vm251_vm3, %v1165_v17  ;;  %9813 = vmatpush3.bf16.msra.mxu1 %v11750_v42 }
 0x99a   :  { %9814 = vmatprep.subr.bf16.mxu1 %v14440_v50  ;;  %9179 = vmatprep.mubr.msk.f32.mxu1 %vm11583_vm0, %v14441_v41 }
 0x99b   :  { %9826 = vmatpush1.bf16.msra.mxu0 %v11816_v21  ;;  %1437 = vmatprep.mubr.f32.mxu0 %v14441_v41 }
 0x99c   :  { %9828 = vmatprep.subr.bf16.mxu0 %v11843_v30 }
 0x99d   :  { %9816 = vmatpush3.bf16.msra.mxu1 %v11756_v44 }
 0x99e   :  { %9817 = vmatprep.subr.bf16.mxu1 %v14440_v50 }
 0x99f   :  { %9830 = vmatpush1.bf16.msra.mxu0 %v11845_v31 }
 0x9a0   :  { %9840 = vmatprep.subr.bf16.mxu0 %v11921_v62 }
 0x9a1   :  { %9819 = vmatpush3.bf16.msra.mxu1 %v11766_v47 }
 0x9a2   :  { %9820 = vmatprep.subr.bf16.mxu1 %v14440_v50 }
 0x9a5   :  { %9822 = vmatpush3.bf16.msra.mxu1 %v11777_v51 }
 0x9a6   :  { %9832 = vmatprep.subr.bf16.mxu1 %v11875_v43 }
 0xa6b   :  { %v1146_v8 = vpop.f32.mrb[12].mxu1 }
 0xa6c   :  { %v1147_v11 = vadd.f32 %v1146_v8, %v12717_v4  ;;  %v9135_v15 = vpop.f32.mrb[13].mxu1  ;;  %v1235_v58 = vpop.f32.mrb[8].mxu0 }
 0xa6d   :  { %v1236_v7 = vadd.f32 %v12723_v29, %v1235_v58  ;;  %v9162_v12 = vpop.f32.mrb[9].mxu0 }
 0xa6e   :  { %1150 = vst [vmem:[#allocation2] sm:$0xff] %v1147_v11 }
 0xa6f   :  { %11252 = vtanh.f32 %v1236_v7  ;;  %v7635_v60 = vmul.f32 -1.442695, %v1236_v7  ;;  %v12749_v7 = vld [vmem:[%s14126_s8] sm:$0xff] }
 0xa71   :  { %11254 = vpow2.f32 %v7635_v60 }
 0xa79   :  { %v11253_v53 = vpop.eup %11252 }
 0xa7a   :  { %1248 = vrot.lane.b32.xlu1 %v11253_v53, %s11585_s14 }
 0xa7b   :  { %v11255_v1 = vpop.eup %11254 }
 0xa7c   :  { %v1242_v52 = vadd.f32 1.0, %v11255_v1 }
 0xa7e   :  { %11256 = vrcp.f32 %v1242_v52 }
 0xa88   :  { %v11257_v40 = vpop.eup %11256 }
 0xa89   :  { %v1246_v57 = vmul.f32 %v11257_v40, %v11738_v38 }
 0xaec   :  { %v1249_v32 = vpop.permute.xlu1 %1248 }
 0xaed   :  { %v1251_v48 = vmul.f32 %v11257_v40, %v1249_v32 }
 0xaef   :  { %1253 = vrot.lane.b32.xlu0 %v1251_v48, %s11581_s27 }
 0xb61   :  { %v1254_v20 = vpop.permute.xlu0 %1253 }
 0xb62   :  { %v12729_v14 = vadd.f32 %v1254_v20, %v1246_v57 }
 0xb64   :  { %11258 = vtanh.f32 %v12729_v14 }
 0xb6e   :  { %v11259_v17 = vpop.eup %11258 }
 0xb6f   :  { %1259 = vrot.lane.b32.xlu1 %v11259_v17, %s11585_s14 }
 0xb73   :  { %1267 = vrot.lane.b32.xlu1 %v11878_v46, %s11585_s14 }
 0xbe1   :  { %v1260_v8 = vpop.permute.xlu1 %1259 }
 0xbe2   :  { %v12735_v11 = vmul.f32 %v11257_v40, %v1260_v8 }
 0xbe4   :  { %1264 = vrot.lane.b32.xlu0 %v12735_v11, %s11581_s27 }
 0xbe5   :  { %v1268_v15 = vpop.permute.xlu1 %1267 }
 0xc56   :  { %v1265_v58 = vpop.permute.xlu0 %1264 }
 0xc57   :  { %v1270_v38 = vsel %vm247_vm1, %v1265_v58, %v1268_v15 }
 0xc58   :  { %9180 = vmatmul.mubr.msk.f32.vlgmr.msra.gmra.mrb[14].mxu1 %vm249_vm2, %v1270_v38 }
 0xc59   :  { %9834 = vmatpush1.bf16.msra.mxu1 %v11894_v54  ;;  %1508 = vmatprep.mubr.f32.mxu1 %v14441_v41 }
 0xc5a   :  { %9836 = vmatprep.subr.bf16.mxu1 %v11896_v55 }
 0xc5d   :  { %9838 = vmatpush1.bf16.msra.mxu1 %v11917_v61 }
 0xc5e   :  { %9848 = vmatprep.subr.bf16.mxu1 %v11818_v22 }
 0xd2b   :  { %v1340_v46 = vpop.f32.mrb[14].mxu1 }
 0xd2c   :  { %v1341_v12 = vadd.f32 %v12749_v7, %v1340_v46  ;;  %v9181_v53 = vpop.f32.mrb[15].mxu1 }
 0xd2d   :  { %v14448_v53 = vld [vmem:[#allocation45_spill] sm:$0xff] }
 0xd2e   :  { %11260 = vtanh.f32 %v1341_v12  ;;  %v7637_v1 = vmul.f32 -1.442695, %v1341_v12  ;;  %v14447_v12 = vld [vmem:[#allocation44_spill] sm:$0xff] }
 0xd30   :  { %11262 = vpow2.f32 %v7637_v1  ;;  %v14450_v1 = vld [vmem:[#allocation47_spill] sm:$0xff] }
 0xd38   :  { %v11261_v60 = vpop.eup %11260 }
 0xd39   :  { %1353 = vrot.lane.b32.xlu0 %v11261_v60, %s11585_s14  ;;  %v14449_v60 = vld [vmem:[#allocation46_spill] sm:$0xff] }
 0xd3a   :  { %v11263_v52 = vpop.eup %11262 }
 0xd3b   :  { %v1347_v40 = vadd.f32 1.0, %v11263_v52  ;;  %v14451_v52 = vld [vmem:[#allocation48_spill] sm:$0xff] }
 0xd3d   :  { %11264 = vrcp.f32 %v1347_v40  ;;  %v14452_v40 = vld [vmem:[#allocation49_spill] sm:$0xff] }
 0xd47   :  { %v11265_v32 = vpop.eup %11264 }
 0xd48   :  { %v1351_v20 = vmul.f32 %v11265_v32, %v11793_v9  ;;  %v14446_v9 = vld [vmem:[#allocation43_spill] sm:$0xff] }
 0xdab   :  { %v1354_v48 = vpop.permute.xlu0 %1353 }
 0xdac   :  { %v1356_v57 = vmul.f32 %v11265_v32, %v1354_v48  ;;  %v14454_v48 = vld [vmem:[#allocation51_spill] sm:$0xff] }
 0xdae   :  { %1358 = vrot.lane.b32.xlu1 %v1356_v57, %s11581_s27  ;;  %v14455_v57 = vld [vmem:[#allocation52_spill] sm:$0xff] }
 0xe20   :  { %v1359_v17 = vpop.permute.xlu1 %1358 }
 0xe21   :  { %v12755_v8 = vadd.f32 %v1359_v17, %v1351_v20  ;;  %v14456_v20 = vld [vmem:[#allocation53_spill] sm:$0xff]  ;;  %v14457_v17 = vld [vmem:[#allocation54_spill] sm:$0xff] }
 0xe23   :  { %11266 = vtanh.f32 %v12755_v8 }
 0xe2d   :  { %v11267_v15 = vpop.eup %11266 }
 0xe2e   :  { %1364 = vrot.lane.b32.xlu0 %v11267_v15, %s11585_s14  ;;  %v14458_v15 = vld [vmem:[#allocation55_spill] sm:$0xff] }
 0xea0   :  { %v1365_v58 = vpop.permute.xlu0 %1364 }
 0xea1   :  { %v12759_v38 = vmul.f32 %v11265_v32, %v1365_v58  ;;  %v14453_v32 = vld [vmem:[#allocation50_spill] sm:$0xff]  ;;  %v14459_v58 = vld [vmem:[#allocation56_spill] sm:$0xff] }
 0xea3   :  { %1369 = vrot.lane.b32.xlu1 %v12759_v38, %s11581_s27 }
 0xf15   :  { %v12763_v46 = vpop.permute.xlu1 %1369 }
 0xf16   :  { %7638 = vmatmul.mubr.msk.f32.vlgmr.msra.gmra.mrb[10].mxu0 %vm247_vm1, %v12763_v46  ;;  %7639 = vmatmul.mubr.msk.f32.vlgmr.msra.gmra.mrb[16].mxu1 %vm247_vm1, %v12763_v46 }
 0xf17   :  { %9842 = vmatpush1.bf16.msra.mxu0 %v11936_v5  ;;  %9850 = vmatpush1.bf16.msra.mxu1 %v11830_v26 }
 0xf18   :  { %9844 = vmatprep.subr.bf16.mxu0 %v11939_v6  ;;  %9852 = vmatprep.subr.bf16.mxu1 %v11857_v35 }
 0xf19   :  { %1579 = vmatprep.mubr.f32.mxu0 %v14441_v41  ;;  %1650 = vmatprep.mubr.f32.mxu1 %v14441_v41 }
 0xf1b   :  { %9846 = vmatpush1.bf16.msra.mxu0 %v11950_v13  ;;  %9854 = vmatpush1.bf16.msra.mxu1 %v11863_v37 }
 0xf1c   :  { %9856 = vmatprep.subr.bf16.mxu0 %v12016_v23  ;;  %9888 = vmatprep.subr.bf16.mxu1 %v12027_v27 }
 0xf1e   :  { %7640 = vmatmul.mubr.msk.f32.vlgmr.msra.gmra.mrb[12].mxu0 %vm247_vm1, %v12763_v46  ;;  %7641 = vmatmul.mubr.msk.f32.vlgmr.msra.gmra.mrb[18].mxu1 %vm247_vm1, %v12763_v46 }
 0xf1f   :  { %9858 = vmatpush3.bf16.msra.mxu0 %v12029_v28  ;;  %9890 = vmatpush3.bf16.msra.mxu1 %v12041_v39 }
 0xf20   :  { %9860 = vmatprep.subr.bf16.mxu0 %v12054_v56  ;;  %9892 = vmatprep.subr.bf16.mxu1 %v12056_v59 }
 0xf23   :  { %9862 = vmatpush3.bf16.msra.mxu0 %v12068_v2  ;;  %9894 = vmatpush3.bf16.msra.mxu1 %v12081_v18 }
 0xf24   :  { %9864 = vmatprep.subr.bf16.mxu0 %v12083_v19  ;;  %9896 = vmatprep.subr.bf16.mxu1 %v14446_v9  ;;  %v12860_v19 = vld [vmem:[%s14121_s3 + $0x38] sm:$0xff] }
 0xf25   :  { %14478 = vst [vmem:[#allocation101_spill] sm:$0xff] %v12860_v19 }
 0xf27   :  { %9866 = vmatpush3.bf16.msra.mxu0 %v14447_v12  ;;  %9898 = vmatpush3.bf16.msra.mxu1 %v14448_v53 }
 0xf28   :  { %9868 = vmatprep.subr.bf16.mxu0 %v14449_v60  ;;  %9900 = vmatprep.subr.bf16.mxu1 %v14450_v1  ;;  %v14460_v60 = vld [vmem:[#allocation57_spill] sm:$0xff]  ;;  %v14461_v1 = vld [vmem:[#allocation58_spill] sm:$0xff] }
 0xf2b   :  { %9870 = vmatpush3.bf16.msra.mxu0 %v14451_v52  ;;  %9902 = vmatpush3.bf16.msra.mxu1 %v14452_v40  ;;  %v14462_v52 = vld [vmem:[#allocation59_spill] sm:$0xff]  ;;  %v14463_v40 = vld [vmem:[#allocation60_spill] sm:$0xff] }
 0xf2c   :  { %9872 = vmatprep.subr.bf16.mxu0 %v14453_v32  ;;  %9904 = vmatprep.subr.bf16.mxu1 %v14454_v48  ;;  %v14464_v32 = vld [vmem:[#allocation61_spill] sm:$0xff]  ;;  %v14465_v48 = vld [vmem:[#allocation62_spill] sm:$0xff] }
 0xf2f   :  { %9874 = vmatpush3.bf16.msra.mxu0 %v14455_v57  ;;  %9906 = vmatpush3.bf16.msra.mxu1 %v14456_v20  ;;  %v14466_v57 = vld [vmem:[#allocation63_spill] sm:$0xff]  ;;  %v14467_v20 = vld [vmem:[#allocation64_spill] sm:$0xff] }
 0xf30   :  { %9876 = vmatprep.subr.bf16.mxu0 %v14457_v17  ;;  %9908 = vmatprep.subr.bf16.mxu1 %v14458_v15  ;;  %v14468_v17 = vld [vmem:[#allocation65_spill] sm:$0xff]  ;;  %v14469_v15 = vld [vmem:[#allocation66_spill] sm:$0xff] }
 0xf33   :  { %9878 = vmatpush3.bf16.msra.mxu0 %v14459_v58  ;;  %9910 = vmatpush3.bf16.msra.mxu1 %v14460_v60  ;;  %v14470_v58 = vld [vmem:[#allocation67_spill] sm:$0xff] }
 0xf34   :  { %9880 = vmatprep.subr.bf16.mxu0 %v14461_v1  ;;  %9912 = vmatprep.subr.bf16.mxu1 %v14462_v52 }
 0xf37   :  { %9882 = vmatpush3.bf16.msra.mxu0 %v14463_v40  ;;  %9914 = vmatpush3.bf16.msra.mxu1 %v14464_v32  ;;  %v12836_v32 = vld [vmem:[%s14121_s3 + $0x30] sm:$0xff] }
 0xf38   :  { %9884 = vmatprep.subr.bf16.mxu0 %v14465_v48  ;;  %9916 = vmatprep.subr.bf16.mxu1 %v14466_v57  ;;  %v12818_v48 = vld [vmem:[%s14121_s3] sm:$0xff]  ;;  %14474 = vst [vmem:[#allocation97_spill] sm:$0xff] %v12836_v32 }
 0xf39   :  { %14471 = vst [vmem:[#allocation94_spill] sm:$0xff] %v12818_v48 }
 0xf3b   :  { %9886 = vmatpush3.bf16.msra.mxu0 %v14467_v20  ;;  %9918 = vmatpush3.bf16.msra.mxu1 %v14468_v17  ;;  %v12824_v17 = vld [vmem:[%s14121_s3 + $0x10] sm:$0xff] }
 0xf3c   :  { %9920 = vmatprep.subr.bf16.mxu0 %v14469_v15  ;;  %9952 = vmatprep.subr.bf16.mxu1 %v14470_v58  ;;  %14472 = vst [vmem:[#allocation95_spill] sm:$0xff] %v12824_v17  ;;  %v12830_v15 = vld [vmem:[%s14121_s3 + $0x20] sm:$0xff] }
 0xf3d   :  { %14473 = vst [vmem:[#allocation96_spill] sm:$0xff] %v12830_v15 }
 0xfe9   :  { %v1439_v60 = vpop.f32.mrb[10].mxu0  ;;  %v1510_v1 = vpop.f32.mrb[16].mxu1 }
 0xfea   :  { %v1441_v53 = vpop.f32.mrb[11].mxu0  ;;  %v1512_v52 = vpop.f32.mrb[17].mxu1  ;;  %v1440_v57 = vadd.f32 %v12818_v48, %v1439_v60  ;;  %v1511_v58 = vadd.f32 %v12824_v17, %v1510_v1  ;;  %v12842_v1 = vld [vmem:[%s14121_s3 + $0x8] sm:$0xff] }
 0xfeb   :  { %14475 = vst [vmem:[#allocation98_spill] sm:$0xff] %v12842_v1  ;;  %v1442_v17 = vadd.f32 %v12842_v1, %v1441_v53 }
 0xff1   :  { %v1581_v12 = vpop.f32.mrb[12].mxu0  ;;  %v1652_v40 = vpop.f32.mrb[18].mxu1 }
 0xff2   :  { %v1582_v20 = vadd.f32 %v12830_v15, %v1581_v12  ;;  %v1653_v60 = vadd.f32 %v12836_v32, %v1652_v40  ;;  %v1583_v48 = vpop.f32.mrb[13].mxu0  ;;  %v1654_v9 = vpop.f32.mrb[19].mxu1  ;;  %v12848_v12 = vld [vmem:[%s14121_s3 + $0x18] sm:$0xff]  ;;  %v12854_v40 = vld [vmem:[%s14121_s3 + $0x28] sm:$0xff] }
 0xff3   :  { %14476 = vst [vmem:[#allocation99_spill] sm:$0xff] %v12848_v12  ;;  %v1513_v15 = vadd.f32 %v12848_v12, %v1512_v52  ;;  %14477 = vst [vmem:[#allocation100_spill] sm:$0xff] %v12854_v40  ;;  %v1584_v32 = vadd.f32 %v12854_v40, %v1583_v48  ;;  %v1655_v53 = vadd.f32 %v12860_v19, %v1654_v9 }
 0xff4   :  { %v1657_v1 = vmax.f32 %v1440_v57, %v1582_v20  ;;  %v1659_v18 = vmax.f32 %v1511_v58, %v1653_v60 }
 0xff5   :  { %v1658_v2 = vmax.f32 %v1442_v17, %v1584_v32  ;;  %v1660_v59 = vmax.f32 %v1513_v15, %v1655_v53 }
 0xff7   :  { %v1661_v56 = vmax.f32 %v1657_v1, %v1658_v2  ;;  %v1662_v52 = vmax.f32 %v1659_v18, %v1660_v59 }
 0xff9   :  { %v1663_v12 = vmax.f32 %v1661_v56, %v1662_v52 }
 0xffb   :  { %1664 = vmax.xlane.f32.xlu0 %v1663_v12 }
0x1088   :  { %v1665_v39 = vpop.xlane.xlu0 %1664 }
0x1089   :  { %v1666_v28 = vsub.f32 %v1440_v57, %v1665_v39  ;;  %v1667_v27 = vsub.f32 %v1442_v17, %v1665_v39  ;;  %v1668_v23 = vsub.f32 %v1511_v58, %v1665_v39  ;;  %v1669_v48 = vsub.f32 %v1513_v15, %v1665_v39 }
0x108a   :  { %v1670_v35 = vsub.f32 %v1582_v20, %v1665_v39  ;;  %v1671_v19 = vsub.f32 %v1584_v32, %v1665_v39  ;;  %v1672_v6 = vsub.f32 %v1653_v60, %v1665_v39  ;;  %v1673_v2 = vsub.f32 %v1655_v53, %v1665_v39 }
0x108b   :  { %v1674_v40 = vmul.f32 1.442695, %v1666_v28  ;;  %v1676_v37 = vmul.f32 1.442695, %v1667_v27  ;;  %v1678_v13 = vmul.f32 1.442695, %v1668_v23 }
0x108c   :  { %v1680_v9 = vmul.f32 1.442695, %v1669_v48  ;;  %v1682_v26 = vmul.f32 1.442695, %v1670_v35  ;;  %v1684_v56 = vmul.f32 1.442695, %v1671_v19 }
0x108d   :  { %11268 = vpow2.f32 %v1674_v40  ;;  %v1686_v59 = vmul.f32 1.442695, %v1672_v6  ;;  %v1688_v18 = vmul.f32 1.442695, %v1673_v2 }
0x108e   :  { %11270 = vpow2.f32 %v1676_v37 }
0x108f   :  { %11272 = vpow2.f32 %v1678_v13 }
0x1090   :  { %11274 = vpow2.f32 %v1680_v9 }
0x1091   :  { %11276 = vpow2.f32 %v1682_v26 }
0x1092   :  { %11278 = vpow2.f32 %v1684_v56  ;;  %v14480_v56 = vld [vmem:[#allocation69_spill] sm:$0xff] }
0x1093   :  { %11280 = vpow2.f32 %v1686_v59  ;;  %v14481_v59 = vld [vmem:[#allocation70_spill] sm:$0xff] }
0x1094   :  { %11282 = vpow2.f32 %v1688_v18  ;;  %v14482_v18 = vld [vmem:[#allocation71_spill] sm:$0xff] }
0x1097   :  { %v11269_v57 = vpop.eup %11268 }
0x1098   :  { %v11271_v17 = vpop.eup %11270 }
0x1099   :  { %v1690_v27 = vadd.f32 %v11271_v17, %v11269_v57  ;;  %v11273_v23 = vpop.eup %11272 }
0x109a   :  { %v11275_v37 = vpop.eup %11274 }
0x109b   :  { %v1691_v28 = vadd.f32 %v11273_v23, %v1690_v27  ;;  %v11277_v32 = vpop.eup %11276  ;;  %v14485_v27 = vld [vmem:[#allocation74_spill] sm:$0xff] }
0x109c   :  { %v11279_v15 = vpop.eup %11278 }
0x109d   :  { %v1692_v20 = vadd.f32 %v11275_v37, %v1691_v28  ;;  %v11281_v39 = vpop.eup %11280  ;;  %v14487_v28 = vld [vmem:[#allocation76_spill] sm:$0xff] }
0x109e   :  { %v11283_v19 = vpop.eup %11282 }
0x109f   :  { %v1693_v13 = vadd.f32 %v11277_v32, %v1692_v20  ;;  %v14489_v20 = vld [vmem:[#allocation78_spill] sm:$0xff] }
0x10a1   :  { %v1694_v35 = vadd.f32 %v11279_v15, %v1693_v13  ;;  %v14491_v13 = vld [vmem:[#allocation80_spill] sm:$0xff] }
0x10a3   :  { %v1695_v58 = vadd.f32 %v11281_v39, %v1694_v35  ;;  %v14493_v35 = vld [vmem:[#allocation82_spill] sm:$0xff] }
0x10a5   :  { %v1696_v26 = vadd.f32 %v11283_v19, %v1695_v58  ;;  %v14495_v58 = vld [vmem:[#allocation88_spill] sm:$0xff] }
0x10a7   :  { %1697 = vadd.xlane.f32.xlu1 %v1696_v26  ;;  %v14497_v26 = vld [vmem:[#allocation8_spill] sm:$0xff] }
0x10b8   :  { %2080 = vrot.lane.b32.xlu1 %v12735_v11, %s11586_s17  ;;  %v14479_v11 = vld [vmem:[#allocation68_spill] sm:$0xff] }
0x1134   :  { %v1698_v6 = vpop.xlane.xlu1 %1697 }
0x1135   :  { %11284 = vrcp.f32 %v1698_v6  ;;  %v14498_v6 = vld [vmem:[#allocation90_spill] sm:$0xff] }
0x113f   :  { %v11285_v60 = vpop.eup %11284 }
0x1140   :  { %v1701_v1 = vmul.f32 %v11285_v60, %v11271_v17  ;;  %v1703_v12 = vmul.f32 %v11285_v60, %v11275_v37  ;;  %v1700_v40 = vmul.f32 %v11285_v60, %v11269_v57  ;;  %v1702_v53 = vmul.f32 %v11285_v60, %v11273_v23  ;;  %v14483_v57 = vld [vmem:[#allocation72_spill] sm:$0xff]  ;;  %v14484_v17 = vld [vmem:[#allocation73_spill] sm:$0xff]  ;;  %v14486_v23 = vld [vmem:[#allocation75_spill] sm:$0xff] }
0x1141   :  { %v1705_v52 = vmul.f32 %v11285_v60, %v11279_v15  ;;  %v1707_v48 = vmul.f32 %v11285_v60, %v11283_v19  ;;  %v1704_v9 = vmul.f32 %v11285_v60, %v11277_v32  ;;  %v1706_v2 = vmul.f32 %v11285_v60, %v11281_v39  ;;  %v14488_v37 = vld [vmem:[#allocation77_spill] sm:$0xff]  ;;  %v14490_v32 = vld [vmem:[#allocation79_spill] sm:$0xff] }
0x1142   :  { %1772 = vmatprep.mubr.f32.mxu0 %v1701_v1  ;;  %2071 = vst [vmem:[#allocation4 + $0x48] sm:$0xff] %v1701_v1  ;;  %1842 = vmatprep.mubr.f32.mxu1 %v1703_v12  ;;  %2073 = vst [vmem:[#allocation4 + $0x58] sm:$0xff] %v1703_v12  ;;  %v14492_v15 = vld [vmem:[#allocation81_spill] sm:$0xff]  ;;  %v14494_v39 = vld [vmem:[#allocation87_spill] sm:$0xff] }
0x1143   :  { %2070 = vst [vmem:[#allocation4 + $0x40] sm:$0xff] %v1700_v40  ;;  %2072 = vst [vmem:[#allocation4 + $0x50] sm:$0xff] %v1702_v53  ;;  %1773 = vmatmul.mubr.f32.vlgmr.msra.gmra.mrb[14].mxu0 %v1700_v40  ;;  %1843 = vmatmul.mubr.f32.vlgmr.msra.gmra.mrb[20].mxu1 %v1702_v53  ;;  %v14496_v19 = vld [vmem:[#allocation89_spill] sm:$0xff]  ;;  %v14500_v1 = vld [vmem:[#allocation91_spill] sm:$0xff] }
0x1144   :  { %2075 = vst [vmem:[#allocation4 + $0x68] sm:$0xff] %v1705_v52  ;;  %2077 = vst [vmem:[#allocation4 + $0x78] sm:$0xff] %v1707_v48  ;;  %9922 = vmatpush3.bf16.msra.mxu0 %v12360_v34  ;;  %9954 = vmatpush3.bf16.msra.mxu1 %v12362_v25  ;;  %v14499_v60 = vld [vmem:[#allocation9_spill] sm:$0xff]  ;;  %v14501_v12 = vld [vmem:[#allocation10_spill] sm:$0xff] }
0x1145   :  { %2074 = vst [vmem:[#allocation4 + $0x60] sm:$0xff] %v1704_v9  ;;  %2076 = vst [vmem:[#allocation4 + $0x70] sm:$0xff] %v1706_v2  ;;  %1912 = vmatprep.mubr.f32.mxu0 %v1705_v52  ;;  %1982 = vmatprep.mubr.f32.mxu1 %v1707_v48  ;;  %v14502_v40 = vld [vmem:[#allocation92_spill] sm:$0xff]  ;;  %v14503_v53 = vld [vmem:[#allocation11_spill] sm:$0xff] }
0x1146   :  { %9924 = vmatprep.subr.bf16.mxu0 %v12400_v33  ;;  %9956 = vmatprep.subr.bf16.mxu1 %v12402_v24  ;;  %v14504_v52 = vld [vmem:[#allocation93_spill] sm:$0xff]  ;;  %v14505_v48 = vld [vmem:[#allocation12_spill] sm:$0xff] }
0x1148   :  { %9926 = vmatpush3.bf16.msra.mxu0 %v12417_v0  ;;  %9958 = vmatpush3.bf16.msra.mxu1 %v12419_v63 }
0x1149   :  { %9928 = vmatprep.subr.bf16.mxu0 %v14479_v11  ;;  %9960 = vmatprep.subr.bf16.mxu1 %v14480_v56 }
0x114c   :  { %9930 = vmatpush3.bf16.msra.mxu0 %v14481_v59  ;;  %9962 = vmatpush3.bf16.msra.mxu1 %v14482_v18 }
0x114d   :  { %9932 = vmatprep.subr.bf16.mxu0 %v14483_v57  ;;  %9964 = vmatprep.subr.bf16.mxu1 %v14484_v17 }
0x1150   :  { %9934 = vmatpush3.bf16.msra.mxu0 %v14485_v27  ;;  %9966 = vmatpush3.bf16.msra.mxu1 %v14486_v23 }
0x1151   :  { %9936 = vmatprep.subr.bf16.mxu0 %v14487_v28  ;;  %9968 = vmatprep.subr.bf16.mxu1 %v14488_v37 }
0x1154   :  { %9938 = vmatpush3.bf16.msra.mxu0 %v14489_v20  ;;  %9970 = vmatpush3.bf16.msra.mxu1 %v14490_v32 }
0x1155   :  { %9940 = vmatprep.subr.bf16.mxu0 %v14491_v13  ;;  %9972 = vmatprep.subr.bf16.mxu1 %v14492_v15 }
0x1158   :  { %9942 = vmatpush3.bf16.msra.mxu0 %v12561_v49  ;;  %9974 = vmatpush3.bf16.msra.mxu1 %v14493_v35 }
0x1159   :  { %9944 = vmatprep.subr.bf16.mxu0 %v12573_v10  ;;  %9976 = vmatprep.subr.bf16.mxu1 %v12575_v16  ;;  %v2081_v16 = vpop.permute.xlu1 %2080 }
0x115c   :  { %9946 = vmatpush3.bf16.msra.mxu0 %v12597_v3  ;;  %9978 = vmatpush3.bf16.msra.mxu1 %v12599_v45 }
0x115d   :  { %9948 = vmatprep.subr.bf16.mxu0 %v12606_v36  ;;  %9980 = vmatprep.subr.bf16.mxu1 %v14494_v39 }
0x1160   :  { %9950 = vmatpush3.bf16.msra.mxu0 %v14495_v58  ;;  %9982 = vmatpush3.bf16.msra.mxu1 %v14496_v19 }
0x1161   :  { %9995 = vmatprep.subr.bf16.mxu1 %v14440_v50  ;;  %9983 = vmatprep.subr.bf16.mxu0 %v14440_v50 }
0x1163   :  { %1913 = vmatmul.mubr.f32.vlgmr.msra.gmra.mrb[16].mxu0 %v1704_v9  ;;  %1983 = vmatmul.mubr.f32.vlgmr.msra.gmra.mrb[22].mxu1 %v1706_v2  ;;  %v14506_v9 = vld [vmem:[#allocation13_spill] sm:$0xff]  ;;  %v14507_v2 = vld [vmem:[#allocation18_spill] sm:$0xff] }
0x1164   :  { %9997 = vmatpush3.bf16.msra.mxu1 %v14497_v26  ;;  %9985 = vmatpush3.bf16.msra.mxu0 %v14498_v6 }
0x1165   :  { %9998 = vmatprep.subr.bf16.mxu1 %v14440_v50  ;;  %9986 = vmatprep.subr.bf16.mxu0 %v14440_v50 }
0x1166   :  { %9198 = vmatprep.mubr.msk.f32.mxu0 %vm11583_vm0, %v14441_v41  ;;  %9225 = vmatprep.mubr.msk.f32.mxu1 %vm11583_vm0, %v14441_v41 }
0x1168   :  { %10000 = vmatpush3.bf16.msra.mxu1 %v14499_v60  ;;  %9988 = vmatpush3.bf16.msra.mxu0 %v14500_v1 }
0x1169   :  { %10001 = vmatprep.subr.bf16.mxu1 %v14440_v50  ;;  %9989 = vmatprep.subr.bf16.mxu0 %v14440_v50 }
0x116c   :  { %10003 = vmatpush3.bf16.msra.mxu1 %v14501_v12  ;;  %9991 = vmatpush3.bf16.msra.mxu0 %v14502_v40 }
0x116d   :  { %10004 = vmatprep.subr.bf16.mxu1 %v14440_v50  ;;  %9992 = vmatprep.subr.bf16.mxu0 %v14440_v50 }
0x1170   :  { %10006 = vmatpush3.bf16.msra.mxu1 %v14503_v53  ;;  %9994 = vmatpush3.bf16.msra.mxu0 %v14504_v52 }
0x1171   :  { %10007 = vmatprep.subr.bf16.mxu1 %v14440_v50  ;;  %10013 = vmatprep.subr.bf16.mxu0 %v14440_v50 }
0x1174   :  { %10009 = vmatpush3.bf16.msra.mxu1 %v14505_v48 }
0x1175   :  { %10010 = vmatprep.subr.bf16.mxu1 %v14440_v50 }
0x1178   :  { %10012 = vmatpush3.bf16.msra.mxu1 %v14506_v9 }
0x1179   :  { %10026 = vmatprep.subr.bf16.mxu1 %v14507_v2  ;;  %v7643_v2 = vld [vmem:[%s14118_s0 + $0x10] sm:$0xff] }
0x1216   :  { %v7928_v40 = vpop.f32.mrb[14].mxu0  ;;  %v7963_v12 = vpop.f32.mrb[20].mxu1 }
0x1217   :  { %v7929_v1 = vpop.f32.mrb[15].mxu0  ;;  %v7964_v60 = vpop.f32.mrb[21].mxu1 }
0x1218   :  { %v7930_v6 = vadd.f32 %v7929_v1, %v7928_v40  ;;  %v7965_v53 = vadd.f32 %v7964_v60, %v7963_v12 }
0x121a   :  { %v1845_v26 = vadd.f32 %v7965_v53, %v7930_v6 }
0x1236   :  { %v7998_v52 = vpop.f32.mrb[16].mxu0  ;;  %v8033_v19 = vpop.f32.mrb[22].mxu1 }
0x1237   :  { %v7999_v58 = vpop.f32.mrb[17].mxu0  ;;  %v8034_v39 = vpop.f32.mrb[23].mxu1 }
0x1238   :  { %v8000_v36 = vadd.f32 %v7999_v58, %v7998_v52  ;;  %v8035_v45 = vadd.f32 %v8034_v39, %v8033_v19 }
0x123a   :  { %v1915_v48 = vadd.f32 %v8000_v36, %v1845_v26 }
0x123c   :  { %v1985_v3 = vadd.f32 %v8035_v45, %v1915_v48 }
0x123e   :  { %1990 = vrot.lane.b32.xlu0 %v1985_v3, %s11581_s27 }
0x12b0   :  { %v1991_v9 = vpop.permute.xlu0 %1990 }
0x12b1   :  { %v1993_v60 = vsel %vm247_vm1, %v12763_v46, %v1991_v9  ;;  %v2083_v6 = vsel %vm247_vm1, %v7643_v2, %v1991_v9 }
0x12b2   :  { %v2084_v1 = vsel %vm249_vm2, %v2083_v6, %v2081_v16  ;;  %9199 = vmatmul.mubr.msk.f32.vlgmr.msra.gmra.mrb[18].mxu0 %vm249_vm2, %v1993_v60 }
0x12b3   :  { %9226 = vmatmul.mubr.msk.f32.vlgmr.msra.gmra.mrb[24].mxu1 %vm251_vm3, %v2084_v1  ;;  %10015 = vmatpush3.bf16.msra.mxu0 %v11750_v42 }
0x12b4   :  { %10016 = vmatprep.subr.bf16.mxu0 %v14440_v50  ;;  %9244 = vmatprep.mubr.msk.f32.mxu0 %vm11583_vm0, %v14441_v41 }
0x12b5   :  { %10028 = vmatpush1.bf16.msra.mxu1 %v11816_v21  ;;  %2356 = vmatprep.mubr.f32.mxu1 %v14441_v41 }
0x12b6   :  { %10030 = vmatprep.subr.bf16.mxu1 %v11843_v30 }
0x12b7   :  { %10018 = vmatpush3.bf16.msra.mxu0 %v11756_v44 }
0x12b8   :  { %10019 = vmatprep.subr.bf16.mxu0 %v14440_v50 }
0x12b9   :  { %10032 = vmatpush1.bf16.msra.mxu1 %v11845_v31 }
0x12ba   :  { %10042 = vmatprep.subr.bf16.mxu1 %v11921_v62 }
0x12bb   :  { %10021 = vmatpush3.bf16.msra.mxu0 %v11766_v47 }
0x12bc   :  { %10022 = vmatprep.subr.bf16.mxu0 %v14440_v50 }
0x12bf   :  { %10024 = vmatpush3.bf16.msra.mxu0 %v11777_v51 }
0x12c0   :  { %10034 = vmatprep.subr.bf16.mxu0 %v11875_v43 }
0x1385   :  { %v2063_v36 = vpop.f32.mrb[18].mxu0 }
0x1386   :  { %v2064_v16 = vadd.f32 %v2063_v36, %v12717_v4  ;;  %v9200_v3 = vpop.f32.mrb[19].mxu0  ;;  %v2154_v45 = vpop.f32.mrb[24].mxu1 }
0x1387   :  { %v2155_v46 = vadd.f32 %v12723_v29, %v2154_v45  ;;  %v9227_v39 = vpop.f32.mrb[25].mxu1 }
0x1388   :  { %2068 = vst [vmem:[#allocation2 + $0x8] sm:$0xff] %v2064_v16 }
0x1389   :  { %11286 = vtanh.f32 %v2155_v46  ;;  %v7645_v19 = vmul.f32 -1.442695, %v2155_v46 }
0x138b   :  { %11288 = vpow2.f32 %v7645_v19 }
0x1393   :  { %v11287_v58 = vpop.eup %11286 }
0x1394   :  { %2167 = vrot.lane.b32.xlu0 %v11287_v58, %s11585_s14 }
0x1395   :  { %v11289_v26 = vpop.eup %11288 }
0x1396   :  { %v2161_v12 = vadd.f32 1.0, %v11289_v26 }
0x1398   :  { %11290 = vrcp.f32 %v2161_v12 }
0x13a2   :  { %v11291_v40 = vpop.eup %11290 }
0x13a3   :  { %v2165_v4 = vmul.f32 %v11291_v40, %v12729_v14 }
0x1406   :  { %v2168_v53 = vpop.permute.xlu0 %2167 }
0x1407   :  { %v2170_v52 = vmul.f32 %v11291_v40, %v2168_v53 }
0x1409   :  { %2172 = vrot.lane.b32.xlu1 %v2170_v52, %s11581_s27 }
0x147b   :  { %v2173_v48 = vpop.permute.xlu1 %2172 }
0x147c   :  { %v12951_v29 = vadd.f32 %v2173_v48, %v2165_v4 }
0x147e   :  { %11292 = vtanh.f32 %v12951_v29 }
0x1488   :  { %v11293_v9 = vpop.eup %11292 }
0x1489   :  { %2178 = vrot.lane.b32.xlu0 %v11293_v9, %s11585_s14  ;;  %v14511_v9 = vld [vmem:[#allocation32_spill] sm:$0xff] }
0x148d   :  { %2186 = vrot.lane.b32.xlu0 %v12759_v38, %s11585_s14 }
0x14fb   :  { %v2179_v2 = vpop.permute.xlu0 %2178 }
0x14fc   :  { %v12957_v60 = vmul.f32 %v11291_v40, %v2179_v2  ;;  %v14512_v2 = vld [vmem:[#allocation24_spill] sm:$0xff] }
0x14fe   :  { %2183 = vrot.lane.b32.xlu1 %v12957_v60, %s11581_s27 }
0x14ff   :  { %v2187_v6 = vpop.permute.xlu0 %2186 }
0x1570   :  { %v2184_v1 = vpop.permute.xlu1 %2183 }
0x1571   :  { %v2189_v14 = vsel %vm247_vm1, %v2184_v1, %v2187_v6  ;;  %v14513_v6 = vld [vmem:[#allocation33_spill] sm:$0xff] }
0x1572   :  { %9245 = vmatmul.mubr.msk.f32.vlgmr.msra.gmra.mrb[20].mxu0 %vm249_vm2, %v2189_v14  ;;  %v14514_v1 = vld [vmem:[#allocation25_spill] sm:$0xff]  ;;  %v14515_v14 = vld [vmem:[#allocation34_spill] sm:$0xff] }
0x1573   :  { %10036 = vmatpush1.bf16.msra.mxu0 %v11894_v54  ;;  %2427 = vmatprep.mubr.f32.mxu0 %v14441_v41 }
0x1574   :  { %10038 = vmatprep.subr.bf16.mxu0 %v11896_v55 }
0x1577   :  { %10040 = vmatpush1.bf16.msra.mxu0 %v11917_v61 }
0x1578   :  { %10050 = vmatprep.subr.bf16.mxu0 %v11818_v22  ;;  %v14556_v22 = vld [vmem:[#allocation101_spill] sm:$0xff] }
0x1645   :  { %v2259_v38 = vpop.f32.mrb[20].mxu0 }
0x1646   :  { %v2260_v36 = vadd.f32 %v12749_v7, %v2259_v38  ;;  %v9246_v16 = vpop.f32.mrb[21].mxu0  ;;  %v14516_v38 = vld [vmem:[#allocation35_spill] sm:$0xff] }
0x1647   :  { %v14518_v16 = vld [vmem:[#allocation37_spill] sm:$0xff] }
0x1648   :  { %11294 = vtanh.f32 %v2260_v36  ;;  %v7647_v45 = vmul.f32 -1.442695, %v2260_v36  ;;  %v14517_v36 = vld [vmem:[#allocation36_spill] sm:$0xff] }
0x164a   :  { %11296 = vpow2.f32 %v7647_v45  ;;  %v14520_v45 = vld [vmem:[#allocation39_spill] sm:$0xff] }
0x1652   :  { %v11295_v3 = vpop.eup %11294 }
0x1653   :  { %2272 = vrot.lane.b32.xlu1 %v11295_v3, %s11585_s14  ;;  %v14519_v3 = vld [vmem:[#allocation38_spill] sm:$0xff] }
0x1654   :  { %v11297_v46 = vpop.eup %11296 }
0x1655   :  { %v2266_v39 = vadd.f32 1.0, %v11297_v46  ;;  %v14521_v46 = vld [vmem:[#allocation40_spill] sm:$0xff] }
0x1657   :  { %11298 = vrcp.f32 %v2266_v39  ;;  %v14522_v39 = vld [vmem:[#allocation41_spill] sm:$0xff] }
0x1661   :  { %v11299_v58 = vpop.eup %11298 }
0x1662   :  { %v2270_v12 = vmul.f32 %v11299_v58, %v12755_v8  ;;  %v14510_v8 = vld [vmem:[#allocation21_spill] sm:$0xff] }
0x16c5   :  { %v2273_v19 = vpop.permute.xlu1 %2272 }
0x16c6   :  { %v2275_v26 = vmul.f32 %v11299_v58, %v2273_v19  ;;  %v14524_v19 = vld [vmem:[#allocation43_spill] sm:$0xff] }
0x16c8   :  { %2277 = vrot.lane.b32.xlu0 %v2275_v26, %s11581_s27  ;;  %v14525_v26 = vld [vmem:[#allocation44_spill] sm:$0xff] }
0x173a   :  { %v2278_v40 = vpop.permute.xlu0 %2277 }
0x173b   :  { %v12972_v53 = vadd.f32 %v2278_v40, %v2270_v12  ;;  %v14526_v12 = vld [vmem:[#allocation45_spill] sm:$0xff]  ;;  %v14527_v40 = vld [vmem:[#allocation46_spill] sm:$0xff] }
0x173d   :  { %14508 = vst [vmem:[#allocation68_spill] sm:$0xff] %v12972_v53  ;;  %11300 = vtanh.f32 %v12972_v53 }
0x1747   :  { %v11301_v7 = vpop.eup %11300 }
0x1748   :  { %2283 = vrot.lane.b32.xlu1 %v11301_v7, %s11585_s14  ;;  %v14528_v7 = vld [vmem:[#allocation47_spill] sm:$0xff] }
0x17ba   :  { %v2284_v52 = vpop.permute.xlu1 %2283 }
0x17bb   :  { %v12976_v4 = vmul.f32 %v11299_v58, %v2284_v52  ;;  %v14523_v58 = vld [vmem:[#allocation42_spill] sm:$0xff]  ;;  %v14529_v52 = vld [vmem:[#allocation48_spill] sm:$0xff] }
0x17bd   :  { %14509 = vst [vmem:[#allocation69_spill] sm:$0xff] %v12976_v4  ;;  %2288 = vrot.lane.b32.xlu0 %v12976_v4, %s11581_s27 }
0x182f   :  { %v12980_v48 = vpop.permute.xlu0 %2288 }
0x1830   :  { %7648 = vmatmul.mubr.msk.f32.vlgmr.msra.gmra.mrb[26].mxu1 %vm247_vm1, %v12980_v48  ;;  %7649 = vmatmul.mubr.msk.f32.vlgmr.msra.gmra.mrb[22].mxu0 %vm247_vm1, %v12980_v48 }
0x1831   :  { %10044 = vmatpush1.bf16.msra.mxu1 %v11936_v5  ;;  %10052 = vmatpush1.bf16.msra.mxu0 %v14510_v8  ;;  %v14554_v8 = vld [vmem:[#allocation99_spill] sm:$0xff]  ;;  %v14555_v5 = vld [vmem:[#allocation100_spill] sm:$0xff] }
0x1832   :  { %10046 = vmatprep.subr.bf16.mxu1 %v14511_v9  ;;  %10054 = vmatprep.subr.bf16.mxu0 %v14512_v2  ;;  %v14553_v9 = vld [vmem:[#allocation98_spill] sm:$0xff] }
0x1833   :  { %2498 = vmatprep.mubr.f32.mxu1 %v14441_v41  ;;  %2569 = vmatprep.mubr.f32.mxu0 %v14441_v41 }
0x1835   :  { %10048 = vmatpush1.bf16.msra.mxu1 %v14513_v6  ;;  %10056 = vmatpush1.bf16.msra.mxu0 %v14514_v1  ;;  %v14551_v1 = vld [vmem:[#allocation96_spill] sm:$0xff]  ;;  %v14552_v6 = vld [vmem:[#allocation97_spill] sm:$0xff] }
0x1836   :  { %10058 = vmatprep.subr.bf16.mxu1 %v14515_v14  ;;  %10090 = vmatprep.subr.bf16.mxu0 %v14516_v38  ;;  %v14549_v38 = vld [vmem:[#allocation94_spill] sm:$0xff]  ;;  %v14550_v14 = vld [vmem:[#allocation95_spill] sm:$0xff] }
0x1838   :  { %7650 = vmatmul.mubr.msk.f32.vlgmr.msra.gmra.mrb[28].mxu1 %vm247_vm1, %v12980_v48  ;;  %7651 = vmatmul.mubr.msk.f32.vlgmr.msra.gmra.mrb[24].mxu0 %vm247_vm1, %v12980_v48 }
0x1839   :  { %10060 = vmatpush3.bf16.msra.mxu1 %v14517_v36  ;;  %10092 = vmatpush3.bf16.msra.mxu0 %v14518_v16 }
0x183a   :  { %10062 = vmatprep.subr.bf16.mxu1 %v14519_v3  ;;  %10094 = vmatprep.subr.bf16.mxu0 %v14520_v45  ;;  %v14530_v3 = vld [vmem:[#allocation49_spill] sm:$0xff]  ;;  %v14531_v45 = vld [vmem:[#allocation50_spill] sm:$0xff] }
0x183d   :  { %10064 = vmatpush3.bf16.msra.mxu1 %v14521_v46  ;;  %10096 = vmatpush3.bf16.msra.mxu0 %v14522_v39  ;;  %v14532_v46 = vld [vmem:[#allocation51_spill] sm:$0xff]  ;;  %v14533_v39 = vld [vmem:[#allocation52_spill] sm:$0xff] }
0x183e   :  { %10066 = vmatprep.subr.bf16.mxu1 %v14523_v58  ;;  %10098 = vmatprep.subr.bf16.mxu0 %v14524_v19  ;;  %v14534_v58 = vld [vmem:[#allocation53_spill] sm:$0xff]  ;;  %v14535_v19 = vld [vmem:[#allocation54_spill] sm:$0xff] }
0x1841   :  { %10068 = vmatpush3.bf16.msra.mxu1 %v14525_v26  ;;  %10100 = vmatpush3.bf16.msra.mxu0 %v14526_v12  ;;  %v14536_v26 = vld [vmem:[#allocation55_spill] sm:$0xff]  ;;  %v14537_v12 = vld [vmem:[#allocation56_spill] sm:$0xff] }
0x1842   :  { %10070 = vmatprep.subr.bf16.mxu1 %v14527_v40  ;;  %10102 = vmatprep.subr.bf16.mxu0 %v14528_v7  ;;  %v14538_v40 = vld [vmem:[#allocation57_spill] sm:$0xff]  ;;  %v14539_v7 = vld [vmem:[#allocation58_spill] sm:$0xff] }
0x1845   :  { %10072 = vmatpush3.bf16.msra.mxu1 %v14529_v52  ;;  %10104 = vmatpush3.bf16.msra.mxu0 %v14530_v3  ;;  %v14540_v52 = vld [vmem:[#allocation59_spill] sm:$0xff]  ;;  %v14541_v3 = vld [vmem:[#allocation60_spill] sm:$0xff] }
0x1846   :  { %10074 = vmatprep.subr.bf16.mxu1 %v14531_v45  ;;  %10106 = vmatprep.subr.bf16.mxu0 %v14532_v46  ;;  %v14542_v45 = vld [vmem:[#allocation61_spill] sm:$0xff]  ;;  %v14543_v46 = vld [vmem:[#allocation62_spill] sm:$0xff] }
0x1849   :  { %10076 = vmatpush3.bf16.msra.mxu1 %v14533_v39  ;;  %10108 = vmatpush3.bf16.msra.mxu0 %v14534_v58  ;;  %v14544_v39 = vld [vmem:[#allocation63_spill] sm:$0xff]  ;;  %v14545_v58 = vld [vmem:[#allocation64_spill] sm:$0xff] }
0x184a   :  { %10078 = vmatprep.subr.bf16.mxu1 %v14535_v19  ;;  %10110 = vmatprep.subr.bf16.mxu0 %v14536_v26  ;;  %v14546_v19 = vld [vmem:[#allocation65_spill] sm:$0xff]  ;;  %v14547_v26 = vld [vmem:[#allocation66_spill] sm:$0xff] }
0x184d   :  { %10080 = vmatpush3.bf16.msra.mxu1 %v14537_v12  ;;  %10112 = vmatpush3.bf16.msra.mxu0 %v14538_v40  ;;  %v14548_v12 = vld [vmem:[#allocation67_spill] sm:$0xff] }
0x184e   :  { %10082 = vmatprep.subr.bf16.mxu1 %v14539_v7  ;;  %10114 = vmatprep.subr.bf16.mxu0 %v14540_v52 }
0x1851   :  { %10084 = vmatpush3.bf16.msra.mxu1 %v14541_v3  ;;  %10116 = vmatpush3.bf16.msra.mxu0 %v14542_v45 }
0x1852   :  { %10086 = vmatprep.subr.bf16.mxu1 %v14543_v46  ;;  %10118 = vmatprep.subr.bf16.mxu0 %v14544_v39 }
0x1855   :  { %10088 = vmatpush3.bf16.msra.mxu1 %v14545_v58  ;;  %10120 = vmatpush3.bf16.msra.mxu0 %v14546_v19 }
0x1856   :  { %10122 = vmatprep.subr.bf16.mxu1 %v14547_v26  ;;  %10154 = vmatprep.subr.bf16.mxu0 %v14548_v12 }
0x1903   :  { %v2358_v40 = vpop.f32.mrb[26].mxu1  ;;  %v2429_v7 = vpop.f32.mrb[22].mxu0 }
0x1904   :  { %v2360_v16 = vpop.f32.mrb[27].mxu1  ;;  %v2431_v52 = vpop.f32.mrb[23].mxu0  ;;  %v2359_v45 = vadd.f32 %v14549_v38, %v2358_v40  ;;  %v2430_v46 = vadd.f32 %v14550_v14, %v2429_v7 }
0x1905   :  { %v2361_v26 = vadd.f32 %v14553_v9, %v2360_v16  ;;  %v2432_v12 = vadd.f32 %v14554_v8, %v2431_v52 }
0x190b   :  { %v2500_v36 = vpop.f32.mrb[28].mxu1  ;;  %v2571_v3 = vpop.f32.mrb[24].mxu0 }
0x190c   :  { %v2501_v39 = vadd.f32 %v14551_v1, %v2500_v36  ;;  %v2572_v58 = vadd.f32 %v14552_v6, %v2571_v3  ;;  %v2502_v2 = vpop.f32.mrb[29].mxu1  ;;  %v2573_v19 = vpop.f32.mrb[25].mxu0 }
0x190d   :  { %v2503_v53 = vadd.f32 %v14555_v5, %v2502_v2  ;;  %v2574_v61 = vadd.f32 %v14556_v22, %v2573_v19 }
0x190e   :  { %v2576_v55 = vmax.f32 %v2359_v45, %v2501_v39  ;;  %v2578_v54 = vmax.f32 %v2430_v46, %v2572_v58 }
0x190f   :  { %v2577_v4 = vmax.f32 %v2361_v26, %v2503_v53  ;;  %v2579_v38 = vmax.f32 %v2432_v12, %v2574_v61 }
0x1911   :  { %v2580_v40 = vmax.f32 %v2576_v55, %v2577_v4  ;;  %v2581_v14 = vmax.f32 %v2578_v54, %v2579_v38 }
0x1913   :  { %v2582_v7 = vmax.f32 %v2580_v40, %v2581_v14 }
0x1915   :  { %2583 = vmax.xlane.f32.xlu1 %v2582_v7 }
0x1926   :  { %2999 = vrot.lane.b32.xlu1 %v12957_v60, %s11586_s17 }
0x19a2   :  { %v2584_v6 = vpop.xlane.xlu1 %2583 }
0x19a3   :  { %v2585_v1 = vsub.f32 %v2359_v45, %v2584_v6  ;;  %v2586_v9 = vsub.f32 %v2361_v26, %v2584_v6  ;;  %v2587_v36 = vsub.f32 %v2430_v46, %v2584_v6  ;;  %v2588_v8 = vsub.f32 %v2432_v12, %v2584_v6 }
0x19a4   :  { %v2589_v22 = vsub.f32 %v2501_v39, %v2584_v6  ;;  %v2590_v19 = vsub.f32 %v2503_v53, %v2584_v6  ;;  %v2591_v54 = vsub.f32 %v2572_v58, %v2584_v6  ;;  %v2592_v4 = vsub.f32 %v2574_v61, %v2584_v6 }
0x19a5   :  { %v2593_v16 = vmul.f32 1.442695, %v2585_v1  ;;  %v2595_v5 = vmul.f32 1.442695, %v2586_v9  ;;  %v2597_v2 = vmul.f32 1.442695, %v2587_v36 }
0x19a6   :  { %v2599_v3 = vmul.f32 1.442695, %v2588_v8  ;;  %v2601_v55 = vmul.f32 1.442695, %v2589_v22  ;;  %v2603_v52 = vmul.f32 1.442695, %v2590_v19 }
0x19a7   :  { %11302 = vpow2.f32 %v2593_v16  ;;  %v2605_v60 = vmul.f32 1.442695, %v2591_v54  ;;  %v2607_v45 = vmul.f32 1.442695, %v2592_v4 }
0x19a8   :  { %11304 = vpow2.f32 %v2595_v5 }
0x19a9   :  { %11306 = vpow2.f32 %v2597_v2 }
0x19aa   :  { %11308 = vpow2.f32 %v2599_v3 }
0x19ab   :  { %11310 = vpow2.f32 %v2601_v55 }
0x19ac   :  { %11312 = vpow2.f32 %v2603_v52  ;;  %v14557_v52 = vld [vmem:[#allocation83_spill] sm:$0xff] }
0x19ad   :  { %11314 = vpow2.f32 %v2605_v60  ;;  %v14558_v60 = vld [vmem:[#allocation84_spill] sm:$0xff] }
0x19ae   :  { %11316 = vpow2.f32 %v2607_v45  ;;  %v14559_v45 = vld [vmem:[#allocation85_spill] sm:$0xff] }
0x19b1   :  { %v11303_v46 = vpop.eup %11302 }
0x19b2   :  { %v11305_v26 = vpop.eup %11304 }
0x19b3   :  { %v2609_v12 = vadd.f32 %v11305_v26, %v11303_v46  ;;  %v11307_v38 = vpop.eup %11306 }
0x19b4   :  { %v11309_v40 = vpop.eup %11308 }
0x19b5   :  { %v2610_v39 = vadd.f32 %v11307_v38, %v2609_v12  ;;  %v11311_v53 = vpop.eup %11310  ;;  %v14562_v12 = vld [vmem:[#allocation88_spill] sm:$0xff] }
0x19b6   :  { %v11313_v58 = vpop.eup %11312 }
0x19b7   :  { %v2611_v14 = vadd.f32 %v11309_v40, %v2610_v39  ;;  %v11315_v61 = vpop.eup %11314  ;;  %v14564_v39 = vld [vmem:[#allocation8_spill] sm:$0xff] }
0x19b8   :  { %v11317_v9 = vpop.eup %11316 }
0x19b9   :  { %v2612_v7 = vadd.f32 %v11311_v53, %v2611_v14  ;;  %v14566_v14 = vld [vmem:[#allocation9_spill] sm:$0xff] }
0x19bb   :  { %v2613_v1 = vadd.f32 %v11313_v58, %v2612_v7  ;;  %v14568_v7 = vld [vmem:[#allocation10_spill] sm:$0xff] }
0x19bd   :  { %v2614_v6 = vadd.f32 %v11315_v61, %v2613_v1  ;;  %v14570_v1 = vld [vmem:[#allocation11_spill] sm:$0xff] }
0x19bf   :  { %v2615_v36 = vadd.f32 %v11317_v9, %v2614_v6  ;;  %v14572_v6 = vld [vmem:[#allocation12_spill] sm:$0xff] }
0x19c1   :  { %2616 = vadd.xlane.f32.xlu0 %v2615_v36  ;;  %v14574_v36 = vld [vmem:[#allocation18_spill] sm:$0xff] }
0x1a4e   :  { %v2617_v8 = vpop.xlane.xlu0 %2616 }
0x1a4f   :  { %11318 = vrcp.f32 %v2617_v8 }
0x1a59   :  { %v11319_v16 = vpop.eup %11318 }
0x1a5a   :  { %v2620_v5 = vmul.f32 %v11319_v16, %v11305_v26  ;;  %v2622_v2 = vmul.f32 %v11319_v16, %v11309_v40  ;;  %v2619_v22 = vmul.f32 %v11319_v16, %v11303_v46  ;;  %v2621_v3 = vmul.f32 %v11319_v16, %v11307_v38  ;;  %v14560_v46 = vld [vmem:[#allocation86_spill] sm:$0xff]  ;;  %v14561_v26 = vld [vmem:[#allocation87_spill] sm:$0xff]  ;;  %v14563_v38 = vld [vmem:[#allocation89_spill] sm:$0xff] }
0x1a5b   :  { %v2624_v19 = vmul.f32 %v11319_v16, %v11313_v58  ;;  %v2626_v54 = vmul.f32 %v11319_v16, %v11317_v9  ;;  %v2623_v55 = vmul.f32 %v11319_v16, %v11311_v53  ;;  %v2625_v4 = vmul.f32 %v11319_v16, %v11315_v61  ;;  %v14565_v40 = vld [vmem:[#allocation90_spill] sm:$0xff]  ;;  %v14567_v53 = vld [vmem:[#allocation91_spill] sm:$0xff]  ;;  %v14569_v58 = vld [vmem:[#allocation92_spill] sm:$0xff] }
0x1a5c   :  { %2691 = vmatprep.mubr.f32.mxu1 %v2620_v5  ;;  %2990 = vst [vmem:[#allocation4 + $0x88] sm:$0xff] %v2620_v5  ;;  %2761 = vmatprep.mubr.f32.mxu0 %v2622_v2  ;;  %2992 = vst [vmem:[#allocation4 + $0x98] sm:$0xff] %v2622_v2  ;;  %v14571_v61 = vld [vmem:[#allocation93_spill] sm:$0xff] }
0x1a5d   :  { %2989 = vst [vmem:[#allocation4 + $0x80] sm:$0xff] %v2619_v22  ;;  %2991 = vst [vmem:[#allocation4 + $0x90] sm:$0xff] %v2621_v3  ;;  %2692 = vmatmul.mubr.f32.vlgmr.msra.gmra.mrb[30].mxu1 %v2619_v22  ;;  %2762 = vmatmul.mubr.f32.vlgmr.msra.gmra.mrb[26].mxu0 %v2621_v3  ;;  %v14573_v9 = vld [vmem:[#allocation13_spill] sm:$0xff] }
0x1a5e   :  { %2994 = vst [vmem:[#allocation4 + $0xa8] sm:$0xff] %v2624_v19  ;;  %2996 = vst [vmem:[#allocation4 + $0xb8] sm:$0xff] %v2626_v54  ;;  %10124 = vmatpush3.bf16.msra.mxu1 %v12360_v34  ;;  %10156 = vmatpush3.bf16.msra.mxu0 %v12362_v25 }
0x1a5f   :  { %2993 = vst [vmem:[#allocation4 + $0xa0] sm:$0xff] %v2623_v55  ;;  %2995 = vst [vmem:[#allocation4 + $0xb0] sm:$0xff] %v2625_v4  ;;  %2831 = vmatprep.mubr.f32.mxu1 %v2624_v19  ;;  %2901 = vmatprep.mubr.f32.mxu0 %v2626_v54 }
0x1a60   :  { %10126 = vmatprep.subr.bf16.mxu1 %v12400_v33  ;;  %10158 = vmatprep.subr.bf16.mxu0 %v12402_v24 }
0x1a62   :  { %10128 = vmatpush3.bf16.msra.mxu1 %v12417_v0  ;;  %10160 = vmatpush3.bf16.msra.mxu0 %v12419_v63 }
0x1a63   :  { %10130 = vmatprep.subr.bf16.mxu1 %v14479_v11  ;;  %10162 = vmatprep.subr.bf16.mxu0 %v14480_v56 }
0x1a66   :  { %10132 = vmatpush3.bf16.msra.mxu1 %v14481_v59  ;;  %10164 = vmatpush3.bf16.msra.mxu0 %v14482_v18 }
0x1a67   :  { %10134 = vmatprep.subr.bf16.mxu1 %v14483_v57  ;;  %10166 = vmatprep.subr.bf16.mxu0 %v14484_v17 }
0x1a6a   :  { %10136 = vmatpush3.bf16.msra.mxu1 %v14485_v27  ;;  %10168 = vmatpush3.bf16.msra.mxu0 %v14486_v23 }
0x1a6b   :  { %10138 = vmatprep.subr.bf16.mxu1 %v14487_v28  ;;  %10170 = vmatprep.subr.bf16.mxu0 %v14488_v37 }
0x1a6e   :  { %10140 = vmatpush3.bf16.msra.mxu1 %v14489_v20  ;;  %10172 = vmatpush3.bf16.msra.mxu0 %v14490_v32 }
0x1a6f   :  { %10142 = vmatprep.subr.bf16.mxu1 %v14491_v13  ;;  %10174 = vmatprep.subr.bf16.mxu0 %v14492_v15 }
0x1a72   :  { %10144 = vmatpush3.bf16.msra.mxu1 %v12561_v49  ;;  %10176 = vmatpush3.bf16.msra.mxu0 %v14493_v35 }
0x1a73   :  { %10146 = vmatprep.subr.bf16.mxu1 %v12573_v10  ;;  %10178 = vmatprep.subr.bf16.mxu0 %v14557_v52 }
0x1a76   :  { %10148 = vmatpush3.bf16.msra.mxu1 %v14558_v60  ;;  %10180 = vmatpush3.bf16.msra.mxu0 %v14559_v45 }
0x1a77   :  { %10150 = vmatprep.subr.bf16.mxu1 %v14560_v46  ;;  %10182 = vmatprep.subr.bf16.mxu0 %v14561_v26 }
0x1a7a   :  { %10152 = vmatpush3.bf16.msra.mxu1 %v14562_v12  ;;  %10184 = vmatpush3.bf16.msra.mxu0 %v14563_v38 }
0x1a7b   :  { %10197 = vmatprep.subr.bf16.mxu0 %v14440_v50  ;;  %10185 = vmatprep.subr.bf16.mxu1 %v14440_v50 }
0x1a7d   :  { %2832 = vmatmul.mubr.f32.vlgmr.msra.gmra.mrb[32].mxu1 %v2623_v55  ;;  %2902 = vmatmul.mubr.f32.vlgmr.msra.gmra.mrb[28].mxu0 %v2625_v4 }
0x1a7e   :  { %10199 = vmatpush3.bf16.msra.mxu0 %v14564_v39  ;;  %10187 = vmatpush3.bf16.msra.mxu1 %v14565_v40 }
0x1a7f   :  { %10200 = vmatprep.subr.bf16.mxu0 %v14440_v50  ;;  %10188 = vmatprep.subr.bf16.mxu1 %v14440_v50 }
0x1a80   :  { %9263 = vmatprep.mubr.msk.f32.mxu1 %vm11583_vm0, %v14441_v41  ;;  %9290 = vmatprep.mubr.msk.f32.mxu0 %vm11583_vm0, %v14441_v41 }
0x1a82   :  { %10202 = vmatpush3.bf16.msra.mxu0 %v14566_v14  ;;  %10190 = vmatpush3.bf16.msra.mxu1 %v14567_v53  ;;  %v3000_v53 = vpop.permute.xlu1 %2999 }
0x1a83   :  { %10203 = vmatprep.subr.bf16.mxu0 %v14440_v50  ;;  %10191 = vmatprep.subr.bf16.mxu1 %v14440_v50 }
0x1a86   :  { %10205 = vmatpush3.bf16.msra.mxu0 %v14568_v7  ;;  %10193 = vmatpush3.bf16.msra.mxu1 %v14569_v58 }
0x1a87   :  { %10206 = vmatprep.subr.bf16.mxu0 %v14440_v50  ;;  %10194 = vmatprep.subr.bf16.mxu1 %v14440_v50 }
0x1a8a   :  { %10208 = vmatpush3.bf16.msra.mxu0 %v14570_v1  ;;  %10196 = vmatpush3.bf16.msra.mxu1 %v14571_v61 }
0x1a8b   :  { %10209 = vmatprep.subr.bf16.mxu0 %v14440_v50  ;;  %10215 = vmatprep.subr.bf16.mxu1 %v14440_v50 }
0x1a8e   :  { %10211 = vmatpush3.bf16.msra.mxu0 %v14572_v6 }
0x1a8f   :  { %10212 = vmatprep.subr.bf16.mxu0 %v14440_v50 }
0x1a92   :  { %10214 = vmatpush3.bf16.msra.mxu0 %v14573_v9 }
0x1a93   :  { %10228 = vmatprep.subr.bf16.mxu0 %v14574_v36  ;;  %v7653_v36 = vld [vmem:[%s14118_s0 + $0x18] sm:$0xff] }
0x1b30   :  { %v8099_v8 = vpop.f32.mrb[30].mxu1  ;;  %v8134_v16 = vpop.f32.mrb[26].mxu0 }
0x1b31   :  { %v8100_v5 = vpop.f32.mrb[31].mxu1  ;;  %v8135_v2 = vpop.f32.mrb[27].mxu0 }
0x1b32   :  { %v8101_v22 = vadd.f32 %v8100_v5, %v8099_v8  ;;  %v8136_v3 = vadd.f32 %v8135_v2, %v8134_v16 }
0x1b34   :  { %v2764_v19 = vadd.f32 %v8136_v3, %v8101_v22 }
0x1b50   :  { %v8169_v54 = vpop.f32.mrb[32].mxu1  ;;  %v8204_v55 = vpop.f32.mrb[28].mxu0 }
0x1b51   :  { %v8170_v4 = vpop.f32.mrb[33].mxu1  ;;  %v8205_v61 = vpop.f32.mrb[29].mxu0 }
0x1b52   :  { %v8171_v1 = vadd.f32 %v8170_v4, %v8169_v54  ;;  %v8206_v58 = vadd.f32 %v8205_v61, %v8204_v55  ;;  %v13132_v61 = vld [vmem:[%s14124_s6] sm:$0xff] }
0x1b53   :  { %14576 = vst [vmem:[#allocation71_spill] sm:$0xff] %v13132_v61 }
0x1b54   :  { %v2834_v6 = vadd.f32 %v8171_v1, %v2764_v19 }
0x1b56   :  { %v2904_v7 = vadd.f32 %v8206_v58, %v2834_v6 }
0x1b58   :  { %2909 = vrot.lane.b32.xlu0 %v2904_v7, %s11581_s27 }
0x1bca   :  { %v2910_v9 = vpop.permute.xlu0 %2909 }
0x1bcb   :  { %v2912_v8 = vsel %vm247_vm1, %v12980_v48, %v2910_v9  ;;  %v3002_v16 = vsel %vm247_vm1, %v7653_v36, %v2910_v9 }
0x1bcc   :  { %v3003_v5 = vsel %vm249_vm2, %v3002_v16, %v3000_v53  ;;  %9264 = vmatmul.mubr.msk.f32.vlgmr.msra.gmra.mrb[34].mxu1 %vm249_vm2, %v2912_v8  ;;  %v13126_v53 = vld [vmem:[%s14128_s10] sm:$0xff] }
0x1bcd   :  { %9291 = vmatmul.mubr.msk.f32.vlgmr.msra.gmra.mrb[30].mxu0 %vm251_vm3, %v3003_v5  ;;  %10217 = vmatpush3.bf16.msra.mxu1 %v11750_v42  ;;  %14575 = vst [vmem:[#allocation70_spill] sm:$0xff] %v13126_v53 }
0x1bce   :  { %10218 = vmatprep.subr.bf16.mxu1 %v14440_v50  ;;  %9309 = vmatprep.mubr.msk.f32.mxu1 %vm11583_vm0, %v14441_v41 }
0x1bcf   :  { %10230 = vmatpush1.bf16.msra.mxu0 %v11816_v21  ;;  %3275 = vmatprep.mubr.f32.mxu0 %v14441_v41 }
0x1bd0   :  { %10232 = vmatprep.subr.bf16.mxu0 %v11843_v30 }
0x1bd1   :  { %10220 = vmatpush3.bf16.msra.mxu1 %v11756_v44 }
0x1bd2   :  { %10221 = vmatprep.subr.bf16.mxu1 %v14440_v50 }
0x1bd3   :  { %10234 = vmatpush1.bf16.msra.mxu0 %v11845_v31 }
0x1bd4   :  { %10244 = vmatprep.subr.bf16.mxu0 %v11921_v62 }
0x1bd5   :  { %10223 = vmatpush3.bf16.msra.mxu1 %v11766_v47 }
0x1bd6   :  { %10224 = vmatprep.subr.bf16.mxu1 %v14440_v50 }
0x1bd9   :  { %10226 = vmatpush3.bf16.msra.mxu1 %v11777_v51 }
0x1bda   :  { %10236 = vmatprep.subr.bf16.mxu1 %v11875_v43 }
0x1c9f   :  { %v2982_v48 = vpop.f32.mrb[34].mxu1 }
0x1ca0   :  { %v2983_v7 = vadd.f32 %v13126_v53, %v2982_v48  ;;  %v9265_v58 = vpop.f32.mrb[35].mxu1  ;;  %v3073_v1 = vpop.f32.mrb[30].mxu0  ;;  %v14578_v48 = vld [vmem:[#allocation69_spill] sm:$0xff] }
0x1ca1   :  { %v3074_v6 = vadd.f32 %v13132_v61, %v3073_v1  ;;  %v9292_v9 = vpop.f32.mrb[31].mxu0 }
0x1ca2   :  { %2987 = vst [vmem:[#allocation2 + $0x10] sm:$0xff] %v2983_v7  ;;  %v14579_v9 = vld [vmem:[#allocation27_spill] sm:$0xff] }
0x1ca3   :  { %11320 = vtanh.f32 %v3074_v6  ;;  %v7655_v2 = vmul.f32 -1.442695, %v3074_v6 }
0x1ca5   :  { %11322 = vpow2.f32 %v7655_v2  ;;  %v14581_v2 = vld [vmem:[#allocation29_spill] sm:$0xff] }
0x1cad   :  { %v11321_v36 = vpop.eup %11320 }
0x1cae   :  { %3086 = vrot.lane.b32.xlu1 %v11321_v36, %s11585_s14  ;;  %v14580_v36 = vld [vmem:[#allocation28_spill] sm:$0xff] }
0x1caf   :  { %v11323_v22 = vpop.eup %11322 }
0x1cb0   :  { %v3080_v3 = vadd.f32 1.0, %v11323_v22  ;;  %v14582_v22 = vld [vmem:[#allocation20_spill] sm:$0xff] }
0x1cb2   :  { %11324 = vrcp.f32 %v3080_v3 }
0x1cbc   :  { %v11325_v19 = vpop.eup %11324 }
0x1cbd   :  { %v3084_v4 = vmul.f32 %v11325_v19, %v12951_v29 }
0x1d20   :  { %v3087_v54 = vpop.permute.xlu1 %3086 }
0x1d21   :  { %v3089_v55 = vmul.f32 %v11325_v19, %v3087_v54 }
0x1d23   :  { %3091 = vrot.lane.b32.xlu0 %v3089_v55, %s11581_s27 }
0x1d95   :  { %v3092_v8 = vpop.permute.xlu0 %3091 }
0x1d96   :  { %v13138_v16 = vadd.f32 %v3092_v8, %v3084_v4 }
0x1d98   :  { %14577 = vst [vmem:[#allocation72_spill] sm:$0xff] %v13138_v16  ;;  %11326 = vtanh.f32 %v13138_v16 }
0x1da2   :  { %v11327_v5 = vpop.eup %11326 }
0x1da3   :  { %3097 = vrot.lane.b32.xlu1 %v11327_v5, %s11585_s14 }
0x1da7   :  { %3105 = vrot.lane.b32.xlu1 %v14578_v48, %s11585_s14 }
0x1e15   :  { %v3098_v7 = vpop.permute.xlu1 %3097 }
0x1e16   :  { %v13144_v58 = vmul.f32 %v11325_v19, %v3098_v7  ;;  %v13158_v19 = vld [vmem:[%s14126_s8] sm:$0xff] }
0x1e17   :  { %14583 = vst [vmem:[#allocation73_spill] sm:$0xff] %v13158_v19 }
0x1e18   :  { %3102 = vrot.lane.b32.xlu0 %v13144_v58, %s11581_s27 }
0x1e19   :  { %v3106_v1 = vpop.permute.xlu1 %3105 }
0x1e8a   :  { %v3103_v6 = vpop.permute.xlu0 %3102 }
0x1e8b   :  { %v3108_v29 = vsel %vm247_vm1, %v3103_v6, %v3106_v1 }
0x1e8c   :  { %9310 = vmatmul.mubr.msk.f32.vlgmr.msra.gmra.mrb[36].mxu1 %vm249_vm2, %v3108_v29  ;;  %v14584_v29 = vld [vmem:[#allocation68_spill] sm:$0xff] }
0x1e8d   :  { %10238 = vmatpush1.bf16.msra.mxu1 %v14579_v9  ;;  %3346 = vmatprep.mubr.f32.mxu1 %v14441_v41 }
0x1e8e   :  { %10240 = vmatprep.subr.bf16.mxu1 %v14580_v36 }
0x1e91   :  { %10242 = vmatpush1.bf16.msra.mxu1 %v14581_v2 }
0x1e92   :  { %10252 = vmatprep.subr.bf16.mxu1 %v14582_v22 }
0x1f5f   :  { %v3178_v3 = vpop.f32.mrb[36].mxu1 }
0x1f60   :  { %v3179_v54 = vadd.f32 %v13158_v19, %v3178_v3  ;;  %v9311_v55 = vpop.f32.mrb[37].mxu1 }
0x1f62   :  { %11328 = vtanh.f32 %v3179_v54  ;;  %v7657_v8 = vmul.f32 -1.442695, %v3179_v54 }
0x1f64   :  { %11330 = vpow2.f32 %v7657_v8  ;;  %v14590_v8 = vld [vmem:[#allocation32_spill] sm:$0xff] }
0x1f6c   :  { %v11329_v4 = vpop.eup %11328 }
0x1f6d   :  { %3191 = vrot.lane.b32.xlu0 %v11329_v4, %s11585_s14 }
0x1f6e   :  { %v11331_v5 = vpop.eup %11330 }
0x1f6f   :  { %v3185_v48 = vadd.f32 1.0, %v11331_v5  ;;  %v14591_v5 = vld [vmem:[#allocation24_spill] sm:$0xff] }
0x1f71   :  { %11332 = vrcp.f32 %v3185_v48  ;;  %v14592_v48 = vld [vmem:[#allocation33_spill] sm:$0xff] }
0x1f7b   :  { %v11333_v7 = vpop.eup %11332 }
0x1f7c   :  { %v3189_v22 = vmul.f32 %v11333_v7, %v14584_v29  ;;  %v14596_v29 = vld [vmem:[#allocation36_spill] sm:$0xff] }
0x1fdf   :  { %v3192_v1 = vpop.permute.xlu0 %3191 }
0x1fe0   :  { %v3194_v6 = vmul.f32 %v11333_v7, %v3192_v1  ;;  %v14594_v1 = vld [vmem:[#allocation34_spill] sm:$0xff] }
0x1fe2   :  { %3196 = vrot.lane.b32.xlu1 %v3194_v6, %s11581_s27  ;;  %v14595_v6 = vld [vmem:[#allocation35_spill] sm:$0xff] }
0x2054   :  { %v3197_v2 = vpop.permute.xlu1 %3196 }
0x2055   :  { %v13164_v36 = vadd.f32 %v3197_v2, %v3189_v22  ;;  %v14588_v2 = vld [vmem:[#allocation31_spill] sm:$0xff]  ;;  %v14589_v22 = vld [vmem:[#allocation21_spill] sm:$0xff] }
0x2057   :  { %14585 = vst [vmem:[#allocation74_spill] sm:$0xff] %v13164_v36  ;;  %11334 = vtanh.f32 %v13164_v36 }
0x2061   :  { %v11335_v3 = vpop.eup %11334 }
0x2062   :  { %3202 = vrot.lane.b32.xlu0 %v11335_v3, %s11585_s14  ;;  %v14597_v3 = vld [vmem:[#allocation37_spill] sm:$0xff] }
0x20d4   :  { %v3203_v54 = vpop.permute.xlu0 %3202 }
0x20d5   :  { %v13168_v55 = vmul.f32 %v11333_v7, %v3203_v54  ;;  %v14593_v7 = vld [vmem:[#allocation25_spill] sm:$0xff]  ;;  %v14598_v54 = vld [vmem:[#allocation38_spill] sm:$0xff] }
0x20d7   :  { %14586 = vst [vmem:[#allocation75_spill] sm:$0xff] %v13168_v55  ;;  %3207 = vrot.lane.b32.xlu1 %v13168_v55, %s11581_s27  ;;  %v13269_v55 = vld [vmem:[%s14121_s3 + $0x38] sm:$0xff] }
0x20d8   :  { %14635 = vst [vmem:[#allocation95_spill] sm:$0xff] %v13269_v55 }
0x2149   :  { %v13172_v4 = vpop.permute.xlu1 %3207 }
0x214a   :  { %14587 = vst [vmem:[#allocation76_spill] sm:$0xff] %v13172_v4  ;;  %7658 = vmatmul.mubr.msk.f32.vlgmr.msra.gmra.mrb[32].mxu0 %vm247_vm1, %v13172_v4  ;;  %7659 = vmatmul.mubr.msk.f32.vlgmr.msra.gmra.mrb[38].mxu1 %vm247_vm1, %v13172_v4 }
0x214b   :  { %10246 = vmatpush1.bf16.msra.mxu0 %v14588_v2  ;;  %10254 = vmatpush1.bf16.msra.mxu1 %v14589_v22  ;;  %v14605_v22 = vld [vmem:[#allocation45_spill] sm:$0xff]  ;;  %v14606_v2 = vld [vmem:[#allocation46_spill] sm:$0xff] }
0x214c   :  { %10248 = vmatprep.subr.bf16.mxu0 %v14590_v8  ;;  %10256 = vmatprep.subr.bf16.mxu1 %v14591_v5  ;;  %v14599_v5 = vld [vmem:[#allocation39_spill] sm:$0xff]  ;;  %v14604_v8 = vld [vmem:[#allocation44_spill] sm:$0xff] }
0x214d   :  { %3417 = vmatprep.mubr.f32.mxu0 %v14441_v41  ;;  %3488 = vmatprep.mubr.f32.mxu1 %v14441_v41 }
0x214f   :  { %10250 = vmatpush1.bf16.msra.mxu0 %v14592_v48  ;;  %10258 = vmatpush1.bf16.msra.mxu1 %v14593_v7  ;;  %v14600_v48 = vld [vmem:[#allocation40_spill] sm:$0xff]  ;;  %v14601_v7 = vld [vmem:[#allocation41_spill] sm:$0xff] }
0x2150   :  { %10260 = vmatprep.subr.bf16.mxu0 %v14594_v1  ;;  %10292 = vmatprep.subr.bf16.mxu1 %v14595_v6  ;;  %v14602_v1 = vld [vmem:[#allocation42_spill] sm:$0xff]  ;;  %v14603_v6 = vld [vmem:[#allocation43_spill] sm:$0xff] }
0x2152   :  { %7660 = vmatmul.mubr.msk.f32.vlgmr.msra.gmra.mrb[34].mxu0 %vm247_vm1, %v13172_v4  ;;  %7661 = vmatmul.mubr.msk.f32.vlgmr.msra.gmra.mrb[40].mxu1 %vm247_vm1, %v13172_v4 }
0x2153   :  { %10262 = vmatpush3.bf16.msra.mxu0 %v14596_v29  ;;  %10294 = vmatpush3.bf16.msra.mxu1 %v14597_v3  ;;  %v14607_v29 = vld [vmem:[#allocation47_spill] sm:$0xff]  ;;  %v14608_v3 = vld [vmem:[#allocation48_spill] sm:$0xff] }
0x2154   :  { %10264 = vmatprep.subr.bf16.mxu0 %v14598_v54  ;;  %10296 = vmatprep.subr.bf16.mxu1 %v14599_v5  ;;  %v14609_v54 = vld [vmem:[#allocation49_spill] sm:$0xff]  ;;  %v14610_v5 = vld [vmem:[#allocation50_spill] sm:$0xff] }
0x2157   :  { %10266 = vmatpush3.bf16.msra.mxu0 %v14600_v48  ;;  %10298 = vmatpush3.bf16.msra.mxu1 %v14601_v7  ;;  %v14611_v48 = vld [vmem:[#allocation51_spill] sm:$0xff]  ;;  %v14612_v7 = vld [vmem:[#allocation52_spill] sm:$0xff] }
0x2158   :  { %10268 = vmatprep.subr.bf16.mxu0 %v14602_v1  ;;  %10300 = vmatprep.subr.bf16.mxu1 %v14603_v6  ;;  %v14613_v1 = vld [vmem:[#allocation53_spill] sm:$0xff]  ;;  %v14614_v6 = vld [vmem:[#allocation54_spill] sm:$0xff] }
0x215b   :  { %10270 = vmatpush3.bf16.msra.mxu0 %v14604_v8  ;;  %10302 = vmatpush3.bf16.msra.mxu1 %v14605_v22  ;;  %v14615_v8 = vld [vmem:[#allocation55_spill] sm:$0xff]  ;;  %v14616_v22 = vld [vmem:[#allocation56_spill] sm:$0xff] }
0x215c   :  { %10272 = vmatprep.subr.bf16.mxu0 %v14606_v2  ;;  %10304 = vmatprep.subr.bf16.mxu1 %v14607_v29  ;;  %v14617_v2 = vld [vmem:[#allocation57_spill] sm:$0xff]  ;;  %v14618_v29 = vld [vmem:[#allocation58_spill] sm:$0xff] }
0x215f   :  { %10274 = vmatpush3.bf16.msra.mxu0 %v14608_v3  ;;  %10306 = vmatpush3.bf16.msra.mxu1 %v14609_v54  ;;  %v14619_v3 = vld [vmem:[#allocation59_spill] sm:$0xff]  ;;  %v14620_v54 = vld [vmem:[#allocation60_spill] sm:$0xff] }
0x2160   :  { %10276 = vmatprep.subr.bf16.mxu0 %v14610_v5  ;;  %10308 = vmatprep.subr.bf16.mxu1 %v14611_v48  ;;  %v14621_v5 = vld [vmem:[#allocation61_spill] sm:$0xff]  ;;  %v14622_v48 = vld [vmem:[#allocation62_spill] sm:$0xff] }
0x2163   :  { %10278 = vmatpush3.bf16.msra.mxu0 %v14612_v7  ;;  %10310 = vmatpush3.bf16.msra.mxu1 %v14613_v1  ;;  %v14623_v7 = vld [vmem:[#allocation63_spill] sm:$0xff]  ;;  %v14624_v1 = vld [vmem:[#allocation64_spill] sm:$0xff] }
0x2164   :  { %10280 = vmatprep.subr.bf16.mxu0 %v14614_v6  ;;  %10312 = vmatprep.subr.bf16.mxu1 %v14615_v8  ;;  %v14625_v6 = vld [vmem:[#allocation65_spill] sm:$0xff]  ;;  %v14626_v8 = vld [vmem:[#allocation66_spill] sm:$0xff] }
0x2167   :  { %10282 = vmatpush3.bf16.msra.mxu0 %v14616_v22  ;;  %10314 = vmatpush3.bf16.msra.mxu1 %v14617_v2  ;;  %v14627_v22 = vld [vmem:[#allocation67_spill] sm:$0xff] }
0x2168   :  { %10284 = vmatprep.subr.bf16.mxu0 %v14618_v29  ;;  %10316 = vmatprep.subr.bf16.mxu1 %v14619_v3 }
0x216b   :  { %10286 = vmatpush3.bf16.msra.mxu0 %v14620_v54  ;;  %10318 = vmatpush3.bf16.msra.mxu1 %v14621_v5  ;;  %v13245_v5 = vld [vmem:[%s14121_s3 + $0x30] sm:$0xff] }
0x216c   :  { %10288 = vmatprep.subr.bf16.mxu0 %v14622_v48  ;;  %10320 = vmatprep.subr.bf16.mxu1 %v14623_v7  ;;  %v13227_v48 = vld [vmem:[%s14121_s3] sm:$0xff]  ;;  %14631 = vst [vmem:[#allocation80_spill] sm:$0xff] %v13245_v5 }
0x216d   :  { %14628 = vst [vmem:[#allocation77_spill] sm:$0xff] %v13227_v48 }
0x216f   :  { %10290 = vmatpush3.bf16.msra.mxu0 %v14624_v1  ;;  %10322 = vmatpush3.bf16.msra.mxu1 %v14625_v6  ;;  %v13233_v6 = vld [vmem:[%s14121_s3 + $0x10] sm:$0xff] }
0x2170   :  { %10324 = vmatprep.subr.bf16.mxu0 %v14626_v8  ;;  %10356 = vmatprep.subr.bf16.mxu1 %v14627_v22  ;;  %14629 = vst [vmem:[#allocation78_spill] sm:$0xff] %v13233_v6  ;;  %v13239_v8 = vld [vmem:[%s14121_s3 + $0x20] sm:$0xff] }
0x2171   :  { %14630 = vst [vmem:[#allocation79_spill] sm:$0xff] %v13239_v8 }
0x221d   :  { %v3277_v2 = vpop.f32.mrb[32].mxu0  ;;  %v3348_v29 = vpop.f32.mrb[38].mxu1 }
0x221e   :  { %v3279_v36 = vpop.f32.mrb[33].mxu0  ;;  %v3350_v3 = vpop.f32.mrb[39].mxu1  ;;  %v3278_v7 = vadd.f32 %v13227_v48, %v3277_v2  ;;  %v3349_v22 = vadd.f32 %v13233_v6, %v3348_v29  ;;  %v13251_v29 = vld [vmem:[%s14121_s3 + $0x8] sm:$0xff] }
0x221f   :  { %14632 = vst [vmem:[#allocation81_spill] sm:$0xff] %v13251_v29  ;;  %v3280_v6 = vadd.f32 %v13251_v29, %v3279_v36 }
0x2225   :  { %v3419_v19 = vpop.f32.mrb[34].mxu0  ;;  %v3490_v54 = vpop.f32.mrb[40].mxu1 }
0x2226   :  { %v3420_v1 = vadd.f32 %v13239_v8, %v3419_v19  ;;  %v3491_v2 = vadd.f32 %v13245_v5, %v3490_v54  ;;  %v3421_v48 = vpop.f32.mrb[35].mxu0  ;;  %v3492_v9 = vpop.f32.mrb[41].mxu1  ;;  %v13257_v19 = vld [vmem:[%s14121_s3 + $0x18] sm:$0xff]  ;;  %v13263_v54 = vld [vmem:[%s14121_s3 + $0x28] sm:$0xff] }
0x2227   :  { %14633 = vst [vmem:[#allocation82_spill] sm:$0xff] %v13257_v19  ;;  %v3351_v8 = vadd.f32 %v13257_v19, %v3350_v3  ;;  %14634 = vst [vmem:[#allocation94_spill] sm:$0xff] %v13263_v54  ;;  %v3422_v5 = vadd.f32 %v13263_v54, %v3421_v48  ;;  %v3493_v36 = vadd.f32 %v13269_v55, %v3492_v9 }
0x2228   :  { %v3495_v29 = vmax.f32 %v3278_v7, %v3420_v1  ;;  %v3497_v16 = vmax.f32 %v3349_v22, %v3491_v2 }
0x2229   :  { %v3496_v61 = vmax.f32 %v3280_v6, %v3422_v5  ;;  %v3498_v53 = vmax.f32 %v3351_v8, %v3493_v36 }
0x222b   :  { %v3499_v43 = vmax.f32 %v3495_v29, %v3496_v61  ;;  %v3500_v3 = vmax.f32 %v3497_v16, %v3498_v53 }
0x222d   :  { %v3501_v19 = vmax.f32 %v3499_v43, %v3500_v3 }
0x222f   :  { %3502 = vmax.xlane.f32.xlu0 %v3501_v19 }
0x22bc   :  { %v3503_v51 = vpop.xlane.xlu0 %3502 }
0x22bd   :  { %v3504_v47 = vsub.f32 %v3278_v7, %v3503_v51  ;;  %v3505_v62 = vsub.f32 %v3280_v6, %v3503_v51  ;;  %v3506_v31 = vsub.f32 %v3349_v22, %v3503_v51  ;;  %v3507_v48 = vsub.f32 %v3351_v8, %v3503_v51 }
0x22be   :  { %v3508_v21 = vsub.f32 %v3420_v1, %v3503_v51  ;;  %v3509_v55 = vsub.f32 %v3422_v5, %v3503_v51  ;;  %v3510_v42 = vsub.f32 %v3491_v2, %v3503_v51  ;;  %v3511_v61 = vsub.f32 %v3493_v36, %v3503_v51 }
0x22bf   :  { %v3512_v54 = vmul.f32 1.442695, %v3504_v47  ;;  %v3514_v44 = vmul.f32 1.442695, %v3505_v62  ;;  %v3516_v30 = vmul.f32 1.442695, %v3506_v31 }
0x22c0   :  { %v3518_v9 = vmul.f32 1.442695, %v3507_v48  ;;  %v3520_v4 = vmul.f32 1.442695, %v3508_v21  ;;  %v3522_v43 = vmul.f32 1.442695, %v3509_v55 }
0x22c1   :  { %11336 = vpow2.f32 %v3512_v54  ;;  %v3524_v53 = vmul.f32 1.442695, %v3510_v42  ;;  %v3526_v16 = vmul.f32 1.442695, %v3511_v61 }
0x22c2   :  { %11338 = vpow2.f32 %v3514_v44 }
0x22c3   :  { %11340 = vpow2.f32 %v3516_v30 }
0x22c4   :  { %11342 = vpow2.f32 %v3518_v9 }
0x22c5   :  { %11344 = vpow2.f32 %v3520_v4 }
0x22c6   :  { %11346 = vpow2.f32 %v3522_v43  ;;  %v14637_v43 = vld [vmem:[#allocation10_spill] sm:$0xff] }
0x22c7   :  { %11348 = vpow2.f32 %v3524_v53  ;;  %v14638_v53 = vld [vmem:[#allocation92_spill] sm:$0xff] }
0x22c8   :  { %11350 = vpow2.f32 %v3526_v16  ;;  %v14639_v16 = vld [vmem:[#allocation11_spill] sm:$0xff] }
0x22cb   :  { %v11337_v22 = vpop.eup %11336 }
0x22cc   :  { %v11339_v8 = vpop.eup %11338 }
0x22cd   :  { %v3528_v47 = vadd.f32 %v11339_v8, %v11337_v22  ;;  %v11341_v31 = vpop.eup %11340 }
0x22ce   :  { %v11343_v44 = vpop.eup %11342 }
0x22cf   :  { %v3529_v62 = vadd.f32 %v11341_v31, %v3528_v47  ;;  %v11345_v5 = vpop.eup %11344  ;;  %v14642_v47 = vld [vmem:[#allocation13_spill] sm:$0xff] }
0x22d0   :  { %v11347_v1 = vpop.eup %11346 }
0x22d1   :  { %v3530_v7 = vadd.f32 %v11343_v44, %v3529_v62  ;;  %v11349_v51 = vpop.eup %11348 }
0x22d2   :  { %v11351_v55 = vpop.eup %11350 }
0x22d3   :  { %v3531_v30 = vadd.f32 %v11345_v5, %v3530_v7 }
0x22d5   :  { %v3532_v21 = vadd.f32 %v11347_v1, %v3531_v30 }
0x22d7   :  { %v3533_v6 = vadd.f32 %v11349_v51, %v3532_v21 }
0x22d9   :  { %v3534_v4 = vadd.f32 %v11351_v55, %v3533_v6 }
0x22db   :  { %3535 = vadd.xlane.f32.xlu1 %v3534_v4 }
0x22ec   :  { %3918 = vrot.lane.b32.xlu1 %v13144_v58, %s11586_s17  ;;  %v14636_v58 = vld [vmem:[#allocation91_spill] sm:$0xff] }
0x2368   :  { %v3536_v42 = vpop.xlane.xlu1 %3535 }
0x2369   :  { %11352 = vrcp.f32 %v3536_v42 }
0x2373   :  { %v11353_v2 = vpop.eup %11352 }
0x2374   :  { %v3539_v29 = vmul.f32 %v11353_v2, %v11339_v8  ;;  %v3541_v19 = vmul.f32 %v11353_v2, %v11343_v44  ;;  %v3538_v54 = vmul.f32 %v11353_v2, %v11337_v22  ;;  %v3540_v36 = vmul.f32 %v11353_v2, %v11341_v31  ;;  %v14640_v22 = vld [vmem:[#allocation93_spill] sm:$0xff]  ;;  %v14641_v8 = vld [vmem:[#allocation12_spill] sm:$0xff]  ;;  %v14643_v31 = vld [vmem:[#allocation18_spill] sm:$0xff] }
0x2375   :  { %v3543_v3 = vmul.f32 %v11353_v2, %v11347_v1  ;;  %v3545_v48 = vmul.f32 %v11353_v2, %v11351_v55  ;;  %v3542_v9 = vmul.f32 %v11353_v2, %v11345_v5  ;;  %v3544_v61 = vmul.f32 %v11353_v2, %v11349_v51 }
0x2376   :  { %3610 = vmatprep.mubr.f32.mxu0 %v3539_v29  ;;  %3909 = vst [vmem:[#allocation4 + $0xc8] sm:$0xff] %v3539_v29  ;;  %3680 = vmatprep.mubr.f32.mxu1 %v3541_v19  ;;  %3911 = vst [vmem:[#allocation4 + $0xd8] sm:$0xff] %v3541_v19 }
0x2377   :  { %3908 = vst [vmem:[#allocation4 + $0xc0] sm:$0xff] %v3538_v54  ;;  %3910 = vst [vmem:[#allocation4 + $0xd0] sm:$0xff] %v3540_v36  ;;  %3611 = vmatmul.mubr.f32.vlgmr.msra.gmra.mrb[36].mxu0 %v3538_v54  ;;  %3681 = vmatmul.mubr.f32.vlgmr.msra.gmra.mrb[42].mxu1 %v3540_v36  ;;  %v7663_v54 = vld [vmem:[%s14118_s0 + $0x20] sm:$0xff] }
0x2378   :  { %3913 = vst [vmem:[#allocation4 + $0xe8] sm:$0xff] %v3543_v3  ;;  %3915 = vst [vmem:[#allocation4 + $0xf8] sm:$0xff] %v3545_v48  ;;  %10326 = vmatpush3.bf16.msra.mxu0 %v12360_v34  ;;  %10358 = vmatpush3.bf16.msra.mxu1 %v12362_v25 }
0x2379   :  { %3912 = vst [vmem:[#allocation4 + $0xe0] sm:$0xff] %v3542_v9  ;;  %3914 = vst [vmem:[#allocation4 + $0xf0] sm:$0xff] %v3544_v61  ;;  %3750 = vmatprep.mubr.f32.mxu0 %v3543_v3  ;;  %3820 = vmatprep.mubr.f32.mxu1 %v3545_v48  ;;  %v3919_v3 = vpop.permute.xlu1 %3918  ;;  %v14644_v48 = vld [vmem:[#allocation76_spill] sm:$0xff] }
0x237a   :  { %10328 = vmatprep.subr.bf16.mxu0 %v12400_v33  ;;  %10360 = vmatprep.subr.bf16.mxu1 %v12402_v24 }
0x237c   :  { %10330 = vmatpush3.bf16.msra.mxu0 %v12417_v0  ;;  %10362 = vmatpush3.bf16.msra.mxu1 %v12419_v63 }
0x237d   :  { %10332 = vmatprep.subr.bf16.mxu0 %v14479_v11  ;;  %10364 = vmatprep.subr.bf16.mxu1 %v14480_v56 }
0x2380   :  { %10334 = vmatpush3.bf16.msra.mxu0 %v14481_v59  ;;  %10366 = vmatpush3.bf16.msra.mxu1 %v14482_v18 }
0x2381   :  { %10336 = vmatprep.subr.bf16.mxu0 %v14483_v57  ;;  %10368 = vmatprep.subr.bf16.mxu1 %v14484_v17 }
0x2384   :  { %10338 = vmatpush3.bf16.msra.mxu0 %v14485_v27  ;;  %10370 = vmatpush3.bf16.msra.mxu1 %v14486_v23 }
0x2385   :  { %10340 = vmatprep.subr.bf16.mxu0 %v14487_v28  ;;  %10372 = vmatprep.subr.bf16.mxu1 %v14488_v37 }
0x2388   :  { %10342 = vmatpush3.bf16.msra.mxu0 %v14489_v20  ;;  %10374 = vmatpush3.bf16.msra.mxu1 %v14490_v32 }
0x2389   :  { %10344 = vmatprep.subr.bf16.mxu0 %v14491_v13  ;;  %10376 = vmatprep.subr.bf16.mxu1 %v14492_v15 }
0x238c   :  { %10346 = vmatpush3.bf16.msra.mxu0 %v12561_v49  ;;  %10378 = vmatpush3.bf16.msra.mxu1 %v14493_v35 }
0x238d   :  { %10348 = vmatprep.subr.bf16.mxu0 %v12573_v10  ;;  %10380 = vmatprep.subr.bf16.mxu1 %v14557_v52 }
0x2390   :  { %10350 = vmatpush3.bf16.msra.mxu0 %v14558_v60  ;;  %10382 = vmatpush3.bf16.msra.mxu1 %v14559_v45 }
0x2391   :  { %10352 = vmatprep.subr.bf16.mxu0 %v14560_v46  ;;  %10384 = vmatprep.subr.bf16.mxu1 %v14561_v26 }
0x2394   :  { %10354 = vmatpush3.bf16.msra.mxu0 %v14562_v12  ;;  %10386 = vmatpush3.bf16.msra.mxu1 %v14563_v38 }
0x2395   :  { %10399 = vmatprep.subr.bf16.mxu1 %v14440_v50  ;;  %10387 = vmatprep.subr.bf16.mxu0 %v14440_v50 }
0x2397   :  { %3751 = vmatmul.mubr.f32.vlgmr.msra.gmra.mrb[38].mxu0 %v3542_v9  ;;  %3821 = vmatmul.mubr.f32.vlgmr.msra.gmra.mrb[44].mxu1 %v3544_v61 }
0x2398   :  { %10401 = vmatpush3.bf16.msra.mxu1 %v14564_v39  ;;  %10389 = vmatpush3.bf16.msra.mxu0 %v14565_v40 }
0x2399   :  { %10402 = vmatprep.subr.bf16.mxu1 %v14440_v50  ;;  %10390 = vmatprep.subr.bf16.mxu0 %v14440_v50 }
0x239a   :  { %9328 = vmatprep.mubr.msk.f32.mxu0 %vm11583_vm0, %v14441_v41  ;;  %9355 = vmatprep.mubr.msk.f32.mxu1 %vm11583_vm0, %v14441_v41 }
0x239c   :  { %10404 = vmatpush3.bf16.msra.mxu1 %v14566_v14  ;;  %10392 = vmatpush3.bf16.msra.mxu0 %v14636_v58 }
0x239d   :  { %10405 = vmatprep.subr.bf16.mxu1 %v14440_v50  ;;  %10393 = vmatprep.subr.bf16.mxu0 %v14440_v50 }
0x23a0   :  { %10407 = vmatpush3.bf16.msra.mxu1 %v14637_v43  ;;  %10395 = vmatpush3.bf16.msra.mxu0 %v14638_v53 }
0x23a1   :  { %10408 = vmatprep.subr.bf16.mxu1 %v14440_v50  ;;  %10396 = vmatprep.subr.bf16.mxu0 %v14440_v50 }
0x23a4   :  { %10410 = vmatpush3.bf16.msra.mxu1 %v14639_v16  ;;  %10398 = vmatpush3.bf16.msra.mxu0 %v14640_v22 }
0x23a5   :  { %10411 = vmatprep.subr.bf16.mxu1 %v14440_v50  ;;  %10417 = vmatprep.subr.bf16.mxu0 %v14440_v50 }
0x23a8   :  { %10413 = vmatpush3.bf16.msra.mxu1 %v14641_v8  ;;  %v14715_v8 = vld [vmem:[#allocation95_spill] sm:$0xff] }
0x23a9   :  { %10414 = vmatprep.subr.bf16.mxu1 %v14440_v50 }
0x23ac   :  { %10416 = vmatpush3.bf16.msra.mxu1 %v14642_v47 }
0x23ad   :  { %10430 = vmatprep.subr.bf16.mxu1 %v14643_v31  ;;  %v14714_v31 = vld [vmem:[#allocation94_spill] sm:$0xff] }
0x244a   :  { %v8270_v62 = vpop.f32.mrb[36].mxu0  ;;  %v8305_v44 = vpop.f32.mrb[42].mxu1 }
0x244b   :  { %v8271_v7 = vpop.f32.mrb[37].mxu0  ;;  %v8306_v5 = vpop.f32.mrb[43].mxu1 }
0x244c   :  { %v8272_v30 = vadd.f32 %v8271_v7, %v8270_v62  ;;  %v8307_v1 = vadd.f32 %v8306_v5, %v8305_v44  ;;  %v14645_v44 = vld [vmem:[#allocation14_spill] sm:$0xff]  ;;  %v14646_v7 = vld [vmem:[#allocation19_spill] sm:$0xff] }
0x244d   :  { %v14647_v5 = vld [vmem:[#allocation22_spill] sm:$0xff] }
0x244e   :  { %v3683_v21 = vadd.f32 %v8307_v1, %v8272_v30  ;;  %v14648_v30 = vld [vmem:[#allocation15_spill] sm:$0xff] }
0x244f   :  { %v14649_v1 = vld [vmem:[#allocation23_spill] sm:$0xff] }
0x246a   :  { %v8340_v51 = vpop.f32.mrb[38].mxu0  ;;  %v8375_v6 = vpop.f32.mrb[44].mxu1 }
0x246b   :  { %v8341_v55 = vpop.f32.mrb[39].mxu0  ;;  %v8376_v4 = vpop.f32.mrb[45].mxu1 }
0x246c   :  { %v8342_v42 = vadd.f32 %v8341_v55, %v8340_v51  ;;  %v8377_v2 = vadd.f32 %v8376_v4, %v8375_v6  ;;  %v14651_v51 = vld [vmem:[#allocation16_spill] sm:$0xff]  ;;  %v14652_v6 = vld [vmem:[#allocation17_spill] sm:$0xff]  ;;  %v14653_v55 = vld [vmem:[#allocation26_spill] sm:$0xff] }
0x246e   :  { %v3753_v29 = vadd.f32 %v8342_v42, %v3683_v21  ;;  %v14650_v21 = vld [vmem:[#allocation30_spill] sm:$0xff] }
0x246f   :  { %v14654_v42 = vld [vmem:[#allocation70_spill] sm:$0xff] }
0x2470   :  { %v3823_v19 = vadd.f32 %v8377_v2, %v3753_v29 }
0x2472   :  { %3828 = vrot.lane.b32.xlu0 %v3823_v19, %s11581_s27 }
0x24e4   :  { %v3829_v36 = vpop.permute.xlu0 %3828 }
0x24e5   :  { %v3831_v9 = vsel %vm247_vm1, %v14644_v48, %v3829_v36  ;;  %v3921_v61 = vsel %vm247_vm1, %v7663_v54, %v3829_v36  ;;  %v14655_v54 = vld [vmem:[#allocation71_spill] sm:$0xff] }
0x24e6   :  { %v3922_v62 = vsel %vm249_vm2, %v3921_v61, %v3919_v3  ;;  %9329 = vmatmul.mubr.msk.f32.vlgmr.msra.gmra.mrb[40].mxu0 %vm249_vm2, %v3831_v9 }
0x24e7   :  { %9356 = vmatmul.mubr.msk.f32.vlgmr.msra.gmra.mrb[46].mxu1 %vm251_vm3, %v3922_v62  ;;  %10419 = vmatpush3.bf16.msra.mxu0 %v14645_v44  ;;  %v14712_v44 = vld [vmem:[#allocation81_spill] sm:$0xff] }
0x24e8   :  { %10420 = vmatprep.subr.bf16.mxu0 %v14440_v50  ;;  %9374 = vmatprep.mubr.msk.f32.mxu0 %vm11583_vm0, %v14441_v41 }
0x24e9   :  { %10432 = vmatpush1.bf16.msra.mxu1 %v14646_v7  ;;  %4194 = vmatprep.mubr.f32.mxu1 %v14441_v41 }
0x24ea   :  { %10434 = vmatprep.subr.bf16.mxu1 %v14647_v5  ;;  %v14711_v5 = vld [vmem:[#allocation80_spill] sm:$0xff] }
0x24eb   :  { %10422 = vmatpush3.bf16.msra.mxu0 %v14648_v30  ;;  %v14710_v30 = vld [vmem:[#allocation79_spill] sm:$0xff] }
0x24ec   :  { %10423 = vmatprep.subr.bf16.mxu0 %v14440_v50 }
0x24ed   :  { %10436 = vmatpush1.bf16.msra.mxu1 %v14649_v1  ;;  %v14709_v1 = vld [vmem:[#allocation78_spill] sm:$0xff] }
0x24ee   :  { %10446 = vmatprep.subr.bf16.mxu1 %v14650_v21 }
0x24ef   :  { %10425 = vmatpush3.bf16.msra.mxu0 %v14651_v51 }
0x24f0   :  { %10426 = vmatprep.subr.bf16.mxu0 %v14440_v50 }
0x24f3   :  { %10428 = vmatpush3.bf16.msra.mxu0 %v14652_v6 }
0x24f4   :  { %10438 = vmatprep.subr.bf16.mxu0 %v14653_v55 }
0x25b9   :  { %v3901_v4 = vpop.f32.mrb[40].mxu0 }
0x25ba   :  { %v3902_v2 = vadd.f32 %v14654_v42, %v3901_v4  ;;  %v9330_v29 = vpop.f32.mrb[41].mxu0  ;;  %v3992_v19 = vpop.f32.mrb[46].mxu1  ;;  %v14656_v4 = vld [vmem:[#allocation72_spill] sm:$0xff] }
0x25bb   :  { %v3993_v36 = vadd.f32 %v14655_v54, %v3992_v19  ;;  %v9357_v3 = vpop.f32.mrb[47].mxu1  ;;  %v14658_v54 = vld [vmem:[#allocation75_spill] sm:$0xff] }
0x25bc   :  { %3906 = vst [vmem:[#allocation2 + $0x18] sm:$0xff] %v3902_v2 }
0x25bd   :  { %11354 = vtanh.f32 %v3993_v36  ;;  %v7665_v9 = vmul.f32 -1.442695, %v3993_v36 }
0x25bf   :  { %11356 = vpow2.f32 %v7665_v9  ;;  %v14659_v9 = vld [vmem:[#allocation27_spill] sm:$0xff] }
0x25c7   :  { %v11355_v48 = vpop.eup %11354 }
0x25c8   :  { %4005 = vrot.lane.b32.xlu0 %v11355_v48, %s11585_s14 }
0x25c9   :  { %v11357_v61 = vpop.eup %11356 }
0x25ca   :  { %v3999_v62 = vadd.f32 1.0, %v11357_v61  ;;  %v14660_v61 = vld [vmem:[#allocation28_spill] sm:$0xff] }
0x25cc   :  { %11358 = vrcp.f32 %v3999_v62  ;;  %v14661_v62 = vld [vmem:[#allocation29_spill] sm:$0xff] }
0x25d6   :  { %v11359_v6 = vpop.eup %11358 }
0x25d7   :  { %v4003_v42 = vmul.f32 %v11359_v6, %v14656_v4  ;;  %v14662_v4 = vld [vmem:[#allocation20_spill] sm:$0xff] }
0x263a   :  { %v4006_v55 = vpop.permute.xlu0 %4005 }
0x263b   :  { %v4008_v51 = vmul.f32 %v11359_v6, %v4006_v55 }
0x263d   :  { %4010 = vrot.lane.b32.xlu1 %v4008_v51, %s11581_s27 }
0x26af   :  { %v4011_v29 = vpop.permute.xlu1 %4010 }
0x26b0   :  { %v13360_v19 = vadd.f32 %v4011_v29, %v4003_v42  ;;  %v14663_v42 = vld [vmem:[#allocation73_spill] sm:$0xff] }
0x26b2   :  { %14657 = vst [vmem:[#allocation96_spill] sm:$0xff] %v13360_v19  ;;  %11360 = vtanh.f32 %v13360_v19 }
0x26bc   :  { %v11361_v2 = vpop.eup %11360 }
0x26bd   :  { %4016 = vrot.lane.b32.xlu0 %v11361_v2, %s11585_s14 }
0x26c1   :  { %4024 = vrot.lane.b32.xlu0 %v14658_v54, %s11585_s14 }
0x272f   :  { %v4017_v36 = vpop.permute.xlu0 %4016 }
0x2730   :  { %v13366_v3 = vmul.f32 %v11359_v6, %v4017_v36 }
0x2732   :  { %4021 = vrot.lane.b32.xlu1 %v13366_v3, %s11581_s27 }
0x2733   :  { %v4025_v51 = vpop.permute.xlu0 %4024 }
0x27a4   :  { %v4022_v55 = vpop.permute.xlu1 %4021 }
0x27a5   :  { %v4027_v48 = vsel %vm247_vm1, %v4022_v55, %v4025_v51 }
0x27a6   :  { %9375 = vmatmul.mubr.msk.f32.vlgmr.msra.gmra.mrb[42].mxu0 %vm249_vm2, %v4027_v48 }
0x27a7   :  { %10440 = vmatpush1.bf16.msra.mxu0 %v14659_v9  ;;  %4265 = vmatprep.mubr.f32.mxu0 %v14441_v41 }
0x27a8   :  { %10442 = vmatprep.subr.bf16.mxu0 %v14660_v61 }
0x27ab   :  { %10444 = vmatpush1.bf16.msra.mxu0 %v14661_v62  ;;  %v14664_v62 = vld [vmem:[#allocation74_spill] sm:$0xff] }
0x27ac   :  { %10454 = vmatprep.subr.bf16.mxu0 %v14662_v4 }
0x2879   :  { %v4097_v6 = vpop.f32.mrb[42].mxu0 }
0x287a   :  { %v4098_v29 = vadd.f32 %v14663_v42, %v4097_v6  ;;  %v9376_v2 = vpop.f32.mrb[43].mxu0 }
0x287c   :  { %11362 = vtanh.f32 %v4098_v29  ;;  %v7667_v36 = vmul.f32 -1.442695, %v4098_v29 }
0x287e   :  { %11364 = vpow2.f32 %v7667_v36  ;;  %v14674_v36 = vld [vmem:[#allocation34_spill] sm:$0xff] }
0x2886   :  { %v11363_v54 = vpop.eup %11362 }
0x2887   :  { %4110 = vrot.lane.b32.xlu1 %v11363_v54, %s11585_s14  ;;  %v14673_v54 = vld [vmem:[#allocation25_spill] sm:$0xff] }
0x2888   :  { %v11365_v51 = vpop.eup %11364 }
0x2889   :  { %v4104_v55 = vadd.f32 1.0, %v11365_v51  ;;  %v14675_v51 = vld [vmem:[#allocation35_spill] sm:$0xff] }
0x288b   :  { %11366 = vrcp.f32 %v4104_v55  ;;  %v14676_v55 = vld [vmem:[#allocation36_spill] sm:$0xff] }
0x2895   :  { %v11367_v48 = vpop.eup %11366 }
0x2896   :  { %v4108_v4 = vmul.f32 %v11367_v48, %v14664_v62  ;;  %v14671_v62 = vld [vmem:[#allocation24_spill] sm:$0xff] }
0x28f9   :  { %v4111_v9 = vpop.permute.xlu1 %4110 }
0x28fa   :  { %v4113_v61 = vmul.f32 %v11367_v48, %v4111_v9  ;;  %v14669_v9 = vld [vmem:[#allocation21_spill] sm:$0xff] }
0x28fc   :  { %4115 = vrot.lane.b32.xlu0 %v4113_v61, %s11581_s27  ;;  %v14670_v61 = vld [vmem:[#allocation32_spill] sm:$0xff] }
0x296e   :  { %v4116_v19 = vpop.permute.xlu0 %4115 }
0x296f   :  { %v13381_v21 = vadd.f32 %v4116_v19, %v4108_v4  ;;  %v14668_v19 = vld [vmem:[#allocation31_spill] sm:$0xff]  ;;  %v14672_v4 = vld [vmem:[#allocation33_spill] sm:$0xff] }
0x2971   :  { %14665 = vst [vmem:[#allocation97_spill] sm:$0xff] %v13381_v21  ;;  %11368 = vtanh.f32 %v13381_v21 }
0x297b   :  { %v11369_v6 = vpop.eup %11368 }
0x297c   :  { %4121 = vrot.lane.b32.xlu1 %v11369_v6, %s11585_s14  ;;  %v14678_v6 = vld [vmem:[#allocation38_spill] sm:$0xff] }
0x29ee   :  { %v4122_v42 = vpop.permute.xlu1 %4121 }
0x29ef   :  { %v13385_v29 = vmul.f32 %v11367_v48, %v4122_v42  ;;  %v14677_v48 = vld [vmem:[#allocation37_spill] sm:$0xff]  ;;  %v14679_v42 = vld [vmem:[#allocation39_spill] sm:$0xff] }
0x29f1   :  { %14666 = vst [vmem:[#allocation98_spill] sm:$0xff] %v13385_v29  ;;  %4126 = vrot.lane.b32.xlu0 %v13385_v29, %s11581_s27  ;;  %v14708_v29 = vld [vmem:[#allocation77_spill] sm:$0xff] }
0x2a63   :  { %v13389_v2 = vpop.permute.xlu0 %4126 }
0x2a64   :  { %14667 = vst [vmem:[#allocation99_spill] sm:$0xff] %v13389_v2  ;;  %7668 = vmatmul.mubr.msk.f32.vlgmr.msra.gmra.mrb[48].mxu1 %vm247_vm1, %v13389_v2  ;;  %7669 = vmatmul.mubr.msk.f32.vlgmr.msra.gmra.mrb[44].mxu0 %vm247_vm1, %v13389_v2 }
0x2a65   :  { %10448 = vmatpush1.bf16.msra.mxu1 %v14668_v19  ;;  %10456 = vmatpush1.bf16.msra.mxu0 %v14669_v9  ;;  %v14686_v9 = vld [vmem:[#allocation46_spill] sm:$0xff] }
0x2a66   :  { %10450 = vmatprep.subr.bf16.mxu1 %v14670_v61  ;;  %10458 = vmatprep.subr.bf16.mxu0 %v14671_v62  ;;  %v14684_v62 = vld [vmem:[#allocation44_spill] sm:$0xff]  ;;  %v14685_v61 = vld [vmem:[#allocation45_spill] sm:$0xff] }
0x2a67   :  { %4336 = vmatprep.mubr.f32.mxu1 %v14441_v41  ;;  %4407 = vmatprep.mubr.f32.mxu0 %v14441_v41 }
0x2a69   :  { %10452 = vmatpush1.bf16.msra.mxu1 %v14672_v4  ;;  %10460 = vmatpush1.bf16.msra.mxu0 %v14673_v54  ;;  %v14680_v4 = vld [vmem:[#allocation40_spill] sm:$0xff]  ;;  %v14681_v54 = vld [vmem:[#allocation41_spill] sm:$0xff] }
0x2a6a   :  { %10462 = vmatprep.subr.bf16.mxu1 %v14674_v36  ;;  %10494 = vmatprep.subr.bf16.mxu0 %v14675_v51  ;;  %v14682_v36 = vld [vmem:[#allocation42_spill] sm:$0xff]  ;;  %v14683_v51 = vld [vmem:[#allocation43_spill] sm:$0xff] }
0x2a6c   :  { %7670 = vmatmul.mubr.msk.f32.vlgmr.msra.gmra.mrb[50].mxu1 %vm247_vm1, %v13389_v2  ;;  %7671 = vmatmul.mubr.msk.f32.vlgmr.msra.gmra.mrb[46].mxu0 %vm247_vm1, %v13389_v2  ;;  %v14713_v2 = vld [vmem:[#allocation82_spill] sm:$0xff] }
0x2a6d   :  { %10464 = vmatpush3.bf16.msra.mxu1 %v14676_v55  ;;  %10496 = vmatpush3.bf16.msra.mxu0 %v14677_v48  ;;  %v14687_v55 = vld [vmem:[#allocation47_spill] sm:$0xff]  ;;  %v14688_v48 = vld [vmem:[#allocation48_spill] sm:$0xff] }
0x2a6e   :  { %10466 = vmatprep.subr.bf16.mxu1 %v14678_v6  ;;  %10498 = vmatprep.subr.bf16.mxu0 %v14679_v42  ;;  %v14689_v6 = vld [vmem:[#allocation49_spill] sm:$0xff]  ;;  %v14690_v42 = vld [vmem:[#allocation50_spill] sm:$0xff] }
0x2a71   :  { %10468 = vmatpush3.bf16.msra.mxu1 %v14680_v4  ;;  %10500 = vmatpush3.bf16.msra.mxu0 %v14681_v54  ;;  %v14691_v4 = vld [vmem:[#allocation51_spill] sm:$0xff]  ;;  %v14692_v54 = vld [vmem:[#allocation52_spill] sm:$0xff] }
0x2a72   :  { %10470 = vmatprep.subr.bf16.mxu1 %v14682_v36  ;;  %10502 = vmatprep.subr.bf16.mxu0 %v14683_v51  ;;  %v14693_v36 = vld [vmem:[#allocation53_spill] sm:$0xff]  ;;  %v14694_v51 = vld [vmem:[#allocation54_spill] sm:$0xff] }
0x2a75   :  { %10472 = vmatpush3.bf16.msra.mxu1 %v14684_v62  ;;  %10504 = vmatpush3.bf16.msra.mxu0 %v14685_v61  ;;  %v14695_v62 = vld [vmem:[#allocation55_spill] sm:$0xff]  ;;  %v14696_v61 = vld [vmem:[#allocation56_spill] sm:$0xff] }
0x2a76   :  { %10474 = vmatprep.subr.bf16.mxu1 %v14686_v9  ;;  %10506 = vmatprep.subr.bf16.mxu0 %v14687_v55  ;;  %v14697_v9 = vld [vmem:[#allocation57_spill] sm:$0xff]  ;;  %v14698_v55 = vld [vmem:[#allocation58_spill] sm:$0xff] }
0x2a79   :  { %10476 = vmatpush3.bf16.msra.mxu1 %v14688_v48  ;;  %10508 = vmatpush3.bf16.msra.mxu0 %v14689_v6  ;;  %v14699_v48 = vld [vmem:[#allocation59_spill] sm:$0xff]  ;;  %v14700_v6 = vld [vmem:[#allocation60_spill] sm:$0xff] }
0x2a7a   :  { %10478 = vmatprep.subr.bf16.mxu1 %v14690_v42  ;;  %10510 = vmatprep.subr.bf16.mxu0 %v14691_v4  ;;  %v14701_v42 = vld [vmem:[#allocation61_spill] sm:$0xff]  ;;  %v14702_v4 = vld [vmem:[#allocation62_spill] sm:$0xff] }
0x2a7d   :  { %10480 = vmatpush3.bf16.msra.mxu1 %v14692_v54  ;;  %10512 = vmatpush3.bf16.msra.mxu0 %v14693_v36  ;;  %v14703_v54 = vld [vmem:[#allocation63_spill] sm:$0xff]  ;;  %v14704_v36 = vld [vmem:[#allocation64_spill] sm:$0xff] }
0x2a7e   :  { %10482 = vmatprep.subr.bf16.mxu1 %v14694_v51  ;;  %10514 = vmatprep.subr.bf16.mxu0 %v14695_v62  ;;  %v14705_v51 = vld [vmem:[#allocation65_spill] sm:$0xff]  ;;  %v14706_v62 = vld [vmem:[#allocation66_spill] sm:$0xff] }
0x2a81   :  { %10484 = vmatpush3.bf16.msra.mxu1 %v14696_v61  ;;  %10516 = vmatpush3.bf16.msra.mxu0 %v14697_v9  ;;  %v14707_v61 = vld [vmem:[#allocation67_spill] sm:$0xff] }
0x2a82   :  { %10486 = vmatprep.subr.bf16.mxu1 %v14698_v55  ;;  %10518 = vmatprep.subr.bf16.mxu0 %v14699_v48 }
0x2a85   :  { %10488 = vmatpush3.bf16.msra.mxu1 %v14700_v6  ;;  %10520 = vmatpush3.bf16.msra.mxu0 %v14701_v42 }
0x2a86   :  { %10490 = vmatprep.subr.bf16.mxu1 %v14702_v4  ;;  %10522 = vmatprep.subr.bf16.mxu0 %v14703_v54 }
0x2a89   :  { %10492 = vmatpush3.bf16.msra.mxu1 %v14704_v36  ;;  %10524 = vmatpush3.bf16.msra.mxu0 %v14705_v51 }
0x2a8a   :  { %10526 = vmatprep.subr.bf16.mxu1 %v14706_v62  ;;  %10558 = vmatprep.subr.bf16.mxu0 %v14707_v61 }
0x2b37   :  { %v4196_v9 = vpop.f32.mrb[48].mxu1  ;;  %v4267_v55 = vpop.f32.mrb[44].mxu0 }
0x2b38   :  { %v4198_v19 = vpop.f32.mrb[49].mxu1  ;;  %v4269_v48 = vpop.f32.mrb[45].mxu0  ;;  %v4197_v42 = vadd.f32 %v14708_v29, %v4196_v9  ;;  %v4268_v4 = vadd.f32 %v14709_v1, %v4267_v55 }
0x2b39   :  { %v4199_v62 = vadd.f32 %v14712_v44, %v4198_v19  ;;  %v4270_v61 = vadd.f32 %v14713_v2, %v4269_v48 }
0x2b3f   :  { %v4338_v21 = vpop.f32.mrb[50].mxu1  ;;  %v4409_v6 = vpop.f32.mrb[46].mxu0 }
0x2b40   :  { %v4339_v54 = vadd.f32 %v14710_v30, %v4338_v21  ;;  %v4410_v36 = vadd.f32 %v14711_v5, %v4409_v6  ;;  %v4340_v7 = vpop.f32.mrb[51].mxu1  ;;  %v4411_v51 = vpop.f32.mrb[47].mxu0 }
0x2b41   :  { %v4341_v47 = vadd.f32 %v14714_v31, %v4340_v7  ;;  %v4412_v22 = vadd.f32 %v14715_v8, %v4411_v51 }
0x2b42   :  { %v4414_v16 = vmax.f32 %v4197_v42, %v4339_v54  ;;  %v4416_v53 = vmax.f32 %v4268_v4, %v4410_v36 }
0x2b43   :  { %v4415_v43 = vmax.f32 %v4199_v62, %v4341_v47  ;;  %v4417_v29 = vmax.f32 %v4270_v61, %v4412_v22 }
0x2b45   :  { %v4418_v9 = vmax.f32 %v4414_v16, %v4415_v43  ;;  %v4419_v1 = vmax.f32 %v4416_v53, %v4417_v29 }
0x2b47   :  { %v4420_v55 = vmax.f32 %v4418_v9, %v4419_v1 }
0x2b49   :  { %4421 = vmax.xlane.f32.xlu1 %v4420_v55 }
0x2b5a   :  { %4837 = vrot.lane.b32.xlu1 %v13366_v3, %s11586_s17 }
0x2bd6   :  { %v4422_v5 = vpop.xlane.xlu1 %4421 }
0x2bd7   :  { %v4423_v30 = vsub.f32 %v4197_v42, %v4422_v5  ;;  %v4424_v44 = vsub.f32 %v4199_v62, %v4422_v5  ;;  %v4425_v21 = vsub.f32 %v4268_v4, %v4422_v5  ;;  %v4426_v2 = vsub.f32 %v4270_v61, %v4422_v5 }
0x2bd8   :  { %v4427_v8 = vsub.f32 %v4339_v54, %v4422_v5  ;;  %v4428_v48 = vsub.f32 %v4341_v47, %v4422_v5  ;;  %v4429_v43 = vsub.f32 %v4410_v36, %v4422_v5  ;;  %v4430_v16 = vsub.f32 %v4412_v22, %v4422_v5 }
0x2bd9   :  { %v4431_v19 = vmul.f32 1.442695, %v4423_v30  ;;  %v4433_v31 = vmul.f32 1.442695, %v4424_v44  ;;  %v4435_v7 = vmul.f32 1.442695, %v4425_v21 }
0x2bda   :  { %v4437_v51 = vmul.f32 1.442695, %v4426_v2  ;;  %v4439_v53 = vmul.f32 1.442695, %v4427_v8  ;;  %v4441_v6 = vmul.f32 1.442695, %v4428_v48 }
0x2bdb   :  { %11370 = vpow2.f32 %v4431_v19  ;;  %v4443_v3 = vmul.f32 1.442695, %v4429_v43  ;;  %v4445_v62 = vmul.f32 1.442695, %v4430_v16 }
0x2bdc   :  { %11372 = vpow2.f32 %v4433_v31 }
0x2bdd   :  { %11374 = vpow2.f32 %v4435_v7 }
0x2bde   :  { %11376 = vpow2.f32 %v4437_v51 }
0x2bdf   :  { %11378 = vpow2.f32 %v4439_v53 }
0x2be0   :  { %11380 = vpow2.f32 %v4441_v6  ;;  %v14716_v6 = vld [vmem:[#allocation10_spill] sm:$0xff] }
0x2be1   :  { %11382 = vpow2.f32 %v4443_v3  ;;  %v14717_v3 = vld [vmem:[#allocation92_spill] sm:$0xff] }
0x2be2   :  { %11384 = vpow2.f32 %v4445_v62  ;;  %v14718_v62 = vld [vmem:[#allocation11_spill] sm:$0xff] }
0x2be5   :  { %v11371_v4 = vpop.eup %11370 }
0x2be6   :  { %v11373_v61 = vpop.eup %11372 }
0x2be7   :  { %v4447_v42 = vadd.f32 %v11373_v61, %v11371_v4  ;;  %v11375_v29 = vpop.eup %11374 }
0x2be8   :  { %v11377_v9 = vpop.eup %11376 }
0x2be9   :  { %v4448_v54 = vadd.f32 %v11375_v29, %v4447_v42  ;;  %v11379_v47 = vpop.eup %11378  ;;  %v14721_v42 = vld [vmem:[#allocation13_spill] sm:$0xff] }
0x2bea   :  { %v11381_v36 = vpop.eup %11380 }
0x2beb   :  { %v4449_v1 = vadd.f32 %v11377_v9, %v4448_v54  ;;  %v11383_v22 = vpop.eup %11382 }
0x2bec   :  { %v11385_v44 = vpop.eup %11384 }
0x2bed   :  { %v4450_v55 = vadd.f32 %v11379_v47, %v4449_v1 }
0x2bef   :  { %v4451_v30 = vadd.f32 %v11381_v36, %v4450_v55 }
0x2bf1   :  { %v4452_v5 = vadd.f32 %v11383_v22, %v4451_v30 }
0x2bf3   :  { %v4453_v21 = vadd.f32 %v11385_v44, %v4452_v5 }
0x2bf5   :  { %4454 = vadd.xlane.f32.xlu0 %v4453_v21 }
0x2c82   :  { %v4455_v2 = vpop.xlane.xlu0 %4454 }
0x2c83   :  { %11386 = vrcp.f32 %v4455_v2 }
0x2c8d   :  { %v11387_v19 = vpop.eup %11386 }
0x2c8e   :  { %v4458_v31 = vmul.f32 %v11387_v19, %v11373_v61  ;;  %v4460_v7 = vmul.f32 %v11387_v19, %v11377_v9  ;;  %v4457_v8 = vmul.f32 %v11387_v19, %v11371_v4  ;;  %v4459_v51 = vmul.f32 %v11387_v19, %v11375_v29  ;;  %v14719_v4 = vld [vmem:[#allocation93_spill] sm:$0xff]  ;;  %v14720_v61 = vld [vmem:[#allocation12_spill] sm:$0xff]  ;;  %v14722_v29 = vld [vmem:[#allocation18_spill] sm:$0xff] }
0x2c8f   :  { %v4462_v48 = vmul.f32 %v11387_v19, %v11381_v36  ;;  %v4464_v43 = vmul.f32 %v11387_v19, %v11385_v44  ;;  %v4461_v53 = vmul.f32 %v11387_v19, %v11379_v47  ;;  %v4463_v16 = vmul.f32 %v11387_v19, %v11383_v22 }
0x2c90   :  { %4529 = vmatprep.mubr.f32.mxu1 %v4458_v31  ;;  %4828 = vst [vmem:[#allocation4 + $0x108] sm:$0xff] %v4458_v31  ;;  %4599 = vmatprep.mubr.f32.mxu0 %v4460_v7  ;;  %4830 = vst [vmem:[#allocation4 + $0x118] sm:$0xff] %v4460_v7 }
0x2c91   :  { %4827 = vst [vmem:[#allocation4 + $0x100] sm:$0xff] %v4457_v8  ;;  %4829 = vst [vmem:[#allocation4 + $0x110] sm:$0xff] %v4459_v51  ;;  %4530 = vmatmul.mubr.f32.vlgmr.msra.gmra.mrb[52].mxu1 %v4457_v8  ;;  %4600 = vmatmul.mubr.f32.vlgmr.msra.gmra.mrb[48].mxu0 %v4459_v51  ;;  %v7673_v8 = vld [vmem:[%s14118_s0 + $0x28] sm:$0xff] }
0x2c92   :  { %4832 = vst [vmem:[#allocation4 + $0x128] sm:$0xff] %v4462_v48  ;;  %4834 = vst [vmem:[#allocation4 + $0x138] sm:$0xff] %v4464_v43  ;;  %10528 = vmatpush3.bf16.msra.mxu1 %v12360_v34  ;;  %10560 = vmatpush3.bf16.msra.mxu0 %v12362_v25 }
0x2c93   :  { %4831 = vst [vmem:[#allocation4 + $0x120] sm:$0xff] %v4461_v53  ;;  %4833 = vst [vmem:[#allocation4 + $0x130] sm:$0xff] %v4463_v16  ;;  %4669 = vmatprep.mubr.f32.mxu1 %v4462_v48  ;;  %4739 = vmatprep.mubr.f32.mxu0 %v4464_v43  ;;  %v4838_v48 = vpop.permute.xlu1 %4837  ;;  %v14723_v43 = vld [vmem:[#allocation99_spill] sm:$0xff] }
0x2c94   :  { %10530 = vmatprep.subr.bf16.mxu1 %v12400_v33  ;;  %10562 = vmatprep.subr.bf16.mxu0 %v12402_v24 }
0x2c96   :  { %10532 = vmatpush3.bf16.msra.mxu1 %v12417_v0  ;;  %10564 = vmatpush3.bf16.msra.mxu0 %v12419_v63 }
0x2c97   :  { %10534 = vmatprep.subr.bf16.mxu1 %v14479_v11  ;;  %10566 = vmatprep.subr.bf16.mxu0 %v14480_v56 }
0x2c9a   :  { %10536 = vmatpush3.bf16.msra.mxu1 %v14481_v59  ;;  %10568 = vmatpush3.bf16.msra.mxu0 %v14482_v18 }
0x2c9b   :  { %10538 = vmatprep.subr.bf16.mxu1 %v14483_v57  ;;  %10570 = vmatprep.subr.bf16.mxu0 %v14484_v17 }
0x2c9e   :  { %10540 = vmatpush3.bf16.msra.mxu1 %v14485_v27  ;;  %10572 = vmatpush3.bf16.msra.mxu0 %v14486_v23 }
0x2c9f   :  { %10542 = vmatprep.subr.bf16.mxu1 %v14487_v28  ;;  %10574 = vmatprep.subr.bf16.mxu0 %v14488_v37 }
0x2ca2   :  { %10544 = vmatpush3.bf16.msra.mxu1 %v14489_v20  ;;  %10576 = vmatpush3.bf16.msra.mxu0 %v14490_v32 }
0x2ca3   :  { %10546 = vmatprep.subr.bf16.mxu1 %v14491_v13  ;;  %10578 = vmatprep.subr.bf16.mxu0 %v14492_v15 }
0x2ca6   :  { %10548 = vmatpush3.bf16.msra.mxu1 %v12561_v49  ;;  %10580 = vmatpush3.bf16.msra.mxu0 %v14493_v35 }
0x2ca7   :  { %10550 = vmatprep.subr.bf16.mxu1 %v12573_v10  ;;  %10582 = vmatprep.subr.bf16.mxu0 %v14557_v52 }
0x2caa   :  { %10552 = vmatpush3.bf16.msra.mxu1 %v14558_v60  ;;  %10584 = vmatpush3.bf16.msra.mxu0 %v14559_v45 }
0x2cab   :  { %10554 = vmatprep.subr.bf16.mxu1 %v14560_v46  ;;  %10586 = vmatprep.subr.bf16.mxu0 %v14561_v26 }
0x2cae   :  { %10556 = vmatpush3.bf16.msra.mxu1 %v14562_v12  ;;  %10588 = vmatpush3.bf16.msra.mxu0 %v14563_v38 }
0x2caf   :  { %10601 = vmatprep.subr.bf16.mxu0 %v14440_v50  ;;  %10589 = vmatprep.subr.bf16.mxu1 %v14440_v50 }
0x2cb1   :  { %4670 = vmatmul.mubr.f32.vlgmr.msra.gmra.mrb[54].mxu1 %v4461_v53  ;;  %4740 = vmatmul.mubr.f32.vlgmr.msra.gmra.mrb[50].mxu0 %v4463_v16 }
0x2cb2   :  { %10603 = vmatpush3.bf16.msra.mxu0 %v14564_v39  ;;  %10591 = vmatpush3.bf16.msra.mxu1 %v14565_v40 }
0x2cb3   :  { %10604 = vmatprep.subr.bf16.mxu0 %v14440_v50  ;;  %10592 = vmatprep.subr.bf16.mxu1 %v14440_v50 }
0x2cb4   :  { %9393 = vmatprep.mubr.msk.f32.mxu1 %vm11583_vm0, %v14441_v41  ;;  %9420 = vmatprep.mubr.msk.f32.mxu0 %vm11583_vm0, %v14441_v41 }
0x2cb6   :  { %10606 = vmatpush3.bf16.msra.mxu0 %v14566_v14  ;;  %10594 = vmatpush3.bf16.msra.mxu1 %v14636_v58 }
0x2cb7   :  { %10607 = vmatprep.subr.bf16.mxu0 %v14440_v50  ;;  %10595 = vmatprep.subr.bf16.mxu1 %v14440_v50 }
0x2cba   :  { %10609 = vmatpush3.bf16.msra.mxu0 %v14716_v6  ;;  %10597 = vmatpush3.bf16.msra.mxu1 %v14717_v3 }
0x2cbb   :  { %10610 = vmatprep.subr.bf16.mxu0 %v14440_v50  ;;  %10598 = vmatprep.subr.bf16.mxu1 %v14440_v50 }
0x2cbe   :  { %10612 = vmatpush3.bf16.msra.mxu0 %v14718_v62  ;;  %10600 = vmatpush3.bf16.msra.mxu1 %v14719_v4 }
0x2cbf   :  { %10613 = vmatprep.subr.bf16.mxu0 %v14440_v50  ;;  %10619 = vmatprep.subr.bf16.mxu1 %v14440_v50 }
0x2cc2   :  { %10615 = vmatpush3.bf16.msra.mxu0 %v14720_v61 }
0x2cc3   :  { %10616 = vmatprep.subr.bf16.mxu0 %v14440_v50 }
0x2cc6   :  { %10618 = vmatpush3.bf16.msra.mxu0 %v14721_v42 }
0x2cc7   :  { %10632 = vmatprep.subr.bf16.mxu0 %v14722_v29 }
0x2d64   :  { %v8441_v54 = vpop.f32.mrb[52].mxu1  ;;  %v8476_v9 = vpop.f32.mrb[48].mxu0 }
0x2d65   :  { %v8442_v1 = vpop.f32.mrb[53].mxu1  ;;  %v8477_v47 = vpop.f32.mrb[49].mxu0 }
0x2d66   :  { %v8443_v55 = vadd.f32 %v8442_v1, %v8441_v54  ;;  %v8478_v36 = vadd.f32 %v8477_v47, %v8476_v9  ;;  %v14724_v9 = vld [vmem:[#allocation14_spill] sm:$0xff]  ;;  %v14725_v1 = vld [vmem:[#allocation19_spill] sm:$0xff] }
0x2d67   :  { %v14726_v47 = vld [vmem:[#allocation22_spill] sm:$0xff] }
0x2d68   :  { %v4602_v30 = vadd.f32 %v8478_v36, %v8443_v55  ;;  %v14727_v55 = vld [vmem:[#allocation15_spill] sm:$0xff] }
0x2d69   :  { %v14728_v36 = vld [vmem:[#allocation23_spill] sm:$0xff] }
0x2d84   :  { %v8511_v22 = vpop.f32.mrb[54].mxu1  ;;  %v8546_v5 = vpop.f32.mrb[50].mxu0 }
0x2d85   :  { %v8512_v44 = vpop.f32.mrb[55].mxu1  ;;  %v8547_v21 = vpop.f32.mrb[51].mxu0 }
0x2d86   :  { %v8513_v2 = vadd.f32 %v8512_v44, %v8511_v22  ;;  %v8548_v19 = vadd.f32 %v8547_v21, %v8546_v5  ;;  %v14730_v22 = vld [vmem:[#allocation16_spill] sm:$0xff]  ;;  %v14731_v5 = vld [vmem:[#allocation17_spill] sm:$0xff]  ;;  %v14732_v44 = vld [vmem:[#allocation26_spill] sm:$0xff] }
0x2d88   :  { %v4672_v31 = vadd.f32 %v8513_v2, %v4602_v30  ;;  %v14729_v30 = vld [vmem:[#allocation30_spill] sm:$0xff]  ;;  %v13535_v2 = vld [vmem:[%s14128_s10] sm:$0xff] }
0x2d89   :  { %14733 = vst [vmem:[#allocation100_spill] sm:$0xff] %v13535_v2 }
0x2d8a   :  { %v4742_v7 = vadd.f32 %v8548_v19, %v4672_v31 }
0x2d8c   :  { %4747 = vrot.lane.b32.xlu0 %v4742_v7, %s11581_s27 }
0x2dfe   :  { %v4748_v51 = vpop.permute.xlu0 %4747 }
0x2dff   :  { %v4750_v53 = vsel %vm247_vm1, %v14723_v43, %v4748_v51  ;;  %v4840_v16 = vsel %vm247_vm1, %v7673_v8, %v4748_v51  ;;  %v13541_v8 = vld [vmem:[%s14124_s6] sm:$0xff] }
0x2e00   :  { %v4841_v54 = vsel %vm249_vm2, %v4840_v16, %v4838_v48  ;;  %9394 = vmatmul.mubr.msk.f32.vlgmr.msra.gmra.mrb[56].mxu1 %vm249_vm2, %v4750_v53  ;;  %14734 = vst [vmem:[#allocation101_spill] sm:$0xff] %v13541_v8 }
0x2e01   :  { %9421 = vmatmul.mubr.msk.f32.vlgmr.msra.gmra.mrb[52].mxu0 %vm251_vm3, %v4841_v54  ;;  %10621 = vmatpush3.bf16.msra.mxu1 %v14724_v9 }
0x2e02   :  { %10622 = vmatprep.subr.bf16.mxu1 %v14440_v50  ;;  %9439 = vmatprep.mubr.msk.f32.mxu1 %vm11583_vm0, %v14441_v41 }
0x2e03   :  { %10634 = vmatpush1.bf16.msra.mxu0 %v14725_v1  ;;  %5113 = vmatprep.mubr.f32.mxu0 %v14441_v41 }
0x2e04   :  { %10636 = vmatprep.subr.bf16.mxu0 %v14726_v47 }
0x2e05   :  { %10624 = vmatpush3.bf16.msra.mxu1 %v14727_v55 }
0x2e06   :  { %10625 = vmatprep.subr.bf16.mxu1 %v14440_v50 }
0x2e07   :  { %10638 = vmatpush1.bf16.msra.mxu0 %v14728_v36  ;;  %v13678_v36 = vld [vmem:[%s14121_s3 + $0x38] sm:$0xff] }
0x2e08   :  { %10648 = vmatprep.subr.bf16.mxu0 %v14729_v30  ;;  %14794 = vst [vmem:[#allocation76_spill] sm:$0xff] %v13678_v36 }
0x2e09   :  { %10627 = vmatpush3.bf16.msra.mxu1 %v14730_v22 }
0x2e0a   :  { %10628 = vmatprep.subr.bf16.mxu1 %v14440_v50 }
0x2e0d   :  { %10630 = vmatpush3.bf16.msra.mxu1 %v14731_v5 }
0x2e0e   :  { %10640 = vmatprep.subr.bf16.mxu1 %v14732_v44  ;;  %v14735_v44 = vld [vmem:[#allocation96_spill] sm:$0xff] }
0x2ed3   :  { %v4820_v21 = vpop.f32.mrb[56].mxu1 }
0x2ed4   :  { %v4821_v19 = vadd.f32 %v13535_v2, %v4820_v21  ;;  %v9395_v31 = vpop.f32.mrb[57].mxu1  ;;  %v4911_v7 = vpop.f32.mrb[52].mxu0 }
0x2ed5   :  { %v4912_v51 = vadd.f32 %v13541_v8, %v4911_v7  ;;  %v9422_v48 = vpop.f32.mrb[53].mxu0 }
0x2ed6   :  { %4825 = vst [vmem:[#allocation2 + $0x20] sm:$0xff] %v4821_v19 }
0x2ed7   :  { %11388 = vtanh.f32 %v4912_v51  ;;  %v7675_v53 = vmul.f32 -1.442695, %v4912_v51  ;;  %v14737_v51 = vld [vmem:[#allocation98_spill] sm:$0xff] }
0x2ed9   :  { %11390 = vpow2.f32 %v7675_v53 }
0x2ee1   :  { %v11389_v43 = vpop.eup %11388 }
0x2ee2   :  { %4924 = vrot.lane.b32.xlu1 %v11389_v43, %s11585_s14 }
0x2ee3   :  { %v11391_v16 = vpop.eup %11390 }
0x2ee4   :  { %v4918_v54 = vadd.f32 1.0, %v11391_v16  ;;  %v14740_v16 = vld [vmem:[#allocation29_spill] sm:$0xff] }
0x2ee6   :  { %11392 = vrcp.f32 %v4918_v54  ;;  %v14741_v54 = vld [vmem:[#allocation20_spill] sm:$0xff] }
0x2ef0   :  { %v11393_v21 = vpop.eup %11392 }
0x2ef1   :  { %v4922_v5 = vmul.f32 %v11393_v21, %v14735_v44 }
0x2f54   :  { %v4925_v31 = vpop.permute.xlu1 %4924 }
0x2f55   :  { %v4927_v2 = vmul.f32 %v11393_v21, %v4925_v31  ;;  %v13567_v31 = vld [vmem:[%s14126_s8] sm:$0xff] }
0x2f56   :  { %14742 = vst [vmem:[#allocation84_spill] sm:$0xff] %v13567_v31 }
0x2f57   :  { %4929 = vrot.lane.b32.xlu0 %v4927_v2, %s11581_s27 }
0x2fc9   :  { %v4930_v22 = vpop.permute.xlu0 %4929 }
0x2fca   :  { %v13547_v7 = vadd.f32 %v4930_v22, %v4922_v5  ;;  %v14738_v22 = vld [vmem:[#allocation27_spill] sm:$0xff]  ;;  %v14739_v5 = vld [vmem:[#allocation28_spill] sm:$0xff] }
0x2fcc   :  { %14736 = vst [vmem:[#allocation83_spill] sm:$0xff] %v13547_v7  ;;  %11394 = vtanh.f32 %v13547_v7 }
0x2fd6   :  { %v11395_v19 = vpop.eup %11394 }
0x2fd7   :  { %4935 = vrot.lane.b32.xlu1 %v11395_v19, %s11585_s14 }
0x2fdb   :  { %4943 = vrot.lane.b32.xlu1 %v14737_v51, %s11585_s14 }
0x3049   :  { %v4936_v48 = vpop.permute.xlu1 %4935 }
0x304a   :  { %v13553_v43 = vmul.f32 %v11393_v21, %v4936_v48 }
0x304c   :  { %4940 = vrot.lane.b32.xlu0 %v13553_v43, %s11581_s27 }
0x304d   :  { %v4944_v2 = vpop.permute.xlu1 %4943 }
0x30be   :  { %v4941_v53 = vpop.permute.xlu0 %4940 }
0x30bf   :  { %v4946_v44 = vsel %vm247_vm1, %v4941_v53, %v4944_v2 }
0x30c0   :  { %9440 = vmatmul.mubr.msk.f32.vlgmr.msra.gmra.mrb[58].mxu1 %vm249_vm2, %v4946_v44 }
0x30c1   :  { %10642 = vmatpush1.bf16.msra.mxu1 %v14738_v22  ;;  %5184 = vmatprep.mubr.f32.mxu1 %v14441_v41  ;;  %v14743_v22 = vld [vmem:[#allocation97_spill] sm:$0xff] }
0x30c2   :  { %10644 = vmatprep.subr.bf16.mxu1 %v14739_v5 }
0x30c5   :  { %10646 = vmatpush1.bf16.msra.mxu1 %v14740_v16 }
0x30c6   :  { %10656 = vmatprep.subr.bf16.mxu1 %v14741_v54 }
0x3193   :  { %v5016_v21 = vpop.f32.mrb[58].mxu1 }
0x3194   :  { %v5017_v19 = vadd.f32 %v13567_v31, %v5016_v21  ;;  %v9441_v51 = vpop.f32.mrb[59].mxu1 }
0x3196   :  { %11396 = vtanh.f32 %v5017_v19  ;;  %v7677_v2 = vmul.f32 -1.442695, %v5017_v19 }
0x3198   :  { %11398 = vpow2.f32 %v7677_v2  ;;  %v14753_v2 = vld [vmem:[#allocation34_spill] sm:$0xff] }
0x31a0   :  { %v11397_v48 = vpop.eup %11396 }
0x31a1   :  { %5029 = vrot.lane.b32.xlu0 %v11397_v48, %s11585_s14 }
0x31a2   :  { %v11399_v53 = vpop.eup %11398 }
0x31a3   :  { %v5023_v44 = vadd.f32 1.0, %v11399_v53  ;;  %v14754_v53 = vld [vmem:[#allocation35_spill] sm:$0xff] }
0x31a5   :  { %11400 = vrcp.f32 %v5023_v44  ;;  %v14755_v44 = vld [vmem:[#allocation36_spill] sm:$0xff] }
0x31af   :  { %v11401_v16 = vpop.eup %11400 }
0x31b0   :  { %v5027_v7 = vmul.f32 %v11401_v16, %v14743_v22  ;;  %v14749_v22 = vld [vmem:[#allocation32_spill] sm:$0xff] }
0x3213   :  { %v5030_v54 = vpop.permute.xlu0 %5029 }
0x3214   :  { %v5032_v5 = vmul.f32 %v11401_v16, %v5030_v54  ;;  %v14752_v54 = vld [vmem:[#allocation25_spill] sm:$0xff] }
0x3216   :  { %5034 = vrot.lane.b32.xlu1 %v5032_v5, %s11581_s27  ;;  %v14750_v5 = vld [vmem:[#allocation24_spill] sm:$0xff] }
0x3288   :  { %v5035_v8 = vpop.permute.xlu1 %5034 }
0x3289   :  { %v13573_v30 = vadd.f32 %v5035_v8, %v5027_v7  ;;  %v14747_v8 = vld [vmem:[#allocation31_spill] sm:$0xff]  ;;  %v14748_v7 = vld [vmem:[#allocation21_spill] sm:$0xff] }
0x328b   :  { %14744 = vst [vmem:[#allocation85_spill] sm:$0xff] %v13573_v30  ;;  %11402 = vtanh.f32 %v13573_v30 }
0x3295   :  { %v11403_v21 = vpop.eup %11402 }
0x3296   :  { %5040 = vrot.lane.b32.xlu0 %v11403_v21, %s11585_s14  ;;  %v14756_v21 = vld [vmem:[#allocation37_spill] sm:$0xff] }
0x3308   :  { %v5041_v19 = vpop.permute.xlu0 %5040 }
0x3309   :  { %v13577_v51 = vmul.f32 %v11401_v16, %v5041_v19  ;;  %v14751_v16 = vld [vmem:[#allocation33_spill] sm:$0xff]  ;;  %v14757_v19 = vld [vmem:[#allocation38_spill] sm:$0xff] }
0x330b   :  { %14745 = vst [vmem:[#allocation86_spill] sm:$0xff] %v13577_v51  ;;  %5045 = vrot.lane.b32.xlu1 %v13577_v51, %s11581_s27 }
0x337d   :  { %v13581_v48 = vpop.permute.xlu1 %5045 }
0x337e   :  { %14746 = vst [vmem:[#allocation87_spill] sm:$0xff] %v13581_v48  ;;  %7678 = vmatmul.mubr.msk.f32.vlgmr.msra.gmra.mrb[54].mxu0 %vm247_vm1, %v13581_v48  ;;  %7679 = vmatmul.mubr.msk.f32.vlgmr.msra.gmra.mrb[60].mxu1 %vm247_vm1, %v13581_v48 }
0x337f   :  { %10650 = vmatpush1.bf16.msra.mxu0 %v14747_v8  ;;  %10658 = vmatpush1.bf16.msra.mxu1 %v14748_v7  ;;  %v14764_v7 = vld [vmem:[#allocation45_spill] sm:$0xff]  ;;  %v14765_v8 = vld [vmem:[#allocation46_spill] sm:$0xff] }
0x3380   :  { %10652 = vmatprep.subr.bf16.mxu0 %v14749_v22  ;;  %10660 = vmatprep.subr.bf16.mxu1 %v14750_v5  ;;  %v14758_v5 = vld [vmem:[#allocation39_spill] sm:$0xff]  ;;  %v14763_v22 = vld [vmem:[#allocation44_spill] sm:$0xff] }
0x3381   :  { %5255 = vmatprep.mubr.f32.mxu0 %v14441_v41  ;;  %5326 = vmatprep.mubr.f32.mxu1 %v14441_v41 }
0x3383   :  { %10654 = vmatpush1.bf16.msra.mxu0 %v14751_v16  ;;  %10662 = vmatpush1.bf16.msra.mxu1 %v14752_v54  ;;  %v14759_v16 = vld [vmem:[#allocation40_spill] sm:$0xff]  ;;  %v14760_v54 = vld [vmem:[#allocation41_spill] sm:$0xff] }
0x3384   :  { %10664 = vmatprep.subr.bf16.mxu0 %v14753_v2  ;;  %10696 = vmatprep.subr.bf16.mxu1 %v14754_v53  ;;  %v14761_v2 = vld [vmem:[#allocation42_spill] sm:$0xff]  ;;  %v14762_v53 = vld [vmem:[#allocation43_spill] sm:$0xff] }
0x3386   :  { %7680 = vmatmul.mubr.msk.f32.vlgmr.msra.gmra.mrb[56].mxu0 %vm247_vm1, %v13581_v48  ;;  %7681 = vmatmul.mubr.msk.f32.vlgmr.msra.gmra.mrb[62].mxu1 %vm247_vm1, %v13581_v48 }
0x3387   :  { %10666 = vmatpush3.bf16.msra.mxu0 %v14755_v44  ;;  %10698 = vmatpush3.bf16.msra.mxu1 %v14756_v21  ;;  %v14766_v44 = vld [vmem:[#allocation47_spill] sm:$0xff]  ;;  %v14767_v21 = vld [vmem:[#allocation48_spill] sm:$0xff] }
0x3388   :  { %10668 = vmatprep.subr.bf16.mxu0 %v14757_v19  ;;  %10700 = vmatprep.subr.bf16.mxu1 %v14758_v5  ;;  %v14768_v19 = vld [vmem:[#allocation49_spill] sm:$0xff]  ;;  %v14769_v5 = vld [vmem:[#allocation50_spill] sm:$0xff] }
0x338b   :  { %10670 = vmatpush3.bf16.msra.mxu0 %v14759_v16  ;;  %10702 = vmatpush3.bf16.msra.mxu1 %v14760_v54  ;;  %v14770_v16 = vld [vmem:[#allocation51_spill] sm:$0xff]  ;;  %v14771_v54 = vld [vmem:[#allocation52_spill] sm:$0xff] }
0x338c   :  { %10672 = vmatprep.subr.bf16.mxu0 %v14761_v2  ;;  %10704 = vmatprep.subr.bf16.mxu1 %v14762_v53  ;;  %v14772_v2 = vld [vmem:[#allocation53_spill] sm:$0xff]  ;;  %v14773_v53 = vld [vmem:[#allocation54_spill] sm:$0xff] }
0x338f   :  { %10674 = vmatpush3.bf16.msra.mxu0 %v14763_v22  ;;  %10706 = vmatpush3.bf16.msra.mxu1 %v14764_v7  ;;  %v14774_v22 = vld [vmem:[#allocation55_spill] sm:$0xff]  ;;  %v14775_v7 = vld [vmem:[#allocation56_spill] sm:$0xff] }
0x3390   :  { %10676 = vmatprep.subr.bf16.mxu0 %v14765_v8  ;;  %10708 = vmatprep.subr.bf16.mxu1 %v14766_v44  ;;  %v14776_v8 = vld [vmem:[#allocation57_spill] sm:$0xff]  ;;  %v14777_v44 = vld [vmem:[#allocation58_spill] sm:$0xff] }
0x3393   :  { %10678 = vmatpush3.bf16.msra.mxu0 %v14767_v21  ;;  %10710 = vmatpush3.bf16.msra.mxu1 %v14768_v19  ;;  %v14778_v21 = vld [vmem:[#allocation59_spill] sm:$0xff]  ;;  %v14779_v19 = vld [vmem:[#allocation60_spill] sm:$0xff] }
0x3394   :  { %10680 = vmatprep.subr.bf16.mxu0 %v14769_v5  ;;  %10712 = vmatprep.subr.bf16.mxu1 %v14770_v16  ;;  %v14780_v5 = vld [vmem:[#allocation61_spill] sm:$0xff]  ;;  %v14781_v16 = vld [vmem:[#allocation62_spill] sm:$0xff] }
0x3397   :  { %10682 = vmatpush3.bf16.msra.mxu0 %v14771_v54  ;;  %10714 = vmatpush3.bf16.msra.mxu1 %v14772_v2  ;;  %v14782_v54 = vld [vmem:[#allocation63_spill] sm:$0xff]  ;;  %v14783_v2 = vld [vmem:[#allocation64_spill] sm:$0xff] }
0x3398   :  { %10684 = vmatprep.subr.bf16.mxu0 %v14773_v53  ;;  %10716 = vmatprep.subr.bf16.mxu1 %v14774_v22  ;;  %v14784_v53 = vld [vmem:[#allocation65_spill] sm:$0xff]  ;;  %v14785_v22 = vld [vmem:[#allocation66_spill] sm:$0xff] }
0x339b   :  { %10686 = vmatpush3.bf16.msra.mxu0 %v14775_v7  ;;  %10718 = vmatpush3.bf16.msra.mxu1 %v14776_v8  ;;  %v14786_v7 = vld [vmem:[#allocation67_spill] sm:$0xff] }
0x339c   :  { %10688 = vmatprep.subr.bf16.mxu0 %v14777_v44  ;;  %10720 = vmatprep.subr.bf16.mxu1 %v14778_v21 }
0x339f   :  { %10690 = vmatpush3.bf16.msra.mxu0 %v14779_v19  ;;  %10722 = vmatpush3.bf16.msra.mxu1 %v14780_v5  ;;  %v13654_v5 = vld [vmem:[%s14121_s3 + $0x30] sm:$0xff] }
0x33a0   :  { %10692 = vmatprep.subr.bf16.mxu0 %v14781_v16  ;;  %10724 = vmatprep.subr.bf16.mxu1 %v14782_v54  ;;  %v13636_v16 = vld [vmem:[%s14121_s3] sm:$0xff]  ;;  %14790 = vst [vmem:[#allocation90_spill] sm:$0xff] %v13654_v5 }
0x33a1   :  { %14787 = vst [vmem:[#allocation88_spill] sm:$0xff] %v13636_v16 }
0x33a3   :  { %10694 = vmatpush3.bf16.msra.mxu0 %v14783_v2  ;;  %10726 = vmatpush3.bf16.msra.mxu1 %v14784_v53  ;;  %v13642_v53 = vld [vmem:[%s14121_s3 + $0x10] sm:$0xff] }
0x33a4   :  { %10728 = vmatprep.subr.bf16.mxu0 %v14785_v22  ;;  %10760 = vmatprep.subr.bf16.mxu1 %v14786_v7  ;;  %14788 = vst [vmem:[#allocation89_spill] sm:$0xff] %v13642_v53  ;;  %v13648_v22 = vld [vmem:[%s14121_s3 + $0x20] sm:$0xff] }
0x33a5   :  { %14789 = vst [vmem:[#allocation8_spill] sm:$0xff] %v13648_v22 }
0x3451   :  { %v5115_v8 = vpop.f32.mrb[54].mxu0  ;;  %v5186_v44 = vpop.f32.mrb[60].mxu1 }
0x3452   :  { %v5117_v30 = vpop.f32.mrb[55].mxu0  ;;  %v5188_v21 = vpop.f32.mrb[61].mxu1  ;;  %v5116_v54 = vadd.f32 %v13636_v16, %v5115_v8  ;;  %v5187_v7 = vadd.f32 %v13642_v53, %v5186_v44  ;;  %v13660_v44 = vld [vmem:[%s14121_s3 + $0x8] sm:$0xff] }
0x3453   :  { %14791 = vst [vmem:[#allocation9_spill] sm:$0xff] %v13660_v44  ;;  %v5118_v53 = vadd.f32 %v13660_v44, %v5117_v30 }
0x3459   :  { %v5257_v31 = vpop.f32.mrb[56].mxu0  ;;  %v5328_v19 = vpop.f32.mrb[62].mxu1 }
0x345a   :  { %v5258_v2 = vadd.f32 %v13648_v22, %v5257_v31  ;;  %v5329_v8 = vadd.f32 %v13654_v5, %v5328_v19  ;;  %v5259_v16 = vpop.f32.mrb[57].mxu0  ;;  %v5330_v51 = vpop.f32.mrb[63].mxu1  ;;  %v13666_v31 = vld [vmem:[%s14121_s3 + $0x18] sm:$0xff]  ;;  %v13672_v19 = vld [vmem:[%s14121_s3 + $0x28] sm:$0xff] }
0x345b   :  { %14792 = vst [vmem:[#allocation69_spill] sm:$0xff] %v13666_v31  ;;  %v5189_v22 = vadd.f32 %v13666_v31, %v5188_v21  ;;  %14793 = vst [vmem:[#allocation68_spill] sm:$0xff] %v13672_v19  ;;  %v5260_v5 = vadd.f32 %v13672_v19, %v5259_v16  ;;  %v5331_v30 = vadd.f32 %v13678_v36, %v5330_v51 }
0x345c   :  { %v5333_v44 = vmax.f32 %v5116_v54, %v5258_v2  ;;  %v5335_v55 = vmax.f32 %v5187_v7, %v5329_v8 }
0x345d   :  { %v5334_v47 = vmax.f32 %v5118_v53, %v5260_v5  ;;  %v5336_v1 = vmax.f32 %v5189_v22, %v5331_v30 }
0x345f   :  { %v5337_v9 = vmax.f32 %v5333_v44, %v5334_v47  ;;  %v5338_v21 = vmax.f32 %v5335_v55, %v5336_v1 }
0x3461   :  { %v5339_v31 = vmax.f32 %v5337_v9, %v5338_v21 }
0x3463   :  { %5340 = vmax.xlane.f32.xlu0 %v5339_v31 }
0x34f0   :  { %v5341_v48 = vpop.xlane.xlu0 %5340 }
0x34f1   :  { %v5342_v29 = vsub.f32 %v5116_v54, %v5341_v48  ;;  %v5343_v42 = vsub.f32 %v5118_v53, %v5341_v48  ;;  %v5344_v61 = vsub.f32 %v5187_v7, %v5341_v48  ;;  %v5345_v16 = vsub.f32 %v5189_v22, %v5341_v48 }
0x34f2   :  { %v5346_v3 = vsub.f32 %v5258_v2, %v5341_v48  ;;  %v5347_v36 = vsub.f32 %v5260_v5, %v5341_v48  ;;  %v5348_v6 = vsub.f32 %v5329_v8, %v5341_v48  ;;  %v5349_v47 = vsub.f32 %v5331_v30, %v5341_v48 }
0x34f3   :  { %v5350_v19 = vmul.f32 1.442695, %v5342_v29  ;;  %v5352_v4 = vmul.f32 1.442695, %v5343_v42  ;;  %v5354_v62 = vmul.f32 1.442695, %v5344_v61 }
0x34f4   :  { %v5356_v51 = vmul.f32 1.442695, %v5345_v16  ;;  %v5358_v58 = vmul.f32 1.442695, %v5346_v3  ;;  %v5360_v9 = vmul.f32 1.442695, %v5347_v36 }
0x34f5   :  { %11404 = vpow2.f32 %v5350_v19  ;;  %v5362_v1 = vmul.f32 1.442695, %v5348_v6  ;;  %v5364_v55 = vmul.f32 1.442695, %v5349_v47 }
0x34f6   :  { %11406 = vpow2.f32 %v5352_v4 }
0x34f7   :  { %11408 = vpow2.f32 %v5354_v62 }
0x34f8   :  { %11410 = vpow2.f32 %v5356_v51 }
0x34f9   :  { %11412 = vpow2.f32 %v5358_v58 }
0x34fa   :  { %11414 = vpow2.f32 %v5360_v9  ;;  %v14796_v9 = vld [vmem:[#allocation10_spill] sm:$0xff] }
0x34fb   :  { %11416 = vpow2.f32 %v5362_v1  ;;  %v14797_v1 = vld [vmem:[#allocation92_spill] sm:$0xff] }
0x34fc   :  { %11418 = vpow2.f32 %v5364_v55  ;;  %v14798_v55 = vld [vmem:[#allocation11_spill] sm:$0xff] }
0x34ff   :  { %v11405_v7 = vpop.eup %11404 }
0x3500   :  { %v11407_v22 = vpop.eup %11406 }
0x3501   :  { %v5366_v42 = vadd.f32 %v11407_v22, %v11405_v7  ;;  %v11409_v61 = vpop.eup %11408 }
0x3502   :  { %v11411_v4 = vpop.eup %11410 }
0x3503   :  { %v5367_v29 = vadd.f32 %v11409_v61, %v5366_v42  ;;  %v11413_v5 = vpop.eup %11412  ;;  %v14801_v42 = vld [vmem:[#allocation13_spill] sm:$0xff] }
0x3504   :  { %v11415_v2 = vpop.eup %11414 }
0x3505   :  { %v5368_v54 = vadd.f32 %v11411_v4, %v5367_v29  ;;  %v11417_v48 = vpop.eup %11416 }
0x3506   :  { %v11419_v36 = vpop.eup %11418 }
0x3507   :  { %v5369_v62 = vadd.f32 %v11413_v5, %v5368_v54 }
0x3509   :  { %v5370_v3 = vadd.f32 %v11415_v2, %v5369_v62 }
0x350b   :  { %v5371_v53 = vadd.f32 %v11417_v48, %v5370_v3 }
0x350d   :  { %v5372_v58 = vadd.f32 %v11419_v36, %v5371_v53 }
0x350f   :  { %5373 = vadd.xlane.f32.xlu1 %v5372_v58 }
0x3520   :  { %5756 = vrot.lane.b32.xlu1 %v13553_v43, %s11586_s17  ;;  %v14795_v43 = vld [vmem:[#allocation91_spill] sm:$0xff] }
0x359c   :  { %v5374_v6 = vpop.xlane.xlu1 %5373 }
0x359d   :  { %11420 = vrcp.f32 %v5374_v6 }
0x35a7   :  { %v11421_v8 = vpop.eup %11420 }
0x35a8   :  { %v5377_v44 = vmul.f32 %v11421_v8, %v11407_v22  ;;  %v5379_v31 = vmul.f32 %v11421_v8, %v11411_v4  ;;  %v5376_v19 = vmul.f32 %v11421_v8, %v11405_v7  ;;  %v5378_v30 = vmul.f32 %v11421_v8, %v11409_v61  ;;  %v14799_v7 = vld [vmem:[#allocation93_spill] sm:$0xff]  ;;  %v14800_v22 = vld [vmem:[#allocation12_spill] sm:$0xff]  ;;  %v14802_v61 = vld [vmem:[#allocation18_spill] sm:$0xff] }
0x35a9   :  { %v5381_v21 = vmul.f32 %v11421_v8, %v11415_v2  ;;  %v5383_v16 = vmul.f32 %v11421_v8, %v11419_v36  ;;  %v5380_v51 = vmul.f32 %v11421_v8, %v11413_v5  ;;  %v5382_v47 = vmul.f32 %v11421_v8, %v11417_v48 }
0x35aa   :  { %5448 = vmatprep.mubr.f32.mxu0 %v5377_v44  ;;  %5747 = vst [vmem:[#allocation4 + $0x148] sm:$0xff] %v5377_v44  ;;  %5518 = vmatprep.mubr.f32.mxu1 %v5379_v31  ;;  %5749 = vst [vmem:[#allocation4 + $0x158] sm:$0xff] %v5379_v31 }
0x35ab   :  { %5746 = vst [vmem:[#allocation4 + $0x140] sm:$0xff] %v5376_v19  ;;  %5748 = vst [vmem:[#allocation4 + $0x150] sm:$0xff] %v5378_v30  ;;  %5449 = vmatmul.mubr.f32.vlgmr.msra.gmra.mrb[58].mxu0 %v5376_v19  ;;  %5519 = vmatmul.mubr.f32.vlgmr.msra.gmra.mrb[64].mxu1 %v5378_v30  ;;  %v7683_v19 = vld [vmem:[%s14118_s0 + $0x30] sm:$0xff] }
0x35ac   :  { %5751 = vst [vmem:[#allocation4 + $0x168] sm:$0xff] %v5381_v21  ;;  %5753 = vst [vmem:[#allocation4 + $0x178] sm:$0xff] %v5383_v16  ;;  %10730 = vmatpush3.bf16.msra.mxu0 %v12360_v34  ;;  %10762 = vmatpush3.bf16.msra.mxu1 %v12362_v25 }
0x35ad   :  { %5750 = vst [vmem:[#allocation4 + $0x160] sm:$0xff] %v5380_v51  ;;  %5752 = vst [vmem:[#allocation4 + $0x170] sm:$0xff] %v5382_v47  ;;  %5588 = vmatprep.mubr.f32.mxu0 %v5381_v21  ;;  %5658 = vmatprep.mubr.f32.mxu1 %v5383_v16  ;;  %v5757_v21 = vpop.permute.xlu1 %5756  ;;  %v14803_v16 = vld [vmem:[#allocation87_spill] sm:$0xff] }
0x35ae   :  { %10732 = vmatprep.subr.bf16.mxu0 %v12400_v33  ;;  %10764 = vmatprep.subr.bf16.mxu1 %v12402_v24 }
0x35b0   :  { %10734 = vmatpush3.bf16.msra.mxu0 %v12417_v0  ;;  %10766 = vmatpush3.bf16.msra.mxu1 %v12419_v63 }
0x35b1   :  { %10736 = vmatprep.subr.bf16.mxu0 %v14479_v11  ;;  %10768 = vmatprep.subr.bf16.mxu1 %v14480_v56 }
0x35b4   :  { %10738 = vmatpush3.bf16.msra.mxu0 %v14481_v59  ;;  %10770 = vmatpush3.bf16.msra.mxu1 %v14482_v18 }
0x35b5   :  { %10740 = vmatprep.subr.bf16.mxu0 %v14483_v57  ;;  %10772 = vmatprep.subr.bf16.mxu1 %v14484_v17 }
0x35b8   :  { %10742 = vmatpush3.bf16.msra.mxu0 %v14485_v27  ;;  %10774 = vmatpush3.bf16.msra.mxu1 %v14486_v23 }
0x35b9   :  { %10744 = vmatprep.subr.bf16.mxu0 %v14487_v28  ;;  %10776 = vmatprep.subr.bf16.mxu1 %v14488_v37 }
0x35bc   :  { %10746 = vmatpush3.bf16.msra.mxu0 %v14489_v20  ;;  %10778 = vmatpush3.bf16.msra.mxu1 %v14490_v32 }
0x35bd   :  { %10748 = vmatprep.subr.bf16.mxu0 %v14491_v13  ;;  %10780 = vmatprep.subr.bf16.mxu1 %v14492_v15 }
0x35c0   :  { %10750 = vmatpush3.bf16.msra.mxu0 %v12561_v49  ;;  %10782 = vmatpush3.bf16.msra.mxu1 %v14493_v35 }
0x35c1   :  { %10752 = vmatprep.subr.bf16.mxu0 %v12573_v10  ;;  %10784 = vmatprep.subr.bf16.mxu1 %v14557_v52 }
0x35c4   :  { %10754 = vmatpush3.bf16.msra.mxu0 %v14558_v60  ;;  %10786 = vmatpush3.bf16.msra.mxu1 %v14559_v45 }
0x35c5   :  { %10756 = vmatprep.subr.bf16.mxu0 %v14560_v46  ;;  %10788 = vmatprep.subr.bf16.mxu1 %v14561_v26 }
0x35c8   :  { %10758 = vmatpush3.bf16.msra.mxu0 %v14562_v12  ;;  %10790 = vmatpush3.bf16.msra.mxu1 %v14563_v38 }
0x35c9   :  { %10803 = vmatprep.subr.bf16.mxu1 %v14440_v50  ;;  %10791 = vmatprep.subr.bf16.mxu0 %v14440_v50 }
0x35cb   :  { %5589 = vmatmul.mubr.f32.vlgmr.msra.gmra.mrb[60].mxu0 %v5380_v51  ;;  %5659 = vmatmul.mubr.f32.vlgmr.msra.gmra.mrb[66].mxu1 %v5382_v47 }
0x35cc   :  { %10805 = vmatpush3.bf16.msra.mxu1 %v14564_v39  ;;  %10793 = vmatpush3.bf16.msra.mxu0 %v14565_v40 }
0x35cd   :  { %10806 = vmatprep.subr.bf16.mxu1 %v14440_v50  ;;  %10794 = vmatprep.subr.bf16.mxu0 %v14440_v50 }
0x35ce   :  { %9458 = vmatprep.mubr.msk.f32.mxu0 %vm11583_vm0, %v14441_v41  ;;  %9485 = vmatprep.mubr.msk.f32.mxu1 %vm11583_vm0, %v14441_v41 }
0x35d0   :  { %10808 = vmatpush3.bf16.msra.mxu1 %v14566_v14  ;;  %10796 = vmatpush3.bf16.msra.mxu0 %v14795_v43 }
0x35d1   :  { %10809 = vmatprep.subr.bf16.mxu1 %v14440_v50  ;;  %10797 = vmatprep.subr.bf16.mxu0 %v14440_v50 }
0x35d4   :  { %10811 = vmatpush3.bf16.msra.mxu1 %v14796_v9  ;;  %10799 = vmatpush3.bf16.msra.mxu0 %v14797_v1 }
0x35d5   :  { %10812 = vmatprep.subr.bf16.mxu1 %v14440_v50  ;;  %10800 = vmatprep.subr.bf16.mxu0 %v14440_v50 }
0x35d8   :  { %10814 = vmatpush3.bf16.msra.mxu1 %v14798_v55  ;;  %10802 = vmatpush3.bf16.msra.mxu0 %v14799_v7 }
0x35d9   :  { %10815 = vmatprep.subr.bf16.mxu1 %v14440_v50  ;;  %10821 = vmatprep.subr.bf16.mxu0 %v14440_v50 }
0x35dc   :  { %10817 = vmatpush3.bf16.msra.mxu1 %v14800_v22  ;;  %v14874_v22 = vld [vmem:[#allocation76_spill] sm:$0xff] }
0x35dd   :  { %10818 = vmatprep.subr.bf16.mxu1 %v14440_v50 }
0x35e0   :  { %10820 = vmatpush3.bf16.msra.mxu1 %v14801_v42 }
0x35e1   :  { %10834 = vmatprep.subr.bf16.mxu1 %v14802_v61  ;;  %v14873_v61 = vld [vmem:[#allocation68_spill] sm:$0xff] }
0x367e   :  { %v8612_v29 = vpop.f32.mrb[58].mxu0  ;;  %v8647_v4 = vpop.f32.mrb[64].mxu1 }
0x367f   :  { %v8613_v54 = vpop.f32.mrb[59].mxu0  ;;  %v8648_v5 = vpop.f32.mrb[65].mxu1 }
0x3680   :  { %v8614_v62 = vadd.f32 %v8613_v54, %v8612_v29  ;;  %v8649_v2 = vadd.f32 %v8648_v5, %v8647_v4  ;;  %v14804_v4 = vld [vmem:[#allocation14_spill] sm:$0xff]  ;;  %v14805_v54 = vld [vmem:[#allocation19_spill] sm:$0xff] }
0x3681   :  { %v14806_v5 = vld [vmem:[#allocation22_spill] sm:$0xff] }
0x3682   :  { %v5521_v3 = vadd.f32 %v8649_v2, %v8614_v62  ;;  %v14807_v62 = vld [vmem:[#allocation15_spill] sm:$0xff] }
0x3683   :  { %v14808_v2 = vld [vmem:[#allocation23_spill] sm:$0xff] }
0x369e   :  { %v8682_v48 = vpop.f32.mrb[60].mxu0  ;;  %v8717_v53 = vpop.f32.mrb[66].mxu1 }
0x369f   :  { %v8683_v36 = vpop.f32.mrb[61].mxu0  ;;  %v8718_v58 = vpop.f32.mrb[67].mxu1 }
0x36a0   :  { %v8684_v6 = vadd.f32 %v8683_v36, %v8682_v48  ;;  %v8719_v8 = vadd.f32 %v8718_v58, %v8717_v53  ;;  %v14810_v48 = vld [vmem:[#allocation16_spill] sm:$0xff]  ;;  %v14811_v53 = vld [vmem:[#allocation17_spill] sm:$0xff]  ;;  %v14812_v36 = vld [vmem:[#allocation26_spill] sm:$0xff] }
0x36a2   :  { %v5591_v44 = vadd.f32 %v8684_v6, %v5521_v3  ;;  %v14809_v3 = vld [vmem:[#allocation30_spill] sm:$0xff]  ;;  %v14813_v6 = vld [vmem:[#allocation100_spill] sm:$0xff] }
0x36a4   :  { %v5661_v31 = vadd.f32 %v8719_v8, %v5591_v44 }
0x36a6   :  { %5666 = vrot.lane.b32.xlu0 %v5661_v31, %s11581_s27 }
0x3718   :  { %v5667_v30 = vpop.permute.xlu0 %5666 }
0x3719   :  { %v5669_v51 = vsel %vm247_vm1, %v14803_v16, %v5667_v30  ;;  %v5759_v47 = vsel %vm247_vm1, %v7683_v19, %v5667_v30  ;;  %v14814_v19 = vld [vmem:[#allocation101_spill] sm:$0xff] }
0x371a   :  { %v5760_v29 = vsel %vm249_vm2, %v5759_v47, %v5757_v21  ;;  %9459 = vmatmul.mubr.msk.f32.vlgmr.msra.gmra.mrb[62].mxu0 %vm249_vm2, %v5669_v51 }
0x371b   :  { %9486 = vmatmul.mubr.msk.f32.vlgmr.msra.gmra.mrb[68].mxu1 %vm251_vm3, %v5760_v29  ;;  %10823 = vmatpush3.bf16.msra.mxu0 %v14804_v4  ;;  %v14871_v4 = vld [vmem:[#allocation9_spill] sm:$0xff] }
0x371c   :  { %10824 = vmatprep.subr.bf16.mxu0 %v14440_v50  ;;  %9504 = vmatprep.mubr.msk.f32.mxu0 %vm11583_vm0, %v14441_v41 }
0x371d   :  { %10836 = vmatpush1.bf16.msra.mxu1 %v14805_v54  ;;  %6032 = vmatprep.mubr.f32.mxu1 %v14441_v41 }
0x371e   :  { %10838 = vmatprep.subr.bf16.mxu1 %v14806_v5  ;;  %v14870_v5 = vld [vmem:[#allocation90_spill] sm:$0xff] }
0x371f   :  { %10826 = vmatpush3.bf16.msra.mxu0 %v14807_v62  ;;  %v14869_v62 = vld [vmem:[#allocation8_spill] sm:$0xff] }
0x3720   :  { %10827 = vmatprep.subr.bf16.mxu0 %v14440_v50 }
0x3721   :  { %10840 = vmatpush1.bf16.msra.mxu1 %v14808_v2  ;;  %v14868_v2 = vld [vmem:[#allocation89_spill] sm:$0xff] }
0x3722   :  { %10850 = vmatprep.subr.bf16.mxu1 %v14809_v3 }
0x3723   :  { %10829 = vmatpush3.bf16.msra.mxu0 %v14810_v48 }
0x3724   :  { %10830 = vmatprep.subr.bf16.mxu0 %v14440_v50 }
0x3727   :  { %10832 = vmatpush3.bf16.msra.mxu0 %v14811_v53 }
0x3728   :  { %10842 = vmatprep.subr.bf16.mxu0 %v14812_v36 }
0x37ed   :  { %v5739_v58 = vpop.f32.mrb[62].mxu0 }
0x37ee   :  { %v5740_v8 = vadd.f32 %v14813_v6, %v5739_v58  ;;  %v9460_v44 = vpop.f32.mrb[63].mxu0  ;;  %v5830_v31 = vpop.f32.mrb[68].mxu1  ;;  %v14815_v58 = vld [vmem:[#allocation83_spill] sm:$0xff] }
0x37ef   :  { %v5831_v30 = vadd.f32 %v14814_v19, %v5830_v31  ;;  %v9487_v21 = vpop.f32.mrb[69].mxu1  ;;  %v14817_v19 = vld [vmem:[#allocation86_spill] sm:$0xff] }
0x37f0   :  { %5744 = vst [vmem:[#allocation2 + $0x28] sm:$0xff] %v5740_v8 }
0x37f1   :  { %11422 = vtanh.f32 %v5831_v30  ;;  %v7685_v51 = vmul.f32 -1.442695, %v5831_v30 }
0x37f3   :  { %11424 = vpow2.f32 %v7685_v51  ;;  %v14818_v51 = vld [vmem:[#allocation27_spill] sm:$0xff] }
0x37fb   :  { %v11423_v16 = vpop.eup %11422 }
0x37fc   :  { %5843 = vrot.lane.b32.xlu0 %v11423_v16, %s11585_s14 }
0x37fd   :  { %v11425_v47 = vpop.eup %11424 }
0x37fe   :  { %v5837_v29 = vadd.f32 1.0, %v11425_v47  ;;  %v14819_v47 = vld [vmem:[#allocation28_spill] sm:$0xff] }
0x3800   :  { %11426 = vrcp.f32 %v5837_v29  ;;  %v14820_v29 = vld [vmem:[#allocation29_spill] sm:$0xff] }
0x380a   :  { %v11427_v53 = vpop.eup %11426 }
0x380b   :  { %v5841_v6 = vmul.f32 %v11427_v53, %v14815_v58  ;;  %v14821_v58 = vld [vmem:[#allocation20_spill] sm:$0xff] }
0x386e   :  { %v5844_v36 = vpop.permute.xlu0 %5843 }
0x386f   :  { %v5846_v48 = vmul.f32 %v11427_v53, %v5844_v36 }
0x3871   :  { %5848 = vrot.lane.b32.xlu1 %v5846_v48, %s11581_s27 }
0x38e3   :  { %v5849_v44 = vpop.permute.xlu1 %5848 }
0x38e4   :  { %v13769_v31 = vadd.f32 %v5849_v44, %v5841_v6  ;;  %v14822_v6 = vld [vmem:[#allocation84_spill] sm:$0xff] }
0x38e6   :  { %14816 = vst [vmem:[#allocation70_spill] sm:$0xff] %v13769_v31  ;;  %11428 = vtanh.f32 %v13769_v31 }
0x38f0   :  { %v11429_v8 = vpop.eup %11428 }
0x38f1   :  { %5854 = vrot.lane.b32.xlu0 %v11429_v8, %s11585_s14 }
0x38f5   :  { %5862 = vrot.lane.b32.xlu0 %v14817_v19, %s11585_s14 }
0x3963   :  { %v5855_v30 = vpop.permute.xlu0 %5854 }
0x3964   :  { %v13775_v21 = vmul.f32 %v11427_v53, %v5855_v30 }
0x3966   :  { %5859 = vrot.lane.b32.xlu1 %v13775_v21, %s11581_s27 }
0x3967   :  { %v5863_v48 = vpop.permute.xlu0 %5862 }
0x39d8   :  { %v5860_v36 = vpop.permute.xlu1 %5859 }
0x39d9   :  { %v5865_v16 = vsel %vm247_vm1, %v5860_v36, %v5863_v48 }
0x39da   :  { %9505 = vmatmul.mubr.msk.f32.vlgmr.msra.gmra.mrb[64].mxu0 %vm249_vm2, %v5865_v16 }
0x39db   :  { %10844 = vmatpush1.bf16.msra.mxu0 %v14818_v51  ;;  %6103 = vmatprep.mubr.f32.mxu0 %v14441_v41 }
0x39dc   :  { %10846 = vmatprep.subr.bf16.mxu0 %v14819_v47 }
0x39df   :  { %10848 = vmatpush1.bf16.msra.mxu0 %v14820_v29  ;;  %v14823_v29 = vld [vmem:[#allocation85_spill] sm:$0xff] }
0x39e0   :  { %10858 = vmatprep.subr.bf16.mxu0 %v14821_v58 }
0x3aad   :  { %v5935_v53 = vpop.f32.mrb[64].mxu0 }
0x3aae   :  { %v5936_v44 = vadd.f32 %v14822_v6, %v5935_v53  ;;  %v9506_v8 = vpop.f32.mrb[65].mxu0 }
0x3ab0   :  { %11430 = vtanh.f32 %v5936_v44  ;;  %v7687_v30 = vmul.f32 -1.442695, %v5936_v44 }
0x3ab2   :  { %11432 = vpow2.f32 %v7687_v30  ;;  %v14833_v30 = vld [vmem:[#allocation34_spill] sm:$0xff] }
0x3aba   :  { %v11431_v19 = vpop.eup %11430 }
0x3abb   :  { %5948 = vrot.lane.b32.xlu1 %v11431_v19, %s11585_s14  ;;  %v14832_v19 = vld [vmem:[#allocation25_spill] sm:$0xff] }
0x3abc   :  { %v11433_v48 = vpop.eup %11432 }
0x3abd   :  { %v5942_v36 = vadd.f32 1.0, %v11433_v48  ;;  %v14834_v48 = vld [vmem:[#allocation35_spill] sm:$0xff] }
0x3abf   :  { %11434 = vrcp.f32 %v5942_v36  ;;  %v14835_v36 = vld [vmem:[#allocation36_spill] sm:$0xff] }
0x3ac9   :  { %v11435_v16 = vpop.eup %11434 }
0x3aca   :  { %v5946_v58 = vmul.f32 %v11435_v16, %v14823_v29  ;;  %v14830_v29 = vld [vmem:[#allocation24_spill] sm:$0xff] }
0x3b2d   :  { %v5949_v51 = vpop.permute.xlu1 %5948 }
0x3b2e   :  { %v5951_v47 = vmul.f32 %v11435_v16, %v5949_v51  ;;  %v14828_v51 = vld [vmem:[#allocation21_spill] sm:$0xff] }
0x3b30   :  { %5953 = vrot.lane.b32.xlu0 %v5951_v47, %s11581_s27  ;;  %v14829_v47 = vld [vmem:[#allocation32_spill] sm:$0xff] }
0x3ba2   :  { %v5954_v31 = vpop.permute.xlu0 %5953 }
0x3ba3   :  { %v13790_v3 = vadd.f32 %v5954_v31, %v5946_v58  ;;  %v14827_v31 = vld [vmem:[#allocation31_spill] sm:$0xff]  ;;  %v14831_v58 = vld [vmem:[#allocation33_spill] sm:$0xff] }
0x3ba5   :  { %14824 = vst [vmem:[#allocation71_spill] sm:$0xff] %v13790_v3  ;;  %11436 = vtanh.f32 %v13790_v3 }
0x3baf   :  { %v11437_v53 = vpop.eup %11436 }
0x3bb0   :  { %5959 = vrot.lane.b32.xlu1 %v11437_v53, %s11585_s14  ;;  %v14837_v53 = vld [vmem:[#allocation38_spill] sm:$0xff] }
0x3c22   :  { %v5960_v6 = vpop.permute.xlu1 %5959 }
0x3c23   :  { %v13794_v44 = vmul.f32 %v11435_v16, %v5960_v6  ;;  %v14836_v16 = vld [vmem:[#allocation37_spill] sm:$0xff]  ;;  %v14838_v6 = vld [vmem:[#allocation39_spill] sm:$0xff] }
0x3c25   :  { %14825 = vst [vmem:[#allocation72_spill] sm:$0xff] %v13794_v44  ;;  %5964 = vrot.lane.b32.xlu0 %v13794_v44, %s11581_s27  ;;  %v14867_v44 = vld [vmem:[#allocation88_spill] sm:$0xff] }
0x3c97   :  { %v13798_v8 = vpop.permute.xlu0 %5964 }
0x3c98   :  { %14826 = vst [vmem:[#allocation75_spill] sm:$0xff] %v13798_v8  ;;  %7688 = vmatmul.mubr.msk.f32.vlgmr.msra.gmra.mrb[70].mxu1 %vm247_vm1, %v13798_v8  ;;  %7689 = vmatmul.mubr.msk.f32.vlgmr.msra.gmra.mrb[66].mxu0 %vm247_vm1, %v13798_v8 }
0x3c99   :  { %10852 = vmatpush1.bf16.msra.mxu1 %v14827_v31  ;;  %10860 = vmatpush1.bf16.msra.mxu0 %v14828_v51  ;;  %v14845_v51 = vld [vmem:[#allocation46_spill] sm:$0xff] }
0x3c9a   :  { %10854 = vmatprep.subr.bf16.mxu1 %v14829_v47  ;;  %10862 = vmatprep.subr.bf16.mxu0 %v14830_v29  ;;  %v14843_v29 = vld [vmem:[#allocation44_spill] sm:$0xff]  ;;  %v14844_v47 = vld [vmem:[#allocation45_spill] sm:$0xff] }
0x3c9b   :  { %6174 = vmatprep.mubr.f32.mxu1 %v14441_v41  ;;  %6245 = vmatprep.mubr.f32.mxu0 %v14441_v41 }
0x3c9d   :  { %10856 = vmatpush1.bf16.msra.mxu1 %v14831_v58  ;;  %10864 = vmatpush1.bf16.msra.mxu0 %v14832_v19  ;;  %v14839_v58 = vld [vmem:[#allocation40_spill] sm:$0xff]  ;;  %v14840_v19 = vld [vmem:[#allocation41_spill] sm:$0xff] }
0x3c9e   :  { %10866 = vmatprep.subr.bf16.mxu1 %v14833_v30  ;;  %10898 = vmatprep.subr.bf16.mxu0 %v14834_v48  ;;  %v14841_v30 = vld [vmem:[#allocation42_spill] sm:$0xff]  ;;  %v14842_v48 = vld [vmem:[#allocation43_spill] sm:$0xff] }
0x3ca0   :  { %7690 = vmatmul.mubr.msk.f32.vlgmr.msra.gmra.mrb[72].mxu1 %vm247_vm1, %v13798_v8  ;;  %7691 = vmatmul.mubr.msk.f32.vlgmr.msra.gmra.mrb[68].mxu0 %vm247_vm1, %v13798_v8  ;;  %v14872_v8 = vld [vmem:[#allocation69_spill] sm:$0xff] }
0x3ca1   :  { %10868 = vmatpush3.bf16.msra.mxu1 %v14835_v36  ;;  %10900 = vmatpush3.bf16.msra.mxu0 %v14836_v16  ;;  %v14846_v36 = vld [vmem:[#allocation47_spill] sm:$0xff]  ;;  %v14847_v16 = vld [vmem:[#allocation48_spill] sm:$0xff] }
0x3ca2   :  { %10870 = vmatprep.subr.bf16.mxu1 %v14837_v53  ;;  %10902 = vmatprep.subr.bf16.mxu0 %v14838_v6  ;;  %v14848_v53 = vld [vmem:[#allocation49_spill] sm:$0xff]  ;;  %v14849_v6 = vld [vmem:[#allocation50_spill] sm:$0xff] }
0x3ca5   :  { %10872 = vmatpush3.bf16.msra.mxu1 %v14839_v58  ;;  %10904 = vmatpush3.bf16.msra.mxu0 %v14840_v19  ;;  %v14850_v58 = vld [vmem:[#allocation51_spill] sm:$0xff]  ;;  %v14851_v19 = vld [vmem:[#allocation52_spill] sm:$0xff] }
0x3ca6   :  { %10874 = vmatprep.subr.bf16.mxu1 %v14841_v30  ;;  %10906 = vmatprep.subr.bf16.mxu0 %v14842_v48  ;;  %v14852_v30 = vld [vmem:[#allocation53_spill] sm:$0xff]  ;;  %v14853_v48 = vld [vmem:[#allocation54_spill] sm:$0xff] }
0x3ca9   :  { %10876 = vmatpush3.bf16.msra.mxu1 %v14843_v29  ;;  %10908 = vmatpush3.bf16.msra.mxu0 %v14844_v47  ;;  %v14854_v29 = vld [vmem:[#allocation55_spill] sm:$0xff]  ;;  %v14855_v47 = vld [vmem:[#allocation56_spill] sm:$0xff] }
0x3caa   :  { %10878 = vmatprep.subr.bf16.mxu1 %v14845_v51  ;;  %10910 = vmatprep.subr.bf16.mxu0 %v14846_v36  ;;  %v14856_v51 = vld [vmem:[#allocation57_spill] sm:$0xff]  ;;  %v14857_v36 = vld [vmem:[#allocation58_spill] sm:$0xff] }
0x3cad   :  { %10880 = vmatpush3.bf16.msra.mxu1 %v14847_v16  ;;  %10912 = vmatpush3.bf16.msra.mxu0 %v14848_v53  ;;  %v14858_v16 = vld [vmem:[#allocation59_spill] sm:$0xff]  ;;  %v14859_v53 = vld [vmem:[#allocation60_spill] sm:$0xff] }
0x3cae   :  { %10882 = vmatprep.subr.bf16.mxu1 %v14849_v6  ;;  %10914 = vmatprep.subr.bf16.mxu0 %v14850_v58  ;;  %v14860_v6 = vld [vmem:[#allocation61_spill] sm:$0xff]  ;;  %v14861_v58 = vld [vmem:[#allocation62_spill] sm:$0xff] }
0x3cb1   :  { %10884 = vmatpush3.bf16.msra.mxu1 %v14851_v19  ;;  %10916 = vmatpush3.bf16.msra.mxu0 %v14852_v30  ;;  %v14862_v19 = vld [vmem:[#allocation63_spill] sm:$0xff]  ;;  %v14863_v30 = vld [vmem:[#allocation64_spill] sm:$0xff] }
0x3cb2   :  { %10886 = vmatprep.subr.bf16.mxu1 %v14853_v48  ;;  %10918 = vmatprep.subr.bf16.mxu0 %v14854_v29  ;;  %v14864_v48 = vld [vmem:[#allocation65_spill] sm:$0xff]  ;;  %v14865_v29 = vld [vmem:[#allocation66_spill] sm:$0xff] }
0x3cb5   :  { %10888 = vmatpush3.bf16.msra.mxu1 %v14855_v47  ;;  %10920 = vmatpush3.bf16.msra.mxu0 %v14856_v51  ;;  %v14866_v47 = vld [vmem:[#allocation67_spill] sm:$0xff] }
0x3cb6   :  { %10890 = vmatprep.subr.bf16.mxu1 %v14857_v36  ;;  %10922 = vmatprep.subr.bf16.mxu0 %v14858_v16 }
0x3cb9   :  { %10892 = vmatpush3.bf16.msra.mxu1 %v14859_v53  ;;  %10924 = vmatpush3.bf16.msra.mxu0 %v14860_v6 }
0x3cba   :  { %10894 = vmatprep.subr.bf16.mxu1 %v14861_v58  ;;  %10926 = vmatprep.subr.bf16.mxu0 %v14862_v19 }
0x3cbd   :  { %10896 = vmatpush3.bf16.msra.mxu1 %v14863_v30  ;;  %10928 = vmatpush3.bf16.msra.mxu0 %v14864_v48 }
0x3cbe   :  { %10930 = vmatprep.subr.bf16.mxu1 %v14865_v29  ;;  %10962 = vmatprep.subr.bf16.mxu0 %v14866_v47 }
0x3d6b   :  { %v6034_v51 = vpop.f32.mrb[70].mxu1  ;;  %v6105_v36 = vpop.f32.mrb[66].mxu0 }
0x3d6c   :  { %v6036_v31 = vpop.f32.mrb[71].mxu1  ;;  %v6107_v16 = vpop.f32.mrb[67].mxu0  ;;  %v6035_v6 = vadd.f32 %v14867_v44, %v6034_v51  ;;  %v6106_v58 = vadd.f32 %v14868_v2, %v6105_v36 }
0x3d6d   :  { %v6037_v29 = vadd.f32 %v14871_v4, %v6036_v31  ;;  %v6108_v47 = vadd.f32 %v14872_v8, %v6107_v16 }
0x3d73   :  { %v6176_v3 = vpop.f32.mrb[72].mxu1  ;;  %v6247_v53 = vpop.f32.mrb[68].mxu0 }
0x3d74   :  { %v6177_v19 = vadd.f32 %v14869_v62, %v6176_v3  ;;  %v6248_v30 = vadd.f32 %v14870_v5, %v6247_v53  ;;  %v6178_v54 = vpop.f32.mrb[73].mxu1  ;;  %v6249_v48 = vpop.f32.mrb[69].mxu0 }
0x3d75   :  { %v6179_v42 = vadd.f32 %v14873_v61, %v6178_v54  ;;  %v6250_v7 = vadd.f32 %v14874_v22, %v6249_v48 }
0x3d76   :  { %v6252_v55 = vmax.f32 %v6035_v6, %v6177_v19  ;;  %v6254_v1 = vmax.f32 %v6106_v58, %v6248_v30 }
0x3d77   :  { %v6253_v9 = vmax.f32 %v6037_v29, %v6179_v42  ;;  %v6255_v44 = vmax.f32 %v6108_v47, %v6250_v7 }
0x3d79   :  { %v6256_v51 = vmax.f32 %v6252_v55, %v6253_v9  ;;  %v6257_v2 = vmax.f32 %v6254_v1, %v6255_v44 }
0x3d7b   :  { %v6258_v36 = vmax.f32 %v6256_v51, %v6257_v2 }
0x3d7d   :  { %6259 = vmax.xlane.f32.xlu1 %v6258_v36 }
0x3d8e   :  { %6675 = vrot.lane.b32.xlu1 %v13775_v21, %s11586_s17 }
0x3e0a   :  { %v6260_v5 = vpop.xlane.xlu1 %6259 }
0x3e0b   :  { %v6261_v62 = vsub.f32 %v6035_v6, %v6260_v5  ;;  %v6262_v4 = vsub.f32 %v6037_v29, %v6260_v5  ;;  %v6263_v3 = vsub.f32 %v6106_v58, %v6260_v5  ;;  %v6264_v8 = vsub.f32 %v6108_v47, %v6260_v5 }
0x3e0c   :  { %v6265_v22 = vsub.f32 %v6177_v19, %v6260_v5  ;;  %v6266_v16 = vsub.f32 %v6179_v42, %v6260_v5  ;;  %v6267_v9 = vsub.f32 %v6248_v30, %v6260_v5  ;;  %v6268_v55 = vsub.f32 %v6250_v7, %v6260_v5 }
0x3e0d   :  { %v6269_v31 = vmul.f32 1.442695, %v6261_v62  ;;  %v6271_v61 = vmul.f32 1.442695, %v6262_v4  ;;  %v6273_v54 = vmul.f32 1.442695, %v6263_v3 }
0x3e0e   :  { %v6275_v48 = vmul.f32 1.442695, %v6264_v8  ;;  %v6277_v1 = vmul.f32 1.442695, %v6265_v22  ;;  %v6279_v53 = vmul.f32 1.442695, %v6266_v16 }
0x3e0f   :  { %11438 = vpow2.f32 %v6269_v31  ;;  %v6281_v21 = vmul.f32 1.442695, %v6267_v9  ;;  %v6283_v29 = vmul.f32 1.442695, %v6268_v55 }
0x3e10   :  { %11440 = vpow2.f32 %v6271_v61 }
0x3e11   :  { %11442 = vpow2.f32 %v6273_v54 }
0x3e12   :  { %11444 = vpow2.f32 %v6275_v48 }
0x3e13   :  { %11446 = vpow2.f32 %v6277_v1 }
0x3e14   :  { %11448 = vpow2.f32 %v6279_v53  ;;  %v14876_v53 = vld [vmem:[#allocation92_spill] sm:$0xff] }
0x3e15   :  { %11450 = vpow2.f32 %v6281_v21  ;;  %v14877_v21 = vld [vmem:[#allocation11_spill] sm:$0xff] }
0x3e16   :  { %11452 = vpow2.f32 %v6283_v29  ;;  %v14878_v29 = vld [vmem:[#allocation93_spill] sm:$0xff] }
0x3e19   :  { %v11439_v58 = vpop.eup %11438 }
0x3e1a   :  { %v11441_v47 = vpop.eup %11440 }
0x3e1b   :  { %v6285_v6 = vadd.f32 %v11441_v47, %v11439_v58  ;;  %v11443_v44 = vpop.eup %11442 }
0x3e1c   :  { %v11445_v51 = vpop.eup %11444 }
0x3e1d   :  { %v6286_v19 = vadd.f32 %v11443_v44, %v6285_v6  ;;  %v11447_v42 = vpop.eup %11446 }
0x3e1e   :  { %v11449_v30 = vpop.eup %11448 }
0x3e1f   :  { %v6287_v2 = vadd.f32 %v11445_v51, %v6286_v19  ;;  %v11451_v7 = vpop.eup %11450 }
0x3e20   :  { %v11453_v4 = vpop.eup %11452 }
0x3e21   :  { %v6288_v36 = vadd.f32 %v11447_v42, %v6287_v2 }
0x3e23   :  { %v6289_v62 = vadd.f32 %v11449_v30, %v6288_v36 }
0x3e25   :  { %v6290_v5 = vadd.f32 %v11451_v7, %v6289_v62 }
0x3e27   :  { %v6291_v3 = vadd.f32 %v11453_v4, %v6290_v5 }
0x3e29   :  { %6292 = vadd.xlane.f32.xlu0 %v6291_v3 }
0x3eb6   :  { %v6293_v8 = vpop.xlane.xlu0 %6292 }
0x3eb7   :  { %11454 = vrcp.f32 %v6293_v8 }
0x3ec1   :  { %v11455_v31 = vpop.eup %11454 }
0x3ec2   :  { %v6296_v61 = vmul.f32 %v11455_v31, %v11441_v47  ;;  %v6298_v54 = vmul.f32 %v11455_v31, %v11445_v51  ;;  %v6295_v22 = vmul.f32 %v11455_v31, %v11439_v58  ;;  %v6297_v48 = vmul.f32 %v11455_v31, %v11443_v44  ;;  %v14880_v58 = vld [vmem:[#allocation13_spill] sm:$0xff]  ;;  %v14881_v47 = vld [vmem:[#allocation18_spill] sm:$0xff] }
0x3ec3   :  { %v6300_v16 = vmul.f32 %v11455_v31, %v11449_v30  ;;  %v6302_v9 = vmul.f32 %v11455_v31, %v11453_v4  ;;  %v6299_v1 = vmul.f32 %v11455_v31, %v11447_v42  ;;  %v6301_v55 = vmul.f32 %v11455_v31, %v11451_v7 }
0x3ec4   :  { %6367 = vmatprep.mubr.f32.mxu1 %v6296_v61  ;;  %6666 = vst [vmem:[#allocation4 + $0x188] sm:$0xff] %v6296_v61  ;;  %6437 = vmatprep.mubr.f32.mxu0 %v6298_v54  ;;  %6668 = vst [vmem:[#allocation4 + $0x198] sm:$0xff] %v6298_v54  ;;  %v7693_v61 = vld [vmem:[%s14118_s0 + $0x38] sm:$0xff] }
0x3ec5   :  { %6665 = vst [vmem:[#allocation4 + $0x180] sm:$0xff] %v6295_v22  ;;  %6667 = vst [vmem:[#allocation4 + $0x190] sm:$0xff] %v6297_v48  ;;  %6368 = vmatmul.mubr.f32.vlgmr.msra.gmra.mrb[74].mxu1 %v6295_v22  ;;  %6438 = vmatmul.mubr.f32.vlgmr.msra.gmra.mrb[70].mxu0 %v6297_v48  ;;  %v6676_v22 = vpop.permute.xlu1 %6675  ;;  %v14882_v48 = vld [vmem:[#allocation75_spill] sm:$0xff] }
0x3ec6   :  { %6670 = vst [vmem:[#allocation4 + $0x1a8] sm:$0xff] %v6300_v16  ;;  %6672 = vst [vmem:[#allocation4 + $0x1b8] sm:$0xff] %v6302_v9  ;;  %10932 = vmatpush3.bf16.msra.mxu1 %v12360_v34  ;;  %10964 = vmatpush3.bf16.msra.mxu0 %v12362_v25 }
0x3ec7   :  { %6669 = vst [vmem:[#allocation4 + $0x1a0] sm:$0xff] %v6299_v1  ;;  %6671 = vst [vmem:[#allocation4 + $0x1b0] sm:$0xff] %v6301_v55  ;;  %6507 = vmatprep.mubr.f32.mxu1 %v6300_v16  ;;  %6577 = vmatprep.mubr.f32.mxu0 %v6302_v9 }
0x3ec8   :  { %10934 = vmatprep.subr.bf16.mxu1 %v12400_v33  ;;  %10966 = vmatprep.subr.bf16.mxu0 %v12402_v24 }
0x3eca   :  { %10936 = vmatpush3.bf16.msra.mxu1 %v12417_v0  ;;  %10968 = vmatpush3.bf16.msra.mxu0 %v12419_v63 }
0x3ecb   :  { %10938 = vmatprep.subr.bf16.mxu1 %v14479_v11  ;;  %10970 = vmatprep.subr.bf16.mxu0 %v14480_v56 }
0x3ece   :  { %10940 = vmatpush3.bf16.msra.mxu1 %v14481_v59  ;;  %10972 = vmatpush3.bf16.msra.mxu0 %v14482_v18 }
0x3ecf   :  { %10942 = vmatprep.subr.bf16.mxu1 %v14483_v57  ;;  %10974 = vmatprep.subr.bf16.mxu0 %v14484_v17 }
0x3ed2   :  { %10944 = vmatpush3.bf16.msra.mxu1 %v14485_v27  ;;  %10976 = vmatpush3.bf16.msra.mxu0 %v14486_v23 }
0x3ed3   :  { %10946 = vmatprep.subr.bf16.mxu1 %v14487_v28  ;;  %10978 = vmatprep.subr.bf16.mxu0 %v14488_v37 }
0x3ed6   :  { %10948 = vmatpush3.bf16.msra.mxu1 %v14489_v20  ;;  %10980 = vmatpush3.bf16.msra.mxu0 %v14490_v32 }
0x3ed7   :  { %10950 = vmatprep.subr.bf16.mxu1 %v14491_v13  ;;  %10982 = vmatprep.subr.bf16.mxu0 %v14492_v15 }
0x3eda   :  { %10952 = vmatpush3.bf16.msra.mxu1 %v12561_v49  ;;  %10984 = vmatpush3.bf16.msra.mxu0 %v14493_v35 }
0x3edb   :  { %10954 = vmatprep.subr.bf16.mxu1 %v12573_v10  ;;  %10986 = vmatprep.subr.bf16.mxu0 %v14557_v52 }
0x3ede   :  { %10956 = vmatpush3.bf16.msra.mxu1 %v14558_v60  ;;  %10988 = vmatpush3.bf16.msra.mxu0 %v14559_v45 }
0x3edf   :  { %10958 = vmatprep.subr.bf16.mxu1 %v14560_v46  ;;  %10990 = vmatprep.subr.bf16.mxu0 %v14561_v26 }
0x3ee2   :  { %10960 = vmatpush3.bf16.msra.mxu1 %v14562_v12  ;;  %10992 = vmatpush3.bf16.msra.mxu0 %v14563_v38 }
0x3ee3   :  { %11005 = vmatprep.subr.bf16.mxu0 %v14440_v50  ;;  %10993 = vmatprep.subr.bf16.mxu1 %v14440_v50 }
0x3ee5   :  { %6508 = vmatmul.mubr.f32.vlgmr.msra.gmra.mrb[76].mxu1 %v6299_v1  ;;  %6578 = vmatmul.mubr.f32.vlgmr.msra.gmra.mrb[72].mxu0 %v6301_v55  ;;  %v14883_v55 = vld [vmem:[#allocation14_spill] sm:$0xff] }
0x3ee6   :  { %11007 = vmatpush3.bf16.msra.mxu0 %v14564_v39  ;;  %10995 = vmatpush3.bf16.msra.mxu1 %v14565_v40  ;;  %v14875_v39 = vld [vmem:[#allocation10_spill] sm:$0xff] }
0x3ee7   :  { %11008 = vmatprep.subr.bf16.mxu0 %v14440_v50  ;;  %10996 = vmatprep.subr.bf16.mxu1 %v14440_v50 }
0x3ee8   :  { %9523 = vmatprep.mubr.msk.f32.mxu1 %vm11583_vm0, %v14441_v41  ;;  %9550 = vmatprep.mubr.msk.f32.mxu0 %vm11583_vm0, %v14441_v41 }
0x3eea   :  { %11010 = vmatpush3.bf16.msra.mxu0 %v14566_v14  ;;  %10998 = vmatpush3.bf16.msra.mxu1 %v14795_v43  ;;  %v14879_v14 = vld [vmem:[#allocation12_spill] sm:$0xff] }
0x3eeb   :  { %11011 = vmatprep.subr.bf16.mxu0 %v14440_v50  ;;  %10999 = vmatprep.subr.bf16.mxu1 %v14440_v50 }
0x3eee   :  { %11013 = vmatpush3.bf16.msra.mxu0 %v14875_v39  ;;  %11001 = vmatpush3.bf16.msra.mxu1 %v14876_v53  ;;  %v14884_v39 = vld [vmem:[#allocation19_spill] sm:$0xff] }
0x3eef   :  { %11014 = vmatprep.subr.bf16.mxu0 %v14440_v50  ;;  %11002 = vmatprep.subr.bf16.mxu1 %v14440_v50 }
0x3ef2   :  { %11016 = vmatpush3.bf16.msra.mxu0 %v14877_v21  ;;  %11004 = vmatpush3.bf16.msra.mxu1 %v14878_v29  ;;  %v14885_v21 = vld [vmem:[#allocation22_spill] sm:$0xff] }
0x3ef3   :  { %11017 = vmatprep.subr.bf16.mxu0 %v14440_v50  ;;  %11023 = vmatprep.subr.bf16.mxu1 %v14440_v50 }
0x3ef6   :  { %11019 = vmatpush3.bf16.msra.mxu0 %v14879_v14  ;;  %v14886_v14 = vld [vmem:[#allocation15_spill] sm:$0xff] }
0x3ef7   :  { %11020 = vmatprep.subr.bf16.mxu0 %v14440_v50 }
0x3efa   :  { %11022 = vmatpush3.bf16.msra.mxu0 %v14880_v58  ;;  %v14887_v58 = vld [vmem:[#allocation23_spill] sm:$0xff] }
0x3efb   :  { %11036 = vmatprep.subr.bf16.mxu0 %v14881_v47  ;;  %v14888_v47 = vld [vmem:[#allocation30_spill] sm:$0xff] }
0x3f98   :  { %v8783_v6 = vpop.f32.mrb[74].mxu1  ;;  %v8818_v44 = vpop.f32.mrb[70].mxu0 }
0x3f99   :  { %v8784_v19 = vpop.f32.mrb[75].mxu1  ;;  %v8819_v51 = vpop.f32.mrb[71].mxu0 }
0x3f9a   :  { %v8785_v2 = vadd.f32 %v8784_v19, %v8783_v6  ;;  %v8820_v42 = vadd.f32 %v8819_v51, %v8818_v44  ;;  %v14889_v6 = vld [vmem:[#allocation16_spill] sm:$0xff]  ;;  %v14890_v44 = vld [vmem:[#allocation17_spill] sm:$0xff]  ;;  %v14891_v19 = vld [vmem:[#allocation26_spill] sm:$0xff] }
0x3f9c   :  { %v6440_v36 = vadd.f32 %v8820_v42, %v8785_v2  ;;  %v13944_v2 = vld [vmem:[%s14128_s10] sm:$0xff] }
0x3f9d   :  { %14892 = vst [vmem:[#allocation73_spill] sm:$0xff] %v13944_v2 }
0x3fb8   :  { %v8853_v30 = vpop.f32.mrb[76].mxu1  ;;  %v8888_v62 = vpop.f32.mrb[72].mxu0 }
0x3fb9   :  { %v8854_v7 = vpop.f32.mrb[77].mxu1  ;;  %v8889_v5 = vpop.f32.mrb[73].mxu0 }
0x3fba   :  { %v8855_v4 = vadd.f32 %v8854_v7, %v8853_v30  ;;  %v8890_v3 = vadd.f32 %v8889_v5, %v8888_v62  ;;  %v11523_v62 = vld [vmem:[%s14124_s6] sm:$0xff] }
0x3fbc   :  { %v6510_v8 = vadd.f32 %v8855_v4, %v6440_v36 }
0x3fbe   :  { %v6580_v31 = vadd.f32 %v8890_v3, %v6510_v8 }
0x3fc0   :  { %6585 = vrot.lane.b32.xlu0 %v6580_v31, %s11581_s27 }
0x4032   :  { %v6586_v54 = vpop.permute.xlu0 %6585 }
0x4033   :  { %v6588_v16 = vsel %vm247_vm1, %v14882_v48, %v6586_v54  ;;  %v6678_v9 = vsel %vm247_vm1, %v7693_v61, %v6586_v54  ;;  %v14893_v48 = vld [vmem:[#allocation70_spill] sm:$0xff] }
0x4034   :  { %v6679_v1 = vsel %vm249_vm2, %v6678_v9, %v6676_v22  ;;  %9524 = vmatmul.mubr.msk.f32.vlgmr.msra.gmra.mrb[78].mxu1 %vm249_vm2, %v6588_v16 }
0x4035   :  { %9551 = vmatmul.mubr.msk.f32.vlgmr.msra.gmra.mrb[74].mxu0 %vm251_vm3, %v6679_v1  ;;  %11025 = vmatpush3.bf16.msra.mxu1 %v14883_v55 }
0x4036   :  { %11026 = vmatprep.subr.bf16.mxu1 %v14440_v50  ;;  %9569 = vmatprep.mubr.msk.f32.mxu1 %vm11583_vm0, %v14441_v41 }
0x4037   :  { %11038 = vmatpush1.bf16.msra.mxu0 %v14884_v39  ;;  %6951 = vmatprep.mubr.f32.mxu0 %v14441_v41  ;;  %v14894_v39 = vld [vmem:[#allocation72_spill] sm:$0xff] }
0x4038   :  { %11040 = vmatprep.subr.bf16.mxu0 %v14885_v21 }
0x4039   :  { %11028 = vmatpush3.bf16.msra.mxu1 %v14886_v14 }
0x403a   :  { %11029 = vmatprep.subr.bf16.mxu1 %v14440_v50 }
0x403b   :  { %11042 = vmatpush1.bf16.msra.mxu0 %v14887_v58 }
0x403c   :  { %11052 = vmatprep.subr.bf16.mxu0 %v14888_v47 }
0x403d   :  { %11031 = vmatpush3.bf16.msra.mxu1 %v14889_v6 }
0x403e   :  { %11032 = vmatprep.subr.bf16.mxu1 %v14440_v50 }
0x4041   :  { %11034 = vmatpush3.bf16.msra.mxu1 %v14890_v44  ;;  %v14895_v44 = vld [vmem:[#allocation27_spill] sm:$0xff] }
0x4042   :  { %11044 = vmatprep.subr.bf16.mxu1 %v14891_v19  ;;  %v14896_v19 = vld [vmem:[#allocation28_spill] sm:$0xff] }
0x4107   :  { %v6658_v51 = vpop.f32.mrb[78].mxu1 }
0x4108   :  { %v6659_v42 = vadd.f32 %v13944_v2, %v6658_v51  ;;  %v9525_v36 = vpop.f32.mrb[79].mxu1  ;;  %v6749_v30 = vpop.f32.mrb[74].mxu0  ;;  %v14897_v51 = vld [vmem:[#allocation29_spill] sm:$0xff] }
0x4109   :  { %v6750_v7 = vadd.f32 %v11523_v62, %v6749_v30  ;;  %v9552_v5 = vpop.f32.mrb[75].mxu0  ;;  %v11524_v30 = vld [vmem:[%s14126_s8] sm:$0xff] }
0x410a   :  { %6663 = vst [vmem:[#allocation2 + $0x30] sm:$0xff] %v6659_v42  ;;  %v14898_v42 = vld [vmem:[#allocation20_spill] sm:$0xff] }
0x410b   :  { %11456 = vtanh.f32 %v6750_v7  ;;  %v7695_v3 = vmul.f32 -1.442695, %v6750_v7 }
0x410d   :  { %11458 = vpow2.f32 %v7695_v3 }
0x4115   :  { %v11457_v4 = vpop.eup %11456 }
0x4116   :  { %6762 = vrot.lane.b32.xlu1 %v11457_v4, %s11585_s14 }
0x4117   :  { %v11459_v8 = vpop.eup %11458 }
0x4118   :  { %v6756_v31 = vadd.f32 1.0, %v11459_v8 }
0x411a   :  { %11460 = vrcp.f32 %v6756_v31 }
0x4124   :  { %v11461_v61 = vpop.eup %11460 }
0x4125   :  { %v6760_v16 = vmul.f32 %v11461_v61, %v14893_v48 }
0x4188   :  { %v6763_v54 = vpop.permute.xlu1 %6762 }
0x4189   :  { %v6765_v22 = vmul.f32 %v11461_v61, %v6763_v54 }
0x418b   :  { %6767 = vrot.lane.b32.xlu0 %v6765_v22, %s11581_s27  ;;  %v14899_v22 = vld [vmem:[#allocation71_spill] sm:$0xff] }
0x41fd   :  { %v6768_v9 = vpop.permute.xlu0 %6767 }
0x41fe   :  { %v6770_v1 = vadd.f32 %v6768_v9, %v6760_v16 }
0x4200   :  { %11462 = vtanh.f32 %v6770_v1 }
0x420a   :  { %v11463_v55 = vpop.eup %11462 }
0x420b   :  { %6773 = vrot.lane.b32.xlu1 %v11463_v55, %s11585_s14 }
0x420f   :  { %6781 = vrot.lane.b32.xlu1 %v14894_v39, %s11585_s14 }
0x427d   :  { %v6774_v21 = vpop.permute.xlu1 %6773 }
0x427e   :  { %v6776_v14 = vmul.f32 %v11461_v61, %v6774_v21 }
0x4280   :  { %6778 = vrot.lane.b32.xlu0 %v6776_v14, %s11581_s27  ;;  %v14901_v14 = vld [vmem:[#allocation31_spill] sm:$0xff] }
0x4281   :  { %v6782_v58 = vpop.permute.xlu1 %6781 }
0x42f2   :  { %v6779_v47 = vpop.permute.xlu0 %6778 }
0x42f3   :  { %v6784_v6 = vsel %vm247_vm1, %v6779_v47, %v6782_v58  ;;  %v14902_v58 = vld [vmem:[#allocation21_spill] sm:$0xff]  ;;  %v14903_v47 = vld [vmem:[#allocation32_spill] sm:$0xff] }
0x42f4   :  { %9570 = vmatmul.mubr.msk.f32.vlgmr.msra.gmra.mrb[80].mxu1 %vm249_vm2, %v6784_v6  ;;  %v14904_v6 = vld [vmem:[#allocation24_spill] sm:$0xff] }
0x42f5   :  { %11046 = vmatpush1.bf16.msra.mxu1 %v14895_v44  ;;  %7022 = vmatprep.mubr.f32.mxu1 %v14441_v41  ;;  %v14905_v44 = vld [vmem:[#allocation33_spill] sm:$0xff] }
0x42f6   :  { %11048 = vmatprep.subr.bf16.mxu1 %v14896_v19  ;;  %v14906_v19 = vld [vmem:[#allocation25_spill] sm:$0xff] }
0x42f9   :  { %11050 = vmatpush1.bf16.msra.mxu1 %v14897_v51  ;;  %v14907_v51 = vld [vmem:[#allocation34_spill] sm:$0xff] }
0x42fa   :  { %11060 = vmatprep.subr.bf16.mxu1 %v14898_v42  ;;  %v14908_v42 = vld [vmem:[#allocation35_spill] sm:$0xff] }
0x43c7   :  { %v6854_v36 = vpop.f32.mrb[80].mxu1 }
0x43c8   :  { %v6855_v62 = vadd.f32 %v11524_v30, %v6854_v36  ;;  %v9571_v7 = vpop.f32.mrb[81].mxu1  ;;  %v14909_v36 = vld [vmem:[#allocation36_spill] sm:$0xff]  ;;  %v14910_v30 = vld [vmem:[#allocation37_spill] sm:$0xff] }
0x43c9   :  { %v14912_v7 = vld [vmem:[#allocation39_spill] sm:$0xff] }
0x43ca   :  { %11464 = vtanh.f32 %v6855_v62  ;;  %v7697_v4 = vmul.f32 -1.442695, %v6855_v62  ;;  %v14911_v62 = vld [vmem:[#allocation38_spill] sm:$0xff] }
0x43cc   :  { %11466 = vpow2.f32 %v7697_v4  ;;  %v14914_v4 = vld [vmem:[#allocation41_spill] sm:$0xff] }
0x43d4   :  { %v11465_v5 = vpop.eup %11464 }
0x43d5   :  { %6867 = vrot.lane.b32.xlu0 %v11465_v5, %s11585_s14  ;;  %v14913_v5 = vld [vmem:[#allocation40_spill] sm:$0xff] }
0x43d6   :  { %v11467_v3 = vpop.eup %11466 }
0x43d7   :  { %v6861_v8 = vadd.f32 1.0, %v11467_v3  ;;  %v14915_v3 = vld [vmem:[#allocation42_spill] sm:$0xff] }
0x43d9   :  { %11468 = vrcp.f32 %v6861_v8  ;;  %v14916_v8 = vld [vmem:[#allocation43_spill] sm:$0xff] }
0x43e3   :  { %v11469_v31 = vpop.eup %11468 }
0x43e4   :  { %v6865_v48 = vmul.f32 %v11469_v31, %v14899_v22  ;;  %v14920_v22 = vld [vmem:[#allocation47_spill] sm:$0xff] }
0x4447   :  { %v6868_v61 = vpop.permute.xlu0 %6867 }
0x4448   :  { %v6870_v54 = vmul.f32 %v11469_v31, %v6868_v61  ;;  %v14918_v61 = vld [vmem:[#allocation45_spill] sm:$0xff] }
0x444a   :  { %6872 = vrot.lane.b32.xlu1 %v6870_v54, %s11581_s27  ;;  %v14919_v54 = vld [vmem:[#allocation46_spill] sm:$0xff] }
0x44bc   :  { %v6873_v16 = vpop.permute.xlu1 %6872 }
0x44bd   :  { %v6875_v9 = vadd.f32 %v6873_v16, %v6865_v48  ;;  %v14921_v48 = vld [vmem:[#allocation48_spill] sm:$0xff]  ;;  %v14922_v16 = vld [vmem:[#allocation49_spill] sm:$0xff] }
0x44bf   :  { %11470 = vtanh.f32 %v6875_v9  ;;  %v14923_v9 = vld [vmem:[#allocation50_spill] sm:$0xff] }
0x44c9   :  { %v11471_v1 = vpop.eup %11470 }
0x44ca   :  { %6878 = vrot.lane.b32.xlu0 %v11471_v1, %s11585_s14  ;;  %v14924_v1 = vld [vmem:[#allocation51_spill] sm:$0xff] }
0x453c   :  { %v6879_v55 = vpop.permute.xlu0 %6878 }
0x453d   :  { %v6881_v39 = vmul.f32 %v11469_v31, %v6879_v55  ;;  %v14917_v31 = vld [vmem:[#allocation44_spill] sm:$0xff] }
0x453e   :  { %v14925_v55 = vld [vmem:[#allocation52_spill] sm:$0xff] }
0x453f   :  { %6883 = vrot.lane.b32.xlu1 %v6881_v39, %s11581_s27  ;;  %v14926_v39 = vld [vmem:[#allocation53_spill] sm:$0xff] }
0x45b1   :  { %v13972_v21 = vpop.permute.xlu1 %6883 }
0x45b2   :  { %14900 = vst [vmem:[#allocation74_spill] sm:$0xff] %v13972_v21  ;;  %7698 = vmatmul.mubr.msk.f32.vlgmr.msra.gmra.mrb[76].mxu0 %vm247_vm1, %v13972_v21  ;;  %7699 = vmatmul.mubr.msk.f32.vlgmr.msra.gmra.mrb[82].mxu1 %vm247_vm1, %v13972_v21 }
0x45b3   :  { %11054 = vmatpush1.bf16.msra.mxu0 %v14901_v14  ;;  %11062 = vmatpush1.bf16.msra.mxu1 %v14902_v58  ;;  %v14927_v14 = vld [vmem:[#allocation54_spill] sm:$0xff]  ;;  %v14928_v58 = vld [vmem:[#allocation55_spill] sm:$0xff] }
0x45b4   :  { %11056 = vmatprep.subr.bf16.mxu0 %v14903_v47  ;;  %11064 = vmatprep.subr.bf16.mxu1 %v14904_v6  ;;  %v14929_v47 = vld [vmem:[#allocation56_spill] sm:$0xff]  ;;  %v14930_v6 = vld [vmem:[#allocation57_spill] sm:$0xff] }
0x45b5   :  { %7093 = vmatprep.mubr.f32.mxu0 %v14441_v41  ;;  %7164 = vmatprep.mubr.f32.mxu1 %v14441_v41 }
0x45b7   :  { %11058 = vmatpush1.bf16.msra.mxu0 %v14905_v44  ;;  %11066 = vmatpush1.bf16.msra.mxu1 %v14906_v19  ;;  %v14931_v44 = vld [vmem:[#allocation58_spill] sm:$0xff]  ;;  %v14932_v19 = vld [vmem:[#allocation59_spill] sm:$0xff] }
0x45b8   :  { %11068 = vmatprep.subr.bf16.mxu0 %v14907_v51  ;;  %11100 = vmatprep.subr.bf16.mxu1 %v14908_v42  ;;  %v14933_v51 = vld [vmem:[#allocation60_spill] sm:$0xff]  ;;  %v14934_v42 = vld [vmem:[#allocation61_spill] sm:$0xff] }
0x45ba   :  { %7700 = vmatmul.mubr.msk.f32.vlgmr.msra.gmra.mrb[78].mxu0 %vm247_vm1, %v13972_v21  ;;  %7701 = vmatmul.mubr.msk.f32.vlgmr.msra.gmra.mrb[84].mxu1 %vm247_vm1, %v13972_v21 }
0x45bb   :  { %11070 = vmatpush3.bf16.msra.mxu0 %v14909_v36  ;;  %11102 = vmatpush3.bf16.msra.mxu1 %v14910_v30  ;;  %v14935_v36 = vld [vmem:[#allocation62_spill] sm:$0xff]  ;;  %v14936_v30 = vld [vmem:[#allocation63_spill] sm:$0xff] }
0x45bc   :  { %11072 = vmatprep.subr.bf16.mxu0 %v14911_v62  ;;  %11104 = vmatprep.subr.bf16.mxu1 %v14912_v7  ;;  %v14937_v62 = vld [vmem:[#allocation64_spill] sm:$0xff]  ;;  %v14938_v7 = vld [vmem:[#allocation65_spill] sm:$0xff] }
0x45bf   :  { %11074 = vmatpush3.bf16.msra.mxu0 %v14913_v5  ;;  %11106 = vmatpush3.bf16.msra.mxu1 %v14914_v4  ;;  %v14939_v5 = vld [vmem:[#allocation66_spill] sm:$0xff]  ;;  %v14940_v4 = vld [vmem:[#allocation67_spill] sm:$0xff] }
0x45c0   :  { %11076 = vmatprep.subr.bf16.mxu0 %v14915_v3  ;;  %11108 = vmatprep.subr.bf16.mxu1 %v14916_v8 }
0x45c3   :  { %11078 = vmatpush3.bf16.msra.mxu0 %v14917_v31  ;;  %11110 = vmatpush3.bf16.msra.mxu1 %v14918_v61 }
0x45c4   :  { %11080 = vmatprep.subr.bf16.mxu0 %v14919_v54  ;;  %11112 = vmatprep.subr.bf16.mxu1 %v14920_v22 }
0x45c7   :  { %11082 = vmatpush3.bf16.msra.mxu0 %v14921_v48  ;;  %11114 = vmatpush3.bf16.msra.mxu1 %v14922_v16  ;;  %v11525_v48 = vld [vmem:[%s14121_s3] sm:$0xff] }
0x45c8   :  { %11084 = vmatprep.subr.bf16.mxu0 %v14923_v9  ;;  %11116 = vmatprep.subr.bf16.mxu1 %v14924_v1  ;;  %v11526_v9 = vld [vmem:[%s14121_s3 + $0x10] sm:$0xff] }
0x45cb   :  { %11086 = vmatpush3.bf16.msra.mxu0 %v14925_v55  ;;  %11118 = vmatpush3.bf16.msra.mxu1 %v14926_v39  ;;  %v11527_v55 = vld [vmem:[%s14121_s3 + $0x20] sm:$0xff] }
0x45cc   :  { %11088 = vmatprep.subr.bf16.mxu0 %v14927_v14  ;;  %11120 = vmatprep.subr.bf16.mxu1 %v14928_v58  ;;  %v11528_v14 = vld [vmem:[%s14121_s3 + $0x30] sm:$0xff] }
0x45cf   :  { %11090 = vmatpush3.bf16.msra.mxu0 %v14929_v47  ;;  %11122 = vmatpush3.bf16.msra.mxu1 %v14930_v6 }
0x45d0   :  { %11092 = vmatprep.subr.bf16.mxu0 %v14931_v44  ;;  %11124 = vmatprep.subr.bf16.mxu1 %v14932_v19  ;;  %v11529_v44 = vld [vmem:[%s14121_s3 + $0x8] sm:$0xff] }
0x45d3   :  { %11094 = vmatpush3.bf16.msra.mxu0 %v14933_v51  ;;  %11126 = vmatpush3.bf16.msra.mxu1 %v14934_v42  ;;  %v11530_v51 = vld [vmem:[%s14121_s3 + $0x18] sm:$0xff] }
0x45d4   :  { %11096 = vmatprep.subr.bf16.mxu0 %v14935_v36  ;;  %11128 = vmatprep.subr.bf16.mxu1 %v14936_v30  ;;  %v11531_v36 = vld [vmem:[%s14121_s3 + $0x28] sm:$0xff] }
0x45d7   :  { %11098 = vmatpush3.bf16.msra.mxu0 %v14937_v62  ;;  %11130 = vmatpush3.bf16.msra.mxu1 %v14938_v7  ;;  %v11532_v62 = vld [vmem:[%s14121_s3 + $0x38] sm:$0xff]  ;;  %s11587_s3 = smov [#allocation4]  }
0x45d8   :  { %11132 = vmatprep.subr.bf16.mxu0 %v14939_v5  ;;  %11164 = vmatprep.subr.bf16.mxu1 %v14940_v4  ;;  %s7609_s13 = sshll.u32 %s11587_s3, 4  ;;  %s7610_s13 = int_to_ptr.vmem [resolvable:$true] %s7609_s13 }
0x45d9   :  { %s11533_s15 = scalar_lea.vmem %s7610_s13, 8192  ;;  %p11538_p1 = scmp.lt.s32.totalorder %s7610_s13, %s7610_s13 }
0x45da   :  { %p11534_p0 = scmp.ne.s32.totalorder %s7610_s13, %s11533_s15  ;;  %p11539_p2 = scmp.lt.s32.totalorder %s11533_s15, %s11533_s15 }
0x45dc   :  { %p11540_p3 = por %p11539_p2, %p11538_p1 }
0x45de   :  { %p11541_p4 = pnand %p11540_p3, %p11534_p0 }
0x4685   :  { %v6953_v3 = vpop.f32.mrb[76].mxu0  ;;  %v7024_v8 = vpop.f32.mrb[82].mxu1 }
0x4686   :  { %v6955_v31 = vpop.f32.mrb[77].mxu0  ;;  %v7026_v61 = vpop.f32.mrb[83].mxu1  ;;  %v6954_v16 = vadd.f32 %v11525_v48, %v6953_v3  ;;  %v7025_v1 = vadd.f32 %v11526_v9, %v7024_v8 }
0x4687   :  { %v6956_v19 = vadd.f32 %v11529_v44, %v6955_v31  ;;  %v7027_v42 = vadd.f32 %v11530_v51, %v7026_v61 }
0x468d   :  { %v7095_v54 = vpop.f32.mrb[78].mxu0  ;;  %v7166_v22 = vpop.f32.mrb[84].mxu1 }
0x468e   :  { %v7096_v39 = vadd.f32 %v11527_v55, %v7095_v54  ;;  %v7167_v58 = vadd.f32 %v11528_v14, %v7166_v22  ;;  %v7097_v47 = vpop.f32.mrb[79].mxu0  ;;  %v7168_v6 = vpop.f32.mrb[85].mxu1 }
0x468f   :  { %v7098_v30 = vadd.f32 %v11531_v36, %v7097_v47  ;;  %v7169_v7 = vadd.f32 %v11532_v62, %v7168_v6 }
0x4690   :  { %v7171_v5 = vmax.f32 %v6954_v16, %v7096_v39  ;;  %v7173_v4 = vmax.f32 %v7025_v1, %v7167_v58 }
0x4691   :  { %v7172_v3 = vmax.f32 %v6956_v19, %v7098_v30  ;;  %v7174_v8 = vmax.f32 %v7027_v42, %v7169_v7 }
0x4693   :  { %v7175_v31 = vmax.f32 %v7171_v5, %v7172_v3  ;;  %v7176_v54 = vmax.f32 %v7173_v4, %v7174_v8 }
0x4695   :  { %v7177_v22 = vmax.f32 %v7175_v31, %v7176_v54 }
0x4697   :  { %7178 = vmax.xlane.f32.xlu0 %v7177_v22 }
0x4724   :  { %v7179_v48 = vpop.xlane.xlu0 %7178 }
0x4725   :  { %v7180_v61 = vsub.f32 %v6954_v16, %v7179_v48  ;;  %v7181_v9 = vsub.f32 %v6956_v19, %v7179_v48  ;;  %v7182_v55 = vsub.f32 %v7025_v1, %v7179_v48  ;;  %v7183_v14 = vsub.f32 %v7027_v42, %v7179_v48 }
0x4726   :  { %v7184_v51 = vsub.f32 %v7096_v39, %v7179_v48  ;;  %v7185_v2 = vsub.f32 %v7098_v30, %v7179_v48  ;;  %v7186_v21 = vsub.f32 %v7167_v58, %v7179_v48  ;;  %v7187_v5 = vsub.f32 %v7169_v7, %v7179_v48 }
0x4727   :  { %v7188_v44 = vmul.f32 1.442695, %v7180_v61  ;;  %v7190_v47 = vmul.f32 1.442695, %v7181_v9  ;;  %v7192_v36 = vmul.f32 1.442695, %v7182_v55 }
0x4728   :  { %v7194_v6 = vmul.f32 1.442695, %v7183_v14  ;;  %v7196_v62 = vmul.f32 1.442695, %v7184_v51  ;;  %v7198_v4 = vmul.f32 1.442695, %v7185_v2 }
0x4729   :  { %11472 = vpow2.f32 %v7188_v44  ;;  %v7200_v3 = vmul.f32 1.442695, %v7186_v21  ;;  %v7202_v16 = vmul.f32 1.442695, %v7187_v5 }
0x472a   :  { %11474 = vpow2.f32 %v7190_v47 }
0x472b   :  { %11476 = vpow2.f32 %v7192_v36 }
0x472c   :  { %11478 = vpow2.f32 %v7194_v6 }
0x472d   :  { %11480 = vpow2.f32 %v7196_v62 }
0x472e   :  { %11482 = vpow2.f32 %v7198_v4 }
0x472f   :  { %11484 = vpow2.f32 %v7200_v3 }
0x4730   :  { %11486 = vpow2.f32 %v7202_v16 }
0x4733   :  { %v11473_v1 = vpop.eup %11472 }
0x4734   :  { %v11475_v19 = vpop.eup %11474 }
0x4735   :  { %v7204_v42 = vadd.f32 %v11475_v19, %v11473_v1  ;;  %v11477_v39 = vpop.eup %11476 }
0x4736   :  { %v11479_v30 = vpop.eup %11478 }
0x4737   :  { %v7205_v8 = vadd.f32 %v11477_v39, %v7204_v42  ;;  %v11481_v54 = vpop.eup %11480 }
0x4738   :  { %v11483_v61 = vpop.eup %11482 }
0x4739   :  { %v7206_v31 = vadd.f32 %v11479_v30, %v7205_v8  ;;  %v11485_v9 = vpop.eup %11484 }
0x473a   :  { %v11487_v2 = vpop.eup %11486 }
0x473b   :  { %v7207_v22 = vadd.f32 %v11481_v54, %v7206_v31 }
0x473d   :  { %v7208_v58 = vadd.f32 %v11483_v61, %v7207_v22 }
0x473f   :  { %v7209_v7 = vadd.f32 %v11485_v9, %v7208_v58 }
0x4741   :  { %v7210_v48 = vadd.f32 %v11487_v2, %v7209_v7 }
0x4743   :  { %7211 = vadd.xlane.f32.xlu1 %v7210_v48 }
0x47d0   :  { %v7212_v21 = vpop.xlane.xlu1 %7211 }
0x47d1   :  { %11488 = vrcp.f32 %v7212_v21 }
0x47db   :  { %v11489_v55 = vpop.eup %11488 }
0x47dc   :  { %v7215_v14 = vmul.f32 %v11489_v55, %v11475_v19  ;;  %v7217_v44 = vmul.f32 %v11489_v55, %v11479_v30  ;;  %v7214_v47 = vmul.f32 %v11489_v55, %v11473_v1  ;;  %v7216_v51 = vmul.f32 %v11489_v55, %v11477_v39 }
0x47dd   :  { %v7219_v36 = vmul.f32 %v11489_v55, %v11483_v61  ;;  %v7221_v6 = vmul.f32 %v11489_v55, %v11487_v2  ;;  %v7218_v62 = vmul.f32 %v11489_v55, %v11481_v54  ;;  %v7220_v5 = vmul.f32 %v11489_v55, %v11485_v9 }
0x47de   :  { %7286 = vmatprep.mubr.f32.mxu0 %v7215_v14  ;;  %7585 = vst [vmem:[#allocation4 + $0x1c8] sm:$0xff] %v7215_v14  ;;  %7356 = vmatprep.mubr.f32.mxu1 %v7217_v44  ;;  %7587 = vst [vmem:[#allocation4 + $0x1d8] sm:$0xff] %v7217_v44 }
0x47df   :  { %7584 = vst [vmem:[#allocation4 + $0x1c0] sm:$0xff] %v7214_v47  ;;  %7586 = vst [vmem:[#allocation4 + $0x1d0] sm:$0xff] %v7216_v51  ;;  %7287 = vmatmul.mubr.f32.vlgmr.msra.gmra.mrb[80].mxu0 %v7214_v47  ;;  %7357 = vmatmul.mubr.f32.vlgmr.msra.gmra.mrb[86].mxu1 %v7216_v51 }
0x47e0   :  { %7589 = vst [vmem:[#allocation4 + $0x1e8] sm:$0xff] %v7219_v36  ;;  %7591 = vst [vmem:[#allocation4 + $0x1f8] sm:$0xff] %v7221_v6  ;;  %11134 = vmatpush3.bf16.msra.mxu0 %v12360_v34  ;;  %11166 = vmatpush3.bf16.msra.mxu1 %v12362_v25 }
0x47e1   :  { %7588 = vst [vmem:[#allocation4 + $0x1e0] sm:$0xff] %v7218_v62  ;;  %7590 = vst [vmem:[#allocation4 + $0x1f0] sm:$0xff] %v7220_v5  ;;  %7426 = vmatprep.mubr.f32.mxu0 %v7219_v36  ;;  %7496 = vmatprep.mubr.f32.mxu1 %v7221_v6 }
0x47e2   :  { %11136 = vmatprep.subr.bf16.mxu0 %v12400_v33  ;;  %11168 = vmatprep.subr.bf16.mxu1 %v12402_v24 }
0x47e4   :  { %11138 = vmatpush3.bf16.msra.mxu0 %v12417_v0  ;;  %11170 = vmatpush3.bf16.msra.mxu1 %v12419_v63 }
0x47e5   :  { %11140 = vmatprep.subr.bf16.mxu0 %v14479_v11  ;;  %11172 = vmatprep.subr.bf16.mxu1 %v14480_v56 }
0x47e8   :  { %11142 = vmatpush3.bf16.msra.mxu0 %v14481_v59  ;;  %11174 = vmatpush3.bf16.msra.mxu1 %v14482_v18 }
0x47e9   :  { %11144 = vmatprep.subr.bf16.mxu0 %v14483_v57  ;;  %11176 = vmatprep.subr.bf16.mxu1 %v14484_v17 }
0x47ec   :  { %11146 = vmatpush3.bf16.msra.mxu0 %v14485_v27  ;;  %11178 = vmatpush3.bf16.msra.mxu1 %v14486_v23  ;;  %v14941_v27 = vld [vmem:[#allocation74_spill] sm:$0xff] }
0x47ed   :  { %11148 = vmatprep.subr.bf16.mxu0 %v14487_v28  ;;  %11180 = vmatprep.subr.bf16.mxu1 %v14488_v37 }
0x47f0   :  { %11150 = vmatpush3.bf16.msra.mxu0 %v14489_v20  ;;  %11182 = vmatpush3.bf16.msra.mxu1 %v14490_v32 }
0x47f1   :  { %11152 = vmatprep.subr.bf16.mxu0 %v14491_v13  ;;  %11184 = vmatprep.subr.bf16.mxu1 %v14492_v15 }
0x47f4   :  { %11154 = vmatpush3.bf16.msra.mxu0 %v12561_v49  ;;  %11186 = vmatpush3.bf16.msra.mxu1 %v14493_v35 }
0x47f5   :  { %11156 = vmatprep.subr.bf16.mxu0 %v12573_v10  ;;  %11188 = vmatprep.subr.bf16.mxu1 %v14557_v52 }
0x47f8   :  { %11158 = vmatpush3.bf16.msra.mxu0 %v14558_v60  ;;  %11190 = vmatpush3.bf16.msra.mxu1 %v14559_v45 }
0x47f9   :  { %11160 = vmatprep.subr.bf16.mxu0 %v14560_v46  ;;  %11192 = vmatprep.subr.bf16.mxu1 %v14561_v26 }
0x47fc   :  { %11162 = vmatpush3.bf16.msra.mxu0 %v14562_v12  ;;  %11194 = vmatpush3.bf16.msra.mxu1 %v14563_v38 }
0x47fd   :  { %11195 = vmatprep.subr.bf16.mxu0 %v14440_v50 }
0x47ff   :  { %7427 = vmatmul.mubr.f32.vlgmr.msra.gmra.mrb[82].mxu0 %v7218_v62  ;;  %7497 = vmatmul.mubr.f32.vlgmr.msra.gmra.mrb[88].mxu1 %v7220_v5 }
0x4800   :  { %11197 = vmatpush3.bf16.msra.mxu0 %v14565_v40  ;;  %9588 = vmatprep.mubr.msk.f32.mxu0 %vm11583_vm0, %v14441_v41 }
0x4801   :  { %11198 = vmatprep.subr.bf16.mxu0 %v14440_v50 }
0x4804   :  { %11200 = vmatpush3.bf16.msra.mxu0 %v14795_v43 }
0x4805   :  { %11201 = vmatprep.subr.bf16.mxu0 %v14440_v50 }
0x4808   :  { %11203 = vmatpush3.bf16.msra.mxu0 %v14876_v53 }
0x4809   :  { %11204 = vmatprep.subr.bf16.mxu0 %v14440_v50 }
0x480c   :  { %11206 = vmatpush3.bf16.msra.mxu0 %v14878_v29 }
0x48b2   :  { %v8954_v34 = vpop.f32.mrb[80].mxu0  ;;  %v8989_v25 = vpop.f32.mrb[86].mxu1 }
0x48b3   :  { %v8955_v33 = vpop.f32.mrb[81].mxu0  ;;  %v8990_v24 = vpop.f32.mrb[87].mxu1 }
0x48b4   :  { %v8956_v0 = vadd.f32 %v8955_v33, %v8954_v34  ;;  %v8991_v63 = vadd.f32 %v8990_v24, %v8989_v25 }
0x48b6   :  { %v7359_v10 = vadd.f32 %v8991_v63, %v8956_v0 }
0x48d2   :  { %v9024_v49 = vpop.f32.mrb[82].mxu0  ;;  %v9059_v41 = vpop.f32.mrb[88].mxu1 }
0x48d3   :  { %v9025_v11 = vpop.f32.mrb[83].mxu0  ;;  %v9060_v56 = vpop.f32.mrb[89].mxu1 }
0x48d4   :  { %v9026_v59 = vadd.f32 %v9025_v11, %v9024_v49  ;;  %v9061_v18 = vadd.f32 %v9060_v56, %v9059_v41 }
0x48d6   :  { %v7429_v57 = vadd.f32 %v9026_v59, %v7359_v10 }
0x48d8   :  { %v7499_v17 = vadd.f32 %v9061_v18, %v7429_v57 }
0x48da   :  { %7504 = vrot.lane.b32.xlu0 %v7499_v17, %s11581_s27 }
0x494c   :  { %v7505_v50 = vpop.permute.xlu0 %7504 }
0x494d   :  { %v7507_v23 = vsel %vm247_vm1, %v14941_v27, %v7505_v50 }
0x494e   :  { %9589 = vmatmul.mubr.msk.f32.vlgmr.msra.gmra.mrb[84].mxu0 %vm249_vm2, %v7507_v23 }
0x494f   :  { %11544 = shalt.err (!%p11541_p4)
}
0x4950   :  { %s11545_s27 = scalar_lea.hbm %s14130_s12, 8192 }
0x4951   :  { %p11546_p5 = scmp.ne.s32.totalorder %s14130_s12, %s11545_s27  ;;  %p11549_p6 = scmp.lt.u32.totalorder %s11545_s27, %s14130_s12 }
0x4953   :  { %p11551_p7 = pnand %p11549_p6, %p11546_p5 }
0x4955   :  { %11554 = shalt.err (!%p11551_p7)
}
0x4956   :  { %s11588_s6 = smov 1024   ;;  %s11589_s1 = smov [#allocation2]   ;;  %v14942_v37 = vld [vmem:[#allocation73_spill] sm:$0xff] }
0x4957   :  { %7615 = dma.vmem_to_hbm [thread:$0]  %s7610_s13, 8192, %s14130_s12, [#allocation5], %s11588_s6, %s11588_s6, %s11585_s14  }
0x4958   :  { %s7597_s21 = sshll.u32 %s11589_s1, 4  ;;  %s7598_s21 = int_to_ptr.vmem [resolvable:$true] %s7597_s21 }
0x4959   :  { %s11555_s9 = scalar_lea.vmem %s7598_s21, 1024  ;;  %p11560_p9 = scmp.lt.s32.totalorder %s7598_s21, %s7598_s21 }
0x495a   :  { %p11556_p8 = scmp.ne.s32.totalorder %s7598_s21, %s11555_s9  ;;  %p11561_p10 = scmp.lt.s32.totalorder %s11555_s9, %s11555_s9 }
0x495c   :  { %p11562_p11 = por %p11561_p10, %p11560_p9 }
0x495e   :  { %p11563_p12 = pnand %p11562_p11, %p11556_p8 }
0x4a21   :  { %v7577_v28 = vpop.f32.mrb[84].mxu0 }
0x4a22   :  { %v7578_v20 = vadd.f32 %v14942_v37, %v7577_v28  ;;  %v9590_v32 = vpop.f32.mrb[85].mxu0 }
0x4a24   :  { %7582 = vst [vmem:[#allocation2 + $0x38] sm:$0xff] %v7578_v20 }
0x4a25   :  { %11566 = shalt.err (!%p11563_p12)
}
0x4a26   :  { %s11567_s24 = scalar_lea.hbm %s14129_s11, 1024 }
0x4a27   :  { %p11568_p13 = scmp.ne.s32.totalorder %s14129_s11, %s11567_s24  ;;  %p11571_p0 = scmp.lt.u32.totalorder %s11567_s24, %s14129_s11 }
0x4a29   :  { %p11573_p1 = pnand %p11571_p0, %p11568_p13 }
0x4a2b   :  { %11576 = shalt.err (!%p11573_p1)
}
0x4a2c   :  { %s11590_s26 = smov 128   ;;  %s11591_s28 = smov 8  }
0x4a2d   :  { %7603 = dma.vmem_to_hbm [thread:$0]  %s7598_s21, 1024, %s14129_s11, [#allocation3], %s11590_s26, %s11590_s26, %s11591_s28  }
0x4a2e   :  { %11577 = dma.done.wait [#allocation3], 1024  }
0x4a2f   :  { %11578 = vsyncadd [#allocation3], 4294966272 }
0x4a30   :  { %11579 = dma.done.wait [#allocation5], 8192  }
0x4a31   :  { %11580 = vsyncadd [#allocation5], 4294959104 }
0x4a32   :  { %7622 = vsyncpa [#allocation3], 1 }
0x4a33   :  { %7623 = vsyncpa [#allocation5], 1 }

</bundles_post_ra>
